<compile_context>
chip_gen: v7x
topology: tpu7x:2x2x1
jax: 0.10.0
libtpu: 0.0.40
codegen_flags: <defaults>
</compile_context>

<pallas_src>
import functools

import jax
import jax.numpy as jnp
from jax.experimental import pallas as pl
from jax.experimental.pallas import tpu as pltpu


_LN_EPS = 1e-5
_MIN_STD = 0.1

_CP_PARALLEL = pltpu.CompilerParams(
    dimension_semantics=("parallel",),
    vmem_limit_bytes=32 * 1024 * 1024,   # safe on v5e/v6e (128 MiB) and v7x (64 MiB)
)


def _bf16(x):
    return x.astype(jnp.bfloat16)


def _layernorm(x, g, b):
    mu = jnp.mean(x, axis=-1, keepdims=True)
    xc = x - mu
    var = jnp.mean(xc * xc, axis=-1, keepdims=True)
    return xc * jax.lax.rsqrt(var + _LN_EPS) * g + b


def _heads_attention(q, k, v, bias, n_head, scale):
    """Multi-head attention for one item.

    q: (Tq, D), k/v: (Tk, D) fp32.  Per-head fp32 scores / exact softmax, bf16
    MXU dots; head outputs are re-concatenated along the lane axis so the
    caller performs ONE full-K out-projection dot (instead of n_head K=dh
    dots + a VPU accumulate chain).
    """
    D = q.shape[-1]
    dh = D // n_head
    o_cols = []
    for h in range(n_head):
        qh = q[:, h * dh:(h + 1) * dh]
        kh = k[:, h * dh:(h + 1) * dh]
        vh = v[:, h * dh:(h + 1) * dh]
        s = jax.lax.dot_general(
            _bf16(qh), _bf16(kh), (((1,), (1,)), ((), ())),
            preferred_element_type=jnp.float32) * scale
        if bias is not None:
            s = s + bias
        s = s - jnp.max(s, axis=-1, keepdims=True)
        p = jnp.exp(s)
        p = p / jnp.sum(p, axis=-1, keepdims=True)      # exact softmax
        o_cols.append(jnp.dot(_bf16(p), _bf16(vh),
                              preferred_element_type=jnp.float32))
    return jnp.concatenate(o_cols, axis=-1)             # (Tq, D)


# ----------------------------------------------------------------------------
# Kernel 1: PerceiverDecoder (all layers) + rep_dis_net RepresentationModel
# ----------------------------------------------------------------------------

def _perceiver_rep_kernel(kv_ref, q0_ref,
                          lnqg_ref, lnqb_ref, lnkg_ref, lnkb_ref,
                          wq_ref, bq_ref, wkv_ref, bkv_ref, wo_ref, bo_ref,
                          mlg_ref, mlb_ref, w1_ref, b1_ref, w2_ref, b2_ref,
                          rw1_ref, rb1_ref, rw2_ref, rb2_ref,
                          mu_ref, sig_ref,
                          *, n_layer, n_head, ipb, min_std):
    Tk, E = kv_ref.shape[1], kv_ref.shape[2]
    Rq = q0_ref.shape[0]
    dh = E // n_head
    scale = 1.0 / float(dh) ** 0.5
    latent = rw2_ref.shape[1] // 2

    # Item-flattened residual streams (matmuls run on all items at once).
    kv = kv_ref[...].reshape(ipb * Tk, E)
    q0 = q0_ref[...]
    q = jnp.concatenate([q0] * ipb, axis=0) if ipb > 1 else q0      # (ipb*Rq, E)

    for l in range(n_layer):                       # static unroll, weights resident
        # ---- cross-attention block ----
        qn = _layernorm(q, lnqg_ref[l], lnqb_ref[l])
        kn = _layernorm(kv, lnkg_ref[l], lnkb_ref[l])
        qp = jnp.dot(_bf16(qn), wq_ref[l],
                     preferred_element_type=jnp.float32) + bq_ref[l]
        kvp = jnp.dot(_bf16(kn), wkv_ref[l],
                      preferred_element_type=jnp.float32) + bkv_ref[l]
        k_all, v_all = kvp[:, :E], kvp[:, E:]
        rows = []
        for it in range(ipb):                      # scores/softmax per item
            rows.append(_heads_attention(
                qp[it * Rq:(it + 1) * Rq],
                k_all[it * Tk:(it + 1) * Tk],
                v_all[it * Tk:(it + 1) * Tk],
                None, n_head, scale))
        attn = jnp.concatenate(rows, axis=0) if ipb > 1 else rows[0]
        # single full-K out-projection over all items
        q = q + jnp.dot(_bf16(attn), wo_ref[l],
                        preferred_element_type=jnp.float32) + bo_ref[l]
        # ---- MLP block ----
        hn = _layernorm(q, mlg_ref[l], mlb_ref[l])
        m = jnp.dot(_bf16(hn), w1_ref[l],
                    preferred_element_type=jnp.float32) + b1_ref[l]
        m = jax.nn.gelu(m, approximate=True)
        q = q + jnp.dot(_bf16(m), w2_ref[l],
                        preferred_element_type=jnp.float32) + b2_ref[l]

    # ---- rep_dis_net: nn.LeakyReLU(True) => slope 1.0 => identity ----
    h1 = jnp.dot(_bf16(q), rw1_ref[...],
                 preferred_element_type=jnp.float32) + rb1_ref[...]
    ml = jnp.dot(_bf16(h1), rw2_ref[...],
                 preferred_element_type=jnp.float32) + rb2_ref[...]
    mu_ref[...] = ml[:, :latent].reshape(ipb, Rq, latent)
    # sigmoid2(x, min_std) = 2 * sigmoid(x / 2) + min_std
    sig_ref[...] = (2.0 * jax.nn.sigmoid(ml[:, latent:] * 0.5)
                    + min_std).reshape(ipb, Rq, latent)


def perceiver_rep_forward(kv, dec, rep, n_head, min_std=_MIN_STD):
    """kv: (N, Tk, E) fp32.  Returns (mu, sigma) of shape (N, Rq, H)."""
    N, Tk, E = kv.shape
    Rq = dec["queries"].shape[0]
    L = dec["wq"].shape[0]
    latent = rep["w2"].shape[1] // 2
    ipb = 2 if N % 2 == 0 else 1          # 2 items / block -> >=2 grid steps (v7x)
    grid = (N // ipb,)

    def fixed(shape):
        nd = len(shape)
        return pl.BlockSpec(shape, lambda i: (0,) * nd)

    in_specs = [
        pl.BlockSpec((ipb, Tk, E), lambda i: (i, 0, 0)),
        fixed((Rq, E)),
        fixed((L, 1, E)), fixed((L, 1, E)), fixed((L, 1, E)), fixed((L, 1, E)),
        fixed((L, E, E)), fixed((L, 1, E)),
        fixed((L, E, 2 * E)), fixed((L, 1, 2 * E)),
        fixed((L, E, E)), fixed((L, 1, E)),
        fixed((L, 1, E)), fixed((L, 1, E)),
        fixed((L, E, 4 * E)), fixed((L, 1, 4 * E)),
        fixed((L, 4 * E, E)), fixed((L, 1, E)),
        fixed((E, E)), fixed((1, E)),
        fixed((E, 2 * latent)), fixed((1, 2 * latent)),
    ]
    out_specs = (pl.BlockSpec((ipb, Rq, latent), lambda i: (i, 0, 0)),
                 pl.BlockSpec((ipb, Rq, latent), lambda i: (i, 0, 0)))
    mu, sig = pl.pallas_call(
        functools.partial(_perceiver_rep_kernel, n_layer=L, n_head=n_head,
                          ipb=ipb, min_std=min_std),
        out_shape=(jax.ShapeDtypeStruct((N, Rq, latent), jnp.float32),
                   jax.ShapeDtypeStruct((N, Rq, latent), jnp.float32)),
        grid=grid, in_specs=in_specs, out_specs=out_specs,
        compiler_params=_CP_PARALLEL,
    )(kv, dec["queries"],
      dec["ln_q_g"], dec["ln_q_b"], dec["ln_kv_g"], dec["ln_kv_b"],
      dec["wq"], dec["bq"], dec["wkv"], dec["bkv"], dec["wo"], dec["bo"],
      dec["mlp_ln_g"], dec["mlp_ln_b"], dec["w1"], dec["b1"], dec["w2"], dec["b2"],
      rep["w1"], rep["b1"], rep["w2"], rep["b2"])
    return mu, sig


# ----------------------------------------------------------------------------
# Kernel 2: embed_ln + wpe + GPT-2 stack + ln_f + latent_net
# ----------------------------------------------------------------------------

def _gpt_latent_kernel(x_ref, bias_ref, eg_ref, eb_ref, wpe_ref,
                       l1g_ref, l1b_ref, wqkv_ref, bqkv_ref, wo_ref, bo_ref,
                       l2g_ref, l2b_ref, w1_ref, b1_ref, w2_ref, b2_ref,
                       lfg_ref, lfb_ref, lw1_ref, lb1_ref, lw2_ref, lb2_ref,
                       mu_ref, sig_ref, *, n_layer, n_head, min_std):
    T, H = x_ref.shape[1], x_ref.shape[2]
    dh = H // n_head
    scale = 1.0 / float(dh) ** 0.5
    latent = lw2_ref.shape[1] // 2

    bias = bias_ref[0]                                        # (T, T) precomputed
    # embed_ln + GPT-2 positional embedding prologue
    h = _layernorm(x_ref[0], eg_ref[...], eb_ref[...]) + wpe_ref[...]

    for l in range(n_layer):                                  # static unroll
        # ---- causal self-attention block ----
        hn = _layernorm(h, l1g_ref[l], l1b_ref[l])
        qkv = jnp.dot(_bf16(hn), wqkv_ref[l],
                      preferred_element_type=jnp.float32) + bqkv_ref[l]
        attn = _heads_attention(qkv[:, :H], qkv[:, H:2 * H], qkv[:, 2 * H:],
                                bias, n_head, scale)
        h = h + jnp.dot(_bf16(attn), wo_ref[l],
                        preferred_element_type=jnp.float32) + bo_ref[l]
        # ---- MLP block (GPT-2 "gelu_new" ~ tanh gelu) ----
        hn = _layernorm(h, l2g_ref[l], l2b_ref[l])
        m = jnp.dot(_bf16(hn), w1_ref[l],
                    preferred_element_type=jnp.float32) + b1_ref[l]
        m = jax.nn.gelu(m, approximate=True)
        h = h + jnp.dot(_bf16(m), w2_ref[l],
                        preferred_element_type=jnp.float32) + b2_ref[l]

    # ---- ln_f + latent_net epilogue (all T tokens; latent slice taken outside) ----
    hf = _layernorm(h, lfg_ref[...], lfb_ref[...])
    h1 = jnp.dot(_bf16(hf), lw1_ref[...],
                 preferred_element_type=jnp.float32) + lb1_ref[...]
    ml = jnp.dot(_bf16(h1), lw2_ref[...],
                 preferred_element_type=jnp.float32) + lb2_ref[...]
    mu_ref[0] = ml[:, :latent]
    sig_ref[0] = 2.0 * jax.nn.sigmoid(ml[:, latent:] * 0.5) + min_std


def gpt_latent_forward(x, bias, params, n_head, min_std=_MIN_STD):
    """x: (B, T, H) stacked inputs; bias: (B, T, T) causal+pad bias (fp32)."""
    B, T, H = x.shape
    gpt = params["gpt"]
    lat = params["latent_net"]
    L = gpt["wqkv"].shape[0]
    latent = lat["w2"].shape[1] // 2
    wpe = gpt["wpe"][:T]

    def fixed(shape):
        nd = len(shape)
        return pl.BlockSpec(shape, lambda i: (0,) * nd)

    in_specs = [
        pl.BlockSpec((1, T, H), lambda i: (i, 0, 0)),
        pl.BlockSpec((1, T, T), lambda i: (i, 0, 0)),
        fixed((1, H)), fixed((1, H)),
        fixed((T, H)),
        fixed((L, 1, H)), fixed((L, 1, H)),
        fixed((L, H, 3 * H)), fixed((L, 1, 3 * H)),
        fixed((L, H, H)), fixed((L, 1, H)),
        fixed((L, 1, H)), fixed((L, 1, H)),
        fixed((L, H, 4 * H)), fixed((L, 1, 4 * H)),
        fixed((L, 4 * H, H)), fixed((L, 1, H)),
        fixed((1, H)), fixed((1, H)),
        fixed((H, H)), fixed((1, H)),
        fixed((H, 2 * latent)), fixed((1, 2 * latent)),
    ]
    out_specs = (pl.BlockSpec((1, T, latent), lambda i: (i, 0, 0)),
                 pl.BlockSpec((1, T, latent), lambda i: (i, 0, 0)))
    mu, sig = pl.pallas_call(
        functools.partial(_gpt_latent_kernel, n_layer=L, n_head=n_head,
                          min_std=min_std),
        out_shape=(jax.ShapeDtypeStruct((B, T, latent), jnp.float32),
                   jax.ShapeDtypeStruct((B, T, latent), jnp.float32)),
        grid=(B,), in_specs=in_specs, out_specs=out_specs,
        compiler_params=_CP_PARALLEL,
    )(x, bias, params["embed_ln_g"], params["embed_ln_b"], wpe,
      gpt["ln1_g"], gpt["ln1_b"], gpt["wqkv"], gpt["bqkv"], gpt["wo"], gpt["bo"],
      gpt["ln2_g"], gpt["ln2_b"], gpt["w1"], gpt["b1"], gpt["w2"], gpt["b2"],
      gpt["lnf_g"], gpt["lnf_b"], lat["w1"], lat["b1"], lat["w2"], lat["b2"])
    return mu, sig


# ----------------------------------------------------------------------------
# Parameter init (deterministic, synthetic; matmul weights stored in bf16,
# stacked along a leading layer axis so each kernel holds them resident)
# ----------------------------------------------------------------------------

def init_params(key, cfg):
    H, E = cfg["hidden_size"], cfg["enc_hidden_size"]
    Rq, Rrec = cfg["representation_query_num"], cfg["reconstruction_query_num"]
    act_dim = cfg["act_dim"]
    Ld, Lg = cfg["decoder_layer"], cfg["gpt_layer"]
    keys = iter(jax.random.split(key, 64))

    def nrm(shape, scale=0.02, dtype=jnp.bfloat16):
        return (scale * jax.random.normal(next(keys), shape,
                                          dtype=jnp.float32)).astype(dtype)

    def zeros(shape):
        return jnp.zeros(shape, jnp.float32)

    def ones(shape):
        return jnp.ones(shape, jnp.float32)

    params = dict(
        # Positional parameters (zeros in the reference __init__; small random
        # here so the adds are exercised non-trivially).
        pe_rep=nrm((1, 1, Rrec, E), dtype=jnp.float32),
        pe_gpt_instance=nrm((1, 1, Rq + act_dim, H), dtype=jnp.float32),
        rep_dec=dict(
            queries=0.1 * jax.random.normal(next(keys), (Rq, E), dtype=jnp.float32),
            ln_q_g=ones((Ld, 1, E)), ln_q_b=zeros((Ld, 1, E)),
            ln_kv_g=ones((Ld, 1, E)), ln_kv_b=zeros((Ld, 1, E)),
            wq=nrm((Ld, E, E)), bq=zeros((Ld, 1, E)),
            wkv=nrm((Ld, E, 2 * E)), bkv=zeros((Ld, 1, 2 * E)),
            wo=nrm((Ld, E, E)), bo=zeros((Ld, 1, E)),
            mlp_ln_g=ones((Ld, 1, E)), mlp_ln_b=zeros((Ld, 1, E)),
            w1=nrm((Ld, E, 4 * E)), b1=zeros((Ld, 1, 4 * E)),
            w2=nrm((Ld, 4 * E, E)), b2=zeros((Ld, 1, E)),
        ),
        rep_dis_net=dict(w1=nrm((H, H)), b1=zeros((1, H)),
                         w2=nrm((H, 2 * H)), b2=zeros((1, 2 * H))),
        latent_net=dict(w1=nrm((H, H)), b1=zeros((1, H)),
                        w2=nrm((H, 2 * H)), b2=zeros((1, 2 * H))),
        embed_ordering=nrm((cfg["max_ep_len"], H), dtype=jnp.float32),
        # action embedding stays fp32: it runs as a plain jnp matmul (K=3)
        embed_action_w=nrm((act_dim, act_dim * H), dtype=jnp.float32),
        embed_action_b=zeros((act_dim * H,)),
        embed_ln_g=ones((1, H)), embed_ln_b=zeros((1, H)),
        gpt=dict(
            wpe=nrm((cfg["n_positions"], H), dtype=jnp.float32),
            ln1_g=ones((Lg, 1, H)), ln1_b=zeros((Lg, 1, H)),
            wqkv=nrm((Lg, H, 3 * H)), bqkv=zeros((Lg, 1, 3 * H)),
            wo=nrm((Lg, H, H)), bo=zeros((Lg, 1, H)),
            ln2_g=ones((Lg, 1, H)), ln2_b=zeros((Lg, 1, H)),
            w1=nrm((Lg, H, 4 * H)), b1=zeros((Lg, 1, 4 * H)),
            w2=nrm((Lg, 4 * H, H)), b2=zeros((Lg, 1, H)),
            lnf_g=ones((1, H)), lnf_b=zeros((1, H)),
        ),
    )
    return params


# ----------------------------------------------------------------------------
# LatentWorldModel.forward
# ----------------------------------------------------------------------------

def latent_world_model_forward(params, bert_embeddings, actions, timesteps,
                               padding_mask, cfg):
    B, S, Rrec, E = bert_embeddings.shape
    H = cfg["hidden_size"]
    Rq = cfg["representation_query_num"]
    act_dim = cfg["act_dim"]

    if padding_mask is None:
        padding_mask = jnp.ones((B, S, 1), jnp.int32)

    # ---- representation decoder + rep_dis_net: ONE pallas_call ----
    r_in = (bert_embeddings.astype(jnp.float32) + params["pe_rep"]).reshape(
        B * S, Rrec, E)
    rep_mu, rep_sigma = perceiver_rep_forward(
        r_in, params["rep_dec"], params["rep_dis_net"], cfg["decoder_head"])
    rep_mu = rep_mu.reshape(B, S, Rq, H)
    rep_sigma = rep_sigma.reshape(B, S, Rq, H)
    # eval-mode: sample_from_distribution(mu, sigma, deterministic=True) -> mu
    rep_embed = rep_mu

    # ---- action / ordering embeddings: plain jnp (dispatch-dominated otherwise) ----
    if actions is not None:
        action_embeddings = (actions @ params["embed_action_w"]
                             + params["embed_action_b"]).reshape(B, S, act_dim, H)
    else:
        action_embeddings = jnp.zeros((B, S, act_dim, H), jnp.float32)

    if cfg["ordering"]:
        order = params["embed_ordering"][timesteps][:, :, None, :]   # (B, S, 1, H)
    else:
        order = 0.0

    state_embeddings = rep_embed + order
    action_embeddings = action_embeddings + order

    stacked = jnp.concatenate([action_embeddings, state_embeddings], axis=-2)
    stacked = stacked + params["pe_gpt_instance"]                    # (B, S, Lsent, H)
    Lsent = stacked.shape[-2]
    T = S * Lsent
    stacked = stacked.reshape(B, T, H)

    # ---- causal + padding bias, hoisted out of the kernel (computed once) ----
    pad = jnp.broadcast_to(padding_mask, (B, S, Lsent)).astype(jnp.float32)
    if actions is None:
        pad = pad.at[:, :, :act_dim].set(0.0)
    pad = pad.reshape(B, 1, T)
    row = jax.lax.broadcasted_iota(jnp.int32, (T, T), 0)
    col = jax.lax.broadcasted_iota(jnp.int32, (T, T), 1)
    causal = jnp.where(row >= col, 0.0, -1e9)[None]                  # (1, T, T)
    bias = causal + (pad - 1.0) * 1e9                                # (B, T, T)

    # ---- embed_ln + wpe + GPT-2 stack + ln_f + latent_net: ONE pallas_call ----
    lat_mu_full, lat_sig_full = gpt_latent_forward(
        stacked, bias, params, cfg["gpt_head"])
    lat_mu = lat_mu_full.reshape(B, S, Lsent, H)[:, :, act_dim:, :]
    lat_sigma = lat_sig_full.reshape(B, S, Lsent, H)[:, :, act_dim:, :]
    return (rep_mu, rep_sigma), (lat_mu, lat_sigma)


# ----------------------------------------------------------------------------
# Demo
# ----------------------------------------------------------------------------

if __name__ == "__main__":
    cfg = dict(
        act_dim=3,
        enc_hidden_size=128,      # lane-dense feature axis (128-lane vregs)
        hidden_size=128,
        ordering=1,
        max_ep_len=64,
        decoder_layer=2,
        decoder_head=4,
        representation_query_num=8,
        reconstruction_query_num=16,
        gpt_layer=2,
        gpt_head=4,
        n_positions=64,
    )

    B, S = 2, 2
    key = jax.random.PRNGKey(0)
    k_in, k_act, k_ts, k_par = jax.random.split(key, 4)

    bert_embeddings = jax.random.normal(
        k_in, (B, S, cfg["reconstruction_query_num"], cfg["enc_hidden_size"]),
        dtype=jnp.float32)
    actions = jax.random.normal(k_act, (B, S, cfg["act_dim"]), dtype=jnp.float32)
    timesteps = jax.random.randint(k_ts, (B, S), 0, cfg["max_ep_len"], dtype=jnp.int32)
    padding_mask = jnp.ones((B, S, 1), jnp.int32)

    params = init_params(k_par, cfg)

    fwd = jax.jit(functools.partial(latent_world_model_forward, cfg=cfg))

    (rep_mu, rep_sigma), (lat_mu, lat_sigma) = fwd(
        params, bert_embeddings, actions, timesteps, padding_mask)
    jax.block_until_ready((rep_mu, rep_sigma, lat_mu, lat_sigma))

    Rq, H = cfg["representation_query_num"], cfg["hidden_size"]
    assert rep_mu.shape == (B, S, Rq, H)
    assert rep_sigma.shape == (B, S, Rq, H)
    assert lat_mu.shape == (B, S, Rq, H)
    assert lat_sigma.shape == (B, S, Rq, H)
    assert bool(jnp.all(jnp.isfinite(rep_mu))) and bool(jnp.all(jnp.isfinite(lat_mu)))
    assert bool(jnp.all(jnp.isfinite(rep_sigma))) and bool(jnp.all(jnp.isfinite(lat_sigma)))
    assert bool(jnp.all(rep_sigma > 0.0)) and bool(jnp.all(lat_sigma > 0.0))
    print("KERNEL_OK")
</pallas_src>

<mosaic_0001>
module attributes {stable_mosaic.version = 11 : i64} {
  func.func @_gpt_latent_kernel(%arg0: i32, %arg1: memref<1x22x128xf32, #tpu.memory_space<vmem>>, %arg2: memref<1x22x22xf32, #tpu.memory_space<vmem>>, %arg3: memref<1x128xf32, #tpu.memory_space<vmem>>, %arg4: memref<1x128xf32, #tpu.memory_space<vmem>>, %arg5: memref<22x128xf32, #tpu.memory_space<vmem>>, %arg6: memref<2x1x128xf32, #tpu.memory_space<vmem>>, %arg7: memref<2x1x128xf32, #tpu.memory_space<vmem>>, %arg8: memref<2x128x384xbf16, #tpu.memory_space<vmem>>, %arg9: memref<2x1x384xf32, #tpu.memory_space<vmem>>, %arg10: memref<2x128x128xbf16, #tpu.memory_space<vmem>>, %arg11: memref<2x1x128xf32, #tpu.memory_space<vmem>>, %arg12: memref<2x1x128xf32, #tpu.memory_space<vmem>>, %arg13: memref<2x1x128xf32, #tpu.memory_space<vmem>>, %arg14: memref<2x128x512xbf16, #tpu.memory_space<vmem>>, %arg15: memref<2x1x512xf32, #tpu.memory_space<vmem>>, %arg16: memref<2x512x128xbf16, #tpu.memory_space<vmem>>, %arg17: memref<2x1x128xf32, #tpu.memory_space<vmem>>, %arg18: memref<1x128xf32, #tpu.memory_space<vmem>>, %arg19: memref<1x128xf32, #tpu.memory_space<vmem>>, %arg20: memref<128x128xbf16, #tpu.memory_space<vmem>>, %arg21: memref<1x128xf32, #tpu.memory_space<vmem>>, %arg22: memref<128x256xbf16, #tpu.memory_space<vmem>>, %arg23: memref<1x256xf32, #tpu.memory_space<vmem>>, %arg24: memref<1x22x128xf32, #tpu.memory_space<vmem>>, %arg25: memref<1x22x128xf32, #tpu.memory_space<vmem>>) attributes {dimension_semantics = [#tpu.dimension_semantics<parallel>], iteration_bounds = array<i64: 2>, scalar_prefetch = 0 : i64, scratch_operands = 0 : i64, tpu.core_type = #tpu.core_type<tc>, window_params = [{transform_indices = @transform_0, window_bounds = array<i64: 1, 22, 128>}, {transform_indices = @transform_1, window_bounds = array<i64: 1, 22, 22>}, {pipeline_mode = #tpu.pipeline_mode<synchronous>, transform_indices = @transform_2, window_bounds = array<i64: 1, 128>}, {pipeline_mode = #tpu.pipeline_mode<synchronous>, transform_indices = @transform_3, window_bounds = array<i64: 1, 128>}, {pipeline_mode = #tpu.pipeline_mode<synchronous>, transform_indices = @transform_4, window_bounds = array<i64: 22, 128>}, {pipeline_mode = #tpu.pipeline_mode<synchronous>, transform_indices = @transform_5, window_bounds = array<i64: 2, 1, 128>}, {pipeline_mode = #tpu.pipeline_mode<synchronous>, transform_indices = @transform_6, window_bounds = array<i64: 2, 1, 128>}, {pipeline_mode = #tpu.pipeline_mode<synchronous>, transform_indices = @transform_7, window_bounds = array<i64: 2, 128, 384>}, {pipeline_mode = #tpu.pipeline_mode<synchronous>, transform_indices = @transform_8, window_bounds = array<i64: 2, 1, 384>}, {pipeline_mode = #tpu.pipeline_mode<synchronous>, transform_indices = @transform_9, window_bounds = array<i64: 2, 128, 128>}, {pipeline_mode = #tpu.pipeline_mode<synchronous>, transform_indices = @transform_10, window_bounds = array<i64: 2, 1, 128>}, {pipeline_mode = #tpu.pipeline_mode<synchronous>, transform_indices = @transform_11, window_bounds = array<i64: 2, 1, 128>}, {pipeline_mode = #tpu.pipeline_mode<synchronous>, transform_indices = @transform_12, window_bounds = array<i64: 2, 1, 128>}, {pipeline_mode = #tpu.pipeline_mode<synchronous>, transform_indices = @transform_13, window_bounds = array<i64: 2, 128, 512>}, {pipeline_mode = #tpu.pipeline_mode<synchronous>, transform_indices = @transform_14, window_bounds = array<i64: 2, 1, 512>}, {pipeline_mode = #tpu.pipeline_mode<synchronous>, transform_indices = @transform_15, window_bounds = array<i64: 2, 512, 128>}, {pipeline_mode = #tpu.pipeline_mode<synchronous>, transform_indices = @transform_16, window_bounds = array<i64: 2, 1, 128>}, {pipeline_mode = #tpu.pipeline_mode<synchronous>, transform_indices = @transform_17, window_bounds = array<i64: 1, 128>}, {pipeline_mode = #tpu.pipeline_mode<synchronous>, transform_indices = @transform_18, window_bounds = array<i64: 1, 128>}, {pipeline_mode = #tpu.pipeline_mode<synchronous>, transform_indices = @transform_19, window_bounds = array<i64: 128, 128>}, {pipeline_mode = #tpu.pipeline_mode<synchronous>, transform_indices = @transform_20, window_bounds = array<i64: 1, 128>}, {pipeline_mode = #tpu.pipeline_mode<synchronous>, transform_indices = @transform_21, window_bounds = array<i64: 128, 256>}, {pipeline_mode = #tpu.pipeline_mode<synchronous>, transform_indices = @transform_22, window_bounds = array<i64: 1, 256>}, {transform_indices = @transform_23, window_bounds = array<i64: 1, 22, 128>}, {transform_indices = @transform_24, window_bounds = array<i64: 1, 22, 128>}]} {
    %c0 = arith.constant 0 : index
    %c0_0 = arith.constant 0 : index
    %c0_1 = arith.constant 0 : index
    %0 = vector.load %arg2[%c0, %c0_0, %c0_1] : memref<1x22x22xf32, #tpu.memory_space<vmem>>, vector<1x22x22xf32>
    %1 = vector.shape_cast %0 : vector<1x22x22xf32> to vector<22x22xf32>
    %c0_2 = arith.constant 0 : index
    %c0_3 = arith.constant 0 : index
    %c0_4 = arith.constant 0 : index
    %2 = vector.load %arg1[%c0_2, %c0_3, %c0_4] : memref<1x22x128xf32, #tpu.memory_space<vmem>>, vector<1x22x128xf32>
    %3 = vector.shape_cast %2 : vector<1x22x128xf32> to vector<22x128xf32>
    %c0_5 = arith.constant 0 : index
    %c0_6 = arith.constant 0 : index
    %4 = vector.load %arg3[%c0_5, %c0_6] : memref<1x128xf32, #tpu.memory_space<vmem>>, vector<1x128xf32>
    %c0_7 = arith.constant 0 : index
    %c0_8 = arith.constant 0 : index
    %5 = vector.load %arg4[%c0_7, %c0_8] : memref<1x128xf32, #tpu.memory_space<vmem>>, vector<1x128xf32>
    %cst = arith.constant dense<0.000000e+00> : vector<22xf32>
    %6 = vector.multi_reduction <add>, %3, %cst [1] : vector<22x128xf32> to vector<22xf32>
    %7 = vector.shape_cast %6 : vector<22xf32> to vector<22x1xf32>
    %cst_9 = arith.constant 1.280000e+02 : f32
    %8 = vector.broadcast %cst_9 : f32 to vector<22x1xf32>
    %9 = arith.divf %7, %8 : vector<22x1xf32>
    %10 = vector.broadcast %9 : vector<22x1xf32> to vector<22x128xf32>
    %11 = arith.subf %3, %10 : vector<22x128xf32>
    %12 = arith.mulf %11, %11 : vector<22x128xf32>
    %cst_10 = arith.constant dense<0.000000e+00> : vector<22xf32>
    %13 = vector.multi_reduction <add>, %12, %cst_10 [1] : vector<22x128xf32> to vector<22xf32>
    %14 = vector.shape_cast %13 : vector<22xf32> to vector<22x1xf32>
    %cst_11 = arith.constant 1.280000e+02 : f32
    %15 = vector.broadcast %cst_11 : f32 to vector<22x1xf32>
    %16 = arith.divf %14, %15 : vector<22x1xf32>
    %cst_12 = arith.constant 9.99999974E-6 : f32
    %17 = vector.broadcast %cst_12 : f32 to vector<22x1xf32>
    %18 = arith.addf %16, %17 : vector<22x1xf32>
    %19 = math.rsqrt %18 : vector<22x1xf32>
    %20 = vector.broadcast %19 : vector<22x1xf32> to vector<22x128xf32>
    %21 = arith.mulf %11, %20 : vector<22x128xf32>
    %22 = vector.broadcast %4 : vector<1x128xf32> to vector<22x128xf32>
    %23 = arith.mulf %21, %22 : vector<22x128xf32>
    %24 = vector.broadcast %5 : vector<1x128xf32> to vector<22x128xf32>
    %25 = arith.addf %23, %24 : vector<22x128xf32>
    %c0_13 = arith.constant 0 : index
    %c0_14 = arith.constant 0 : index
    %26 = vector.load %arg5[%c0_13, %c0_14] : memref<22x128xf32, #tpu.memory_space<vmem>>, vector<22x128xf32>
    %27 = arith.addf %25, %26 : vector<22x128xf32>
    %c0_15 = arith.constant 0 : index
    %c0_16 = arith.constant 0 : index
    %c0_17 = arith.constant 0 : index
    %28 = vector.load %arg6[%c0_15, %c0_16, %c0_17] : memref<2x1x128xf32, #tpu.memory_space<vmem>>, vector<1x1x128xf32>
    %29 = vector.shape_cast %28 : vector<1x1x128xf32> to vector<1x128xf32>
    %c0_18 = arith.constant 0 : index
    %c0_19 = arith.constant 0 : index
    %c0_20 = arith.constant 0 : index
    %30 = vector.load %arg7[%c0_18, %c0_19, %c0_20] : memref<2x1x128xf32, #tpu.memory_space<vmem>>, vector<1x1x128xf32>
    %31 = vector.shape_cast %30 : vector<1x1x128xf32> to vector<1x128xf32>
    %cst_21 = arith.constant dense<0.000000e+00> : vector<22xf32>
    %32 = vector.multi_reduction <add>, %27, %cst_21 [1] : vector<22x128xf32> to vector<22xf32>
    %33 = vector.shape_cast %32 : vector<22xf32> to vector<22x1xf32>
    %cst_22 = arith.constant 1.280000e+02 : f32
    %34 = vector.broadcast %cst_22 : f32 to vector<22x1xf32>
    %35 = arith.divf %33, %34 : vector<22x1xf32>
    %36 = vector.broadcast %35 : vector<22x1xf32> to vector<22x128xf32>
    %37 = arith.subf %27, %36 : vector<22x128xf32>
    %38 = arith.mulf %37, %37 : vector<22x128xf32>
    %cst_23 = arith.constant dense<0.000000e+00> : vector<22xf32>
    %39 = vector.multi_reduction <add>, %38, %cst_23 [1] : vector<22x128xf32> to vector<22xf32>
    %40 = vector.shape_cast %39 : vector<22xf32> to vector<22x1xf32>
    %cst_24 = arith.constant 1.280000e+02 : f32
    %41 = vector.broadcast %cst_24 : f32 to vector<22x1xf32>
    %42 = arith.divf %40, %41 : vector<22x1xf32>
    %cst_25 = arith.constant 9.99999974E-6 : f32
    %43 = vector.broadcast %cst_25 : f32 to vector<22x1xf32>
    %44 = arith.addf %42, %43 : vector<22x1xf32>
    %45 = math.rsqrt %44 : vector<22x1xf32>
    %46 = vector.broadcast %45 : vector<22x1xf32> to vector<22x128xf32>
    %47 = arith.mulf %37, %46 : vector<22x128xf32>
    %48 = vector.broadcast %29 : vector<1x128xf32> to vector<22x128xf32>
    %49 = arith.mulf %47, %48 : vector<22x128xf32>
    %50 = vector.broadcast %31 : vector<1x128xf32> to vector<22x128xf32>
    %51 = arith.addf %49, %50 : vector<22x128xf32>
    %52 = arith.truncf %51 : vector<22x128xf32> to vector<22x128xbf16>
    %c0_26 = arith.constant 0 : index
    %c0_27 = arith.constant 0 : index
    %c0_28 = arith.constant 0 : index
    %53 = vector.load %arg8[%c0_26, %c0_27, %c0_28] : memref<2x128x384xbf16, #tpu.memory_space<vmem>>, vector<1x128x384xbf16>
    %54 = vector.shape_cast %53 : vector<1x128x384xbf16> to vector<128x384xbf16>
    %cst_29 = arith.constant dense<0.000000e+00> : vector<22x384xf32>
    %55 = tpu.matmul %52, %54, %cst_29 {dimension_numbers = #tpu.dot_dimension_numbers<[1], [0], [0], [1], [0, 0, 1, 1], [], []>} : vector<22x128xbf16>, vector<128x384xbf16>, vector<22x384xf32> -> vector<22x384xf32>
    %c0_30 = arith.constant 0 : index
    %c0_31 = arith.constant 0 : index
    %c0_32 = arith.constant 0 : index
    %56 = vector.load %arg9[%c0_30, %c0_31, %c0_32] : memref<2x1x384xf32, #tpu.memory_space<vmem>>, vector<1x1x384xf32>
    %57 = vector.shape_cast %56 : vector<1x1x384xf32> to vector<1x384xf32>
    %58 = vector.broadcast %57 : vector<1x384xf32> to vector<22x384xf32>
    %59 = arith.addf %55, %58 : vector<22x384xf32>
    %60 = vector.extract_strided_slice %59 {offsets = [0, 0], sizes = [22, 128], strides = [1, 1]} : vector<22x384xf32> to vector<22x128xf32>
    %61 = vector.extract_strided_slice %59 {offsets = [0, 128], sizes = [22, 128], strides = [1, 1]} : vector<22x384xf32> to vector<22x128xf32>
    %62 = vector.extract_strided_slice %59 {offsets = [0, 256], sizes = [22, 128], strides = [1, 1]} : vector<22x384xf32> to vector<22x128xf32>
    %63 = vector.extract_strided_slice %60 {offsets = [0, 0], sizes = [22, 32], strides = [1, 1]} : vector<22x128xf32> to vector<22x32xf32>
    %64 = vector.extract_strided_slice %61 {offsets = [0, 0], sizes = [22, 32], strides = [1, 1]} : vector<22x128xf32> to vector<22x32xf32>
    %65 = vector.extract_strided_slice %62 {offsets = [0, 0], sizes = [22, 32], strides = [1, 1]} : vector<22x128xf32> to vector<22x32xf32>
    %66 = arith.truncf %63 : vector<22x32xf32> to vector<22x32xbf16>
    %67 = arith.truncf %64 : vector<22x32xf32> to vector<22x32xbf16>
    %cst_33 = arith.constant dense<0.000000e+00> : vector<22x22xf32>
    %68 = tpu.matmul %66, %67, %cst_33 {dimension_numbers = #tpu.dot_dimension_numbers<[1], [1], [0], [0], [0, 0, 1, 0], [], []>} : vector<22x32xbf16>, vector<22x32xbf16>, vector<22x22xf32> -> vector<22x22xf32>
    %cst_34 = arith.constant 0.176776692 : f32
    %69 = vector.broadcast %cst_34 : f32 to vector<22x22xf32>
    %70 = arith.mulf %68, %69 : vector<22x22xf32>
    %71 = arith.addf %70, %1 : vector<22x22xf32>
    %cst_35 = arith.constant dense<0xFF800000> : vector<22xf32>
    %72 = vector.multi_reduction <maximumf>, %71, %cst_35 [1] : vector<22x22xf32> to vector<22xf32>
    %73 = vector.shape_cast %72 : vector<22xf32> to vector<22x1xf32>
    %74 = vector.broadcast %73 : vector<22x1xf32> to vector<22x22xf32>
    %75 = arith.subf %71, %74 : vector<22x22xf32>
    %76 = math.exp %75 : vector<22x22xf32>
    %cst_36 = arith.constant dense<0.000000e+00> : vector<22xf32>
    %77 = vector.multi_reduction <add>, %76, %cst_36 [1] : vector<22x22xf32> to vector<22xf32>
    %78 = vector.shape_cast %77 : vector<22xf32> to vector<22x1xf32>
    %79 = vector.broadcast %78 : vector<22x1xf32> to vector<22x22xf32>
    %80 = arith.divf %76, %79 : vector<22x22xf32>
    %81 = arith.truncf %80 : vector<22x22xf32> to vector<22x22xbf16>
    %82 = arith.truncf %65 : vector<22x32xf32> to vector<22x32xbf16>
    %cst_37 = arith.constant dense<0.000000e+00> : vector<22x32xf32>
    %83 = tpu.matmul %81, %82, %cst_37 {dimension_numbers = #tpu.dot_dimension_numbers<[1], [0], [0], [1], [0, 0, 1, 1], [], []>} : vector<22x22xbf16>, vector<22x32xbf16>, vector<22x32xf32> -> vector<22x32xf32>
    %84 = vector.extract_strided_slice %60 {offsets = [0, 32], sizes = [22, 32], strides = [1, 1]} : vector<22x128xf32> to vector<22x32xf32>
    %85 = vector.extract_strided_slice %61 {offsets = [0, 32], sizes = [22, 32], strides = [1, 1]} : vector<22x128xf32> to vector<22x32xf32>
    %86 = vector.extract_strided_slice %62 {offsets = [0, 32], sizes = [22, 32], strides = [1, 1]} : vector<22x128xf32> to vector<22x32xf32>
    %87 = arith.truncf %84 : vector<22x32xf32> to vector<22x32xbf16>
    %88 = arith.truncf %85 : vector<22x32xf32> to vector<22x32xbf16>
    %cst_38 = arith.constant dense<0.000000e+00> : vector<22x22xf32>
    %89 = tpu.matmul %87, %88, %cst_38 {dimension_numbers = #tpu.dot_dimension_numbers<[1], [1], [0], [0], [0, 0, 1, 0], [], []>} : vector<22x32xbf16>, vector<22x32xbf16>, vector<22x22xf32> -> vector<22x22xf32>
    %cst_39 = arith.constant 0.176776692 : f32
    %90 = vector.broadcast %cst_39 : f32 to vector<22x22xf32>
    %91 = arith.mulf %89, %90 : vector<22x22xf32>
    %92 = arith.addf %91, %1 : vector<22x22xf32>
    %cst_40 = arith.constant dense<0xFF800000> : vector<22xf32>
    %93 = vector.multi_reduction <maximumf>, %92, %cst_40 [1] : vector<22x22xf32> to vector<22xf32>
    %94 = vector.shape_cast %93 : vector<22xf32> to vector<22x1xf32>
    %95 = vector.broadcast %94 : vector<22x1xf32> to vector<22x22xf32>
    %96 = arith.subf %92, %95 : vector<22x22xf32>
    %97 = math.exp %96 : vector<22x22xf32>
    %cst_41 = arith.constant dense<0.000000e+00> : vector<22xf32>
    %98 = vector.multi_reduction <add>, %97, %cst_41 [1] : vector<22x22xf32> to vector<22xf32>
    %99 = vector.shape_cast %98 : vector<22xf32> to vector<22x1xf32>
    %100 = vector.broadcast %99 : vector<22x1xf32> to vector<22x22xf32>
    %101 = arith.divf %97, %100 : vector<22x22xf32>
    %102 = arith.truncf %101 : vector<22x22xf32> to vector<22x22xbf16>
    %103 = arith.truncf %86 : vector<22x32xf32> to vector<22x32xbf16>
    %cst_42 = arith.constant dense<0.000000e+00> : vector<22x32xf32>
    %104 = tpu.matmul %102, %103, %cst_42 {dimension_numbers = #tpu.dot_dimension_numbers<[1], [0], [0], [1], [0, 0, 1, 1], [], []>} : vector<22x22xbf16>, vector<22x32xbf16>, vector<22x32xf32> -> vector<22x32xf32>
    %105 = vector.extract_strided_slice %60 {offsets = [0, 64], sizes = [22, 32], strides = [1, 1]} : vector<22x128xf32> to vector<22x32xf32>
    %106 = vector.extract_strided_slice %61 {offsets = [0, 64], sizes = [22, 32], strides = [1, 1]} : vector<22x128xf32> to vector<22x32xf32>
    %107 = vector.extract_strided_slice %62 {offsets = [0, 64], sizes = [22, 32], strides = [1, 1]} : vector<22x128xf32> to vector<22x32xf32>
    %108 = arith.truncf %105 : vector<22x32xf32> to vector<22x32xbf16>
    %109 = arith.truncf %106 : vector<22x32xf32> to vector<22x32xbf16>
    %cst_43 = arith.constant dense<0.000000e+00> : vector<22x22xf32>
    %110 = tpu.matmul %108, %109, %cst_43 {dimension_numbers = #tpu.dot_dimension_numbers<[1], [1], [0], [0], [0, 0, 1, 0], [], []>} : vector<22x32xbf16>, vector<22x32xbf16>, vector<22x22xf32> -> vector<22x22xf32>
    %cst_44 = arith.constant 0.176776692 : f32
    %111 = vector.broadcast %cst_44 : f32 to vector<22x22xf32>
    %112 = arith.mulf %110, %111 : vector<22x22xf32>
    %113 = arith.addf %112, %1 : vector<22x22xf32>
    %cst_45 = arith.constant dense<0xFF800000> : vector<22xf32>
    %114 = vector.multi_reduction <maximumf>, %113, %cst_45 [1] : vector<22x22xf32> to vector<22xf32>
    %115 = vector.shape_cast %114 : vector<22xf32> to vector<22x1xf32>
    %116 = vector.broadcast %115 : vector<22x1xf32> to vector<22x22xf32>
    %117 = arith.subf %113, %116 : vector<22x22xf32>
    %118 = math.exp %117 : vector<22x22xf32>
    %cst_46 = arith.constant dense<0.000000e+00> : vector<22xf32>
    %119 = vector.multi_reduction <add>, %118, %cst_46 [1] : vector<22x22xf32> to vector<22xf32>
    %120 = vector.shape_cast %119 : vector<22xf32> to vector<22x1xf32>
    %121 = vector.broadcast %120 : vector<22x1xf32> to vector<22x22xf32>
    %122 = arith.divf %118, %121 : vector<22x22xf32>
    %123 = arith.truncf %122 : vector<22x22xf32> to vector<22x22xbf16>
    %124 = arith.truncf %107 : vector<22x32xf32> to vector<22x32xbf16>
    %cst_47 = arith.constant dense<0.000000e+00> : vector<22x32xf32>
    %125 = tpu.matmul %123, %124, %cst_47 {dimension_numbers = #tpu.dot_dimension_numbers<[1], [0], [0], [1], [0, 0, 1, 1], [], []>} : vector<22x22xbf16>, vector<22x32xbf16>, vector<22x32xf32> -> vector<22x32xf32>
    %126 = vector.extract_strided_slice %60 {offsets = [0, 96], sizes = [22, 32], strides = [1, 1]} : vector<22x128xf32> to vector<22x32xf32>
    %127 = vector.extract_strided_slice %61 {offsets = [0, 96], sizes = [22, 32], strides = [1, 1]} : vector<22x128xf32> to vector<22x32xf32>
    %128 = vector.extract_strided_slice %62 {offsets = [0, 96], sizes = [22, 32], strides = [1, 1]} : vector<22x128xf32> to vector<22x32xf32>
    %129 = arith.truncf %126 : vector<22x32xf32> to vector<22x32xbf16>
    %130 = arith.truncf %127 : vector<22x32xf32> to vector<22x32xbf16>
    %cst_48 = arith.constant dense<0.000000e+00> : vector<22x22xf32>
    %131 = tpu.matmul %129, %130, %cst_48 {dimension_numbers = #tpu.dot_dimension_numbers<[1], [1], [0], [0], [0, 0, 1, 0], [], []>} : vector<22x32xbf16>, vector<22x32xbf16>, vector<22x22xf32> -> vector<22x22xf32>
    %cst_49 = arith.constant 0.176776692 : f32
    %132 = vector.broadcast %cst_49 : f32 to vector<22x22xf32>
    %133 = arith.mulf %131, %132 : vector<22x22xf32>
    %134 = arith.addf %133, %1 : vector<22x22xf32>
    %cst_50 = arith.constant dense<0xFF800000> : vector<22xf32>
    %135 = vector.multi_reduction <maximumf>, %134, %cst_50 [1] : vector<22x22xf32> to vector<22xf32>
    %136 = vector.shape_cast %135 : vector<22xf32> to vector<22x1xf32>
    %137 = vector.broadcast %136 : vector<22x1xf32> to vector<22x22xf32>
    %138 = arith.subf %134, %137 : vector<22x22xf32>
    %139 = math.exp %138 : vector<22x22xf32>
    %cst_51 = arith.constant dense<0.000000e+00> : vector<22xf32>
    %140 = vector.multi_reduction <add>, %139, %cst_51 [1] : vector<22x22xf32> to vector<22xf32>
    %141 = vector.shape_cast %140 : vector<22xf32> to vector<22x1xf32>
    %142 = vector.broadcast %141 : vector<22x1xf32> to vector<22x22xf32>
    %143 = arith.divf %139, %142 : vector<22x22xf32>
    %144 = arith.truncf %143 : vector<22x22xf32> to vector<22x22xbf16>
    %145 = arith.truncf %128 : vector<22x32xf32> to vector<22x32xbf16>
    %cst_52 = arith.constant dense<0.000000e+00> : vector<22x32xf32>
    %146 = tpu.matmul %144, %145, %cst_52 {dimension_numbers = #tpu.dot_dimension_numbers<[1], [0], [0], [1], [0, 0, 1, 1], [], []>} : vector<22x22xbf16>, vector<22x32xbf16>, vector<22x32xf32> -> vector<22x32xf32>
    %147 = tpu.concatenate %83, %104, %125, %146 in 1 : vector<22x32xf32>, vector<22x32xf32>, vector<22x32xf32>, vector<22x32xf32> -> vector<22x128xf32>
    %148 = arith.truncf %147 : vector<22x128xf32> to vector<22x128xbf16>
    %c0_53 = arith.constant 0 : index
    %c0_54 = arith.constant 0 : index
    %c0_55 = arith.constant 0 : index
    %149 = vector.load %arg10[%c0_53, %c0_54, %c0_55] : memref<2x128x128xbf16, #tpu.memory_space<vmem>>, vector<1x128x128xbf16>
    %150 = vector.shape_cast %149 : vector<1x128x128xbf16> to vector<128x128xbf16>
    %cst_56 = arith.constant dense<0.000000e+00> : vector<22x128xf32>
    %151 = tpu.matmul %148, %150, %cst_56 {dimension_numbers = #tpu.dot_dimension_numbers<[1], [0], [0], [1], [0, 0, 1, 1], [], []>} : vector<22x128xbf16>, vector<128x128xbf16>, vector<22x128xf32> -> vector<22x128xf32>
    %152 = arith.addf %27, %151 : vector<22x128xf32>
    %c0_57 = arith.constant 0 : index
    %c0_58 = arith.constant 0 : index
    %c0_59 = arith.constant 0 : index
    %153 = vector.load %arg11[%c0_57, %c0_58, %c0_59] : memref<2x1x128xf32, #tpu.memory_space<vmem>>, vector<1x1x128xf32>
    %154 = vector.shape_cast %153 : vector<1x1x128xf32> to vector<1x128xf32>
    %155 = vector.broadcast %154 : vector<1x128xf32> to vector<22x128xf32>
    %156 = arith.addf %152, %155 : vector<22x128xf32>
    %c0_60 = arith.constant 0 : index
    %c0_61 = arith.constant 0 : index
    %c0_62 = arith.constant 0 : index
    %157 = vector.load %arg12[%c0_60, %c0_61, %c0_62] : memref<2x1x128xf32, #tpu.memory_space<vmem>>, vector<1x1x128xf32>
    %158 = vector.shape_cast %157 : vector<1x1x128xf32> to vector<1x128xf32>
    %c0_63 = arith.constant 0 : index
    %c0_64 = arith.constant 0 : index
    %c0_65 = arith.constant 0 : index
    %159 = vector.load %arg13[%c0_63, %c0_64, %c0_65] : memref<2x1x128xf32, #tpu.memory_space<vmem>>, vector<1x1x128xf32>
    %160 = vector.shape_cast %159 : vector<1x1x128xf32> to vector<1x128xf32>
    %cst_66 = arith.constant dense<0.000000e+00> : vector<22xf32>
    %161 = vector.multi_reduction <add>, %156, %cst_66 [1] : vector<22x128xf32> to vector<22xf32>
    %162 = vector.shape_cast %161 : vector<22xf32> to vector<22x1xf32>
    %cst_67 = arith.constant 1.280000e+02 : f32
    %163 = vector.broadcast %cst_67 : f32 to vector<22x1xf32>
    %164 = arith.divf %162, %163 : vector<22x1xf32>
    %165 = vector.broadcast %164 : vector<22x1xf32> to vector<22x128xf32>
    %166 = arith.subf %156, %165 : vector<22x128xf32>
    %167 = arith.mulf %166, %166 : vector<22x128xf32>
    %cst_68 = arith.constant dense<0.000000e+00> : vector<22xf32>
    %168 = vector.multi_reduction <add>, %167, %cst_68 [1] : vector<22x128xf32> to vector<22xf32>
    %169 = vector.shape_cast %168 : vector<22xf32> to vector<22x1xf32>
    %cst_69 = arith.constant 1.280000e+02 : f32
    %170 = vector.broadcast %cst_69 : f32 to vector<22x1xf32>
    %171 = arith.divf %169, %170 : vector<22x1xf32>
    %cst_70 = arith.constant 9.99999974E-6 : f32
    %172 = vector.broadcast %cst_70 : f32 to vector<22x1xf32>
    %173 = arith.addf %171, %172 : vector<22x1xf32>
    %174 = math.rsqrt %173 : vector<22x1xf32>
    %175 = vector.broadcast %174 : vector<22x1xf32> to vector<22x128xf32>
    %176 = arith.mulf %166, %175 : vector<22x128xf32>
    %177 = vector.broadcast %158 : vector<1x128xf32> to vector<22x128xf32>
    %178 = arith.mulf %176, %177 : vector<22x128xf32>
    %179 = vector.broadcast %160 : vector<1x128xf32> to vector<22x128xf32>
    %180 = arith.addf %178, %179 : vector<22x128xf32>
    %181 = arith.truncf %180 : vector<22x128xf32> to vector<22x128xbf16>
    %c0_71 = arith.constant 0 : index
    %c0_72 = arith.constant 0 : index
    %c0_73 = arith.constant 0 : index
    %182 = vector.load %arg14[%c0_71, %c0_72, %c0_73] : memref<2x128x512xbf16, #tpu.memory_space<vmem>>, vector<1x128x512xbf16>
    %183 = vector.shape_cast %182 : vector<1x128x512xbf16> to vector<128x512xbf16>
    %cst_74 = arith.constant dense<0.000000e+00> : vector<22x512xf32>
    %184 = tpu.matmul %181, %183, %cst_74 {dimension_numbers = #tpu.dot_dimension_numbers<[1], [0], [0], [1], [0, 0, 1, 1], [], []>} : vector<22x128xbf16>, vector<128x512xbf16>, vector<22x512xf32> -> vector<22x512xf32>
    %c0_75 = arith.constant 0 : index
    %c0_76 = arith.constant 0 : index
    %c0_77 = arith.constant 0 : index
    %185 = vector.load %arg15[%c0_75, %c0_76, %c0_77] : memref<2x1x512xf32, #tpu.memory_space<vmem>>, vector<1x1x512xf32>
    %186 = vector.shape_cast %185 : vector<1x1x512xf32> to vector<1x512xf32>
    %187 = vector.broadcast %186 : vector<1x512xf32> to vector<22x512xf32>
    %188 = arith.addf %184, %187 : vector<22x512xf32>
    %189 = arith.mulf %188, %188 : vector<22x512xf32>
    %190 = arith.mulf %188, %189 : vector<22x512xf32>
    %cst_78 = arith.constant 4.471500e-02 : f32
    %191 = vector.broadcast %cst_78 : f32 to vector<22x512xf32>
    %192 = arith.mulf %191, %190 : vector<22x512xf32>
    %193 = arith.addf %188, %192 : vector<22x512xf32>
    %cst_79 = arith.constant 0.797884583 : f32
    %194 = vector.broadcast %cst_79 : f32 to vector<22x512xf32>
    %195 = arith.mulf %194, %193 : vector<22x512xf32>
    %196 = math.tanh %195 : vector<22x512xf32>
    %cst_80 = arith.constant 1.000000e+00 : f32
    %197 = vector.broadcast %cst_80 : f32 to vector<22x512xf32>
    %198 = arith.addf %197, %196 : vector<22x512xf32>
    %cst_81 = arith.constant 5.000000e-01 : f32
    %199 = vector.broadcast %cst_81 : f32 to vector<22x512xf32>
    %200 = arith.mulf %199, %198 : vector<22x512xf32>
    %201 = arith.mulf %188, %200 : vector<22x512xf32>
    %202 = arith.truncf %201 : vector<22x512xf32> to vector<22x512xbf16>
    %c0_82 = arith.constant 0 : index
    %c0_83 = arith.constant 0 : index
    %c0_84 = arith.constant 0 : index
    %203 = vector.load %arg16[%c0_82, %c0_83, %c0_84] : memref<2x512x128xbf16, #tpu.memory_space<vmem>>, vector<1x512x128xbf16>
    %204 = vector.shape_cast %203 : vector<1x512x128xbf16> to vector<512x128xbf16>
    %cst_85 = arith.constant dense<0.000000e+00> : vector<22x128xf32>
    %205 = tpu.matmul %202, %204, %cst_85 {dimension_numbers = #tpu.dot_dimension_numbers<[1], [0], [0], [1], [0, 0, 1, 1], [], []>} : vector<22x512xbf16>, vector<512x128xbf16>, vector<22x128xf32> -> vector<22x128xf32>
    %206 = arith.addf %156, %205 : vector<22x128xf32>
    %c0_86 = arith.constant 0 : index
    %c0_87 = arith.constant 0 : index
    %c0_88 = arith.constant 0 : index
    %207 = vector.load %arg17[%c0_86, %c0_87, %c0_88] : memref<2x1x128xf32, #tpu.memory_space<vmem>>, vector<1x1x128xf32>
    %208 = vector.shape_cast %207 : vector<1x1x128xf32> to vector<1x128xf32>
    %209 = vector.broadcast %208 : vector<1x128xf32> to vector<22x128xf32>
    %210 = arith.addf %206, %209 : vector<22x128xf32>
    %c1 = arith.constant 1 : index
    %c0_89 = arith.constant 0 : index
    %c0_90 = arith.constant 0 : index
    %211 = vector.load %arg6[%c1, %c0_89, %c0_90] : memref<2x1x128xf32, #tpu.memory_space<vmem>>, vector<1x1x128xf32>
    %212 = vector.shape_cast %211 : vector<1x1x128xf32> to vector<1x128xf32>
    %c1_91 = arith.constant 1 : index
    %c0_92 = arith.constant 0 : index
    %c0_93 = arith.constant 0 : index
    %213 = vector.load %arg7[%c1_91, %c0_92, %c0_93] : memref<2x1x128xf32, #tpu.memory_space<vmem>>, vector<1x1x128xf32>
    %214 = vector.shape_cast %213 : vector<1x1x128xf32> to vector<1x128xf32>
    %cst_94 = arith.constant dense<0.000000e+00> : vector<22xf32>
    %215 = vector.multi_reduction <add>, %210, %cst_94 [1] : vector<22x128xf32> to vector<22xf32>
    %216 = vector.shape_cast %215 : vector<22xf32> to vector<22x1xf32>
    %cst_95 = arith.constant 1.280000e+02 : f32
    %217 = vector.broadcast %cst_95 : f32 to vector<22x1xf32>
    %218 = arith.divf %216, %217 : vector<22x1xf32>
    %219 = vector.broadcast %218 : vector<22x1xf32> to vector<22x128xf32>
    %220 = arith.subf %210, %219 : vector<22x128xf32>
    %221 = arith.mulf %220, %220 : vector<22x128xf32>
    %cst_96 = arith.constant dense<0.000000e+00> : vector<22xf32>
    %222 = vector.multi_reduction <add>, %221, %cst_96 [1] : vector<22x128xf32> to vector<22xf32>
    %223 = vector.shape_cast %222 : vector<22xf32> to vector<22x1xf32>
    %cst_97 = arith.constant 1.280000e+02 : f32
    %224 = vector.broadcast %cst_97 : f32 to vector<22x1xf32>
    %225 = arith.divf %223, %224 : vector<22x1xf32>
    %cst_98 = arith.constant 9.99999974E-6 : f32
    %226 = vector.broadcast %cst_98 : f32 to vector<22x1xf32>
    %227 = arith.addf %225, %226 : vector<22x1xf32>
    %228 = math.rsqrt %227 : vector<22x1xf32>
    %229 = vector.broadcast %228 : vector<22x1xf32> to vector<22x128xf32>
    %230 = arith.mulf %220, %229 : vector<22x128xf32>
    %231 = vector.broadcast %212 : vector<1x128xf32> to vector<22x128xf32>
    %232 = arith.mulf %230, %231 : vector<22x128xf32>
    %233 = vector.broadcast %214 : vector<1x128xf32> to vector<22x128xf32>
    %234 = arith.addf %232, %233 : vector<22x128xf32>
    %235 = arith.truncf %234 : vector<22x128xf32> to vector<22x128xbf16>
    %c1_99 = arith.constant 1 : index
    %c0_100 = arith.constant 0 : index
    %c0_101 = arith.constant 0 : index
    %236 = vector.load %arg8[%c1_99, %c0_100, %c0_101] : memref<2x128x384xbf16, #tpu.memory_space<vmem>>, vector<1x128x384xbf16>
    %237 = vector.shape_cast %236 : vector<1x128x384xbf16> to vector<128x384xbf16>
    %cst_102 = arith.constant dense<0.000000e+00> : vector<22x384xf32>
    %238 = tpu.matmul %235, %237, %cst_102 {dimension_numbers = #tpu.dot_dimension_numbers<[1], [0], [0], [1], [0, 0, 1, 1], [], []>} : vector<22x128xbf16>, vector<128x384xbf16>, vector<22x384xf32> -> vector<22x384xf32>
    %c1_103 = arith.constant 1 : index
    %c0_104 = arith.constant 0 : index
    %c0_105 = arith.constant 0 : index
    %239 = vector.load %arg9[%c1_103, %c0_104, %c0_105] : memref<2x1x384xf32, #tpu.memory_space<vmem>>, vector<1x1x384xf32>
    %240 = vector.shape_cast %239 : vector<1x1x384xf32> to vector<1x384xf32>
    %241 = vector.broadcast %240 : vector<1x384xf32> to vector<22x384xf32>
    %242 = arith.addf %238, %241 : vector<22x384xf32>
    %243 = vector.extract_strided_slice %242 {offsets = [0, 0], sizes = [22, 128], strides = [1, 1]} : vector<22x384xf32> to vector<22x128xf32>
    %244 = vector.extract_strided_slice %242 {offsets = [0, 128], sizes = [22, 128], strides = [1, 1]} : vector<22x384xf32> to vector<22x128xf32>
    %245 = vector.extract_strided_slice %242 {offsets = [0, 256], sizes = [22, 128], strides = [1, 1]} : vector<22x384xf32> to vector<22x128xf32>
    %246 = vector.extract_strided_slice %243 {offsets = [0, 0], sizes = [22, 32], strides = [1, 1]} : vector<22x128xf32> to vector<22x32xf32>
    %247 = vector.extract_strided_slice %244 {offsets = [0, 0], sizes = [22, 32], strides = [1, 1]} : vector<22x128xf32> to vector<22x32xf32>
    %248 = vector.extract_strided_slice %245 {offsets = [0, 0], sizes = [22, 32], strides = [1, 1]} : vector<22x128xf32> to vector<22x32xf32>
    %249 = arith.truncf %246 : vector<22x32xf32> to vector<22x32xbf16>
    %250 = arith.truncf %247 : vector<22x32xf32> to vector<22x32xbf16>
    %cst_106 = arith.constant dense<0.000000e+00> : vector<22x22xf32>
    %251 = tpu.matmul %249, %250, %cst_106 {dimension_numbers = #tpu.dot_dimension_numbers<[1], [1], [0], [0], [0, 0, 1, 0], [], []>} : vector<22x32xbf16>, vector<22x32xbf16>, vector<22x22xf32> -> vector<22x22xf32>
    %cst_107 = arith.constant 0.176776692 : f32
    %252 = vector.broadcast %cst_107 : f32 to vector<22x22xf32>
    %253 = arith.mulf %251, %252 : vector<22x22xf32>
    %254 = arith.addf %253, %1 : vector<22x22xf32>
    %cst_108 = arith.constant dense<0xFF800000> : vector<22xf32>
    %255 = vector.multi_reduction <maximumf>, %254, %cst_108 [1] : vector<22x22xf32> to vector<22xf32>
    %256 = vector.shape_cast %255 : vector<22xf32> to vector<22x1xf32>
    %257 = vector.broadcast %256 : vector<22x1xf32> to vector<22x22xf32>
    %258 = arith.subf %254, %257 : vector<22x22xf32>
    %259 = math.exp %258 : vector<22x22xf32>
    %cst_109 = arith.constant dense<0.000000e+00> : vector<22xf32>
    %260 = vector.multi_reduction <add>, %259, %cst_109 [1] : vector<22x22xf32> to vector<22xf32>
    %261 = vector.shape_cast %260 : vector<22xf32> to vector<22x1xf32>
    %262 = vector.broadcast %261 : vector<22x1xf32> to vector<22x22xf32>
    %263 = arith.divf %259, %262 : vector<22x22xf32>
    %264 = arith.truncf %263 : vector<22x22xf32> to vector<22x22xbf16>
    %265 = arith.truncf %248 : vector<22x32xf32> to vector<22x32xbf16>
    %cst_110 = arith.constant dense<0.000000e+00> : vector<22x32xf32>
    %266 = tpu.matmul %264, %265, %cst_110 {dimension_numbers = #tpu.dot_dimension_numbers<[1], [0], [0], [1], [0, 0, 1, 1], [], []>} : vector<22x22xbf16>, vector<22x32xbf16>, vector<22x32xf32> -> vector<22x32xf32>
    %267 = vector.extract_strided_slice %243 {offsets = [0, 32], sizes = [22, 32], strides = [1, 1]} : vector<22x128xf32> to vector<22x32xf32>
    %268 = vector.extract_strided_slice %244 {offsets = [0, 32], sizes = [22, 32], strides = [1, 1]} : vector<22x128xf32> to vector<22x32xf32>
    %269 = vector.extract_strided_slice %245 {offsets = [0, 32], sizes = [22, 32], strides = [1, 1]} : vector<22x128xf32> to vector<22x32xf32>
    %270 = arith.truncf %267 : vector<22x32xf32> to vector<22x32xbf16>
    %271 = arith.truncf %268 : vector<22x32xf32> to vector<22x32xbf16>
    %cst_111 = arith.constant dense<0.000000e+00> : vector<22x22xf32>
    %272 = tpu.matmul %270, %271, %cst_111 {dimension_numbers = #tpu.dot_dimension_numbers<[1], [1], [0], [0], [0, 0, 1, 0], [], []>} : vector<22x32xbf16>, vector<22x32xbf16>, vector<22x22xf32> -> vector<22x22xf32>
    %cst_112 = arith.constant 0.176776692 : f32
    %273 = vector.broadcast %cst_112 : f32 to vector<22x22xf32>
    %274 = arith.mulf %272, %273 : vector<22x22xf32>
    %275 = arith.addf %274, %1 : vector<22x22xf32>
    %cst_113 = arith.constant dense<0xFF800000> : vector<22xf32>
    %276 = vector.multi_reduction <maximumf>, %275, %cst_113 [1] : vector<22x22xf32> to vector<22xf32>
    %277 = vector.shape_cast %276 : vector<22xf32> to vector<22x1xf32>
    %278 = vector.broadcast %277 : vector<22x1xf32> to vector<22x22xf32>
    %279 = arith.subf %275, %278 : vector<22x22xf32>
    %280 = math.exp %279 : vector<22x22xf32>
    %cst_114 = arith.constant dense<0.000000e+00> : vector<22xf32>
    %281 = vector.multi_reduction <add>, %280, %cst_114 [1] : vector<22x22xf32> to vector<22xf32>
    %282 = vector.shape_cast %281 : vector<22xf32> to vector<22x1xf32>
    %283 = vector.broadcast %282 : vector<22x1xf32> to vector<22x22xf32>
    %284 = arith.divf %280, %283 : vector<22x22xf32>
    %285 = arith.truncf %284 : vector<22x22xf32> to vector<22x22xbf16>
    %286 = arith.truncf %269 : vector<22x32xf32> to vector<22x32xbf16>
    %cst_115 = arith.constant dense<0.000000e+00> : vector<22x32xf32>
    %287 = tpu.matmul %285, %286, %cst_115 {dimension_numbers = #tpu.dot_dimension_numbers<[1], [0], [0], [1], [0, 0, 1, 1], [], []>} : vector<22x22xbf16>, vector<22x32xbf16>, vector<22x32xf32> -> vector<22x32xf32>
    %288 = vector.extract_strided_slice %243 {offsets = [0, 64], sizes = [22, 32], strides = [1, 1]} : vector<22x128xf32> to vector<22x32xf32>
    %289 = vector.extract_strided_slice %244 {offsets = [0, 64], sizes = [22, 32], strides = [1, 1]} : vector<22x128xf32> to vector<22x32xf32>
    %290 = vector.extract_strided_slice %245 {offsets = [0, 64], sizes = [22, 32], strides = [1, 1]} : vector<22x128xf32> to vector<22x32xf32>
    %291 = arith.truncf %288 : vector<22x32xf32> to vector<22x32xbf16>
    %292 = arith.truncf %289 : vector<22x32xf32> to vector<22x32xbf16>
    %cst_116 = arith.constant dense<0.000000e+00> : vector<22x22xf32>
    %293 = tpu.matmul %291, %292, %cst_116 {dimension_numbers = #tpu.dot_dimension_numbers<[1], [1], [0], [0], [0, 0, 1, 0], [], []>} : vector<22x32xbf16>, vector<22x32xbf16>, vector<22x22xf32> -> vector<22x22xf32>
    %cst_117 = arith.constant 0.176776692 : f32
    %294 = vector.broadcast %cst_117 : f32 to vector<22x22xf32>
    %295 = arith.mulf %293, %294 : vector<22x22xf32>
    %296 = arith.addf %295, %1 : vector<22x22xf32>
    %cst_118 = arith.constant dense<0xFF800000> : vector<22xf32>
    %297 = vector.multi_reduction <maximumf>, %296, %cst_118 [1] : vector<22x22xf32> to vector<22xf32>
    %298 = vector.shape_cast %297 : vector<22xf32> to vector<22x1xf32>
    %299 = vector.broadcast %298 : vector<22x1xf32> to vector<22x22xf32>
    %300 = arith.subf %296, %299 : vector<22x22xf32>
    %301 = math.exp %300 : vector<22x22xf32>
    %cst_119 = arith.constant dense<0.000000e+00> : vector<22xf32>
    %302 = vector.multi_reduction <add>, %301, %cst_119 [1] : vector<22x22xf32> to vector<22xf32>
    %303 = vector.shape_cast %302 : vector<22xf32> to vector<22x1xf32>
    %304 = vector.broadcast %303 : vector<22x1xf32> to vector<22x22xf32>
    %305 = arith.divf %301, %304 : vector<22x22xf32>
    %306 = arith.truncf %305 : vector<22x22xf32> to vector<22x22xbf16>
    %307 = arith.truncf %290 : vector<22x32xf32> to vector<22x32xbf16>
    %cst_120 = arith.constant dense<0.000000e+00> : vector<22x32xf32>
    %308 = tpu.matmul %306, %307, %cst_120 {dimension_numbers = #tpu.dot_dimension_numbers<[1], [0], [0], [1], [0, 0, 1, 1], [], []>} : vector<22x22xbf16>, vector<22x32xbf16>, vector<22x32xf32> -> vector<22x32xf32>
    %309 = vector.extract_strided_slice %243 {offsets = [0, 96], sizes = [22, 32], strides = [1, 1]} : vector<22x128xf32> to vector<22x32xf32>
    %310 = vector.extract_strided_slice %244 {offsets = [0, 96], sizes = [22, 32], strides = [1, 1]} : vector<22x128xf32> to vector<22x32xf32>
    %311 = vector.extract_strided_slice %245 {offsets = [0, 96], sizes = [22, 32], strides = [1, 1]} : vector<22x128xf32> to vector<22x32xf32>
    %312 = arith.truncf %309 : vector<22x32xf32> to vector<22x32xbf16>
    %313 = arith.truncf %310 : vector<22x32xf32> to vector<22x32xbf16>
    %cst_121 = arith.constant dense<0.000000e+00> : vector<22x22xf32>
    %314 = tpu.matmul %312, %313, %cst_121 {dimension_numbers = #tpu.dot_dimension_numbers<[1], [1], [0], [0], [0, 0, 1, 0], [], []>} : vector<22x32xbf16>, vector<22x32xbf16>, vector<22x22xf32> -> vector<22x22xf32>
    %cst_122 = arith.constant 0.176776692 : f32
    %315 = vector.broadcast %cst_122 : f32 to vector<22x22xf32>
    %316 = arith.mulf %314, %315 : vector<22x22xf32>
    %317 = arith.addf %316, %1 : vector<22x22xf32>
    %cst_123 = arith.constant dense<0xFF800000> : vector<22xf32>
    %318 = vector.multi_reduction <maximumf>, %317, %cst_123 [1] : vector<22x22xf32> to vector<22xf32>
    %319 = vector.shape_cast %318 : vector<22xf32> to vector<22x1xf32>
    %320 = vector.broadcast %319 : vector<22x1xf32> to vector<22x22xf32>
    %321 = arith.subf %317, %320 : vector<22x22xf32>
    %322 = math.exp %321 : vector<22x22xf32>
    %cst_124 = arith.constant dense<0.000000e+00> : vector<22xf32>
    %323 = vector.multi_reduction <add>, %322, %cst_124 [1] : vector<22x22xf32> to vector<22xf32>
    %324 = vector.shape_cast %323 : vector<22xf32> to vector<22x1xf32>
    %325 = vector.broadcast %324 : vector<22x1xf32> to vector<22x22xf32>
    %326 = arith.divf %322, %325 : vector<22x22xf32>
    %327 = arith.truncf %326 : vector<22x22xf32> to vector<22x22xbf16>
    %328 = arith.truncf %311 : vector<22x32xf32> to vector<22x32xbf16>
    %cst_125 = arith.constant dense<0.000000e+00> : vector<22x32xf32>
    %329 = tpu.matmul %327, %328, %cst_125 {dimension_numbers = #tpu.dot_dimension_numbers<[1], [0], [0], [1], [0, 0, 1, 1], [], []>} : vector<22x22xbf16>, vector<22x32xbf16>, vector<22x32xf32> -> vector<22x32xf32>
    %330 = tpu.concatenate %266, %287, %308, %329 in 1 : vector<22x32xf32>, vector<22x32xf32>, vector<22x32xf32>, vector<22x32xf32> -> vector<22x128xf32>
    %331 = arith.truncf %330 : vector<22x128xf32> to vector<22x128xbf16>
    %c1_126 = arith.constant 1 : index
    %c0_127 = arith.constant 0 : index
    %c0_128 = arith.constant 0 : index
    %332 = vector.load %arg10[%c1_126, %c0_127, %c0_128] : memref<2x128x128xbf16, #tpu.memory_space<vmem>>, vector<1x128x128xbf16>
    %333 = vector.shape_cast %332 : vector<1x128x128xbf16> to vector<128x128xbf16>
    %cst_129 = arith.constant dense<0.000000e+00> : vector<22x128xf32>
    %334 = tpu.matmul %331, %333, %cst_129 {dimension_numbers = #tpu.dot_dimension_numbers<[1], [0], [0], [1], [0, 0, 1, 1], [], []>} : vector<22x128xbf16>, vector<128x128xbf16>, vector<22x128xf32> -> vector<22x128xf32>
    %335 = arith.addf %210, %334 : vector<22x128xf32>
    %c1_130 = arith.constant 1 : index
    %c0_131 = arith.constant 0 : index
    %c0_132 = arith.constant 0 : index
    %336 = vector.load %arg11[%c1_130, %c0_131, %c0_132] : memref<2x1x128xf32, #tpu.memory_space<vmem>>, vector<1x1x128xf32>
    %337 = vector.shape_cast %336 : vector<1x1x128xf32> to vector<1x128xf32>
    %338 = vector.broadcast %337 : vector<1x128xf32> to vector<22x128xf32>
    %339 = arith.addf %335, %338 : vector<22x128xf32>
    %c1_133 = arith.constant 1 : index
    %c0_134 = arith.constant 0 : index
    %c0_135 = arith.constant 0 : index
    %340 = vector.load %arg12[%c1_133, %c0_134, %c0_135] : memref<2x1x128xf32, #tpu.memory_space<vmem>>, vector<1x1x128xf32>
    %341 = vector.shape_cast %340 : vector<1x1x128xf32> to vector<1x128xf32>
    %c1_136 = arith.constant 1 : index
    %c0_137 = arith.constant 0 : index
    %c0_138 = arith.constant 0 : index
    %342 = vector.load %arg13[%c1_136, %c0_137, %c0_138] : memref<2x1x128xf32, #tpu.memory_space<vmem>>, vector<1x1x128xf32>
    %343 = vector.shape_cast %342 : vector<1x1x128xf32> to vector<1x128xf32>
    %cst_139 = arith.constant dense<0.000000e+00> : vector<22xf32>
    %344 = vector.multi_reduction <add>, %339, %cst_139 [1] : vector<22x128xf32> to vector<22xf32>
    %345 = vector.shape_cast %344 : vector<22xf32> to vector<22x1xf32>
    %cst_140 = arith.constant 1.280000e+02 : f32
    %346 = vector.broadcast %cst_140 : f32 to vector<22x1xf32>
    %347 = arith.divf %345, %346 : vector<22x1xf32>
    %348 = vector.broadcast %347 : vector<22x1xf32> to vector<22x128xf32>
    %349 = arith.subf %339, %348 : vector<22x128xf32>
    %350 = arith.mulf %349, %349 : vector<22x128xf32>
    %cst_141 = arith.constant dense<0.000000e+00> : vector<22xf32>
    %351 = vector.multi_reduction <add>, %350, %cst_141 [1] : vector<22x128xf32> to vector<22xf32>
    %352 = vector.shape_cast %351 : vector<22xf32> to vector<22x1xf32>
    %cst_142 = arith.constant 1.280000e+02 : f32
    %353 = vector.broadcast %cst_142 : f32 to vector<22x1xf32>
    %354 = arith.divf %352, %353 : vector<22x1xf32>
    %cst_143 = arith.constant 9.99999974E-6 : f32
    %355 = vector.broadcast %cst_143 : f32 to vector<22x1xf32>
    %356 = arith.addf %354, %355 : vector<22x1xf32>
    %357 = math.rsqrt %356 : vector<22x1xf32>
    %358 = vector.broadcast %357 : vector<22x1xf32> to vector<22x128xf32>
    %359 = arith.mulf %349, %358 : vector<22x128xf32>
    %360 = vector.broadcast %341 : vector<1x128xf32> to vector<22x128xf32>
    %361 = arith.mulf %359, %360 : vector<22x128xf32>
    %362 = vector.broadcast %343 : vector<1x128xf32> to vector<22x128xf32>
    %363 = arith.addf %361, %362 : vector<22x128xf32>
    %364 = arith.truncf %363 : vector<22x128xf32> to vector<22x128xbf16>
    %c1_144 = arith.constant 1 : index
    %c0_145 = arith.constant 0 : index
    %c0_146 = arith.constant 0 : index
    %365 = vector.load %arg14[%c1_144, %c0_145, %c0_146] : memref<2x128x512xbf16, #tpu.memory_space<vmem>>, vector<1x128x512xbf16>
    %366 = vector.shape_cast %365 : vector<1x128x512xbf16> to vector<128x512xbf16>
    %cst_147 = arith.constant dense<0.000000e+00> : vector<22x512xf32>
    %367 = tpu.matmul %364, %366, %cst_147 {dimension_numbers = #tpu.dot_dimension_numbers<[1], [0], [0], [1], [0, 0, 1, 1], [], []>} : vector<22x128xbf16>, vector<128x512xbf16>, vector<22x512xf32> -> vector<22x512xf32>
    %c1_148 = arith.constant 1 : index
    %c0_149 = arith.constant 0 : index
    %c0_150 = arith.constant 0 : index
    %368 = vector.load %arg15[%c1_148, %c0_149, %c0_150] : memref<2x1x512xf32, #tpu.memory_space<vmem>>, vector<1x1x512xf32>
    %369 = vector.shape_cast %368 : vector<1x1x512xf32> to vector<1x512xf32>
    %370 = vector.broadcast %369 : vector<1x512xf32> to vector<22x512xf32>
    %371 = arith.addf %367, %370 : vector<22x512xf32>
    %372 = arith.mulf %371, %371 : vector<22x512xf32>
    %373 = arith.mulf %371, %372 : vector<22x512xf32>
    %cst_151 = arith.constant 4.471500e-02 : f32
    %374 = vector.broadcast %cst_151 : f32 to vector<22x512xf32>
    %375 = arith.mulf %374, %373 : vector<22x512xf32>
    %376 = arith.addf %371, %375 : vector<22x512xf32>
    %cst_152 = arith.constant 0.797884583 : f32
    %377 = vector.broadcast %cst_152 : f32 to vector<22x512xf32>
    %378 = arith.mulf %377, %376 : vector<22x512xf32>
    %379 = math.tanh %378 : vector<22x512xf32>
    %cst_153 = arith.constant 1.000000e+00 : f32
    %380 = vector.broadcast %cst_153 : f32 to vector<22x512xf32>
    %381 = arith.addf %380, %379 : vector<22x512xf32>
    %cst_154 = arith.constant 5.000000e-01 : f32
    %382 = vector.broadcast %cst_154 : f32 to vector<22x512xf32>
    %383 = arith.mulf %382, %381 : vector<22x512xf32>
    %384 = arith.mulf %371, %383 : vector<22x512xf32>
    %385 = arith.truncf %384 : vector<22x512xf32> to vector<22x512xbf16>
    %c1_155 = arith.constant 1 : index
    %c0_156 = arith.constant 0 : index
    %c0_157 = arith.constant 0 : index
    %386 = vector.load %arg16[%c1_155, %c0_156, %c0_157] : memref<2x512x128xbf16, #tpu.memory_space<vmem>>, vector<1x512x128xbf16>
    %387 = vector.shape_cast %386 : vector<1x512x128xbf16> to vector<512x128xbf16>
    %cst_158 = arith.constant dense<0.000000e+00> : vector<22x128xf32>
    %388 = tpu.matmul %385, %387, %cst_158 {dimension_numbers = #tpu.dot_dimension_numbers<[1], [0], [0], [1], [0, 0, 1, 1], [], []>} : vector<22x512xbf16>, vector<512x128xbf16>, vector<22x128xf32> -> vector<22x128xf32>
    %389 = arith.addf %339, %388 : vector<22x128xf32>
    %c1_159 = arith.constant 1 : index
    %c0_160 = arith.constant 0 : index
    %c0_161 = arith.constant 0 : index
    %390 = vector.load %arg17[%c1_159, %c0_160, %c0_161] : memref<2x1x128xf32, #tpu.memory_space<vmem>>, vector<1x1x128xf32>
    %391 = vector.shape_cast %390 : vector<1x1x128xf32> to vector<1x128xf32>
    %392 = vector.broadcast %391 : vector<1x128xf32> to vector<22x128xf32>
    %393 = arith.addf %389, %392 : vector<22x128xf32>
    %c0_162 = arith.constant 0 : index
    %c0_163 = arith.constant 0 : index
    %394 = vector.load %arg18[%c0_162, %c0_163] : memref<1x128xf32, #tpu.memory_space<vmem>>, vector<1x128xf32>
    %c0_164 = arith.constant 0 : index
    %c0_165 = arith.constant 0 : index
    %395 = vector.load %arg19[%c0_164, %c0_165] : memref<1x128xf32, #tpu.memory_space<vmem>>, vector<1x128xf32>
    %cst_166 = arith.constant dense<0.000000e+00> : vector<22xf32>
    %396 = vector.multi_reduction <add>, %393, %cst_166 [1] : vector<22x128xf32> to vector<22xf32>
    %397 = vector.shape_cast %396 : vector<22xf32> to vector<22x1xf32>
    %cst_167 = arith.constant 1.280000e+02 : f32
    %398 = vector.broadcast %cst_167 : f32 to vector<22x1xf32>
    %399 = arith.divf %397, %398 : vector<22x1xf32>
    %400 = vector.broadcast %399 : vector<22x1xf32> to vector<22x128xf32>
    %401 = arith.subf %393, %400 : vector<22x128xf32>
    %402 = arith.mulf %401, %401 : vector<22x128xf32>
    %cst_168 = arith.constant dense<0.000000e+00> : vector<22xf32>
    %403 = vector.multi_reduction <add>, %402, %cst_168 [1] : vector<22x128xf32> to vector<22xf32>
    %404 = vector.shape_cast %403 : vector<22xf32> to vector<22x1xf32>
    %cst_169 = arith.constant 1.280000e+02 : f32
    %405 = vector.broadcast %cst_169 : f32 to vector<22x1xf32>
    %406 = arith.divf %404, %405 : vector<22x1xf32>
    %cst_170 = arith.constant 9.99999974E-6 : f32
    %407 = vector.broadcast %cst_170 : f32 to vector<22x1xf32>
    %408 = arith.addf %406, %407 : vector<22x1xf32>
    %409 = math.rsqrt %408 : vector<22x1xf32>
    %410 = vector.broadcast %409 : vector<22x1xf32> to vector<22x128xf32>
    %411 = arith.mulf %401, %410 : vector<22x128xf32>
    %412 = vector.broadcast %394 : vector<1x128xf32> to vector<22x128xf32>
    %413 = arith.mulf %411, %412 : vector<22x128xf32>
    %414 = vector.broadcast %395 : vector<1x128xf32> to vector<22x128xf32>
    %415 = arith.addf %413, %414 : vector<22x128xf32>
    %416 = arith.truncf %415 : vector<22x128xf32> to vector<22x128xbf16>
    %c0_171 = arith.constant 0 : index
    %c0_172 = arith.constant 0 : index
    %417 = vector.load %arg20[%c0_171, %c0_172] : memref<128x128xbf16, #tpu.memory_space<vmem>>, vector<128x128xbf16>
    %cst_173 = arith.constant dense<0.000000e+00> : vector<22x128xf32>
    %418 = tpu.matmul %416, %417, %cst_173 {dimension_numbers = #tpu.dot_dimension_numbers<[1], [0], [0], [1], [0, 0, 1, 1], [], []>} : vector<22x128xbf16>, vector<128x128xbf16>, vector<22x128xf32> -> vector<22x128xf32>
    %c0_174 = arith.constant 0 : index
    %c0_175 = arith.constant 0 : index
    %419 = vector.load %arg21[%c0_174, %c0_175] : memref<1x128xf32, #tpu.memory_space<vmem>>, vector<1x128xf32>
    %420 = vector.broadcast %419 : vector<1x128xf32> to vector<22x128xf32>
    %421 = arith.addf %418, %420 : vector<22x128xf32>
    %422 = arith.truncf %421 : vector<22x128xf32> to vector<22x128xbf16>
    %c0_176 = arith.constant 0 : index
    %c0_177 = arith.constant 0 : index
    %423 = vector.load %arg22[%c0_176, %c0_177] : memref<128x256xbf16, #tpu.memory_space<vmem>>, vector<128x256xbf16>
    %cst_178 = arith.constant dense<0.000000e+00> : vector<22x256xf32>
    %424 = tpu.matmul %422, %423, %cst_178 {dimension_numbers = #tpu.dot_dimension_numbers<[1], [0], [0], [1], [0, 0, 1, 1], [], []>} : vector<22x128xbf16>, vector<128x256xbf16>, vector<22x256xf32> -> vector<22x256xf32>
    %c0_179 = arith.constant 0 : index
    %c0_180 = arith.constant 0 : index
    %425 = vector.load %arg23[%c0_179, %c0_180] : memref<1x256xf32, #tpu.memory_space<vmem>>, vector<1x256xf32>
    %426 = vector.broadcast %425 : vector<1x256xf32> to vector<22x256xf32>
    %427 = arith.addf %424, %426 : vector<22x256xf32>
    %428 = vector.extract_strided_slice %427 {offsets = [0, 0], sizes = [22, 128], strides = [1, 1]} : vector<22x256xf32> to vector<22x128xf32>
    %c0_181 = arith.constant 0 : index
    %c0_182 = arith.constant 0 : index
    %c0_183 = arith.constant 0 : index
    %429 = vector.load %arg24[%c0_181, %c0_182, %c0_183] : memref<1x22x128xf32, #tpu.memory_space<vmem>>, vector<1x22x128xf32>
    %430 = vector.shape_cast %429 : vector<1x22x128xf32> to vector<22x128xf32>
    %431 = vector.shape_cast %428 : vector<22x128xf32> to vector<1x22x128xf32>
    tpu.vector_store %arg24[%c0_181, %c0_182, %c0_183], %431 {strides = array<i32>} : memref<1x22x128xf32, #tpu.memory_space<vmem>>, vector<1x22x128xf32>,
    %432 = vector.extract_strided_slice %427 {offsets = [0, 128], sizes = [22, 128], strides = [1, 1]} : vector<22x256xf32> to vector<22x128xf32>
    %cst_184 = arith.constant 5.000000e-01 : f32
    %433 = vector.broadcast %cst_184 : f32 to vector<22x128xf32>
    %434 = arith.mulf %432, %433 : vector<22x128xf32>
    %435 = arith.negf %434 : vector<22x128xf32>
    %436 = math.exp %435 : vector<22x128xf32>
    %cst_185 = arith.constant 1.000000e+00 : f32
    %437 = vector.broadcast %cst_185 : f32 to vector<22x128xf32>
    %438 = arith.addf %437, %436 : vector<22x128xf32>
    %439 = arith.divf %437, %438 : vector<22x128xf32>
    %cst_186 = arith.constant 2.000000e+00 : f32
    %440 = vector.broadcast %cst_186 : f32 to vector<22x128xf32>
    %441 = arith.mulf %440, %439 : vector<22x128xf32>
    %cst_187 = arith.constant 1.000000e-01 : f32
    %442 = vector.broadcast %cst_187 : f32 to vector<22x128xf32>
    %443 = arith.addf %441, %442 : vector<22x128xf32>
    %c0_188 = arith.constant 0 : index
    %c0_189 = arith.constant 0 : index
    %c0_190 = arith.constant 0 : index
    %444 = vector.load %arg25[%c0_188, %c0_189, %c0_190] : memref<1x22x128xf32, #tpu.memory_space<vmem>>, vector<1x22x128xf32>
    %445 = vector.shape_cast %444 : vector<1x22x128xf32> to vector<22x128xf32>
    %446 = vector.shape_cast %443 : vector<22x128xf32> to vector<1x22x128xf32>
    tpu.vector_store %arg25[%c0_188, %c0_189, %c0_190], %446 {strides = array<i32>} : memref<1x22x128xf32, #tpu.memory_space<vmem>>, vector<1x22x128xf32>,
    return
  }
  func.func @transform_0(%arg0: i32) -> (i32, i32, i32) {
    %c0_i32 = arith.constant 0 : i32
    %c0_i32_0 = arith.constant 0 : i32
    %c0_i32_1 = arith.constant 0 : i32
    return %arg0, %c0_i32, %c0_i32_0 : i32, i32, i32
  }
  func.func @transform_1(%arg0: i32) -> (i32, i32, i32) {
    %c0_i32 = arith.constant 0 : i32
    %c0_i32_0 = arith.constant 0 : i32
    %c0_i32_1 = arith.constant 0 : i32
    return %arg0, %c0_i32, %c0_i32_0 : i32, i32, i32
  }
  func.func @transform_2(%arg0: i32) -> (i32, i32) {
    %c0_i32 = arith.constant 0 : i32
    %c0_i32_0 = arith.constant 0 : i32
    %c0_i32_1 = arith.constant 0 : i32
    return %c0_i32, %c0_i32_0 : i32, i32
  }
  func.func @transform_3(%arg0: i32) -> (i32, i32) {
    %c0_i32 = arith.constant 0 : i32
    %c0_i32_0 = arith.constant 0 : i32
    %c0_i32_1 = arith.constant 0 : i32
    return %c0_i32, %c0_i32_0 : i32, i32
  }
  func.func @transform_4(%arg0: i32) -> (i32, i32) {
    %c0_i32 = arith.constant 0 : i32
    %c0_i32_0 = arith.constant 0 : i32
    %c0_i32_1 = arith.constant 0 : i32
    return %c0_i32, %c0_i32_0 : i32, i32
  }
  func.func @transform_5(%arg0: i32) -> (i32, i32, i32) {
    %c0_i32 = arith.constant 0 : i32
    %c0_i32_0 = arith.constant 0 : i32
    %c0_i32_1 = arith.constant 0 : i32
    %c0_i32_2 = arith.constant 0 : i32
    return %c0_i32, %c0_i32_0, %c0_i32_1 : i32, i32, i32
  }
  func.func @transform_6(%arg0: i32) -> (i32, i32, i32) {
    %c0_i32 = arith.constant 0 : i32
    %c0_i32_0 = arith.constant 0 : i32
    %c0_i32_1 = arith.constant 0 : i32
    %c0_i32_2 = arith.constant 0 : i32
    return %c0_i32, %c0_i32_0, %c0_i32_1 : i32, i32, i32
  }
  func.func @transform_7(%arg0: i32) -> (i32, i32, i32) {
    %c0_i32 = arith.constant 0 : i32
    %c0_i32_0 = arith.constant 0 : i32
    %c0_i32_1 = arith.constant 0 : i32
    %c0_i32_2 = arith.constant 0 : i32
    return %c0_i32, %c0_i32_0, %c0_i32_1 : i32, i32, i32
  }
  func.func @transform_8(%arg0: i32) -> (i32, i32, i32) {
    %c0_i32 = arith.constant 0 : i32
    %c0_i32_0 = arith.constant 0 : i32
    %c0_i32_1 = arith.constant 0 : i32
    %c0_i32_2 = arith.constant 0 : i32
    return %c0_i32, %c0_i32_0, %c0_i32_1 : i32, i32, i32
  }
  func.func @transform_9(%arg0: i32) -> (i32, i32, i32) {
    %c0_i32 = arith.constant 0 : i32
    %c0_i32_0 = arith.constant 0 : i32
    %c0_i32_1 = arith.constant 0 : i32
    %c0_i32_2 = arith.constant 0 : i32
    return %c0_i32, %c0_i32_0, %c0_i32_1 : i32, i32, i32
  }
  func.func @transform_10(%arg0: i32) -> (i32, i32, i32) {
    %c0_i32 = arith.constant 0 : i32
    %c0_i32_0 = arith.constant 0 : i32
    %c0_i32_1 = arith.constant 0 : i32
    %c0_i32_2 = arith.constant 0 : i32
    return %c0_i32, %c0_i32_0, %c0_i32_1 : i32, i32, i32
  }
  func.func @transform_11(%arg0: i32) -> (i32, i32, i32) {
    %c0_i32 = arith.constant 0 : i32
    %c0_i32_0 = arith.constant 0 : i32
    %c0_i32_1 = arith.constant 0 : i32
    %c0_i32_2 = arith.constant 0 : i32
    return %c0_i32, %c0_i32_0, %c0_i32_1 : i32, i32, i32
  }
  func.func @transform_12(%arg0: i32) -> (i32, i32, i32) {
    %c0_i32 = arith.constant 0 : i32
    %c0_i32_0 = arith.constant 0 : i32
    %c0_i32_1 = arith.constant 0 : i32
    %c0_i32_2 = arith.constant 0 : i32
    return %c0_i32, %c0_i32_0, %c0_i32_1 : i32, i32, i32
  }
  func.func @transform_13(%arg0: i32) -> (i32, i32, i32) {
    %c0_i32 = arith.constant 0 : i32
    %c0_i32_0 = arith.constant 0 : i32
    %c0_i32_1 = arith.constant 0 : i32
    %c0_i32_2 = arith.constant 0 : i32
    return %c0_i32, %c0_i32_0, %c0_i32_1 : i32, i32, i32
  }
  func.func @transform_14(%arg0: i32) -> (i32, i32, i32) {
    %c0_i32 = arith.constant 0 : i32
    %c0_i32_0 = arith.constant 0 : i32
    %c0_i32_1 = arith.constant 0 : i32
    %c0_i32_2 = arith.constant 0 : i32
    return %c0_i32, %c0_i32_0, %c0_i32_1 : i32, i32, i32
  }
  func.func @transform_15(%arg0: i32) -> (i32, i32, i32) {
    %c0_i32 = arith.constant 0 : i32
    %c0_i32_0 = arith.constant 0 : i32
    %c0_i32_1 = arith.constant 0 : i32
    %c0_i32_2 = arith.constant 0 : i32
    return %c0_i32, %c0_i32_0, %c0_i32_1 : i32, i32, i32
  }
  func.func @transform_16(%arg0: i32) -> (i32, i32, i32) {
    %c0_i32 = arith.constant 0 : i32
    %c0_i32_0 = arith.constant 0 : i32
    %c0_i32_1 = arith.constant 0 : i32
    %c0_i32_2 = arith.constant 0 : i32
    return %c0_i32, %c0_i32_0, %c0_i32_1 : i32, i32, i32
  }
  func.func @transform_17(%arg0: i32) -> (i32, i32) {
    %c0_i32 = arith.constant 0 : i32
    %c0_i32_0 = arith.constant 0 : i32
    %c0_i32_1 = arith.constant 0 : i32
    return %c0_i32, %c0_i32_0 : i32, i32
  }
  func.func @transform_18(%arg0: i32) -> (i32, i32) {
    %c0_i32 = arith.constant 0 : i32
    %c0_i32_0 = arith.constant 0 : i32
    %c0_i32_1 = arith.constant 0 : i32
    return %c0_i32, %c0_i32_0 : i32, i32
  }
  func.func @transform_19(%arg0: i32) -> (i32, i32) {
    %c0_i32 = arith.constant 0 : i32
    %c0_i32_0 = arith.constant 0 : i32
    %c0_i32_1 = arith.constant 0 : i32
    return %c0_i32, %c0_i32_0 : i32, i32
  }
  func.func @transform_20(%arg0: i32) -> (i32, i32) {
    %c0_i32 = arith.constant 0 : i32
    %c0_i32_0 = arith.constant 0 : i32
    %c0_i32_1 = arith.constant 0 : i32
    return %c0_i32, %c0_i32_0 : i32, i32
  }
  func.func @transform_21(%arg0: i32) -> (i32, i32) {
    %c0_i32 = arith.constant 0 : i32
    %c0_i32_0 = arith.constant 0 : i32
    %c0_i32_1 = arith.constant 0 : i32
    return %c0_i32, %c0_i32_0 : i32, i32
  }
  func.func @transform_22(%arg0: i32) -> (i32, i32) {
    %c0_i32 = arith.constant 0 : i32
    %c0_i32_0 = arith.constant 0 : i32
    %c0_i32_1 = arith.constant 0 : i32
    return %c0_i32, %c0_i32_0 : i32, i32
  }
  func.func @transform_23(%arg0: i32) -> (i32, i32, i32) {
    %c0_i32 = arith.constant 0 : i32
    %c0_i32_0 = arith.constant 0 : i32
    %c0_i32_1 = arith.constant 0 : i32
    return %arg0, %c0_i32, %c0_i32_0 : i32, i32, i32
  }
  func.func @transform_24(%arg0: i32) -> (i32, i32, i32) {
    %c0_i32 = arith.constant 0 : i32
    %c0_i32_0 = arith.constant 0 : i32
    %c0_i32_1 = arith.constant 0 : i32
    return %arg0, %c0_i32, %c0_i32_0 : i32, i32, i32
  }
}

module attributes {stable_mosaic.version = 11 : i64} {
  func.func @_perceiver_rep_kernel(%arg0: i32, %arg1: memref<2x16x128xf32, #tpu.memory_space<vmem>>, %arg2: memref<8x128xf32, #tpu.memory_space<vmem>>, %arg3: memref<2x1x128xf32, #tpu.memory_space<vmem>>, %arg4: memref<2x1x128xf32, #tpu.memory_space<vmem>>, %arg5: memref<2x1x128xf32, #tpu.memory_space<vmem>>, %arg6: memref<2x1x128xf32, #tpu.memory_space<vmem>>, %arg7: memref<2x128x128xbf16, #tpu.memory_space<vmem>>, %arg8: memref<2x1x128xf32, #tpu.memory_space<vmem>>, %arg9: memref<2x128x256xbf16, #tpu.memory_space<vmem>>, %arg10: memref<2x1x256xf32, #tpu.memory_space<vmem>>, %arg11: memref<2x128x128xbf16, #tpu.memory_space<vmem>>, %arg12: memref<2x1x128xf32, #tpu.memory_space<vmem>>, %arg13: memref<2x1x128xf32, #tpu.memory_space<vmem>>, %arg14: memref<2x1x128xf32, #tpu.memory_space<vmem>>, %arg15: memref<2x128x512xbf16, #tpu.memory_space<vmem>>, %arg16: memref<2x1x512xf32, #tpu.memory_space<vmem>>, %arg17: memref<2x512x128xbf16, #tpu.memory_space<vmem>>, %arg18: memref<2x1x128xf32, #tpu.memory_space<vmem>>, %arg19: memref<128x128xbf16, #tpu.memory_space<vmem>>, %arg20: memref<1x128xf32, #tpu.memory_space<vmem>>, %arg21: memref<128x256xbf16, #tpu.memory_space<vmem>>, %arg22: memref<1x256xf32, #tpu.memory_space<vmem>>, %arg23: memref<2x8x128xf32, #tpu.memory_space<vmem>>, %arg24: memref<2x8x128xf32, #tpu.memory_space<vmem>>) attributes {dimension_semantics = [#tpu.dimension_semantics<parallel>], iteration_bounds = array<i64: 2>, scalar_prefetch = 0 : i64, scratch_operands = 0 : i64, tpu.core_type = #tpu.core_type<tc>, window_params = [{transform_indices = @transform_0, window_bounds = array<i64: 2, 16, 128>}, {pipeline_mode = #tpu.pipeline_mode<synchronous>, transform_indices = @transform_1, window_bounds = array<i64: 8, 128>}, {pipeline_mode = #tpu.pipeline_mode<synchronous>, transform_indices = @transform_2, window_bounds = array<i64: 2, 1, 128>}, {pipeline_mode = #tpu.pipeline_mode<synchronous>, transform_indices = @transform_3, window_bounds = array<i64: 2, 1, 128>}, {pipeline_mode = #tpu.pipeline_mode<synchronous>, transform_indices = @transform_4, window_bounds = array<i64: 2, 1, 128>}, {pipeline_mode = #tpu.pipeline_mode<synchronous>, transform_indices = @transform_5, window_bounds = array<i64: 2, 1, 128>}, {pipeline_mode = #tpu.pipeline_mode<synchronous>, transform_indices = @transform_6, window_bounds = array<i64: 2, 128, 128>}, {pipeline_mode = #tpu.pipeline_mode<synchronous>, transform_indices = @transform_7, window_bounds = array<i64: 2, 1, 128>}, {pipeline_mode = #tpu.pipeline_mode<synchronous>, transform_indices = @transform_8, window_bounds = array<i64: 2, 128, 256>}, {pipeline_mode = #tpu.pipeline_mode<synchronous>, transform_indices = @transform_9, window_bounds = array<i64: 2, 1, 256>}, {pipeline_mode = #tpu.pipeline_mode<synchronous>, transform_indices = @transform_10, window_bounds = array<i64: 2, 128, 128>}, {pipeline_mode = #tpu.pipeline_mode<synchronous>, transform_indices = @transform_11, window_bounds = array<i64: 2, 1, 128>}, {pipeline_mode = #tpu.pipeline_mode<synchronous>, transform_indices = @transform_12, window_bounds = array<i64: 2, 1, 128>}, {pipeline_mode = #tpu.pipeline_mode<synchronous>, transform_indices = @transform_13, window_bounds = array<i64: 2, 1, 128>}, {pipeline_mode = #tpu.pipeline_mode<synchronous>, transform_indices = @transform_14, window_bounds = array<i64: 2, 128, 512>}, {pipeline_mode = #tpu.pipeline_mode<synchronous>, transform_indices = @transform_15, window_bounds = array<i64: 2, 1, 512>}, {pipeline_mode = #tpu.pipeline_mode<synchronous>, transform_indices = @transform_16, window_bounds = array<i64: 2, 512, 128>}, {pipeline_mode = #tpu.pipeline_mode<synchronous>, transform_indices = @transform_17, window_bounds = array<i64: 2, 1, 128>}, {pipeline_mode = #tpu.pipeline_mode<synchronous>, transform_indices = @transform_18, window_bounds = array<i64: 128, 128>}, {pipeline_mode = #tpu.pipeline_mode<synchronous>, transform_indices = @transform_19, window_bounds = array<i64: 1, 128>}, {pipeline_mode = #tpu.pipeline_mode<synchronous>, transform_indices = @transform_20, window_bounds = array<i64: 128, 256>}, {pipeline_mode = #tpu.pipeline_mode<synchronous>, transform_indices = @transform_21, window_bounds = array<i64: 1, 256>}, {transform_indices = @transform_22, window_bounds = array<i64: 2, 8, 128>}, {transform_indices = @transform_23, window_bounds = array<i64: 2, 8, 128>}]} {
    %c0 = arith.constant 0 : index
    %c0_0 = arith.constant 0 : index
    %c0_1 = arith.constant 0 : index
    %0 = vector.load %arg1[%c0, %c0_0, %c0_1] : memref<2x16x128xf32, #tpu.memory_space<vmem>>, vector<2x16x128xf32>
    %1 = vector.shape_cast %0 : vector<2x16x128xf32> to vector<32x128xf32>
    %c0_2 = arith.constant 0 : index
    %c0_3 = arith.constant 0 : index
    %2 = vector.load %arg2[%c0_2, %c0_3] : memref<8x128xf32, #tpu.memory_space<vmem>>, vector<8x128xf32>
    %3 = tpu.concatenate %2, %2 in 0 : vector<8x128xf32>, vector<8x128xf32> -> vector<16x128xf32>
    %c0_4 = arith.constant 0 : index
    %c0_5 = arith.constant 0 : index
    %c0_6 = arith.constant 0 : index
    %4 = vector.load %arg3[%c0_4, %c0_5, %c0_6] : memref<2x1x128xf32, #tpu.memory_space<vmem>>, vector<1x1x128xf32>
    %5 = vector.shape_cast %4 : vector<1x1x128xf32> to vector<1x128xf32>
    %c0_7 = arith.constant 0 : index
    %c0_8 = arith.constant 0 : index
    %c0_9 = arith.constant 0 : index
    %6 = vector.load %arg4[%c0_7, %c0_8, %c0_9] : memref<2x1x128xf32, #tpu.memory_space<vmem>>, vector<1x1x128xf32>
    %7 = vector.shape_cast %6 : vector<1x1x128xf32> to vector<1x128xf32>
    %cst = arith.constant dense<0.000000e+00> : vector<16xf32>
    %8 = vector.multi_reduction <add>, %3, %cst [1] : vector<16x128xf32> to vector<16xf32>
    %9 = vector.shape_cast %8 : vector<16xf32> to vector<16x1xf32>
    %cst_10 = arith.constant 1.280000e+02 : f32
    %10 = vector.broadcast %cst_10 : f32 to vector<16x1xf32>
    %11 = arith.divf %9, %10 : vector<16x1xf32>
    %12 = vector.broadcast %11 : vector<16x1xf32> to vector<16x128xf32>
    %13 = arith.subf %3, %12 : vector<16x128xf32>
    %14 = arith.mulf %13, %13 : vector<16x128xf32>
    %cst_11 = arith.constant dense<0.000000e+00> : vector<16xf32>
    %15 = vector.multi_reduction <add>, %14, %cst_11 [1] : vector<16x128xf32> to vector<16xf32>
    %16 = vector.shape_cast %15 : vector<16xf32> to vector<16x1xf32>
    %cst_12 = arith.constant 1.280000e+02 : f32
    %17 = vector.broadcast %cst_12 : f32 to vector<16x1xf32>
    %18 = arith.divf %16, %17 : vector<16x1xf32>
    %cst_13 = arith.constant 9.99999974E-6 : f32
    %19 = vector.broadcast %cst_13 : f32 to vector<16x1xf32>
    %20 = arith.addf %18, %19 : vector<16x1xf32>
    %21 = math.rsqrt %20 : vector<16x1xf32>
    %22 = vector.broadcast %21 : vector<16x1xf32> to vector<16x128xf32>
    %23 = arith.mulf %13, %22 : vector<16x128xf32>
    %24 = vector.broadcast %5 : vector<1x128xf32> to vector<16x128xf32>
    %25 = arith.mulf %23, %24 : vector<16x128xf32>
    %26 = vector.broadcast %7 : vector<1x128xf32> to vector<16x128xf32>
    %27 = arith.addf %25, %26 : vector<16x128xf32>
    %c0_14 = arith.constant 0 : index
    %c0_15 = arith.constant 0 : index
    %c0_16 = arith.constant 0 : index
    %28 = vector.load %arg5[%c0_14, %c0_15, %c0_16] : memref<2x1x128xf32, #tpu.memory_space<vmem>>, vector<1x1x128xf32>
    %29 = vector.shape_cast %28 : vector<1x1x128xf32> to vector<1x128xf32>
    %c0_17 = arith.constant 0 : index
    %c0_18 = arith.constant 0 : index
    %c0_19 = arith.constant 0 : index
    %30 = vector.load %arg6[%c0_17, %c0_18, %c0_19] : memref<2x1x128xf32, #tpu.memory_space<vmem>>, vector<1x1x128xf32>
    %31 = vector.shape_cast %30 : vector<1x1x128xf32> to vector<1x128xf32>
    %cst_20 = arith.constant dense<0.000000e+00> : vector<32xf32>
    %32 = vector.multi_reduction <add>, %1, %cst_20 [1] : vector<32x128xf32> to vector<32xf32>
    %33 = vector.shape_cast %32 : vector<32xf32> to vector<32x1xf32>
    %cst_21 = arith.constant 1.280000e+02 : f32
    %34 = vector.broadcast %cst_21 : f32 to vector<32x1xf32>
    %35 = arith.divf %33, %34 : vector<32x1xf32>
    %36 = vector.broadcast %35 : vector<32x1xf32> to vector<32x128xf32>
    %37 = arith.subf %1, %36 : vector<32x128xf32>
    %38 = arith.mulf %37, %37 : vector<32x128xf32>
    %cst_22 = arith.constant dense<0.000000e+00> : vector<32xf32>
    %39 = vector.multi_reduction <add>, %38, %cst_22 [1] : vector<32x128xf32> to vector<32xf32>
    %40 = vector.shape_cast %39 : vector<32xf32> to vector<32x1xf32>
    %cst_23 = arith.constant 1.280000e+02 : f32
    %41 = vector.broadcast %cst_23 : f32 to vector<32x1xf32>
    %42 = arith.divf %40, %41 : vector<32x1xf32>
    %cst_24 = arith.constant 9.99999974E-6 : f32
    %43 = vector.broadcast %cst_24 : f32 to vector<32x1xf32>
    %44 = arith.addf %42, %43 : vector<32x1xf32>
    %45 = math.rsqrt %44 : vector<32x1xf32>
    %46 = vector.broadcast %45 : vector<32x1xf32> to vector<32x128xf32>
    %47 = arith.mulf %37, %46 : vector<32x128xf32>
    %48 = vector.broadcast %29 : vector<1x128xf32> to vector<32x128xf32>
    %49 = arith.mulf %47, %48 : vector<32x128xf32>
    %50 = vector.broadcast %31 : vector<1x128xf32> to vector<32x128xf32>
    %51 = arith.addf %49, %50 : vector<32x128xf32>
    %52 = arith.truncf %27 : vector<16x128xf32> to vector<16x128xbf16>
    %c0_25 = arith.constant 0 : index
    %c0_26 = arith.constant 0 : index
    %c0_27 = arith.constant 0 : index
    %53 = vector.load %arg7[%c0_25, %c0_26, %c0_27] : memref<2x128x128xbf16, #tpu.memory_space<vmem>>, vector<1x128x128xbf16>
    %54 = vector.shape_cast %53 : vector<1x128x128xbf16> to vector<128x128xbf16>
    %cst_28 = arith.constant dense<0.000000e+00> : vector<16x128xf32>
    %55 = tpu.matmul %52, %54, %cst_28 {dimension_numbers = #tpu.dot_dimension_numbers<[1], [0], [0], [1], [0, 0, 1, 1], [], []>} : vector<16x128xbf16>, vector<128x128xbf16>, vector<16x128xf32> -> vector<16x128xf32>
    %c0_29 = arith.constant 0 : index
    %c0_30 = arith.constant 0 : index
    %c0_31 = arith.constant 0 : index
    %56 = vector.load %arg8[%c0_29, %c0_30, %c0_31] : memref<2x1x128xf32, #tpu.memory_space<vmem>>, vector<1x1x128xf32>
    %57 = vector.shape_cast %56 : vector<1x1x128xf32> to vector<1x128xf32>
    %58 = vector.broadcast %57 : vector<1x128xf32> to vector<16x128xf32>
    %59 = arith.addf %55, %58 : vector<16x128xf32>
    %60 = arith.truncf %51 : vector<32x128xf32> to vector<32x128xbf16>
    %c0_32 = arith.constant 0 : index
    %c0_33 = arith.constant 0 : index
    %c0_34 = arith.constant 0 : index
    %61 = vector.load %arg9[%c0_32, %c0_33, %c0_34] : memref<2x128x256xbf16, #tpu.memory_space<vmem>>, vector<1x128x256xbf16>
    %62 = vector.shape_cast %61 : vector<1x128x256xbf16> to vector<128x256xbf16>
    %cst_35 = arith.constant dense<0.000000e+00> : vector<32x256xf32>
    %63 = tpu.matmul %60, %62, %cst_35 {dimension_numbers = #tpu.dot_dimension_numbers<[1], [0], [0], [1], [0, 0, 1, 1], [], []>} : vector<32x128xbf16>, vector<128x256xbf16>, vector<32x256xf32> -> vector<32x256xf32>
    %c0_36 = arith.constant 0 : index
    %c0_37 = arith.constant 0 : index
    %c0_38 = arith.constant 0 : index
    %64 = vector.load %arg10[%c0_36, %c0_37, %c0_38] : memref<2x1x256xf32, #tpu.memory_space<vmem>>, vector<1x1x256xf32>
    %65 = vector.shape_cast %64 : vector<1x1x256xf32> to vector<1x256xf32>
    %66 = vector.broadcast %65 : vector<1x256xf32> to vector<32x256xf32>
    %67 = arith.addf %63, %66 : vector<32x256xf32>
    %68 = vector.extract_strided_slice %67 {offsets = [0, 0], sizes = [32, 128], strides = [1, 1]} : vector<32x256xf32> to vector<32x128xf32>
    %69 = vector.extract_strided_slice %67 {offsets = [0, 128], sizes = [32, 128], strides = [1, 1]} : vector<32x256xf32> to vector<32x128xf32>
    %70 = vector.extract_strided_slice %59 {offsets = [0, 0], sizes = [8, 128], strides = [1, 1]} : vector<16x128xf32> to vector<8x128xf32>
    %71 = vector.extract_strided_slice %68 {offsets = [0, 0], sizes = [16, 128], strides = [1, 1]} : vector<32x128xf32> to vector<16x128xf32>
    %72 = vector.extract_strided_slice %69 {offsets = [0, 0], sizes = [16, 128], strides = [1, 1]} : vector<32x128xf32> to vector<16x128xf32>
    %73 = vector.extract_strided_slice %70 {offsets = [0, 0], sizes = [8, 32], strides = [1, 1]} : vector<8x128xf32> to vector<8x32xf32>
    %74 = vector.extract_strided_slice %71 {offsets = [0, 0], sizes = [16, 32], strides = [1, 1]} : vector<16x128xf32> to vector<16x32xf32>
    %75 = vector.extract_strided_slice %72 {offsets = [0, 0], sizes = [16, 32], strides = [1, 1]} : vector<16x128xf32> to vector<16x32xf32>
    %76 = arith.truncf %73 : vector<8x32xf32> to vector<8x32xbf16>
    %77 = arith.truncf %74 : vector<16x32xf32> to vector<16x32xbf16>
    %cst_39 = arith.constant dense<0.000000e+00> : vector<8x16xf32>
    %78 = tpu.matmul %76, %77, %cst_39 {dimension_numbers = #tpu.dot_dimension_numbers<[1], [1], [0], [0], [0, 0, 1, 0], [], []>} : vector<8x32xbf16>, vector<16x32xbf16>, vector<8x16xf32> -> vector<8x16xf32>
    %cst_40 = arith.constant 0.176776692 : f32
    %79 = vector.broadcast %cst_40 : f32 to vector<8x16xf32>
    %80 = arith.mulf %78, %79 : vector<8x16xf32>
    %cst_41 = arith.constant dense<0xFF800000> : vector<8xf32>
    %81 = vector.multi_reduction <maximumf>, %80, %cst_41 [1] : vector<8x16xf32> to vector<8xf32>
    %82 = vector.shape_cast %81 : vector<8xf32> to vector<8x1xf32>
    %83 = vector.broadcast %82 : vector<8x1xf32> to vector<8x16xf32>
    %84 = arith.subf %80, %83 : vector<8x16xf32>
    %85 = math.exp %84 : vector<8x16xf32>
    %cst_42 = arith.constant dense<0.000000e+00> : vector<8xf32>
    %86 = vector.multi_reduction <add>, %85, %cst_42 [1] : vector<8x16xf32> to vector<8xf32>
    %87 = vector.shape_cast %86 : vector<8xf32> to vector<8x1xf32>
    %88 = vector.broadcast %87 : vector<8x1xf32> to vector<8x16xf32>
    %89 = arith.divf %85, %88 : vector<8x16xf32>
    %90 = arith.truncf %89 : vector<8x16xf32> to vector<8x16xbf16>
    %91 = arith.truncf %75 : vector<16x32xf32> to vector<16x32xbf16>
    %cst_43 = arith.constant dense<0.000000e+00> : vector<8x32xf32>
    %92 = tpu.matmul %90, %91, %cst_43 {dimension_numbers = #tpu.dot_dimension_numbers<[1], [0], [0], [1], [0, 0, 1, 1], [], []>} : vector<8x16xbf16>, vector<16x32xbf16>, vector<8x32xf32> -> vector<8x32xf32>
    %93 = vector.extract_strided_slice %70 {offsets = [0, 32], sizes = [8, 32], strides = [1, 1]} : vector<8x128xf32> to vector<8x32xf32>
    %94 = vector.extract_strided_slice %71 {offsets = [0, 32], sizes = [16, 32], strides = [1, 1]} : vector<16x128xf32> to vector<16x32xf32>
    %95 = vector.extract_strided_slice %72 {offsets = [0, 32], sizes = [16, 32], strides = [1, 1]} : vector<16x128xf32> to vector<16x32xf32>
    %96 = arith.truncf %93 : vector<8x32xf32> to vector<8x32xbf16>
    %97 = arith.truncf %94 : vector<16x32xf32> to vector<16x32xbf16>
    %cst_44 = arith.constant dense<0.000000e+00> : vector<8x16xf32>
    %98 = tpu.matmul %96, %97, %cst_44 {dimension_numbers = #tpu.dot_dimension_numbers<[1], [1], [0], [0], [0, 0, 1, 0], [], []>} : vector<8x32xbf16>, vector<16x32xbf16>, vector<8x16xf32> -> vector<8x16xf32>
    %cst_45 = arith.constant 0.176776692 : f32
    %99 = vector.broadcast %cst_45 : f32 to vector<8x16xf32>
    %100 = arith.mulf %98, %99 : vector<8x16xf32>
    %cst_46 = arith.constant dense<0xFF800000> : vector<8xf32>
    %101 = vector.multi_reduction <maximumf>, %100, %cst_46 [1] : vector<8x16xf32> to vector<8xf32>
    %102 = vector.shape_cast %101 : vector<8xf32> to vector<8x1xf32>
    %103 = vector.broadcast %102 : vector<8x1xf32> to vector<8x16xf32>
    %104 = arith.subf %100, %103 : vector<8x16xf32>
    %105 = math.exp %104 : vector<8x16xf32>
    %cst_47 = arith.constant dense<0.000000e+00> : vector<8xf32>
    %106 = vector.multi_reduction <add>, %105, %cst_47 [1] : vector<8x16xf32> to vector<8xf32>
    %107 = vector.shape_cast %106 : vector<8xf32> to vector<8x1xf32>
    %108 = vector.broadcast %107 : vector<8x1xf32> to vector<8x16xf32>
    %109 = arith.divf %105, %108 : vector<8x16xf32>
    %110 = arith.truncf %109 : vector<8x16xf32> to vector<8x16xbf16>
    %111 = arith.truncf %95 : vector<16x32xf32> to vector<16x32xbf16>
    %cst_48 = arith.constant dense<0.000000e+00> : vector<8x32xf32>
    %112 = tpu.matmul %110, %111, %cst_48 {dimension_numbers = #tpu.dot_dimension_numbers<[1], [0], [0], [1], [0, 0, 1, 1], [], []>} : vector<8x16xbf16>, vector<16x32xbf16>, vector<8x32xf32> -> vector<8x32xf32>
    %113 = vector.extract_strided_slice %70 {offsets = [0, 64], sizes = [8, 32], strides = [1, 1]} : vector<8x128xf32> to vector<8x32xf32>
    %114 = vector.extract_strided_slice %71 {offsets = [0, 64], sizes = [16, 32], strides = [1, 1]} : vector<16x128xf32> to vector<16x32xf32>
    %115 = vector.extract_strided_slice %72 {offsets = [0, 64], sizes = [16, 32], strides = [1, 1]} : vector<16x128xf32> to vector<16x32xf32>
    %116 = arith.truncf %113 : vector<8x32xf32> to vector<8x32xbf16>
    %117 = arith.truncf %114 : vector<16x32xf32> to vector<16x32xbf16>
    %cst_49 = arith.constant dense<0.000000e+00> : vector<8x16xf32>
    %118 = tpu.matmul %116, %117, %cst_49 {dimension_numbers = #tpu.dot_dimension_numbers<[1], [1], [0], [0], [0, 0, 1, 0], [], []>} : vector<8x32xbf16>, vector<16x32xbf16>, vector<8x16xf32> -> vector<8x16xf32>
    %cst_50 = arith.constant 0.176776692 : f32
    %119 = vector.broadcast %cst_50 : f32 to vector<8x16xf32>
    %120 = arith.mulf %118, %119 : vector<8x16xf32>
    %cst_51 = arith.constant dense<0xFF800000> : vector<8xf32>
    %121 = vector.multi_reduction <maximumf>, %120, %cst_51 [1] : vector<8x16xf32> to vector<8xf32>
    %122 = vector.shape_cast %121 : vector<8xf32> to vector<8x1xf32>
    %123 = vector.broadcast %122 : vector<8x1xf32> to vector<8x16xf32>
    %124 = arith.subf %120, %123 : vector<8x16xf32>
    %125 = math.exp %124 : vector<8x16xf32>
    %cst_52 = arith.constant dense<0.000000e+00> : vector<8xf32>
    %126 = vector.multi_reduction <add>, %125, %cst_52 [1] : vector<8x16xf32> to vector<8xf32>
    %127 = vector.shape_cast %126 : vector<8xf32> to vector<8x1xf32>
    %128 = vector.broadcast %127 : vector<8x1xf32> to vector<8x16xf32>
    %129 = arith.divf %125, %128 : vector<8x16xf32>
    %130 = arith.truncf %129 : vector<8x16xf32> to vector<8x16xbf16>
    %131 = arith.truncf %115 : vector<16x32xf32> to vector<16x32xbf16>
    %cst_53 = arith.constant dense<0.000000e+00> : vector<8x32xf32>
    %132 = tpu.matmul %130, %131, %cst_53 {dimension_numbers = #tpu.dot_dimension_numbers<[1], [0], [0], [1], [0, 0, 1, 1], [], []>} : vector<8x16xbf16>, vector<16x32xbf16>, vector<8x32xf32> -> vector<8x32xf32>
    %133 = vector.extract_strided_slice %70 {offsets = [0, 96], sizes = [8, 32], strides = [1, 1]} : vector<8x128xf32> to vector<8x32xf32>
    %134 = vector.extract_strided_slice %71 {offsets = [0, 96], sizes = [16, 32], strides = [1, 1]} : vector<16x128xf32> to vector<16x32xf32>
    %135 = vector.extract_strided_slice %72 {offsets = [0, 96], sizes = [16, 32], strides = [1, 1]} : vector<16x128xf32> to vector<16x32xf32>
    %136 = arith.truncf %133 : vector<8x32xf32> to vector<8x32xbf16>
    %137 = arith.truncf %134 : vector<16x32xf32> to vector<16x32xbf16>
    %cst_54 = arith.constant dense<0.000000e+00> : vector<8x16xf32>
    %138 = tpu.matmul %136, %137, %cst_54 {dimension_numbers = #tpu.dot_dimension_numbers<[1], [1], [0], [0], [0, 0, 1, 0], [], []>} : vector<8x32xbf16>, vector<16x32xbf16>, vector<8x16xf32> -> vector<8x16xf32>
    %cst_55 = arith.constant 0.176776692 : f32
    %139 = vector.broadcast %cst_55 : f32 to vector<8x16xf32>
    %140 = arith.mulf %138, %139 : vector<8x16xf32>
    %cst_56 = arith.constant dense<0xFF800000> : vector<8xf32>
    %141 = vector.multi_reduction <maximumf>, %140, %cst_56 [1] : vector<8x16xf32> to vector<8xf32>
    %142 = vector.shape_cast %141 : vector<8xf32> to vector<8x1xf32>
    %143 = vector.broadcast %142 : vector<8x1xf32> to vector<8x16xf32>
    %144 = arith.subf %140, %143 : vector<8x16xf32>
    %145 = math.exp %144 : vector<8x16xf32>
    %cst_57 = arith.constant dense<0.000000e+00> : vector<8xf32>
    %146 = vector.multi_reduction <add>, %145, %cst_57 [1] : vector<8x16xf32> to vector<8xf32>
    %147 = vector.shape_cast %146 : vector<8xf32> to vector<8x1xf32>
    %148 = vector.broadcast %147 : vector<8x1xf32> to vector<8x16xf32>
    %149 = arith.divf %145, %148 : vector<8x16xf32>
    %150 = arith.truncf %149 : vector<8x16xf32> to vector<8x16xbf16>
    %151 = arith.truncf %135 : vector<16x32xf32> to vector<16x32xbf16>
    %cst_58 = arith.constant dense<0.000000e+00> : vector<8x32xf32>
    %152 = tpu.matmul %150, %151, %cst_58 {dimension_numbers = #tpu.dot_dimension_numbers<[1], [0], [0], [1], [0, 0, 1, 1], [], []>} : vector<8x16xbf16>, vector<16x32xbf16>, vector<8x32xf32> -> vector<8x32xf32>
    %153 = tpu.concatenate %92, %112, %132, %152 in 1 : vector<8x32xf32>, vector<8x32xf32>, vector<8x32xf32>, vector<8x32xf32> -> vector<8x128xf32>
    %154 = vector.extract_strided_slice %59 {offsets = [8, 0], sizes = [8, 128], strides = [1, 1]} : vector<16x128xf32> to vector<8x128xf32>
    %155 = vector.extract_strided_slice %68 {offsets = [16, 0], sizes = [16, 128], strides = [1, 1]} : vector<32x128xf32> to vector<16x128xf32>
    %156 = vector.extract_strided_slice %69 {offsets = [16, 0], sizes = [16, 128], strides = [1, 1]} : vector<32x128xf32> to vector<16x128xf32>
    %157 = vector.extract_strided_slice %154 {offsets = [0, 0], sizes = [8, 32], strides = [1, 1]} : vector<8x128xf32> to vector<8x32xf32>
    %158 = vector.extract_strided_slice %155 {offsets = [0, 0], sizes = [16, 32], strides = [1, 1]} : vector<16x128xf32> to vector<16x32xf32>
    %159 = vector.extract_strided_slice %156 {offsets = [0, 0], sizes = [16, 32], strides = [1, 1]} : vector<16x128xf32> to vector<16x32xf32>
    %160 = arith.truncf %157 : vector<8x32xf32> to vector<8x32xbf16>
    %161 = arith.truncf %158 : vector<16x32xf32> to vector<16x32xbf16>
    %cst_59 = arith.constant dense<0.000000e+00> : vector<8x16xf32>
    %162 = tpu.matmul %160, %161, %cst_59 {dimension_numbers = #tpu.dot_dimension_numbers<[1], [1], [0], [0], [0, 0, 1, 0], [], []>} : vector<8x32xbf16>, vector<16x32xbf16>, vector<8x16xf32> -> vector<8x16xf32>
    %cst_60 = arith.constant 0.176776692 : f32
    %163 = vector.broadcast %cst_60 : f32 to vector<8x16xf32>
    %164 = arith.mulf %162, %163 : vector<8x16xf32>
    %cst_61 = arith.constant dense<0xFF800000> : vector<8xf32>
    %165 = vector.multi_reduction <maximumf>, %164, %cst_61 [1] : vector<8x16xf32> to vector<8xf32>
    %166 = vector.shape_cast %165 : vector<8xf32> to vector<8x1xf32>
    %167 = vector.broadcast %166 : vector<8x1xf32> to vector<8x16xf32>
    %168 = arith.subf %164, %167 : vector<8x16xf32>
    %169 = math.exp %168 : vector<8x16xf32>
    %cst_62 = arith.constant dense<0.000000e+00> : vector<8xf32>
    %170 = vector.multi_reduction <add>, %169, %cst_62 [1] : vector<8x16xf32> to vector<8xf32>
    %171 = vector.shape_cast %170 : vector<8xf32> to vector<8x1xf32>
    %172 = vector.broadcast %171 : vector<8x1xf32> to vector<8x16xf32>
    %173 = arith.divf %169, %172 : vector<8x16xf32>
    %174 = arith.truncf %173 : vector<8x16xf32> to vector<8x16xbf16>
    %175 = arith.truncf %159 : vector<16x32xf32> to vector<16x32xbf16>
    %cst_63 = arith.constant dense<0.000000e+00> : vector<8x32xf32>
    %176 = tpu.matmul %174, %175, %cst_63 {dimension_numbers = #tpu.dot_dimension_numbers<[1], [0], [0], [1], [0, 0, 1, 1], [], []>} : vector<8x16xbf16>, vector<16x32xbf16>, vector<8x32xf32> -> vector<8x32xf32>
    %177 = vector.extract_strided_slice %154 {offsets = [0, 32], sizes = [8, 32], strides = [1, 1]} : vector<8x128xf32> to vector<8x32xf32>
    %178 = vector.extract_strided_slice %155 {offsets = [0, 32], sizes = [16, 32], strides = [1, 1]} : vector<16x128xf32> to vector<16x32xf32>
    %179 = vector.extract_strided_slice %156 {offsets = [0, 32], sizes = [16, 32], strides = [1, 1]} : vector<16x128xf32> to vector<16x32xf32>
    %180 = arith.truncf %177 : vector<8x32xf32> to vector<8x32xbf16>
    %181 = arith.truncf %178 : vector<16x32xf32> to vector<16x32xbf16>
    %cst_64 = arith.constant dense<0.000000e+00> : vector<8x16xf32>
    %182 = tpu.matmul %180, %181, %cst_64 {dimension_numbers = #tpu.dot_dimension_numbers<[1], [1], [0], [0], [0, 0, 1, 0], [], []>} : vector<8x32xbf16>, vector<16x32xbf16>, vector<8x16xf32> -> vector<8x16xf32>
    %cst_65 = arith.constant 0.176776692 : f32
    %183 = vector.broadcast %cst_65 : f32 to vector<8x16xf32>
    %184 = arith.mulf %182, %183 : vector<8x16xf32>
    %cst_66 = arith.constant dense<0xFF800000> : vector<8xf32>
    %185 = vector.multi_reduction <maximumf>, %184, %cst_66 [1] : vector<8x16xf32> to vector<8xf32>
    %186 = vector.shape_cast %185 : vector<8xf32> to vector<8x1xf32>
    %187 = vector.broadcast %186 : vector<8x1xf32> to vector<8x16xf32>
    %188 = arith.subf %184, %187 : vector<8x16xf32>
    %189 = math.exp %188 : vector<8x16xf32>
    %cst_67 = arith.constant dense<0.000000e+00> : vector<8xf32>
    %190 = vector.multi_reduction <add>, %189, %cst_67 [1] : vector<8x16xf32> to vector<8xf32>
    %191 = vector.shape_cast %190 : vector<8xf32> to vector<8x1xf32>
    %192 = vector.broadcast %191 : vector<8x1xf32> to vector<8x16xf32>
    %193 = arith.divf %189, %192 : vector<8x16xf32>
    %194 = arith.truncf %193 : vector<8x16xf32> to vector<8x16xbf16>
    %195 = arith.truncf %179 : vector<16x32xf32> to vector<16x32xbf16>
    %cst_68 = arith.constant dense<0.000000e+00> : vector<8x32xf32>
    %196 = tpu.matmul %194, %195, %cst_68 {dimension_numbers = #tpu.dot_dimension_numbers<[1], [0], [0], [1], [0, 0, 1, 1], [], []>} : vector<8x16xbf16>, vector<16x32xbf16>, vector<8x32xf32> -> vector<8x32xf32>
    %197 = vector.extract_strided_slice %154 {offsets = [0, 64], sizes = [8, 32], strides = [1, 1]} : vector<8x128xf32> to vector<8x32xf32>
    %198 = vector.extract_strided_slice %155 {offsets = [0, 64], sizes = [16, 32], strides = [1, 1]} : vector<16x128xf32> to vector<16x32xf32>
    %199 = vector.extract_strided_slice %156 {offsets = [0, 64], sizes = [16, 32], strides = [1, 1]} : vector<16x128xf32> to vector<16x32xf32>
    %200 = arith.truncf %197 : vector<8x32xf32> to vector<8x32xbf16>
    %201 = arith.truncf %198 : vector<16x32xf32> to vector<16x32xbf16>
    %cst_69 = arith.constant dense<0.000000e+00> : vector<8x16xf32>
    %202 = tpu.matmul %200, %201, %cst_69 {dimension_numbers = #tpu.dot_dimension_numbers<[1], [1], [0], [0], [0, 0, 1, 0], [], []>} : vector<8x32xbf16>, vector<16x32xbf16>, vector<8x16xf32> -> vector<8x16xf32>
    %cst_70 = arith.constant 0.176776692 : f32
    %203 = vector.broadcast %cst_70 : f32 to vector<8x16xf32>
    %204 = arith.mulf %202, %203 : vector<8x16xf32>
    %cst_71 = arith.constant dense<0xFF800000> : vector<8xf32>
    %205 = vector.multi_reduction <maximumf>, %204, %cst_71 [1] : vector<8x16xf32> to vector<8xf32>
    %206 = vector.shape_cast %205 : vector<8xf32> to vector<8x1xf32>
    %207 = vector.broadcast %206 : vector<8x1xf32> to vector<8x16xf32>
    %208 = arith.subf %204, %207 : vector<8x16xf32>
    %209 = math.exp %208 : vector<8x16xf32>
    %cst_72 = arith.constant dense<0.000000e+00> : vector<8xf32>
    %210 = vector.multi_reduction <add>, %209, %cst_72 [1] : vector<8x16xf32> to vector<8xf32>
    %211 = vector.shape_cast %210 : vector<8xf32> to vector<8x1xf32>
    %212 = vector.broadcast %211 : vector<8x1xf32> to vector<8x16xf32>
    %213 = arith.divf %209, %212 : vector<8x16xf32>
    %214 = arith.truncf %213 : vector<8x16xf32> to vector<8x16xbf16>
    %215 = arith.truncf %199 : vector<16x32xf32> to vector<16x32xbf16>
    %cst_73 = arith.constant dense<0.000000e+00> : vector<8x32xf32>
    %216 = tpu.matmul %214, %215, %cst_73 {dimension_numbers = #tpu.dot_dimension_numbers<[1], [0], [0], [1], [0, 0, 1, 1], [], []>} : vector<8x16xbf16>, vector<16x32xbf16>, vector<8x32xf32> -> vector<8x32xf32>
    %217 = vector.extract_strided_slice %154 {offsets = [0, 96], sizes = [8, 32], strides = [1, 1]} : vector<8x128xf32> to vector<8x32xf32>
    %218 = vector.extract_strided_slice %155 {offsets = [0, 96], sizes = [16, 32], strides = [1, 1]} : vector<16x128xf32> to vector<16x32xf32>
    %219 = vector.extract_strided_slice %156 {offsets = [0, 96], sizes = [16, 32], strides = [1, 1]} : vector<16x128xf32> to vector<16x32xf32>
    %220 = arith.truncf %217 : vector<8x32xf32> to vector<8x32xbf16>
    %221 = arith.truncf %218 : vector<16x32xf32> to vector<16x32xbf16>
    %cst_74 = arith.constant dense<0.000000e+00> : vector<8x16xf32>
    %222 = tpu.matmul %220, %221, %cst_74 {dimension_numbers = #tpu.dot_dimension_numbers<[1], [1], [0], [0], [0, 0, 1, 0], [], []>} : vector<8x32xbf16>, vector<16x32xbf16>, vector<8x16xf32> -> vector<8x16xf32>
    %cst_75 = arith.constant 0.176776692 : f32
    %223 = vector.broadcast %cst_75 : f32 to vector<8x16xf32>
    %224 = arith.mulf %222, %223 : vector<8x16xf32>
    %cst_76 = arith.constant dense<0xFF800000> : vector<8xf32>
    %225 = vector.multi_reduction <maximumf>, %224, %cst_76 [1] : vector<8x16xf32> to vector<8xf32>
    %226 = vector.shape_cast %225 : vector<8xf32> to vector<8x1xf32>
    %227 = vector.broadcast %226 : vector<8x1xf32> to vector<8x16xf32>
    %228 = arith.subf %224, %227 : vector<8x16xf32>
    %229 = math.exp %228 : vector<8x16xf32>
    %cst_77 = arith.constant dense<0.000000e+00> : vector<8xf32>
    %230 = vector.multi_reduction <add>, %229, %cst_77 [1] : vector<8x16xf32> to vector<8xf32>
    %231 = vector.shape_cast %230 : vector<8xf32> to vector<8x1xf32>
    %232 = vector.broadcast %231 : vector<8x1xf32> to vector<8x16xf32>
    %233 = arith.divf %229, %232 : vector<8x16xf32>
    %234 = arith.truncf %233 : vector<8x16xf32> to vector<8x16xbf16>
    %235 = arith.truncf %219 : vector<16x32xf32> to vector<16x32xbf16>
    %cst_78 = arith.constant dense<0.000000e+00> : vector<8x32xf32>
    %236 = tpu.matmul %234, %235, %cst_78 {dimension_numbers = #tpu.dot_dimension_numbers<[1], [0], [0], [1], [0, 0, 1, 1], [], []>} : vector<8x16xbf16>, vector<16x32xbf16>, vector<8x32xf32> -> vector<8x32xf32>
    %237 = tpu.concatenate %176, %196, %216, %236 in 1 : vector<8x32xf32>, vector<8x32xf32>, vector<8x32xf32>, vector<8x32xf32> -> vector<8x128xf32>
    %238 = tpu.concatenate %153, %237 in 0 : vector<8x128xf32>, vector<8x128xf32> -> vector<16x128xf32>
    %239 = arith.truncf %238 : vector<16x128xf32> to vector<16x128xbf16>
    %c0_79 = arith.constant 0 : index
    %c0_80 = arith.constant 0 : index
    %c0_81 = arith.constant 0 : index
    %240 = vector.load %arg11[%c0_79, %c0_80, %c0_81] : memref<2x128x128xbf16, #tpu.memory_space<vmem>>, vector<1x128x128xbf16>
    %241 = vector.shape_cast %240 : vector<1x128x128xbf16> to vector<128x128xbf16>
    %cst_82 = arith.constant dense<0.000000e+00> : vector<16x128xf32>
    %242 = tpu.matmul %239, %241, %cst_82 {dimension_numbers = #tpu.dot_dimension_numbers<[1], [0], [0], [1], [0, 0, 1, 1], [], []>} : vector<16x128xbf16>, vector<128x128xbf16>, vector<16x128xf32> -> vector<16x128xf32>
    %243 = arith.addf %3, %242 : vector<16x128xf32>
    %c0_83 = arith.constant 0 : index
    %c0_84 = arith.constant 0 : index
    %c0_85 = arith.constant 0 : index
    %244 = vector.load %arg12[%c0_83, %c0_84, %c0_85] : memref<2x1x128xf32, #tpu.memory_space<vmem>>, vector<1x1x128xf32>
    %245 = vector.shape_cast %244 : vector<1x1x128xf32> to vector<1x128xf32>
    %246 = vector.broadcast %245 : vector<1x128xf32> to vector<16x128xf32>
    %247 = arith.addf %243, %246 : vector<16x128xf32>
    %c0_86 = arith.constant 0 : index
    %c0_87 = arith.constant 0 : index
    %c0_88 = arith.constant 0 : index
    %248 = vector.load %arg13[%c0_86, %c0_87, %c0_88] : memref<2x1x128xf32, #tpu.memory_space<vmem>>, vector<1x1x128xf32>
    %249 = vector.shape_cast %248 : vector<1x1x128xf32> to vector<1x128xf32>
    %c0_89 = arith.constant 0 : index
    %c0_90 = arith.constant 0 : index
    %c0_91 = arith.constant 0 : index
    %250 = vector.load %arg14[%c0_89, %c0_90, %c0_91] : memref<2x1x128xf32, #tpu.memory_space<vmem>>, vector<1x1x128xf32>
    %251 = vector.shape_cast %250 : vector<1x1x128xf32> to vector<1x128xf32>
    %cst_92 = arith.constant dense<0.000000e+00> : vector<16xf32>
    %252 = vector.multi_reduction <add>, %247, %cst_92 [1] : vector<16x128xf32> to vector<16xf32>
    %253 = vector.shape_cast %252 : vector<16xf32> to vector<16x1xf32>
    %cst_93 = arith.constant 1.280000e+02 : f32
    %254 = vector.broadcast %cst_93 : f32 to vector<16x1xf32>
    %255 = arith.divf %253, %254 : vector<16x1xf32>
    %256 = vector.broadcast %255 : vector<16x1xf32> to vector<16x128xf32>
    %257 = arith.subf %247, %256 : vector<16x128xf32>
    %258 = arith.mulf %257, %257 : vector<16x128xf32>
    %cst_94 = arith.constant dense<0.000000e+00> : vector<16xf32>
    %259 = vector.multi_reduction <add>, %258, %cst_94 [1] : vector<16x128xf32> to vector<16xf32>
    %260 = vector.shape_cast %259 : vector<16xf32> to vector<16x1xf32>
    %cst_95 = arith.constant 1.280000e+02 : f32
    %261 = vector.broadcast %cst_95 : f32 to vector<16x1xf32>
    %262 = arith.divf %260, %261 : vector<16x1xf32>
    %cst_96 = arith.constant 9.99999974E-6 : f32
    %263 = vector.broadcast %cst_96 : f32 to vector<16x1xf32>
    %264 = arith.addf %262, %263 : vector<16x1xf32>
    %265 = math.rsqrt %264 : vector<16x1xf32>
    %266 = vector.broadcast %265 : vector<16x1xf32> to vector<16x128xf32>
    %267 = arith.mulf %257, %266 : vector<16x128xf32>
    %268 = vector.broadcast %249 : vector<1x128xf32> to vector<16x128xf32>
    %269 = arith.mulf %267, %268 : vector<16x128xf32>
    %270 = vector.broadcast %251 : vector<1x128xf32> to vector<16x128xf32>
    %271 = arith.addf %269, %270 : vector<16x128xf32>
    %272 = arith.truncf %271 : vector<16x128xf32> to vector<16x128xbf16>
    %c0_97 = arith.constant 0 : index
    %c0_98 = arith.constant 0 : index
    %c0_99 = arith.constant 0 : index
    %273 = vector.load %arg15[%c0_97, %c0_98, %c0_99] : memref<2x128x512xbf16, #tpu.memory_space<vmem>>, vector<1x128x512xbf16>
    %274 = vector.shape_cast %273 : vector<1x128x512xbf16> to vector<128x512xbf16>
    %cst_100 = arith.constant dense<0.000000e+00> : vector<16x512xf32>
    %275 = tpu.matmul %272, %274, %cst_100 {dimension_numbers = #tpu.dot_dimension_numbers<[1], [0], [0], [1], [0, 0, 1, 1], [], []>} : vector<16x128xbf16>, vector<128x512xbf16>, vector<16x512xf32> -> vector<16x512xf32>
    %c0_101 = arith.constant 0 : index
    %c0_102 = arith.constant 0 : index
    %c0_103 = arith.constant 0 : index
    %276 = vector.load %arg16[%c0_101, %c0_102, %c0_103] : memref<2x1x512xf32, #tpu.memory_space<vmem>>, vector<1x1x512xf32>
    %277 = vector.shape_cast %276 : vector<1x1x512xf32> to vector<1x512xf32>
    %278 = vector.broadcast %277 : vector<1x512xf32> to vector<16x512xf32>
    %279 = arith.addf %275, %278 : vector<16x512xf32>
    %280 = arith.mulf %279, %279 : vector<16x512xf32>
    %281 = arith.mulf %279, %280 : vector<16x512xf32>
    %cst_104 = arith.constant 4.471500e-02 : f32
    %282 = vector.broadcast %cst_104 : f32 to vector<16x512xf32>
    %283 = arith.mulf %282, %281 : vector<16x512xf32>
    %284 = arith.addf %279, %283 : vector<16x512xf32>
    %cst_105 = arith.constant 0.797884583 : f32
    %285 = vector.broadcast %cst_105 : f32 to vector<16x512xf32>
    %286 = arith.mulf %285, %284 : vector<16x512xf32>
    %287 = math.tanh %286 : vector<16x512xf32>
    %cst_106 = arith.constant 1.000000e+00 : f32
    %288 = vector.broadcast %cst_106 : f32 to vector<16x512xf32>
    %289 = arith.addf %288, %287 : vector<16x512xf32>
    %cst_107 = arith.constant 5.000000e-01 : f32
    %290 = vector.broadcast %cst_107 : f32 to vector<16x512xf32>
    %291 = arith.mulf %290, %289 : vector<16x512xf32>
    %292 = arith.mulf %279, %291 : vector<16x512xf32>
    %293 = arith.truncf %292 : vector<16x512xf32> to vector<16x512xbf16>
    %c0_108 = arith.constant 0 : index
    %c0_109 = arith.constant 0 : index
    %c0_110 = arith.constant 0 : index
    %294 = vector.load %arg17[%c0_108, %c0_109, %c0_110] : memref<2x512x128xbf16, #tpu.memory_space<vmem>>, vector<1x512x128xbf16>
    %295 = vector.shape_cast %294 : vector<1x512x128xbf16> to vector<512x128xbf16>
    %cst_111 = arith.constant dense<0.000000e+00> : vector<16x128xf32>
    %296 = tpu.matmul %293, %295, %cst_111 {dimension_numbers = #tpu.dot_dimension_numbers<[1], [0], [0], [1], [0, 0, 1, 1], [], []>} : vector<16x512xbf16>, vector<512x128xbf16>, vector<16x128xf32> -> vector<16x128xf32>
    %297 = arith.addf %247, %296 : vector<16x128xf32>
    %c0_112 = arith.constant 0 : index
    %c0_113 = arith.constant 0 : index
    %c0_114 = arith.constant 0 : index
    %298 = vector.load %arg18[%c0_112, %c0_113, %c0_114] : memref<2x1x128xf32, #tpu.memory_space<vmem>>, vector<1x1x128xf32>
    %299 = vector.shape_cast %298 : vector<1x1x128xf32> to vector<1x128xf32>
    %300 = vector.broadcast %299 : vector<1x128xf32> to vector<16x128xf32>
    %301 = arith.addf %297, %300 : vector<16x128xf32>
    %c1 = arith.constant 1 : index
    %c0_115 = arith.constant 0 : index
    %c0_116 = arith.constant 0 : index
    %302 = vector.load %arg3[%c1, %c0_115, %c0_116] : memref<2x1x128xf32, #tpu.memory_space<vmem>>, vector<1x1x128xf32>
    %303 = vector.shape_cast %302 : vector<1x1x128xf32> to vector<1x128xf32>
    %c1_117 = arith.constant 1 : index
    %c0_118 = arith.constant 0 : index
    %c0_119 = arith.constant 0 : index
    %304 = vector.load %arg4[%c1_117, %c0_118, %c0_119] : memref<2x1x128xf32, #tpu.memory_space<vmem>>, vector<1x1x128xf32>
    %305 = vector.shape_cast %304 : vector<1x1x128xf32> to vector<1x128xf32>
    %cst_120 = arith.constant dense<0.000000e+00> : vector<16xf32>
    %306 = vector.multi_reduction <add>, %301, %cst_120 [1] : vector<16x128xf32> to vector<16xf32>
    %307 = vector.shape_cast %306 : vector<16xf32> to vector<16x1xf32>
    %cst_121 = arith.constant 1.280000e+02 : f32
    %308 = vector.broadcast %cst_121 : f32 to vector<16x1xf32>
    %309 = arith.divf %307, %308 : vector<16x1xf32>
    %310 = vector.broadcast %309 : vector<16x1xf32> to vector<16x128xf32>
    %311 = arith.subf %301, %310 : vector<16x128xf32>
    %312 = arith.mulf %311, %311 : vector<16x128xf32>
    %cst_122 = arith.constant dense<0.000000e+00> : vector<16xf32>
    %313 = vector.multi_reduction <add>, %312, %cst_122 [1] : vector<16x128xf32> to vector<16xf32>
    %314 = vector.shape_cast %313 : vector<16xf32> to vector<16x1xf32>
    %cst_123 = arith.constant 1.280000e+02 : f32
    %315 = vector.broadcast %cst_123 : f32 to vector<16x1xf32>
    %316 = arith.divf %314, %315 : vector<16x1xf32>
    %cst_124 = arith.constant 9.99999974E-6 : f32
    %317 = vector.broadcast %cst_124 : f32 to vector<16x1xf32>
    %318 = arith.addf %316, %317 : vector<16x1xf32>
    %319 = math.rsqrt %318 : vector<16x1xf32>
    %320 = vector.broadcast %319 : vector<16x1xf32> to vector<16x128xf32>
    %321 = arith.mulf %311, %320 : vector<16x128xf32>
    %322 = vector.broadcast %303 : vector<1x128xf32> to vector<16x128xf32>
    %323 = arith.mulf %321, %322 : vector<16x128xf32>
    %324 = vector.broadcast %305 : vector<1x128xf32> to vector<16x128xf32>
    %325 = arith.addf %323, %324 : vector<16x128xf32>
    %c1_125 = arith.constant 1 : index
    %c0_126 = arith.constant 0 : index
    %c0_127 = arith.constant 0 : index
    %326 = vector.load %arg5[%c1_125, %c0_126, %c0_127] : memref<2x1x128xf32, #tpu.memory_space<vmem>>, vector<1x1x128xf32>
    %327 = vector.shape_cast %326 : vector<1x1x128xf32> to vector<1x128xf32>
    %c1_128 = arith.constant 1 : index
    %c0_129 = arith.constant 0 : index
    %c0_130 = arith.constant 0 : index
    %328 = vector.load %arg6[%c1_128, %c0_129, %c0_130] : memref<2x1x128xf32, #tpu.memory_space<vmem>>, vector<1x1x128xf32>
    %329 = vector.shape_cast %328 : vector<1x1x128xf32> to vector<1x128xf32>
    %cst_131 = arith.constant dense<0.000000e+00> : vector<32xf32>
    %330 = vector.multi_reduction <add>, %1, %cst_131 [1] : vector<32x128xf32> to vector<32xf32>
    %331 = vector.shape_cast %330 : vector<32xf32> to vector<32x1xf32>
    %cst_132 = arith.constant 1.280000e+02 : f32
    %332 = vector.broadcast %cst_132 : f32 to vector<32x1xf32>
    %333 = arith.divf %331, %332 : vector<32x1xf32>
    %334 = vector.broadcast %333 : vector<32x1xf32> to vector<32x128xf32>
    %335 = arith.subf %1, %334 : vector<32x128xf32>
    %336 = arith.mulf %335, %335 : vector<32x128xf32>
    %cst_133 = arith.constant dense<0.000000e+00> : vector<32xf32>
    %337 = vector.multi_reduction <add>, %336, %cst_133 [1] : vector<32x128xf32> to vector<32xf32>
    %338 = vector.shape_cast %337 : vector<32xf32> to vector<32x1xf32>
    %cst_134 = arith.constant 1.280000e+02 : f32
    %339 = vector.broadcast %cst_134 : f32 to vector<32x1xf32>
    %340 = arith.divf %338, %339 : vector<32x1xf32>
    %cst_135 = arith.constant 9.99999974E-6 : f32
    %341 = vector.broadcast %cst_135 : f32 to vector<32x1xf32>
    %342 = arith.addf %340, %341 : vector<32x1xf32>
    %343 = math.rsqrt %342 : vector<32x1xf32>
    %344 = vector.broadcast %343 : vector<32x1xf32> to vector<32x128xf32>
    %345 = arith.mulf %335, %344 : vector<32x128xf32>
    %346 = vector.broadcast %327 : vector<1x128xf32> to vector<32x128xf32>
    %347 = arith.mulf %345, %346 : vector<32x128xf32>
    %348 = vector.broadcast %329 : vector<1x128xf32> to vector<32x128xf32>
    %349 = arith.addf %347, %348 : vector<32x128xf32>
    %350 = arith.truncf %325 : vector<16x128xf32> to vector<16x128xbf16>
    %c1_136 = arith.constant 1 : index
    %c0_137 = arith.constant 0 : index
    %c0_138 = arith.constant 0 : index
    %351 = vector.load %arg7[%c1_136, %c0_137, %c0_138] : memref<2x128x128xbf16, #tpu.memory_space<vmem>>, vector<1x128x128xbf16>
    %352 = vector.shape_cast %351 : vector<1x128x128xbf16> to vector<128x128xbf16>
    %cst_139 = arith.constant dense<0.000000e+00> : vector<16x128xf32>
    %353 = tpu.matmul %350, %352, %cst_139 {dimension_numbers = #tpu.dot_dimension_numbers<[1], [0], [0], [1], [0, 0, 1, 1], [], []>} : vector<16x128xbf16>, vector<128x128xbf16>, vector<16x128xf32> -> vector<16x128xf32>
    %c1_140 = arith.constant 1 : index
    %c0_141 = arith.constant 0 : index
    %c0_142 = arith.constant 0 : index
    %354 = vector.load %arg8[%c1_140, %c0_141, %c0_142] : memref<2x1x128xf32, #tpu.memory_space<vmem>>, vector<1x1x128xf32>
    %355 = vector.shape_cast %354 : vector<1x1x128xf32> to vector<1x128xf32>
    %356 = vector.broadcast %355 : vector<1x128xf32> to vector<16x128xf32>
    %357 = arith.addf %353, %356 : vector<16x128xf32>
    %358 = arith.truncf %349 : vector<32x128xf32> to vector<32x128xbf16>
    %c1_143 = arith.constant 1 : index
    %c0_144 = arith.constant 0 : index
    %c0_145 = arith.constant 0 : index
    %359 = vector.load %arg9[%c1_143, %c0_144, %c0_145] : memref<2x128x256xbf16, #tpu.memory_space<vmem>>, vector<1x128x256xbf16>
    %360 = vector.shape_cast %359 : vector<1x128x256xbf16> to vector<128x256xbf16>
    %cst_146 = arith.constant dense<0.000000e+00> : vector<32x256xf32>
    %361 = tpu.matmul %358, %360, %cst_146 {dimension_numbers = #tpu.dot_dimension_numbers<[1], [0], [0], [1], [0, 0, 1, 1], [], []>} : vector<32x128xbf16>, vector<128x256xbf16>, vector<32x256xf32> -> vector<32x256xf32>
    %c1_147 = arith.constant 1 : index
    %c0_148 = arith.constant 0 : index
    %c0_149 = arith.constant 0 : index
    %362 = vector.load %arg10[%c1_147, %c0_148, %c0_149] : memref<2x1x256xf32, #tpu.memory_space<vmem>>, vector<1x1x256xf32>
    %363 = vector.shape_cast %362 : vector<1x1x256xf32> to vector<1x256xf32>
    %364 = vector.broadcast %363 : vector<1x256xf32> to vector<32x256xf32>
    %365 = arith.addf %361, %364 : vector<32x256xf32>
    %366 = vector.extract_strided_slice %365 {offsets = [0, 0], sizes = [32, 128], strides = [1, 1]} : vector<32x256xf32> to vector<32x128xf32>
    %367 = vector.extract_strided_slice %365 {offsets = [0, 128], sizes = [32, 128], strides = [1, 1]} : vector<32x256xf32> to vector<32x128xf32>
    %368 = vector.extract_strided_slice %357 {offsets = [0, 0], sizes = [8, 128], strides = [1, 1]} : vector<16x128xf32> to vector<8x128xf32>
    %369 = vector.extract_strided_slice %366 {offsets = [0, 0], sizes = [16, 128], strides = [1, 1]} : vector<32x128xf32> to vector<16x128xf32>
    %370 = vector.extract_strided_slice %367 {offsets = [0, 0], sizes = [16, 128], strides = [1, 1]} : vector<32x128xf32> to vector<16x128xf32>
    %371 = vector.extract_strided_slice %368 {offsets = [0, 0], sizes = [8, 32], strides = [1, 1]} : vector<8x128xf32> to vector<8x32xf32>
    %372 = vector.extract_strided_slice %369 {offsets = [0, 0], sizes = [16, 32], strides = [1, 1]} : vector<16x128xf32> to vector<16x32xf32>
    %373 = vector.extract_strided_slice %370 {offsets = [0, 0], sizes = [16, 32], strides = [1, 1]} : vector<16x128xf32> to vector<16x32xf32>
    %374 = arith.truncf %371 : vector<8x32xf32> to vector<8x32xbf16>
    %375 = arith.truncf %372 : vector<16x32xf32> to vector<16x32xbf16>
    %cst_150 = arith.constant dense<0.000000e+00> : vector<8x16xf32>
    %376 = tpu.matmul %374, %375, %cst_150 {dimension_numbers = #tpu.dot_dimension_numbers<[1], [1], [0], [0], [0, 0, 1, 0], [], []>} : vector<8x32xbf16>, vector<16x32xbf16>, vector<8x16xf32> -> vector<8x16xf32>
    %cst_151 = arith.constant 0.176776692 : f32
    %377 = vector.broadcast %cst_151 : f32 to vector<8x16xf32>
    %378 = arith.mulf %376, %377 : vector<8x16xf32>
    %cst_152 = arith.constant dense<0xFF800000> : vector<8xf32>
    %379 = vector.multi_reduction <maximumf>, %378, %cst_152 [1] : vector<8x16xf32> to vector<8xf32>
    %380 = vector.shape_cast %379 : vector<8xf32> to vector<8x1xf32>
    %381 = vector.broadcast %380 : vector<8x1xf32> to vector<8x16xf32>
    %382 = arith.subf %378, %381 : vector<8x16xf32>
    %383 = math.exp %382 : vector<8x16xf32>
    %cst_153 = arith.constant dense<0.000000e+00> : vector<8xf32>
    %384 = vector.multi_reduction <add>, %383, %cst_153 [1] : vector<8x16xf32> to vector<8xf32>
    %385 = vector.shape_cast %384 : vector<8xf32> to vector<8x1xf32>
    %386 = vector.broadcast %385 : vector<8x1xf32> to vector<8x16xf32>
    %387 = arith.divf %383, %386 : vector<8x16xf32>
    %388 = arith.truncf %387 : vector<8x16xf32> to vector<8x16xbf16>
    %389 = arith.truncf %373 : vector<16x32xf32> to vector<16x32xbf16>
    %cst_154 = arith.constant dense<0.000000e+00> : vector<8x32xf32>
    %390 = tpu.matmul %388, %389, %cst_154 {dimension_numbers = #tpu.dot_dimension_numbers<[1], [0], [0], [1], [0, 0, 1, 1], [], []>} : vector<8x16xbf16>, vector<16x32xbf16>, vector<8x32xf32> -> vector<8x32xf32>
    %391 = vector.extract_strided_slice %368 {offsets = [0, 32], sizes = [8, 32], strides = [1, 1]} : vector<8x128xf32> to vector<8x32xf32>
    %392 = vector.extract_strided_slice %369 {offsets = [0, 32], sizes = [16, 32], strides = [1, 1]} : vector<16x128xf32> to vector<16x32xf32>
    %393 = vector.extract_strided_slice %370 {offsets = [0, 32], sizes = [16, 32], strides = [1, 1]} : vector<16x128xf32> to vector<16x32xf32>
    %394 = arith.truncf %391 : vector<8x32xf32> to vector<8x32xbf16>
    %395 = arith.truncf %392 : vector<16x32xf32> to vector<16x32xbf16>
    %cst_155 = arith.constant dense<0.000000e+00> : vector<8x16xf32>
    %396 = tpu.matmul %394, %395, %cst_155 {dimension_numbers = #tpu.dot_dimension_numbers<[1], [1], [0], [0], [0, 0, 1, 0], [], []>} : vector<8x32xbf16>, vector<16x32xbf16>, vector<8x16xf32> -> vector<8x16xf32>
    %cst_156 = arith.constant 0.176776692 : f32
    %397 = vector.broadcast %cst_156 : f32 to vector<8x16xf32>
    %398 = arith.mulf %396, %397 : vector<8x16xf32>
    %cst_157 = arith.constant dense<0xFF800000> : vector<8xf32>
    %399 = vector.multi_reduction <maximumf>, %398, %cst_157 [1] : vector<8x16xf32> to vector<8xf32>
    %400 = vector.shape_cast %399 : vector<8xf32> to vector<8x1xf32>
    %401 = vector.broadcast %400 : vector<8x1xf32> to vector<8x16xf32>
    %402 = arith.subf %398, %401 : vector<8x16xf32>
    %403 = math.exp %402 : vector<8x16xf32>
    %cst_158 = arith.constant dense<0.000000e+00> : vector<8xf32>
    %404 = vector.multi_reduction <add>, %403, %cst_158 [1] : vector<8x16xf32> to vector<8xf32>
    %405 = vector.shape_cast %404 : vector<8xf32> to vector<8x1xf32>
    %406 = vector.broadcast %405 : vector<8x1xf32> to vector<8x16xf32>
    %407 = arith.divf %403, %406 : vector<8x16xf32>
    %408 = arith.truncf %407 : vector<8x16xf32> to vector<8x16xbf16>
    %409 = arith.truncf %393 : vector<16x32xf32> to vector<16x32xbf16>
    %cst_159 = arith.constant dense<0.000000e+00> : vector<8x32xf32>
    %410 = tpu.matmul %408, %409, %cst_159 {dimension_numbers = #tpu.dot_dimension_numbers<[1], [0], [0], [1], [0, 0, 1, 1], [], []>} : vector<8x16xbf16>, vector<16x32xbf16>, vector<8x32xf32> -> vector<8x32xf32>
    %411 = vector.extract_strided_slice %368 {offsets = [0, 64], sizes = [8, 32], strides = [1, 1]} : vector<8x128xf32> to vector<8x32xf32>
    %412 = vector.extract_strided_slice %369 {offsets = [0, 64], sizes = [16, 32], strides = [1, 1]} : vector<16x128xf32> to vector<16x32xf32>
    %413 = vector.extract_strided_slice %370 {offsets = [0, 64], sizes = [16, 32], strides = [1, 1]} : vector<16x128xf32> to vector<16x32xf32>
    %414 = arith.truncf %411 : vector<8x32xf32> to vector<8x32xbf16>
    %415 = arith.truncf %412 : vector<16x32xf32> to vector<16x32xbf16>
    %cst_160 = arith.constant dense<0.000000e+00> : vector<8x16xf32>
    %416 = tpu.matmul %414, %415, %cst_160 {dimension_numbers = #tpu.dot_dimension_numbers<[1], [1], [0], [0], [0, 0, 1, 0], [], []>} : vector<8x32xbf16>, vector<16x32xbf16>, vector<8x16xf32> -> vector<8x16xf32>
    %cst_161 = arith.constant 0.176776692 : f32
    %417 = vector.broadcast %cst_161 : f32 to vector<8x16xf32>
    %418 = arith.mulf %416, %417 : vector<8x16xf32>
    %cst_162 = arith.constant dense<0xFF800000> : vector<8xf32>
    %419 = vector.multi_reduction <maximumf>, %418, %cst_162 [1] : vector<8x16xf32> to vector<8xf32>
    %420 = vector.shape_cast %419 : vector<8xf32> to vector<8x1xf32>
    %421 = vector.broadcast %420 : vector<8x1xf32> to vector<8x16xf32>
    %422 = arith.subf %418, %421 : vector<8x16xf32>
    %423 = math.exp %422 : vector<8x16xf32>
    %cst_163 = arith.constant dense<0.000000e+00> : vector<8xf32>
    %424 = vector.multi_reduction <add>, %423, %cst_163 [1] : vector<8x16xf32> to vector<8xf32>
    %425 = vector.shape_cast %424 : vector<8xf32> to vector<8x1xf32>
    %426 = vector.broadcast %425 : vector<8x1xf32> to vector<8x16xf32>
    %427 = arith.divf %423, %426 : vector<8x16xf32>
    %428 = arith.truncf %427 : vector<8x16xf32> to vector<8x16xbf16>
    %429 = arith.truncf %413 : vector<16x32xf32> to vector<16x32xbf16>
    %cst_164 = arith.constant dense<0.000000e+00> : vector<8x32xf32>
    %430 = tpu.matmul %428, %429, %cst_164 {dimension_numbers = #tpu.dot_dimension_numbers<[1], [0], [0], [1], [0, 0, 1, 1], [], []>} : vector<8x16xbf16>, vector<16x32xbf16>, vector<8x32xf32> -> vector<8x32xf32>
    %431 = vector.extract_strided_slice %368 {offsets = [0, 96], sizes = [8, 32], strides = [1, 1]} : vector<8x128xf32> to vector<8x32xf32>
    %432 = vector.extract_strided_slice %369 {offsets = [0, 96], sizes = [16, 32], strides = [1, 1]} : vector<16x128xf32> to vector<16x32xf32>
    %433 = vector.extract_strided_slice %370 {offsets = [0, 96], sizes = [16, 32], strides = [1, 1]} : vector<16x128xf32> to vector<16x32xf32>
    %434 = arith.truncf %431 : vector<8x32xf32> to vector<8x32xbf16>
    %435 = arith.truncf %432 : vector<16x32xf32> to vector<16x32xbf16>
    %cst_165 = arith.constant dense<0.000000e+00> : vector<8x16xf32>
    %436 = tpu.matmul %434, %435, %cst_165 {dimension_numbers = #tpu.dot_dimension_numbers<[1], [1], [0], [0], [0, 0, 1, 0], [], []>} : vector<8x32xbf16>, vector<16x32xbf16>, vector<8x16xf32> -> vector<8x16xf32>
    %cst_166 = arith.constant 0.176776692 : f32
    %437 = vector.broadcast %cst_166 : f32 to vector<8x16xf32>
    %438 = arith.mulf %436, %437 : vector<8x16xf32>
    %cst_167 = arith.constant dense<0xFF800000> : vector<8xf32>
    %439 = vector.multi_reduction <maximumf>, %438, %cst_167 [1] : vector<8x16xf32> to vector<8xf32>
    %440 = vector.shape_cast %439 : vector<8xf32> to vector<8x1xf32>
    %441 = vector.broadcast %440 : vector<8x1xf32> to vector<8x16xf32>
    %442 = arith.subf %438, %441 : vector<8x16xf32>
    %443 = math.exp %442 : vector<8x16xf32>
    %cst_168 = arith.constant dense<0.000000e+00> : vector<8xf32>
    %444 = vector.multi_reduction <add>, %443, %cst_168 [1] : vector<8x16xf32> to vector<8xf32>
    %445 = vector.shape_cast %444 : vector<8xf32> to vector<8x1xf32>
    %446 = vector.broadcast %445 : vector<8x1xf32> to vector<8x16xf32>
    %447 = arith.divf %443, %446 : vector<8x16xf32>
    %448 = arith.truncf %447 : vector<8x16xf32> to vector<8x16xbf16>
    %449 = arith.truncf %433 : vector<16x32xf32> to vector<16x32xbf16>
    %cst_169 = arith.constant dense<0.000000e+00> : vector<8x32xf32>
    %450 = tpu.matmul %448, %449, %cst_169 {dimension_numbers = #tpu.dot_dimension_numbers<[1], [0], [0], [1], [0, 0, 1, 1], [], []>} : vector<8x16xbf16>, vector<16x32xbf16>, vector<8x32xf32> -> vector<8x32xf32>
    %451 = tpu.concatenate %390, %410, %430, %450 in 1 : vector<8x32xf32>, vector<8x32xf32>, vector<8x32xf32>, vector<8x32xf32> -> vector<8x128xf32>
    %452 = vector.extract_strided_slice %357 {offsets = [8, 0], sizes = [8, 128], strides = [1, 1]} : vector<16x128xf32> to vector<8x128xf32>
    %453 = vector.extract_strided_slice %366 {offsets = [16, 0], sizes = [16, 128], strides = [1, 1]} : vector<32x128xf32> to vector<16x128xf32>
    %454 = vector.extract_strided_slice %367 {offsets = [16, 0], sizes = [16, 128], strides = [1, 1]} : vector<32x128xf32> to vector<16x128xf32>
    %455 = vector.extract_strided_slice %452 {offsets = [0, 0], sizes = [8, 32], strides = [1, 1]} : vector<8x128xf32> to vector<8x32xf32>
    %456 = vector.extract_strided_slice %453 {offsets = [0, 0], sizes = [16, 32], strides = [1, 1]} : vector<16x128xf32> to vector<16x32xf32>
    %457 = vector.extract_strided_slice %454 {offsets = [0, 0], sizes = [16, 32], strides = [1, 1]} : vector<16x128xf32> to vector<16x32xf32>
    %458 = arith.truncf %455 : vector<8x32xf32> to vector<8x32xbf16>
    %459 = arith.truncf %456 : vector<16x32xf32> to vector<16x32xbf16>
    %cst_170 = arith.constant dense<0.000000e+00> : vector<8x16xf32>
    %460 = tpu.matmul %458, %459, %cst_170 {dimension_numbers = #tpu.dot_dimension_numbers<[1], [1], [0], [0], [0, 0, 1, 0], [], []>} : vector<8x32xbf16>, vector<16x32xbf16>, vector<8x16xf32> -> vector<8x16xf32>
    %cst_171 = arith.constant 0.176776692 : f32
    %461 = vector.broadcast %cst_171 : f32 to vector<8x16xf32>
    %462 = arith.mulf %460, %461 : vector<8x16xf32>
    %cst_172 = arith.constant dense<0xFF800000> : vector<8xf32>
    %463 = vector.multi_reduction <maximumf>, %462, %cst_172 [1] : vector<8x16xf32> to vector<8xf32>
    %464 = vector.shape_cast %463 : vector<8xf32> to vector<8x1xf32>
    %465 = vector.broadcast %464 : vector<8x1xf32> to vector<8x16xf32>
    %466 = arith.subf %462, %465 : vector<8x16xf32>
    %467 = math.exp %466 : vector<8x16xf32>
    %cst_173 = arith.constant dense<0.000000e+00> : vector<8xf32>
    %468 = vector.multi_reduction <add>, %467, %cst_173 [1] : vector<8x16xf32> to vector<8xf32>
    %469 = vector.shape_cast %468 : vector<8xf32> to vector<8x1xf32>
    %470 = vector.broadcast %469 : vector<8x1xf32> to vector<8x16xf32>
    %471 = arith.divf %467, %470 : vector<8x16xf32>
    %472 = arith.truncf %471 : vector<8x16xf32> to vector<8x16xbf16>
    %473 = arith.truncf %457 : vector<16x32xf32> to vector<16x32xbf16>
    %cst_174 = arith.constant dense<0.000000e+00> : vector<8x32xf32>
    %474 = tpu.matmul %472, %473, %cst_174 {dimension_numbers = #tpu.dot_dimension_numbers<[1], [0], [0], [1], [0, 0, 1, 1], [], []>} : vector<8x16xbf16>, vector<16x32xbf16>, vector<8x32xf32> -> vector<8x32xf32>
    %475 = vector.extract_strided_slice %452 {offsets = [0, 32], sizes = [8, 32], strides = [1, 1]} : vector<8x128xf32> to vector<8x32xf32>
    %476 = vector.extract_strided_slice %453 {offsets = [0, 32], sizes = [16, 32], strides = [1, 1]} : vector<16x128xf32> to vector<16x32xf32>
    %477 = vector.extract_strided_slice %454 {offsets = [0, 32], sizes = [16, 32], strides = [1, 1]} : vector<16x128xf32> to vector<16x32xf32>
    %478 = arith.truncf %475 : vector<8x32xf32> to vector<8x32xbf16>
    %479 = arith.truncf %476 : vector<16x32xf32> to vector<16x32xbf16>
    %cst_175 = arith.constant dense<0.000000e+00> : vector<8x16xf32>
    %480 = tpu.matmul %478, %479, %cst_175 {dimension_numbers = #tpu.dot_dimension_numbers<[1], [1], [0], [0], [0, 0, 1, 0], [], []>} : vector<8x32xbf16>, vector<16x32xbf16>, vector<8x16xf32> -> vector<8x16xf32>
    %cst_176 = arith.constant 0.176776692 : f32
    %481 = vector.broadcast %cst_176 : f32 to vector<8x16xf32>
    %482 = arith.mulf %480, %481 : vector<8x16xf32>
    %cst_177 = arith.constant dense<0xFF800000> : vector<8xf32>
    %483 = vector.multi_reduction <maximumf>, %482, %cst_177 [1] : vector<8x16xf32> to vector<8xf32>
    %484 = vector.shape_cast %483 : vector<8xf32> to vector<8x1xf32>
    %485 = vector.broadcast %484 : vector<8x1xf32> to vector<8x16xf32>
    %486 = arith.subf %482, %485 : vector<8x16xf32>
    %487 = math.exp %486 : vector<8x16xf32>
    %cst_178 = arith.constant dense<0.000000e+00> : vector<8xf32>
    %488 = vector.multi_reduction <add>, %487, %cst_178 [1] : vector<8x16xf32> to vector<8xf32>
    %489 = vector.shape_cast %488 : vector<8xf32> to vector<8x1xf32>
    %490 = vector.broadcast %489 : vector<8x1xf32> to vector<8x16xf32>
    %491 = arith.divf %487, %490 : vector<8x16xf32>
    %492 = arith.truncf %491 : vector<8x16xf32> to vector<8x16xbf16>
    %493 = arith.truncf %477 : vector<16x32xf32> to vector<16x32xbf16>
    %cst_179 = arith.constant dense<0.000000e+00> : vector<8x32xf32>
    %494 = tpu.matmul %492, %493, %cst_179 {dimension_numbers = #tpu.dot_dimension_numbers<[1], [0], [0], [1], [0, 0, 1, 1], [], []>} : vector<8x16xbf16>, vector<16x32xbf16>, vector<8x32xf32> -> vector<8x32xf32>
    %495 = vector.extract_strided_slice %452 {offsets = [0, 64], sizes = [8, 32], strides = [1, 1]} : vector<8x128xf32> to vector<8x32xf32>
    %496 = vector.extract_strided_slice %453 {offsets = [0, 64], sizes = [16, 32], strides = [1, 1]} : vector<16x128xf32> to vector<16x32xf32>
    %497 = vector.extract_strided_slice %454 {offsets = [0, 64], sizes = [16, 32], strides = [1, 1]} : vector<16x128xf32> to vector<16x32xf32>
    %498 = arith.truncf %495 : vector<8x32xf32> to vector<8x32xbf16>
    %499 = arith.truncf %496 : vector<16x32xf32> to vector<16x32xbf16>
    %cst_180 = arith.constant dense<0.000000e+00> : vector<8x16xf32>
    %500 = tpu.matmul %498, %499, %cst_180 {dimension_numbers = #tpu.dot_dimension_numbers<[1], [1], [0], [0], [0, 0, 1, 0], [], []>} : vector<8x32xbf16>, vector<16x32xbf16>, vector<8x16xf32> -> vector<8x16xf32>
    %cst_181 = arith.constant 0.176776692 : f32
    %501 = vector.broadcast %cst_181 : f32 to vector<8x16xf32>
    %502 = arith.mulf %500, %501 : vector<8x16xf32>
    %cst_182 = arith.constant dense<0xFF800000> : vector<8xf32>
    %503 = vector.multi_reduction <maximumf>, %502, %cst_182 [1] : vector<8x16xf32> to vector<8xf32>
    %504 = vector.shape_cast %503 : vector<8xf32> to vector<8x1xf32>
    %505 = vector.broadcast %504 : vector<8x1xf32> to vector<8x16xf32>
    %506 = arith.subf %502, %505 : vector<8x16xf32>
    %507 = math.exp %506 : vector<8x16xf32>
    %cst_183 = arith.constant dense<0.000000e+00> : vector<8xf32>
    %508 = vector.multi_reduction <add>, %507, %cst_183 [1] : vector<8x16xf32> to vector<8xf32>
    %509 = vector.shape_cast %508 : vector<8xf32> to vector<8x1xf32>
    %510 = vector.broadcast %509 : vector<8x1xf32> to vector<8x16xf32>
    %511 = arith.divf %507, %510 : vector<8x16xf32>
    %512 = arith.truncf %511 : vector<8x16xf32> to vector<8x16xbf16>
    %513 = arith.truncf %497 : vector<16x32xf32> to vector<16x32xbf16>
    %cst_184 = arith.constant dense<0.000000e+00> : vector<8x32xf32>
    %514 = tpu.matmul %512, %513, %cst_184 {dimension_numbers = #tpu.dot_dimension_numbers<[1], [0], [0], [1], [0, 0, 1, 1], [], []>} : vector<8x16xbf16>, vector<16x32xbf16>, vector<8x32xf32> -> vector<8x32xf32>
    %515 = vector.extract_strided_slice %452 {offsets = [0, 96], sizes = [8, 32], strides = [1, 1]} : vector<8x128xf32> to vector<8x32xf32>
    %516 = vector.extract_strided_slice %453 {offsets = [0, 96], sizes = [16, 32], strides = [1, 1]} : vector<16x128xf32> to vector<16x32xf32>
    %517 = vector.extract_strided_slice %454 {offsets = [0, 96], sizes = [16, 32], strides = [1, 1]} : vector<16x128xf32> to vector<16x32xf32>
    %518 = arith.truncf %515 : vector<8x32xf32> to vector<8x32xbf16>
    %519 = arith.truncf %516 : vector<16x32xf32> to vector<16x32xbf16>
    %cst_185 = arith.constant dense<0.000000e+00> : vector<8x16xf32>
    %520 = tpu.matmul %518, %519, %cst_185 {dimension_numbers = #tpu.dot_dimension_numbers<[1], [1], [0], [0], [0, 0, 1, 0], [], []>} : vector<8x32xbf16>, vector<16x32xbf16>, vector<8x16xf32> -> vector<8x16xf32>
    %cst_186 = arith.constant 0.176776692 : f32
    %521 = vector.broadcast %cst_186 : f32 to vector<8x16xf32>
    %522 = arith.mulf %520, %521 : vector<8x16xf32>
    %cst_187 = arith.constant dense<0xFF800000> : vector<8xf32>
    %523 = vector.multi_reduction <maximumf>, %522, %cst_187 [1] : vector<8x16xf32> to vector<8xf32>
    %524 = vector.shape_cast %523 : vector<8xf32> to vector<8x1xf32>
    %525 = vector.broadcast %524 : vector<8x1xf32> to vector<8x16xf32>
    %526 = arith.subf %522, %525 : vector<8x16xf32>
    %527 = math.exp %526 : vector<8x16xf32>
    %cst_188 = arith.constant dense<0.000000e+00> : vector<8xf32>
    %528 = vector.multi_reduction <add>, %527, %cst_188 [1] : vector<8x16xf32> to vector<8xf32>
    %529 = vector.shape_cast %528 : vector<8xf32> to vector<8x1xf32>
    %530 = vector.broadcast %529 : vector<8x1xf32> to vector<8x16xf32>
    %531 = arith.divf %527, %530 : vector<8x16xf32>
    %532 = arith.truncf %531 : vector<8x16xf32> to vector<8x16xbf16>
    %533 = arith.truncf %517 : vector<16x32xf32> to vector<16x32xbf16>
    %cst_189 = arith.constant dense<0.000000e+00> : vector<8x32xf32>
    %534 = tpu.matmul %532, %533, %cst_189 {dimension_numbers = #tpu.dot_dimension_numbers<[1], [0], [0], [1], [0, 0, 1, 1], [], []>} : vector<8x16xbf16>, vector<16x32xbf16>, vector<8x32xf32> -> vector<8x32xf32>
    %535 = tpu.concatenate %474, %494, %514, %534 in 1 : vector<8x32xf32>, vector<8x32xf32>, vector<8x32xf32>, vector<8x32xf32> -> vector<8x128xf32>
    %536 = tpu.concatenate %451, %535 in 0 : vector<8x128xf32>, vector<8x128xf32> -> vector<16x128xf32>
    %537 = arith.truncf %536 : vector<16x128xf32> to vector<16x128xbf16>
    %c1_190 = arith.constant 1 : index
    %c0_191 = arith.constant 0 : index
    %c0_192 = arith.constant 0 : index
    %538 = vector.load %arg11[%c1_190, %c0_191, %c0_192] : memref<2x128x128xbf16, #tpu.memory_space<vmem>>, vector<1x128x128xbf16>
    %539 = vector.shape_cast %538 : vector<1x128x128xbf16> to vector<128x128xbf16>
    %cst_193 = arith.constant dense<0.000000e+00> : vector<16x128xf32>
    %540 = tpu.matmul %537, %539, %cst_193 {dimension_numbers = #tpu.dot_dimension_numbers<[1], [0], [0], [1], [0, 0, 1, 1], [], []>} : vector<16x128xbf16>, vector<128x128xbf16>, vector<16x128xf32> -> vector<16x128xf32>
    %541 = arith.addf %301, %540 : vector<16x128xf32>
    %c1_194 = arith.constant 1 : index
    %c0_195 = arith.constant 0 : index
    %c0_196 = arith.constant 0 : index
    %542 = vector.load %arg12[%c1_194, %c0_195, %c0_196] : memref<2x1x128xf32, #tpu.memory_space<vmem>>, vector<1x1x128xf32>
    %543 = vector.shape_cast %542 : vector<1x1x128xf32> to vector<1x128xf32>
    %544 = vector.broadcast %543 : vector<1x128xf32> to vector<16x128xf32>
    %545 = arith.addf %541, %544 : vector<16x128xf32>
    %c1_197 = arith.constant 1 : index
    %c0_198 = arith.constant 0 : index
    %c0_199 = arith.constant 0 : index
    %546 = vector.load %arg13[%c1_197, %c0_198, %c0_199] : memref<2x1x128xf32, #tpu.memory_space<vmem>>, vector<1x1x128xf32>
    %547 = vector.shape_cast %546 : vector<1x1x128xf32> to vector<1x128xf32>
    %c1_200 = arith.constant 1 : index
    %c0_201 = arith.constant 0 : index
    %c0_202 = arith.constant 0 : index
    %548 = vector.load %arg14[%c1_200, %c0_201, %c0_202] : memref<2x1x128xf32, #tpu.memory_space<vmem>>, vector<1x1x128xf32>
    %549 = vector.shape_cast %548 : vector<1x1x128xf32> to vector<1x128xf32>
    %cst_203 = arith.constant dense<0.000000e+00> : vector<16xf32>
    %550 = vector.multi_reduction <add>, %545, %cst_203 [1] : vector<16x128xf32> to vector<16xf32>
    %551 = vector.shape_cast %550 : vector<16xf32> to vector<16x1xf32>
    %cst_204 = arith.constant 1.280000e+02 : f32
    %552 = vector.broadcast %cst_204 : f32 to vector<16x1xf32>
    %553 = arith.divf %551, %552 : vector<16x1xf32>
    %554 = vector.broadcast %553 : vector<16x1xf32> to vector<16x128xf32>
    %555 = arith.subf %545, %554 : vector<16x128xf32>
    %556 = arith.mulf %555, %555 : vector<16x128xf32>
    %cst_205 = arith.constant dense<0.000000e+00> : vector<16xf32>
    %557 = vector.multi_reduction <add>, %556, %cst_205 [1] : vector<16x128xf32> to vector<16xf32>
    %558 = vector.shape_cast %557 : vector<16xf32> to vector<16x1xf32>
    %cst_206 = arith.constant 1.280000e+02 : f32
    %559 = vector.broadcast %cst_206 : f32 to vector<16x1xf32>
    %560 = arith.divf %558, %559 : vector<16x1xf32>
    %cst_207 = arith.constant 9.99999974E-6 : f32
    %561 = vector.broadcast %cst_207 : f32 to vector<16x1xf32>
    %562 = arith.addf %560, %561 : vector<16x1xf32>
    %563 = math.rsqrt %562 : vector<16x1xf32>
    %564 = vector.broadcast %563 : vector<16x1xf32> to vector<16x128xf32>
    %565 = arith.mulf %555, %564 : vector<16x128xf32>
    %566 = vector.broadcast %547 : vector<1x128xf32> to vector<16x128xf32>
    %567 = arith.mulf %565, %566 : vector<16x128xf32>
    %568 = vector.broadcast %549 : vector<1x128xf32> to vector<16x128xf32>
    %569 = arith.addf %567, %568 : vector<16x128xf32>
    %570 = arith.truncf %569 : vector<16x128xf32> to vector<16x128xbf16>
    %c1_208 = arith.constant 1 : index
    %c0_209 = arith.constant 0 : index
    %c0_210 = arith.constant 0 : index
    %571 = vector.load %arg15[%c1_208, %c0_209, %c0_210] : memref<2x128x512xbf16, #tpu.memory_space<vmem>>, vector<1x128x512xbf16>
    %572 = vector.shape_cast %571 : vector<1x128x512xbf16> to vector<128x512xbf16>
    %cst_211 = arith.constant dense<0.000000e+00> : vector<16x512xf32>
    %573 = tpu.matmul %570, %572, %cst_211 {dimension_numbers = #tpu.dot_dimension_numbers<[1], [0], [0], [1], [0, 0, 1, 1], [], []>} : vector<16x128xbf16>, vector<128x512xbf16>, vector<16x512xf32> -> vector<16x512xf32>
    %c1_212 = arith.constant 1 : index
    %c0_213 = arith.constant 0 : index
    %c0_214 = arith.constant 0 : index
    %574 = vector.load %arg16[%c1_212, %c0_213, %c0_214] : memref<2x1x512xf32, #tpu.memory_space<vmem>>, vector<1x1x512xf32>
    %575 = vector.shape_cast %574 : vector<1x1x512xf32> to vector<1x512xf32>
    %576 = vector.broadcast %575 : vector<1x512xf32> to vector<16x512xf32>
    %577 = arith.addf %573, %576 : vector<16x512xf32>
    %578 = arith.mulf %577, %577 : vector<16x512xf32>
    %579 = arith.mulf %577, %578 : vector<16x512xf32>
    %cst_215 = arith.constant 4.471500e-02 : f32
    %580 = vector.broadcast %cst_215 : f32 to vector<16x512xf32>
    %581 = arith.mulf %580, %579 : vector<16x512xf32>
    %582 = arith.addf %577, %581 : vector<16x512xf32>
    %cst_216 = arith.constant 0.797884583 : f32
    %583 = vector.broadcast %cst_216 : f32 to vector<16x512xf32>
    %584 = arith.mulf %583, %582 : vector<16x512xf32>
    %585 = math.tanh %584 : vector<16x512xf32>
    %cst_217 = arith.constant 1.000000e+00 : f32
    %586 = vector.broadcast %cst_217 : f32 to vector<16x512xf32>
    %587 = arith.addf %586, %585 : vector<16x512xf32>
    %cst_218 = arith.constant 5.000000e-01 : f32
    %588 = vector.broadcast %cst_218 : f32 to vector<16x512xf32>
    %589 = arith.mulf %588, %587 : vector<16x512xf32>
    %590 = arith.mulf %577, %589 : vector<16x512xf32>
    %591 = arith.truncf %590 : vector<16x512xf32> to vector<16x512xbf16>
    %c1_219 = arith.constant 1 : index
    %c0_220 = arith.constant 0 : index
    %c0_221 = arith.constant 0 : index
    %592 = vector.load %arg17[%c1_219, %c0_220, %c0_221] : memref<2x512x128xbf16, #tpu.memory_space<vmem>>, vector<1x512x128xbf16>
    %593 = vector.shape_cast %592 : vector<1x512x128xbf16> to vector<512x128xbf16>
    %cst_222 = arith.constant dense<0.000000e+00> : vector<16x128xf32>
    %594 = tpu.matmul %591, %593, %cst_222 {dimension_numbers = #tpu.dot_dimension_numbers<[1], [0], [0], [1], [0, 0, 1, 1], [], []>} : vector<16x512xbf16>, vector<512x128xbf16>, vector<16x128xf32> -> vector<16x128xf32>
    %595 = arith.addf %545, %594 : vector<16x128xf32>
    %c1_223 = arith.constant 1 : index
    %c0_224 = arith.constant 0 : index
    %c0_225 = arith.constant 0 : index
    %596 = vector.load %arg18[%c1_223, %c0_224, %c0_225] : memref<2x1x128xf32, #tpu.memory_space<vmem>>, vector<1x1x128xf32>
    %597 = vector.shape_cast %596 : vector<1x1x128xf32> to vector<1x128xf32>
    %598 = vector.broadcast %597 : vector<1x128xf32> to vector<16x128xf32>
    %599 = arith.addf %595, %598 : vector<16x128xf32>
    %600 = arith.truncf %599 : vector<16x128xf32> to vector<16x128xbf16>
    %c0_226 = arith.constant 0 : index
    %c0_227 = arith.constant 0 : index
    %601 = vector.load %arg19[%c0_226, %c0_227] : memref<128x128xbf16, #tpu.memory_space<vmem>>, vector<128x128xbf16>
    %cst_228 = arith.constant dense<0.000000e+00> : vector<16x128xf32>
    %602 = tpu.matmul %600, %601, %cst_228 {dimension_numbers = #tpu.dot_dimension_numbers<[1], [0], [0], [1], [0, 0, 1, 1], [], []>} : vector<16x128xbf16>, vector<128x128xbf16>, vector<16x128xf32> -> vector<16x128xf32>
    %c0_229 = arith.constant 0 : index
    %c0_230 = arith.constant 0 : index
    %603 = vector.load %arg20[%c0_229, %c0_230] : memref<1x128xf32, #tpu.memory_space<vmem>>, vector<1x128xf32>
    %604 = vector.broadcast %603 : vector<1x128xf32> to vector<16x128xf32>
    %605 = arith.addf %602, %604 : vector<16x128xf32>
    %606 = arith.truncf %605 : vector<16x128xf32> to vector<16x128xbf16>
    %c0_231 = arith.constant 0 : index
    %c0_232 = arith.constant 0 : index
    %607 = vector.load %arg21[%c0_231, %c0_232] : memref<128x256xbf16, #tpu.memory_space<vmem>>, vector<128x256xbf16>
    %cst_233 = arith.constant dense<0.000000e+00> : vector<16x256xf32>
    %608 = tpu.matmul %606, %607, %cst_233 {dimension_numbers = #tpu.dot_dimension_numbers<[1], [0], [0], [1], [0, 0, 1, 1], [], []>} : vector<16x128xbf16>, vector<128x256xbf16>, vector<16x256xf32> -> vector<16x256xf32>
    %c0_234 = arith.constant 0 : index
    %c0_235 = arith.constant 0 : index
    %609 = vector.load %arg22[%c0_234, %c0_235] : memref<1x256xf32, #tpu.memory_space<vmem>>, vector<1x256xf32>
    %610 = vector.broadcast %609 : vector<1x256xf32> to vector<16x256xf32>
    %611 = arith.addf %608, %610 : vector<16x256xf32>
    %612 = vector.extract_strided_slice %611 {offsets = [0, 0], sizes = [16, 128], strides = [1, 1]} : vector<16x256xf32> to vector<16x128xf32>
    %613 = vector.shape_cast %612 : vector<16x128xf32> to vector<2x8x128xf32>
    %c0_236 = arith.constant 0 : index
    %c0_237 = arith.constant 0 : index
    %c0_238 = arith.constant 0 : index
    %614 = vector.load %arg23[%c0_236, %c0_237, %c0_238] : memref<2x8x128xf32, #tpu.memory_space<vmem>>, vector<2x8x128xf32>
    tpu.vector_store %arg23[%c0_236, %c0_237, %c0_238], %613 {strides = array<i32>} : memref<2x8x128xf32, #tpu.memory_space<vmem>>, vector<2x8x128xf32>,
    %615 = vector.extract_strided_slice %611 {offsets = [0, 128], sizes = [16, 128], strides = [1, 1]} : vector<16x256xf32> to vector<16x128xf32>
    %cst_239 = arith.constant 5.000000e-01 : f32
    %616 = vector.broadcast %cst_239 : f32 to vector<16x128xf32>
    %617 = arith.mulf %615, %616 : vector<16x128xf32>
    %618 = arith.negf %617 : vector<16x128xf32>
    %619 = math.exp %618 : vector<16x128xf32>
    %cst_240 = arith.constant 1.000000e+00 : f32
    %620 = vector.broadcast %cst_240 : f32 to vector<16x128xf32>
    %621 = arith.addf %620, %619 : vector<16x128xf32>
    %622 = arith.divf %620, %621 : vector<16x128xf32>
    %cst_241 = arith.constant 2.000000e+00 : f32
    %623 = vector.broadcast %cst_241 : f32 to vector<16x128xf32>
    %624 = arith.mulf %623, %622 : vector<16x128xf32>
    %cst_242 = arith.constant 1.000000e-01 : f32
    %625 = vector.broadcast %cst_242 : f32 to vector<16x128xf32>
    %626 = arith.addf %624, %625 : vector<16x128xf32>
    %627 = vector.shape_cast %626 : vector<16x128xf32> to vector<2x8x128xf32>
    %c0_243 = arith.constant 0 : index
    %c0_244 = arith.constant 0 : index
    %c0_245 = arith.constant 0 : index
    %628 = vector.load %arg24[%c0_243, %c0_244, %c0_245] : memref<2x8x128xf32, #tpu.memory_space<vmem>>, vector<2x8x128xf32>
    tpu.vector_store %arg24[%c0_243, %c0_244, %c0_245], %627 {strides = array<i32>} : memref<2x8x128xf32, #tpu.memory_space<vmem>>, vector<2x8x128xf32>,
    return
  }
  func.func @transform_0(%arg0: i32) -> (i32, i32, i32) {
    %c0_i32 = arith.constant 0 : i32
    %c0_i32_0 = arith.constant 0 : i32
    %c0_i32_1 = arith.constant 0 : i32
    return %arg0, %c0_i32, %c0_i32_0 : i32, i32, i32
  }
  func.func @transform_1(%arg0: i32) -> (i32, i32) {
    %c0_i32 = arith.constant 0 : i32
    %c0_i32_0 = arith.constant 0 : i32
    %c0_i32_1 = arith.constant 0 : i32
    return %c0_i32, %c0_i32_0 : i32, i32
  }
  func.func @transform_2(%arg0: i32) -> (i32, i32, i32) {
    %c0_i32 = arith.constant 0 : i32
    %c0_i32_0 = arith.constant 0 : i32
    %c0_i32_1 = arith.constant 0 : i32
    %c0_i32_2 = arith.constant 0 : i32
    return %c0_i32, %c0_i32_0, %c0_i32_1 : i32, i32, i32
  }
  func.func @transform_3(%arg0: i32) -> (i32, i32, i32) {
    %c0_i32 = arith.constant 0 : i32
    %c0_i32_0 = arith.constant 0 : i32
    %c0_i32_1 = arith.constant 0 : i32
    %c0_i32_2 = arith.constant 0 : i32
    return %c0_i32, %c0_i32_0, %c0_i32_1 : i32, i32, i32
  }
  func.func @transform_4(%arg0: i32) -> (i32, i32, i32) {
    %c0_i32 = arith.constant 0 : i32
    %c0_i32_0 = arith.constant 0 : i32
    %c0_i32_1 = arith.constant 0 : i32
    %c0_i32_2 = arith.constant 0 : i32
    return %c0_i32, %c0_i32_0, %c0_i32_1 : i32, i32, i32
  }
  func.func @transform_5(%arg0: i32) -> (i32, i32, i32) {
    %c0_i32 = arith.constant 0 : i32
    %c0_i32_0 = arith.constant 0 : i32
    %c0_i32_1 = arith.constant 0 : i32
    %c0_i32_2 = arith.constant 0 : i32
    return %c0_i32, %c0_i32_0, %c0_i32_1 : i32, i32, i32
  }
  func.func @transform_6(%arg0: i32) -> (i32, i32, i32) {
    %c0_i32 = arith.constant 0 : i32
    %c0_i32_0 = arith.constant 0 : i32
    %c0_i32_1 = arith.constant 0 : i32
    %c0_i32_2 = arith.constant 0 : i32
    return %c0_i32, %c0_i32_0, %c0_i32_1 : i32, i32, i32
  }
  func.func @transform_7(%arg0: i32) -> (i32, i32, i32) {
    %c0_i32 = arith.constant 0 : i32
    %c0_i32_0 = arith.constant 0 : i32
    %c0_i32_1 = arith.constant 0 : i32
    %c0_i32_2 = arith.constant 0 : i32
    return %c0_i32, %c0_i32_0, %c0_i32_1 : i32, i32, i32
  }
  func.func @transform_8(%arg0: i32) -> (i32, i32, i32) {
    %c0_i32 = arith.constant 0 : i32
    %c0_i32_0 = arith.constant 0 : i32
    %c0_i32_1 = arith.constant 0 : i32
    %c0_i32_2 = arith.constant 0 : i32
    return %c0_i32, %c0_i32_0, %c0_i32_1 : i32, i32, i32
  }
  func.func @transform_9(%arg0: i32) -> (i32, i32, i32) {
    %c0_i32 = arith.constant 0 : i32
    %c0_i32_0 = arith.constant 0 : i32
    %c0_i32_1 = arith.constant 0 : i32
    %c0_i32_2 = arith.constant 0 : i32
    return %c0_i32, %c0_i32_0, %c0_i32_1 : i32, i32, i32
  }
  func.func @transform_10(%arg0: i32) -> (i32, i32, i32) {
    %c0_i32 = arith.constant 0 : i32
    %c0_i32_0 = arith.constant 0 : i32
    %c0_i32_1 = arith.constant 0 : i32
    %c0_i32_2 = arith.constant 0 : i32
    return %c0_i32, %c0_i32_0, %c0_i32_1 : i32, i32, i32
  }
  func.func @transform_11(%arg0: i32) -> (i32, i32, i32) {
    %c0_i32 = arith.constant 0 : i32
    %c0_i32_0 = arith.constant 0 : i32
    %c0_i32_1 = arith.constant 0 : i32
    %c0_i32_2 = arith.constant 0 : i32
    return %c0_i32, %c0_i32_0, %c0_i32_1 : i32, i32, i32
  }
  func.func @transform_12(%arg0: i32) -> (i32, i32, i32) {
    %c0_i32 = arith.constant 0 : i32
    %c0_i32_0 = arith.constant 0 : i32
    %c0_i32_1 = arith.constant 0 : i32
    %c0_i32_2 = arith.constant 0 : i32
    return %c0_i32, %c0_i32_0, %c0_i32_1 : i32, i32, i32
  }
  func.func @transform_13(%arg0: i32) -> (i32, i32, i32) {
    %c0_i32 = arith.constant 0 : i32
    %c0_i32_0 = arith.constant 0 : i32
    %c0_i32_1 = arith.constant 0 : i32
    %c0_i32_2 = arith.constant 0 : i32
    return %c0_i32, %c0_i32_0, %c0_i32_1 : i32, i32, i32
  }
  func.func @transform_14(%arg0: i32) -> (i32, i32, i32) {
    %c0_i32 = arith.constant 0 : i32
    %c0_i32_0 = arith.constant 0 : i32
    %c0_i32_1 = arith.constant 0 : i32
    %c0_i32_2 = arith.constant 0 : i32
    return %c0_i32, %c0_i32_0, %c0_i32_1 : i32, i32, i32
  }
  func.func @transform_15(%arg0: i32) -> (i32, i32, i32) {
    %c0_i32 = arith.constant 0 : i32
    %c0_i32_0 = arith.constant 0 : i32
    %c0_i32_1 = arith.constant 0 : i32
    %c0_i32_2 = arith.constant 0 : i32
    return %c0_i32, %c0_i32_0, %c0_i32_1 : i32, i32, i32
  }
  func.func @transform_16(%arg0: i32) -> (i32, i32, i32) {
    %c0_i32 = arith.constant 0 : i32
    %c0_i32_0 = arith.constant 0 : i32
    %c0_i32_1 = arith.constant 0 : i32
    %c0_i32_2 = arith.constant 0 : i32
    return %c0_i32, %c0_i32_0, %c0_i32_1 : i32, i32, i32
  }
  func.func @transform_17(%arg0: i32) -> (i32, i32, i32) {
    %c0_i32 = arith.constant 0 : i32
    %c0_i32_0 = arith.constant 0 : i32
    %c0_i32_1 = arith.constant 0 : i32
    %c0_i32_2 = arith.constant 0 : i32
    return %c0_i32, %c0_i32_0, %c0_i32_1 : i32, i32, i32
  }
  func.func @transform_18(%arg0: i32) -> (i32, i32) {
    %c0_i32 = arith.constant 0 : i32
    %c0_i32_0 = arith.constant 0 : i32
    %c0_i32_1 = arith.constant 0 : i32
    return %c0_i32, %c0_i32_0 : i32, i32
  }
  func.func @transform_19(%arg0: i32) -> (i32, i32) {
    %c0_i32 = arith.constant 0 : i32
    %c0_i32_0 = arith.constant 0 : i32
    %c0_i32_1 = arith.constant 0 : i32
    return %c0_i32, %c0_i32_0 : i32, i32
  }
  func.func @transform_20(%arg0: i32) -> (i32, i32) {
    %c0_i32 = arith.constant 0 : i32
    %c0_i32_0 = arith.constant 0 : i32
    %c0_i32_1 = arith.constant 0 : i32
    return %c0_i32, %c0_i32_0 : i32, i32
  }
  func.func @transform_21(%arg0: i32) -> (i32, i32) {
    %c0_i32 = arith.constant 0 : i32
    %c0_i32_0 = arith.constant 0 : i32
    %c0_i32_1 = arith.constant 0 : i32
    return %c0_i32, %c0_i32_0 : i32, i32
  }
  func.func @transform_22(%arg0: i32) -> (i32, i32, i32) {
    %c0_i32 = arith.constant 0 : i32
    %c0_i32_0 = arith.constant 0 : i32
    %c0_i32_1 = arith.constant 0 : i32
    return %arg0, %c0_i32, %c0_i32_0 : i32, i32, i32
  }
  func.func @transform_23(%arg0: i32) -> (i32, i32, i32) {
    %c0_i32 = arith.constant 0 : i32
    %c0_i32_0 = arith.constant 0 : i32
    %c0_i32_1 = arith.constant 0 : i32
    return %arg0, %c0_i32, %c0_i32_0 : i32, i32, i32
  }
}

</mosaic_0001>

<bundles_post_ra>
// kernel: latent_world_model_forward.3
= control target key start
LH: loop header
LB: loop body
LE: loop exit
PB: predicated region body
PF: predicated region fallthrough
CT: control target
= control target key end

     0   :  { %s8480_s0 = inlined_call_operand.vmem [shape: f32[2,22,128], index: 0, kind: input, shape index: {}]   ;;  %s8481_s1 = inlined_call_operand.vmem [shape: f32[2,22,22], index: 1, kind: input, shape index: {}]   ;;  %s8482_s2 = inlined_call_operand.vmem [shape: f32[1,128], index: 2, kind: input, shape index: {}]   ;;  %s8483_s3 = inlined_call_operand.vmem [shape: f32[1,128], index: 3, kind: input, shape index: {}]   ;;  %s8484_s4 = inlined_call_operand.vmem [shape: f32[22,128], index: 4, kind: input, shape index: {}]   ;;  %s8485_s5 = inlined_call_operand.vmem [shape: f32[2,1,128], index: 5, kind: input, shape index: {}]   ;;  %s8486_s6 = inlined_call_operand.vmem [shape: f32[2,1,128], index: 6, kind: input, shape index: {}]   ;;  %s8487_s7 = inlined_call_operand.vmem [shape: bf16[2,128,384], index: 7, kind: input, shape index: {}]   ;;  %s8488_s8 = inlined_call_operand.vmem [shape: f32[2,1,384], index: 8, kind: input, shape index: {}]   ;;  %s8489_s9 = inlined_call_operand.vmem [shape: bf16[2,128,128], index: 9, kind: input, shape index: {}]   ;;  %s8490_s10 = inlined_call_operand.vmem [shape: f32[2,1,128], index: 10, kind: input, shape index: {}]   ;;  %s8491_s11 = inlined_call_operand.vmem [shape: f32[2,1,128], index: 11, kind: input, shape index: {}]   ;;  %s8492_s12 = inlined_call_operand.vmem [shape: f32[2,1,128], index: 12, kind: input, shape index: {}]   ;;  %s8493_s13 = inlined_call_operand.vmem [shape: bf16[2,128,512], index: 13, kind: input, shape index: {}]   ;;  %s8494_s14 = inlined_call_operand.vmem [shape: f32[2,1,512], index: 14, kind: input, shape index: {}]   ;;  %s8495_s15 = inlined_call_operand.vmem [shape: bf16[2,512,128], index: 15, kind: input, shape index: {}]   ;;  %s8496_s16 = inlined_call_operand.vmem [shape: f32[2,1,128], index: 16, kind: input, shape index: {}]   ;;  %s8497_s17 = inlined_call_operand.vmem [shape: f32[1,128], index: 17, kind: input, shape index: {}]   ;;  %s8498_s18 = inlined_call_operand.vmem [shape: f32[1,128], index: 18, kind: input, shape index: {}]   ;;  %s8499_s19 = inlined_call_operand.vmem [shape: bf16[128,128], index: 19, kind: input, shape index: {}]   ;;  %s8500_s20 = inlined_call_operand.vmem [shape: f32[1,128], index: 20, kind: input, shape index: {}]   ;;  %s8501_s21 = inlined_call_operand.vmem [shape: bf16[128,256], index: 21, kind: input, shape index: {}]   ;;  %s8502_s22 = inlined_call_operand.vmem [shape: f32[1,256], index: 22, kind: input, shape index: {}]   ;;  %s8503_s23 = inlined_call_operand.vmem [shape: f32[2,22,128], index: 23, kind: output, shape index: {0}]   ;;  %s8504_s24 = inlined_call_operand.vmem [shape: f32[2,22,128], index: 24, kind: output, shape index: {1}]  }
   0x1   :  { %8520 = sst [smem:[#allocation4_spill]] %s8480_s0 }
   0x2   :  { %8521 = sst [smem:[#allocation5_spill]] %s8481_s1 }
   0x3   :  { %8522 = sst [smem:[#allocation6_spill]] %s8482_s2 }
   0x4   :  { %8523 = sst [smem:[#allocation7_spill]] %s8483_s3 }
   0x5   :  { %8524 = sst [smem:[#allocation8_spill]] %s8484_s4 }
   0x6   :  { %8525 = sst [smem:[#allocation9_spill]] %s8485_s5  ;;  %s6969_s5 = smov 0  }
   0x7   :  { %8526 = sst [smem:[#allocation10_spill]] %s8486_s6 }
   0x8   :  { %8527 = sst [smem:[#allocation11_spill]] %s8487_s7 }
   0x9   :  { %8528 = sst [smem:[#allocation12_spill]] %s8488_s8 }
   0xa   :  { %8529 = sst [smem:[#allocation13_spill]] %s8500_s20 }
   0xb   :  { %8530 = sst [smem:[#allocation14_spill]] %s8502_s22 }
   0xc   :  { %8531 = sst [smem:[#allocation15_spill]] %s8503_s23 }
   0xd   :  { %8532 = sst [smem:[#allocation16_spill]] %s8504_s24 }
   0xe LB: > { %8533 = sst [smem:[#allocation2_spill]] %s6838_s5  ;;  %s5413_s26 = sadd.s32 4294967295, %s6838_s5   ;;  %s6838_s5 = sphi %s6969_s5, %s35_s5  }
   0xf   : > { %p5417_p0 = scmp.ge.s32.totalorder %s6838_s5, 1  ;;  %p675_p1 = scmp.lt.s32.totalorder %s6838_s5, 3 }
  0x11   : > { %p676_p2 = pnand %p5417_p0, %p675_p1 }
  0x13   : > { %679 = sbr.rel (%p676_p2) target bundleno = 8803 (0x2263), region = 112 }
  0x1a   : > { %p751_p3 = scmp.lt.s32.totalorder %s5413_s26, 1  ;;  %vm784_vm0 = vcmask 1045504   ;;  %s8535_s2 = sld [smem:[#allocation4_spill]]  ;;  %vm1178_vm1 = vcmask 261120   ;;  %vm1290_vm2 = vcmask 1042432   ;;  %vm1245_vm3 = vcmask 179200  }
  0x1b   : > { %s8536_s30 = sld [smem:[#allocation6_spill]]  ;;  %s8537_s8 = sld [smem:[#allocation7_spill]]  ;;  %vm1252_vm4 = vcmask 177152   ;;  %vm1900_vm5 = vcmask 523264   ;;  %vm1904_vm6 = vcmask 785408  }
  0x1c   : > { %s8554_s26 = smov (!%p751_p3, %s5413_s26), 1  ;;  %s8540_s1 = sld [smem:[#allocation9_spill]] }
  0x1d   : > { %s6977_s27 = smul.u32 24, %s8554_s26  ;;  %s8538_s26 = sld [smem:[#allocation8_spill]] }
  0x1e   : > { %s8542_s7 = sld [smem:[#allocation12_spill]]  ;;  %s8510_s28 = smov 96  }
  0x1f   : > { %8534 = sst [smem:[#allocation3_spill]] %s6977_s27  ;;  %s8512_s6 = smov 64  }
  0x20   : > { %s755_s29 = scalar_lea.vmem %s8535_s2, %s6977_s27  ;;  %s8541_s2 = sld [smem:[#allocation10_spill]] }
  0x21   : > { %v775_v0 = vld [vmem:[%s755_s29] sm:$0xff]  ;;  %v777_v1 = vld [vmem:[%s755_s29 + $0x10] sm:$0x3f]  ;;  %v776_v2 = vld [vmem:[%s755_s29 + $0x8] sm:$0xff]  ;;  %s8514_s29 = smov 32   ;;  %s8545_s3 = smov 64  }
  0x22   : > { %780 = vadd.xlane.f32.xlu0 %v775_v0  ;;  %v785_v3 = vsel %vm784_vm0, %v777_v1, 0.0  ;;  %v5422_v27 = vld [vmem:[%s8536_s30] ss:$0 sm:$0xff]  ;;  %s8539_s30 = sld [smem:[#allocation11_spill]]  ;;  %s8546_s25 = smov 96  }
  0x23   : > { %786 = vadd.xlane.f32.xlu1 %v785_v3  ;;  %v5423_v29 = vld [vmem:[%s8537_s8] ss:$0 sm:$0xff]  ;;  %v837_v40 = vld [vmem:[%s8538_s26 + $0x10] sm:$0x3f]  ;;  %v836_v41 = vld [vmem:[%s8538_s26 + $0x8] sm:$0xff]  ;;  %s8543_s8 = sld [smem:[#allocation5_spill]] }
  0x24   : > { %v835_v32 = vld [vmem:[%s8538_s26] sm:$0xff]  ;;  %s8544_s26 = smov 32   ;;  %s8547_s0 = sld [smem:[#allocation13_spill]] }
  0x25   : > { %s8550_s20 = sld [smem:[#allocation15_spill]] }
  0x26   : > { %782 = vadd.xlane.f32.xlu0 %v776_v2 }
  0x28   : > { %v6365_v47 = vld [vmem:[%s8539_s30 + $0x4] ss:$12 sps:$4 sm:$0xff]   ;;  %v6367_v48 = vld [vmem:[%s8539_s30] ss:$12 sps:$4 sm:$0xff]   ;;  %v6368_v49 = vld [vmem:[%s8539_s30 + $0x8] ss:$12 sps:$4 sm:$0xff]  }
  0x29   : > { %v6369_v50 = vld [vmem:[%s8539_s30 + $0x1c] ss:$12 sps:$4 sm:$0xff]   ;;  %1075 = vmatprep.subr.bf16.mxu0 %v6365_v47  ;;  %6070 = vmatprep.subr.bf16.mxu1 %v6368_v49  ;;  %s7160_s4 = scalar_lea.vmem %s8543_s8, %s6977_s27  ;;  %s8551_s8 = sld [smem:[#allocation16_spill]] }
  0x2a   : > { %1076 = vmatpush1.bf16.msra.mxu0 %v6367_v48  ;;  %6071 = vmatpush3.bf16.msra.mxu1 %v6368_v49  ;;  %v6375_v3 = vld [vmem:[%s8539_s30 + $0x30] ss:$12 sps:$4 sm:$0xff]   ;;  %v932_v49 = vlaneseq }
  0x2b   : > { %1077 = vmatprep.subr.bf16.mxu0 %v6369_v50 }
  0x2c   : > { %v7109_v50 = vshrl.u32 %v932_v49, 7 }
  0xaf   : > { %v781_v4 = vpop.xlane.xlu0 %780 }
  0xb0   : > { %v789_v5 = vmul.f32 0.0078125, %v781_v4  ;;  %v787_v6 = vpop.xlane.xlu1 %786  ;;  %v6376_v4 = vld [vmem:[%s8539_s30 + $0x38] ss:$12 sps:$4 sm:$0xff]  }
  0xb1   : > { %v791_v7 = vmul.f32 0.0078125, %v787_v6  ;;  %v6379_v6 = vld [vmem:[%s8539_s30 + $0x48] ss:$12 sps:$4 sm:$0xff]  }
  0xb2   : > { %v792_v8 = vsub.f32 %v775_v0, %v789_v5  ;;  %v6371_v0 = vld [vmem:[%s8539_s30 + $0x18] ss:$12 sps:$4 sm:$0xff]  }
  0xb3   : > { %v794_v9 = vsub.f32 %v777_v1, %v791_v7  ;;  %v783_v10 = vpop.xlane.xlu0 %782  ;;  %v6372_v1 = vld [vmem:[%s8539_s30 + $0x20] ss:$12 sps:$4 sm:$0xff]   ;;  %1078 = vmatpush1.bf16.msra.mxu0 %v6371_v0  ;;  %v6380_v7 = vld [vmem:[%s8539_s30 + $0x50] ss:$12 sps:$4 sm:$0xff]  }
  0xb4   : > { %v790_v11 = vmul.f32 0.0078125, %v783_v10  ;;  %v795_v12 = vmul.f32 %v792_v8, %v792_v8  ;;  %6072 = vmatprep.subr.bf16.mxu1 %v6372_v1  ;;  %v6377_v5 = vld [vmem:[%s8539_s30 + $0x4c] ss:$12 sps:$4 sm:$0xff]   ;;  %v6384_v10 = vld [vmem:[%s8539_s30 + $0x68] ss:$12 sps:$4 sm:$0xff]  }
  0xb5   : > { %v797_v13 = vmul.f32 %v794_v9, %v794_v9  ;;  %6073 = vmatpush3.bf16.msra.mxu1 %v6372_v1 }
  0xb6   : > { %798 = vadd.xlane.f32.xlu1 %v795_v12  ;;  %v793_v14 = vsub.f32 %v776_v2, %v790_v11  ;;  %v6373_v2 = vld [vmem:[%s8539_s30 + $0x34] ss:$12 sps:$4 sm:$0xff]   ;;  %6074 = vmatprep.subr.bf16.mxu1 %v6376_v4  ;;  %v6385_v11 = vld [vmem:[%s8539_s30 + $0x7c] ss:$12 sps:$4 sm:$0xff]  }
  0xb7   : > { %v802_v15 = vsel %vm784_vm0, %v797_v13, 0.0  ;;  %1079 = vmatprep.subr.bf16.mxu0 %v6373_v2  ;;  %v6388_v12 = vld [vmem:[%s8539_s30 + $0x80] ss:$12 sps:$4 sm:$0xff]   ;;  %v6387_v13 = vld [vmem:[%s8539_s30 + $0x78] ss:$12 sps:$4 sm:$0xff]  }
  0xb8   : > { %v796_v16 = vmul.f32 %v793_v14, %v793_v14  ;;  %1080 = vmatpush1.bf16.msra.mxu0 %v6375_v3 }
  0xb9   : > { %6075 = vmatpush3.bf16.msra.mxu1 %v6376_v4  ;;  %1081 = vmatprep.subr.bf16.mxu0 %v6377_v5 }
  0xba   : > { %803 = vadd.xlane.f32.xlu1 %v802_v15  ;;  %800 = vadd.xlane.f32.xlu0 %v796_v16  ;;  %v6840_v15 = vmov 0   ;;  %v6392_v16 = vld [vmem:[%s8539_s30 + $0x98] ss:$12 sps:$4 sm:$0xff]  }
  0xbb   : > { %6076 = vmatprep.subr.bf16.mxu1 %v6380_v7  ;;  %1107 = vmatprep.mubr.bf16.mxu0 %v6840_v15 }
  0xbc   : > { %1082 = vmatpush1.bf16.msra.mxu0 %v6379_v6 }
  0xbd   : > { %6077 = vmatpush3.bf16.msra.mxu1 %v6380_v7 }
  0xbe   : > { %6078 = vmatprep.subr.bf16.mxu1 %v6384_v10 }
  0xc1   : > { %6079 = vmatpush3.bf16.msra.mxu1 %v6384_v10 }
  0xc2   : > { %6080 = vmatprep.subr.bf16.mxu1 %v6388_v12 }
  0xc5   : > { %6081 = vmatpush3.bf16.msra.mxu1 %v6388_v12 }
  0xc6   : > { %6082 = vmatprep.subr.bf16.mxu1 %v6392_v16 }
  0xc9   : > { %6083 = vmatpush3.bf16.msra.mxu1 %v6392_v16 }
 0x143   : > { %v799_v17 = vpop.xlane.xlu1 %798 }
 0x144   : > { %v805_v18 = vmul.f32 0.0078125, %v799_v17  ;;  %v6391_v17 = vld [vmem:[%s8539_s30 + $0x90] ss:$12 sps:$4 sm:$0xff]  }
 0x146   : > { %v808_v19 = vadd.f32 1e-05, %v805_v18  ;;  %v6393_v18 = vld [vmem:[%s8539_s30 + $0xac] ss:$12 sps:$4 sm:$0xff]  }
 0x147   : > { %v804_v20 = vpop.xlane.xlu1 %803  ;;  %v801_v21 = vpop.xlane.xlu0 %800 }
 0x148   : > { %6637 = vrsqrt.f32 %v808_v19  ;;  %v807_v22 = vmul.f32 0.0078125, %v804_v20  ;;  %v806_v23 = vmul.f32 0.0078125, %v801_v21  ;;  %v6396_v19 = vld [vmem:[%s8539_s30 + $0xb0] ss:$12 sps:$4 sm:$0xff]   ;;  %v6395_v20 = vld [vmem:[%s8539_s30 + $0xa8] ss:$12 sps:$4 sm:$0xff]  }
 0x149   : > { %6084 = vmatprep.subr.bf16.mxu1 %v6396_v19 }
 0x14a   : > { %v810_v24 = vadd.f32 1e-05, %v807_v22  ;;  %v809_v25 = vadd.f32 1e-05, %v806_v23  ;;  %6085 = vmatpush3.bf16.msra.mxu1 %v6396_v19 }
 0x14c   : > { %6639 = vrsqrt.f32 %v810_v24 }
 0x14d   : > { %6641 = vrsqrt.f32 %v809_v25 }
 0x152   : > { %v6638_v26 = vpop.eup %6637 }
 0x153   : > { %v814_v28 = vmul.f32 %v6638_v26, %v792_v8  ;;  %v6381_v8 = vld [vmem:[%s8539_s30 + $0x64] ss:$12 sps:$4 sm:$0xff]  }
 0x154   : > { %1083 = vmatprep.subr.bf16.mxu0 %v6381_v8 }
 0x155   : > { %v823_v30 = vmul.f32 %v5422_v27, %v814_v28 }
 0x156   : > { %v6640_v31 = vpop.eup %6639 }
 0x157   : > { %v6642_v33 = vpop.eup %6641  ;;  %v832_v34 = vadd.f32 %v5423_v29, %v823_v30  ;;  %v816_v35 = vmul.f32 %v6640_v31, %v794_v9  ;;  %v6383_v9 = vld [vmem:[%s8539_s30 + $0x60] ss:$12 sps:$4 sm:$0xff]  }
 0x158   : > { %v815_v36 = vmul.f32 %v6642_v33, %v793_v14  ;;  %1084 = vmatpush1.bf16.msra.mxu0 %v6383_v9  ;;  %v6389_v14 = vld [vmem:[%s8539_s30 + $0x94] ss:$12 sps:$4 sm:$0xff]  }
 0x159   : > { %v6994_v37 = vadd.f32 %v835_v32, %v832_v34  ;;  %v825_v38 = vmul.f32 %v5422_v27, %v816_v35  ;;  %1085 = vmatprep.subr.bf16.mxu0 %v6385_v11  ;;  %v5424_v32 = vld [vmem:[%s8540_s1] ss:$0 sm:$0xff] }
 0x15a   : > { %v824_v39 = vmul.f32 %v5422_v27, %v815_v36 }
 0x15b   : > { %843 = vadd.xlane.f32.xlu0 %v6994_v37  ;;  %v834_v42 = vadd.f32 %v5423_v29, %v825_v38  ;;  %v5425_v38 = vld [vmem:[%s8541_s2] ss:$0 sm:$0xff] }
 0x15c   : > { %v833_v43 = vadd.f32 %v5423_v29, %v824_v39  ;;  %1086 = vmatpush1.bf16.msra.mxu0 %v6387_v13 }
 0x15d   : > { %v7003_v44 = vadd.f32 %v837_v40, %v834_v42  ;;  %1087 = vmatprep.subr.bf16.mxu0 %v6389_v14 }
 0x15e   : > { %v7005_v45 = vadd.f32 %v836_v41, %v833_v43 }
 0x15f   : > { %v847_v46 = vsel %vm784_vm0, %v7003_v44, 0.0 }
 0x160   : > { %845 = vadd.xlane.f32.xlu1 %v7005_v45  ;;  %848 = vadd.xlane.f32.xlu0 %v847_v46 }
 0x161   : > { %1088 = vmatpush1.bf16.msra.mxu0 %v6391_v17 }
 0x162   : > { %1089 = vmatprep.subr.bf16.mxu0 %v6393_v18 }
 0x165   : > { %1090 = vmatpush1.bf16.msra.mxu0 %v6395_v20 }
 0x1e8   : > { %v844_v51 = vpop.xlane.xlu0 %843 }
 0x1e9   : > { %v850_v52 = vmul.f32 0.0078125, %v844_v51  ;;  %v7112_v51 = vsub.s32 0, %v7109_v50 }
 0x1eb   : > { %v7023_v53 = vsub.f32 %v6994_v37, %v850_v52  ;;  %v930_v52 = vld [vmem:[%s8542_s7] sm:$0x7] }
 0x1ed   : > { %v846_v54 = vpop.xlane.xlu1 %845  ;;  %v849_v55 = vpop.xlane.xlu0 %848  ;;  %v856_v56 = vmul.f32 %v7023_v53, %v7023_v53 }
 0x1ee   : > { %v851_v57 = vmul.f32 0.0078125, %v846_v54  ;;  %v852_v58 = vmul.f32 0.0078125, %v849_v55  ;;  %v7121_v54 = vsub.s32 2, %v7109_v50  ;;  %v935_v55 = vrot.slane %v930_v52, %v7112_v51 }
 0x1ef   : > { %859 = vadd.xlane.f32.xlu1 %v856_v56 }
 0x1f0   : > { %v7028_v59 = vsub.f32 %v7003_v44, %v852_v58  ;;  %v7031_v60 = vsub.f32 %v7005_v45, %v851_v57 }
 0x1f2   : > { %v857_v61 = vmul.f32 %v7031_v60, %v7031_v60  ;;  %v858_v62 = vmul.f32 %v7028_v59, %v7028_v59 }
 0x1f4   : > { %861 = vadd.xlane.f32.xlu0 %v857_v61  ;;  %v863_v63 = vsel %vm784_vm0, %v858_v62, 0.0 }
 0x1f5   : > { %864 = vadd.xlane.f32.xlu1 %v863_v63 }
 0x27c   : > { %v860_v21 = vpop.xlane.xlu1 %859 }
 0x27d   : > { %v866_v22 = vmul.f32 0.0078125, %v860_v21 }
 0x27f   : > { %v869_v23 = vadd.f32 1e-05, %v866_v22 }
 0x281   : > { %6643 = vrsqrt.f32 %v869_v23  ;;  %v862_v24 = vpop.xlane.xlu0 %861 }
 0x282   : > { %v867_v25 = vmul.f32 0.0078125, %v862_v24  ;;  %v865_v26 = vpop.xlane.xlu1 %864 }
 0x283   : > { %v868_v27 = vmul.f32 0.0078125, %v865_v26 }
 0x284   : > { %v870_v28 = vadd.f32 1e-05, %v867_v25 }
 0x285   : > { %v871_v29 = vadd.f32 1e-05, %v868_v27  ;;  %v7163_v27 = vld [vmem:[%s7160_s4] sm:$0xff] }
 0x286   : > { %6645 = vrsqrt.f32 %v870_v28 }
 0x287   : > { %6647 = vrsqrt.f32 %v871_v29 }
 0x28b   : > { %v6644_v30 = vpop.eup %6643 }
 0x28c   : > { %v875_v31 = vmul.f32 %v6644_v30, %v7023_v53  ;;  %v7118_v53 = vsub.s32 1, %v7109_v50 }
 0x28e   : > { %v884_v36 = vmul.f32 %v5424_v32, %v875_v31  ;;  %v939_v57 = vrot.slane %v930_v52, %v7118_v53 }
 0x290   : > { %v6646_v33 = vpop.eup %6645  ;;  %v893_v42 = vadd.f32 %v5425_v38, %v884_v36 }
 0x291   : > { %v6648_v34 = vpop.eup %6647  ;;  %v876_v35 = vmul.f32 %v6646_v33, %v7031_v60  ;;  %v7169_v33 = vld [vmem:[%s7160_s4 + $0x10] sm:$0x3f] }
 0x292   : > { %v877_v39 = vmul.f32 %v6648_v34, %v7028_v59  ;;  %v943_v59 = vrot.slane %v930_v52, %v7121_v54 }
 0x293   : > { %v885_v40 = vmul.f32 %v5424_v32, %v876_v35 }
 0x294   : > { %v886_v41 = vmul.f32 %v5424_v32, %v877_v39  ;;  %v7166_v32 = vld [vmem:[%s7160_s4 + $0x8] sm:$0xff] }
 0x295   : > { %v894_v43 = vadd.f32 %v5425_v38, %v885_v40 }
 0x296   : > { %v895_v46 = vadd.f32 %v5425_v38, %v886_v41 }
 0x297   : > { %v896_v47 = vpack.c.bf16 %v894_v43, %v893_v42 }
 0x298   : > { %v897_v48 = vpack.c.bf16 %v895_v46, %v895_v46 }
 0x299   : > { %1108 = vmatmul.mubr.bf16.vlgmr.msra.gmra.mrb[0].mxu0 %v896_v47  ;;  %6086 = vmatprep.mubr.bf16.mxu1 %v896_v47 }
 0x29a   : > { %6087 = vmatmul.mubr.bf16.vlgmr.msra.gmra.mrb[0].mxu1 %v897_v48  ;;  %1117 = vmatprep.mubr.bf16.mxu0 %v6840_v15 }
 0x2a1   : > { %1118 = vmatmul.mubr.bf16.gmra.mrb[4].mxu0 %v897_v48 }
 0x36c   : > { %v1109_v56 = vpop.f32.mrb[0].mxu0 }
 0x36d   : > { %v1111_v58 = vpop.f32.mrb[1].mxu0  ;;  %v6088_v60 = vpop.f32.mrb[0].mxu1  ;;  %v1110_v63 = vadd.f32 %v1109_v56, %v935_v55 }
 0x36e   : > { %v1113_v61 = vpop.f32.mrb[2].mxu0  ;;  %v1160_v62 = vpop.f32.mrb[1].mxu1  ;;  %v1112_v3 = vadd.f32 %v1111_v58, %v939_v57  ;;  %v1169_v7 = vadd.f32 %v6088_v60, %v943_v59 }
 0x36f   : > { %v1114_v0 = vadd.f32 %v1113_v61, %v935_v55  ;;  %v1115_v1 = vpop.f32.mrb[3].mxu0  ;;  %v6089_v2 = vpop.f32.mrb[2].mxu1  ;;  %v1161_v8 = vadd.f32 %v1160_v62, %v943_v59 }
 0x370   : > { %v1116_v4 = vadd.f32 %v1115_v1, %v939_v57  ;;  %v1163_v5 = vpop.f32.mrb[3].mxu1  ;;  %v7138_v14 = vpack.c.bf16 %v1169_v7, %v1169_v7 }
 0x371   : > { %v7126_v6 = vpack.c.bf16 %v1114_v0, %v1110_v63  ;;  %v1164_v9 = vadd.f32 %v1163_v5, %v943_v59 }
 0x372   : > { %v7128_v10 = vpack.c.bf16 %v1116_v4, %v1112_v3  ;;  %v1292_v21 = vsel %vm1290_vm2, %v7138_v14, 0 }
 0x373   : > { %v7130_v11 = vpack.c.bf16 %v1164_v9, %v1161_v8  ;;  %6094 = vmatprep.mubr.msk.bf16.mxu0 %vm1178_vm1, %v7126_v6 }
 0x374   : > { %v1119_v12 = vpop.f32.mrb[4].mxu0  ;;  %6298 = vmatprep.subr.msk.bf16.mxu0 %vm1178_vm1, %v7128_v10  ;;  %v1186_v13 = vsel %vm1178_vm1, %v7128_v10, 0 }
 0x375   : > { %v1121_v16 = vpop.f32.mrb[5].mxu0  ;;  %6091 = vmatpush3.bf16.xpose.msra.mxu0 %v1186_v13  ;;  %6098 = vmatprep.subr.bf16.mxu1 %v7130_v11  ;;  %v1120_v23 = vadd.f32 %v1119_v12, %v935_v55 }
 0x376   : > { %v1122_v17 = vadd.f32 %v1121_v16, %v939_v57  ;;  %v1123_v18 = vpop.f32.mrb[6].mxu0  ;;  %6099 = vmatpush3.bf16.msra.mxu1 %v7130_v11 }
 0x377   : > { %v1124_v19 = vpop.f32.mrb[7].mxu0  ;;  %6300 = vmatprep.subr.msk.bf16.mxu1 %vm1290_vm2, %v7138_v14  ;;  %v7152_v24 = vpack.c.bf16 %v1120_v23, %v1120_v23 }
 0x378   : > { %v7144_v20 = vpack.c.bf16 %v1122_v17, %v1122_v17 }
 0x37a   : > { %6299 = vmatprep.subr.msk.bf16.mxu0 %vm1178_vm1, %v7144_v20  ;;  %6101 = vmatpush3.bf16.msra.mxu1 %v1292_v21  ;;  %v1189_v22 = vsel %vm1178_vm1, %v7144_v20, 0 }
 0x37d   : > { %6093 = vmatpush3.bf16.xpose.msra.mxu0 %v1189_v22 }
 0x384   : > { %6095 = vmatmul.mubr.msk.bf16.vlgmr.msra.gmra.mrb[8].mxu0 %vm1178_vm1, %v7152_v24 }
 0x457   : > { %v6096_v25 = vpop.f32.mrb[8].mxu0 }
 0x458   : > { %v1225_v26 = vpop.f32.mrb[9].mxu0  ;;  %v1241_v28 = vmul.f32 0.17677669, %v6096_v25 }
 0x459   : > { %v1239_v29 = vmul.f32 0.17677669, %v1225_v26  ;;  %v6097_v30 = vpop.f32.mrb[10].mxu0 }
 0x45a   : > { %v1228_v31 = vpop.f32.mrb[11].mxu0  ;;  %v1244_v39 = vadd.f32 %v1241_v28, %v7169_v33 }
 0x45b   : > { %v1240_v34 = vmul.f32 0.17677669, %v1228_v31  ;;  %v1242_v35 = vadd.f32 %v1239_v29, %v7163_v27 }
 0x45c   : > { %v1253_v41 = vsel %vm1252_vm4, %v1244_v39, -inf }
 0x45d   : > { %v1246_v36 = vsel %vm1245_vm3, %v1242_v35, -inf  ;;  %v1243_v38 = vadd.f32 %v1240_v34, %v7166_v32 }
 0x45e   : > { %1247 = vmax.xlane.f32.xlu0 %v1246_v36 }
 0x45f   : > { %v1249_v40 = vsel %vm1245_vm3, %v1243_v38, -inf }
 0x460   : > { %1250 = vmax.xlane.f32.xlu1 %v1249_v40 }
 0x462   : > { %1254 = vmax.xlane.f32.xlu0 %v1253_v41 }
 0x4eb   : > { %v1248_v42 = vpop.xlane.xlu0 %1247 }
 0x4ec   : > { %v1256_v43 = vsub.f32 %v1242_v35, %v1248_v42 }
 0x4ed   : > { %v1251_v46 = vpop.xlane.xlu1 %1250 }
 0x4ee   : > { %v1259_v47 = vmul.f32 1.442695, %v1256_v43  ;;  %v1257_v48 = vsub.f32 %v1243_v38, %v1251_v46 }
 0x4ef   : > { %v1255_v49 = vpop.xlane.xlu0 %1254 }
 0x4f0   : > { %6649 = vpow2.f32 %v1259_v47  ;;  %v1261_v52 = vmul.f32 1.442695, %v1257_v48  ;;  %v1258_v55 = vsub.f32 %v1244_v39, %v1255_v49 }
 0x4f2   : > { %6651 = vpow2.f32 %v1261_v52  ;;  %v1263_v56 = vmul.f32 1.442695, %v1258_v55 }
 0x4f4   : > { %6653 = vpow2.f32 %v1263_v56 }
 0x4fa   : > { %v6650_v57 = vpop.eup %6649 }
 0x4fb   : > { %v1265_v58 = vsel %vm1245_vm3, %v6650_v57, 0.0 }
 0x4fc   : > { %v6652_v59 = vpop.eup %6651  ;;  %1266 = vadd.xlane.f32.xlu1 %v1265_v58 }
 0x4fd   : > { %v1268_v60 = vsel %vm1245_vm3, %v6652_v59, 0.0 }
 0x4fe   : > { %v6654_v61 = vpop.eup %6653  ;;  %1269 = vadd.xlane.f32.xlu0 %v1268_v60 }
 0x4ff   : > { %v1271_v62 = vsel %vm1252_vm4, %v6654_v61, 0.0 }
 0x500   : > { %1272 = vadd.xlane.f32.xlu1 %v1271_v62 }
 0x511   : > { %1352 = vrot.lane.b32.xlu1 %v7144_v20, %s8510_s28 }
 0x514   : > { %1350 = vrot.lane.b32.xlu0 %v7128_v10, %s8510_s28 }
 0x515   : > { %1344 = vrot.lane.b32.xlu1 %v7126_v6, %s8510_s28 }
 0x518   : > { %1346 = vrot.lane.b32.xlu0 %v7152_v24, %s8510_s28 }
 0x519   : > { %1523 = vrot.lane.b32.xlu1 %v7128_v10, %s8512_s6 }
 0x51c   : > { %1519 = vrot.lane.b32.xlu0 %v7126_v6, %s8512_s6 }
 0x51d   : > { %1525 = vrot.lane.b32.xlu1 %v7144_v20, %s8512_s6 }
 0x521   : > { %1521 = vrot.lane.b32.xlu1 %v7152_v24, %s8512_s6 }
 0x589   : > { %v1267_v63 = vpop.xlane.xlu1 %1266 }
 0x58a   : > { %6655 = vrcp.f32 %v1267_v63 }
 0x58b   : > { %v1270_v0 = vpop.xlane.xlu0 %1269 }
 0x58c   : > { %6657 = vrcp.f32 %v1270_v0 }
 0x58d   : > { %v1273_v1 = vpop.xlane.xlu1 %1272 }
 0x58e   : > { %6659 = vrcp.f32 %v1273_v1 }
 0x58f   : > { %v1351_v2 = vpop.permute.xlu0 %1350 }
 0x590   : > { %6301 = vmatprep.subr.msk.bf16.mxu1 %vm1178_vm1, %v1351_v2  ;;  %v1361_v18 = vsel %vm1178_vm1, %v1351_v2, 0 }
 0x591   : > { %v1353_v5 = vpop.permute.xlu1 %1352 }
 0x592   : > { %v1364_v19 = vsel %vm1178_vm1, %v1353_v5, 0 }
 0x593   : > { %v1347_v22 = vpop.permute.xlu0 %1346 }
 0x594   : > { %v6656_v3 = vpop.eup %6655 }
 0x595   : > { %v1275_v7 = vmul.f32 %v6656_v3, %v6650_v57  ;;  %v1345_v17 = vpop.permute.xlu1 %1344 }
 0x596   : > { %v6658_v4 = vpop.eup %6657 }
 0x597   : > { %v1277_v8 = vmul.f32 %v6658_v4, %v6652_v59  ;;  %v1520_v23 = vpop.permute.xlu0 %1519 }
 0x598   : > { %v6660_v9 = vpop.eup %6659 }
 0x599   : > { %v1280_v12 = vpack.c.bf16 %v1277_v8, %v1275_v7  ;;  %v1279_v13 = vmul.f32 %v6660_v9, %v6654_v61  ;;  %v1524_v21 = vpop.permute.xlu1 %1523 }
 0x59a   : > { %v1534_v25 = vsel %vm1178_vm1, %v1524_v21, 0 }
 0x59b   : > { %6102 = vmatprep.mubr.msk.bf16.mxu1 %vm1245_vm3, %v1280_v12  ;;  %v1281_v16 = vpack.c.bf16 %v1279_v13, %v1279_v13 }
 0x59d   : > { %6103 = vmatmul.mubr.msk.bf16.vlgmr.msra.gmra.mrb[4].mxu1 %vm1245_vm3, %v1281_v16  ;;  %v1526_v26 = vpop.permute.xlu1 %1525 }
 0x59e   : > { %6107 = vmatpush3.bf16.xpose.msra.mxu1 %v1361_v18  ;;  %6110 = vmatprep.mubr.msk.bf16.mxu1 %vm1178_vm1, %v1345_v17  ;;  %v1537_v28 = vsel %vm1178_vm1, %v1526_v26, 0 }
 0x59f   : > { %6302 = vmatprep.subr.msk.bf16.mxu1 %vm1178_vm1, %v1353_v5 }
 0x5a1   : > { %v1522_v29 = vpop.permute.xlu1 %1521 }
 0x5a6   : > { %6109 = vmatpush3.bf16.xpose.msra.mxu1 %v1364_v19 }
 0x5a7   : > { %6304 = vmatprep.subr.msk.bf16.mxu1 %vm1178_vm1, %v1524_v21 }
 0x5ad   : > { %6111 = vmatmul.mubr.msk.bf16.vlgmr.msra.gmra.mrb[8].mxu1 %vm1178_vm1, %v1347_v22 }
 0x5ae   : > { %6123 = vmatpush3.bf16.xpose.msra.mxu1 %v1534_v25  ;;  %6126 = vmatprep.mubr.msk.bf16.mxu1 %vm1178_vm1, %v1520_v23 }
 0x5af   : > { %6305 = vmatprep.subr.msk.bf16.mxu1 %vm1178_vm1, %v1526_v26 }
 0x5b6   : > { %6125 = vmatpush3.bf16.xpose.msra.mxu1 %v1537_v28 }
 0x5bd   : > { %6127 = vmatmul.mubr.msk.bf16.vlgmr.msra.gmra.mrb[12].mxu1 %vm1178_vm1, %v1522_v29 }
 0x670   : > { %v7210_v30 = vpop.f32.mrb[4].mxu1 }
 0x671   : > { %v7212_v31 = vpop.f32.mrb[5].mxu1 }
 0x672   : > { %v6105_v34 = vpop.f32.mrb[6].mxu1 }
 0x673   : > { %v7214_v35 = vpop.f32.mrb[7].mxu1 }
 0x680   : > { %v6112_v36 = vpop.f32.mrb[8].mxu1 }
 0x681   : > { %v1400_v38 = vpop.f32.mrb[9].mxu1  ;;  %v1416_v17 = vmul.f32 0.17677669, %v6112_v36 }
 0x682   : > { %v6113_v39 = vpop.f32.mrb[10].mxu1  ;;  %v1414_v16 = vmul.f32 0.17677669, %v1400_v38 }
 0x683   : > { %v1403_v40 = vpop.f32.mrb[11].mxu1 }
 0x684   : > { %v1417_v18 = vadd.f32 %v1414_v16, %v7163_v27  ;;  %v1415_v19 = vmul.f32 0.17677669, %v1403_v40 }
 0x686   : > { %v1420_v21 = vsel %vm1245_vm3, %v1417_v18, -inf }
 0x690   : > { %v6128_v41 = vpop.f32.mrb[12].mxu1 }
 0x691   : > { %v1573_v42 = vpop.f32.mrb[13].mxu1  ;;  %v1589_v43 = vmul.f32 0.17677669, %v6128_v41 }
 0x692   : > { %v1587_v46 = vmul.f32 0.17677669, %v1573_v42  ;;  %v6129_v47 = vpop.f32.mrb[14].mxu1 }
 0x693   : > { %v1576_v48 = vpop.f32.mrb[15].mxu1  ;;  %v1592_v57 = vadd.f32 %v1589_v43, %v7169_v33 }
 0x694   : > { %v1588_v49 = vmul.f32 0.17677669, %v1576_v48  ;;  %v1590_v52 = vadd.f32 %v1587_v46, %v7163_v27 }
 0x695   : > { %v1599_v59 = vsel %vm1252_vm4, %v1592_v57, -inf }
 0x696   : > { %v1593_v55 = vsel %vm1245_vm3, %v1590_v52, -inf  ;;  %v1591_v56 = vadd.f32 %v1588_v49, %v7166_v32 }
 0x697   : > { %1594 = vmax.xlane.f32.xlu0 %v1593_v55 }
 0x698   : > { %v1596_v58 = vsel %vm1245_vm3, %v1591_v56, -inf }
 0x699   : > { %1597 = vmax.xlane.f32.xlu1 %v1596_v58 }
 0x69b   : > { %1600 = vmax.xlane.f32.xlu0 %v1599_v59 }
 0x724   : > { %v1595_v60 = vpop.xlane.xlu0 %1594 }
 0x725   : > { %v1602_v61 = vsub.f32 %v1590_v52, %v1595_v60 }
 0x726   : > { %v1598_v62 = vpop.xlane.xlu1 %1597 }
 0x727   : > { %v1605_v63 = vmul.f32 1.442695, %v1602_v61  ;;  %v1603_v0 = vsub.f32 %v1591_v56, %v1598_v62 }
 0x728   : > { %v1601_v1 = vpop.xlane.xlu0 %1600 }
 0x729   : > { %6661 = vpow2.f32 %v1605_v63  ;;  %v1607_v2 = vmul.f32 1.442695, %v1603_v0  ;;  %v1604_v3 = vsub.f32 %v1592_v57, %v1601_v1 }
 0x72b   : > { %6663 = vpow2.f32 %v1607_v2  ;;  %v1609_v4 = vmul.f32 1.442695, %v1604_v3 }
 0x72d   : > { %6665 = vpow2.f32 %v1609_v4 }
 0x733   : > { %v6662_v5 = vpop.eup %6661 }
 0x734   : > { %v1611_v7 = vsel %vm1245_vm3, %v6662_v5, 0.0 }
 0x735   : > { %v6664_v8 = vpop.eup %6663  ;;  %1612 = vadd.xlane.f32.xlu0 %v1611_v7 }
 0x736   : > { %v1614_v13 = vsel %vm1245_vm3, %v6664_v8, 0.0 }
 0x737   : > { %v6666_v9 = vpop.eup %6665 }
 0x738   : > { %v1617_v12 = vsel %vm1252_vm4, %v6666_v9, 0.0 }
 0x739   : > { %1618 = vadd.xlane.f32.xlu1 %v1617_v12  ;;  %1615 = vadd.xlane.f32.xlu0 %v1614_v13 }
 0x74a   : > { %1630 = vrot.lane.b32.xlu1 %v7138_v14, %s8512_s6 }
 0x74e   : > { %1694 = vrot.lane.b32.xlu1 %v7128_v10, %s8514_s29  ;;  %v1419_v10 = vadd.f32 %v1416_v17, %v7169_v33 }
 0x74f   : > { %1628 = vrot.lane.b32.xlu0 %v7130_v11, %s8512_s6 }
 0x750   : > { %v1426_v22 = vsel %vm1252_vm4, %v1419_v10, -inf }
 0x752   : > { %1696 = vrot.lane.b32.xlu1 %v7144_v20, %s8514_s29  ;;  %v1418_v20 = vadd.f32 %v1415_v19, %v7166_v32 }
 0x753   : > { %1690 = vrot.lane.b32.xlu0 %v7126_v6, %s8514_s29 }
 0x754   : > { %v1423_v6 = vsel %vm1245_vm3, %v1418_v20, -inf }
 0x756   : > { %1692 = vrot.lane.b32.xlu1 %v7152_v24, %s8514_s29 }
 0x772   : > { %1421 = vmax.xlane.f32.xlu0 %v1420_v21 }
 0x776   : > { %1427 = vmax.xlane.f32.xlu0 %v1426_v22 }
 0x77a   : > { %1424 = vmax.xlane.f32.xlu1 %v1423_v6 }
 0x7c2   : > { %v1613_v23 = vpop.xlane.xlu0 %1612 }
 0x7c3   : > { %6667 = vrcp.f32 %v1613_v23 }
 0x7c6   : > { %v1616_v24 = vpop.xlane.xlu0 %1615  ;;  %v1619_v25 = vpop.xlane.xlu1 %1618 }
 0x7c7   : > { %6669 = vrcp.f32 %v1616_v24 }
 0x7c8   : > { %6671 = vrcp.f32 %v1619_v25 }
 0x7ca   : > { %v1629_v26 = vpop.permute.xlu0 %1628  ;;  %v1631_v28 = vpop.permute.xlu1 %1630 }
 0x7cb   : > { %6130 = vmatprep.subr.bf16.mxu1 %v1629_v26  ;;  %v1640_v34 = vsel %vm1290_vm2, %v1631_v28, 0 }
 0x7cc   : > { %6131 = vmatpush3.bf16.msra.mxu1 %v1629_v26 }
 0x7cd   : > { %6306 = vmatprep.subr.msk.bf16.mxu1 %vm1290_vm2, %v1631_v28  ;;  %v6668_v29 = vpop.eup %6667 }
 0x7ce   : > { %v1695_v36 = vpop.permute.xlu1 %1694  ;;  %v1621_v40 = vmul.f32 %v6668_v29, %v6662_v5  ;;  %v1691_v47 = vpop.permute.xlu0 %1690 }
 0x7cf   : > { %v1705_v48 = vsel %vm1178_vm1, %v1695_v36, 0 }
 0x7d0   : > { %6133 = vmatpush3.bf16.msra.mxu1 %v1640_v34 }
 0x7d1   : > { %v6670_v38 = vpop.eup %6669  ;;  %6307 = vmatprep.subr.msk.bf16.mxu1 %vm1178_vm1, %v1695_v36 }
 0x7d2   : > { %v6672_v39 = vpop.eup %6671  ;;  %v1623_v41 = vmul.f32 %v6670_v38, %v6664_v8  ;;  %v1697_v49 = vpop.permute.xlu1 %1696 }
 0x7d3   : > { %v1625_v42 = vmul.f32 %v6672_v39, %v6666_v9  ;;  %v1708_v52 = vsel %vm1178_vm1, %v1697_v49, 0 }
 0x7d4   : > { %v1626_v43 = vpack.c.bf16 %v1623_v41, %v1621_v40 }
 0x7d5   : > { %v1627_v46 = vpack.c.bf16 %v1625_v42, %v1625_v42 }
 0x7d6   : > { %6134 = vmatprep.mubr.msk.bf16.mxu1 %vm1245_vm3, %v1626_v43  ;;  %v1693_v55 = vpop.permute.xlu1 %1692 }
 0x7d7   : > { %6135 = vmatmul.mubr.msk.bf16.vlgmr.msra.gmra.mrb[16].mxu1 %vm1245_vm3, %v1627_v46 }
 0x7d8   : > { %6142 = vmatprep.mubr.msk.bf16.mxu1 %vm1178_vm1, %v1691_v47 }
 0x7d9   : > { %6139 = vmatpush3.bf16.xpose.msra.mxu1 %v1705_v48 }
 0x7da   : > { %6308 = vmatprep.subr.msk.bf16.mxu1 %vm1178_vm1, %v1697_v49 }
 0x7e1   : > { %6141 = vmatpush3.bf16.xpose.msra.mxu1 %v1708_v52 }
 0x7e8   : > { %6143 = vmatmul.mubr.msk.bf16.vlgmr.msra.gmra.mrb[20].mxu1 %vm1178_vm1, %v1693_v55 }
 0x7e9   : > { %2338 = vmatprep.mubr.bf16.mxu1 %v6840_v15 }
 0x7ff   : > { %v1422_v62 = vpop.xlane.xlu0 %1421 }
 0x800   : > { %v1429_v1 = vsub.f32 %v1417_v18, %v1422_v62 }
 0x802   : > { %v1432_v3 = vmul.f32 1.442695, %v1429_v1 }
 0x803   : > { %v1428_v2 = vpop.xlane.xlu0 %1427 }
 0x804   : > { %v1431_v4 = vsub.f32 %v1419_v10, %v1428_v2 }
 0x806   : > { %v1436_v7 = vmul.f32 1.442695, %v1431_v4 }
 0x807   : > { %v1425_v58 = vpop.xlane.xlu1 %1424 }
 0x808   : > { %v1430_v63 = vsub.f32 %v1418_v20, %v1425_v58 }
 0x80a   : > { %v1434_v0 = vmul.f32 1.442695, %v1430_v63 }
 0x80c   : > { %6673 = vpow2.f32 %v1434_v0 }
 0x80d   : > { %6675 = vpow2.f32 %v1432_v3 }
 0x80e   : > { %6677 = vpow2.f32 %v1436_v7 }
 0x816   : > { %v6674_v22 = vpop.eup %6673 }
 0x817   : > { %v1441_v6 = vsel %vm1245_vm3, %v6674_v22, 0.0  ;;  %v6676_v24 = vpop.eup %6675 }
 0x8aa   : > { %v7254_v56 = vpop.f32.mrb[16].mxu1 }
 0x8ab   : > { %v7256_v57 = vpop.f32.mrb[17].mxu1 }
 0x8ac   : > { %v6137_v59 = vpop.f32.mrb[18].mxu1 }
 0x8ad   : > { %v7258_v60 = vpop.f32.mrb[19].mxu1 }
 0x8ae   : > { %v6340_v61 = vpack.i.bf16 %v7258_v60, %v7256_v57 }
 0x8bb   : > { %v6144_v5 = vpop.f32.mrb[20].mxu1 }
 0x8bc   : > { %v1760_v8 = vmul.f32 0.17677669, %v6144_v5  ;;  %v1744_v9 = vpop.f32.mrb[21].mxu1 }
 0x8bd   : > { %v1758_v12 = vmul.f32 0.17677669, %v1744_v9  ;;  %v6145_v13 = vpop.f32.mrb[22].mxu1 }
 0x8be   : > { %v1747_v16 = vpop.f32.mrb[23].mxu1  ;;  %v1763_v17 = vadd.f32 %v1760_v8, %v7169_v33  ;;  %v1438_v33 = vsel %vm1245_vm3, %v6676_v24, 0.0 }
 0x8bf   : > { %v1759_v19 = vmul.f32 0.17677669, %v1747_v16  ;;  %v1761_v21 = vadd.f32 %v1758_v12, %v7163_v27  ;;  %v6678_v27 = vpop.eup %6677 }
 0x8c0   : > { %v1770_v18 = vsel %vm1252_vm4, %v1763_v17, -inf  ;;  %v1444_v25 = vsel %vm1252_vm4, %v6678_v27, 0.0 }
 0x8c1   : > { %1771 = vmax.xlane.f32.xlu1 %v1770_v18  ;;  %v1764_v10 = vsel %vm1245_vm3, %v1761_v21, -inf  ;;  %v1762_v20 = vadd.f32 %v1759_v19, %v7166_v32 }
 0x8c2   : > { %1765 = vmax.xlane.f32.xlu0 %v1764_v10 }
 0x8c3   : > { %v1767_v23 = vsel %vm1245_vm3, %v1762_v20, -inf }
 0x8c5   : > { %1442 = vadd.xlane.f32.xlu1 %v1441_v6  ;;  %v6397_v6 = vld [vmem:[%s8489_s9] sm:$0xff]  }
 0x8c6   : > { %1768 = vmax.xlane.f32.xlu0 %v1767_v23  ;;  %v6398_v23 = vld [vmem:[%s8489_s9 + $0x8] sm:$0xff]  }
 0x8ca   : > { %1439 = vadd.xlane.f32.xlu0 %v1438_v33  ;;  %v6400_v33 = vld [vmem:[%s8489_s9 + $0x18] sm:$0xff]  }
 0x8ce   : > { %1445 = vadd.xlane.f32.xlu0 %v1444_v25  ;;  %v6402_v25 = vld [vmem:[%s8489_s9 + $0x28] sm:$0xff]  }
 0x94e   : > { %v1772_v26 = vpop.xlane.xlu1 %1771 }
 0x94f   : > { %v1775_v28 = vsub.f32 %v1763_v17, %v1772_v26  ;;  %v1766_v29 = vpop.xlane.xlu0 %1765  ;;  %v6403_v26 = vld [vmem:[%s8489_s9 + $0x30] sm:$0xff]  }
 0x950   : > { %v1773_v34 = vsub.f32 %v1761_v21, %v1766_v29 }
 0x951   : > { %v1780_v32 = vmul.f32 1.442695, %v1775_v28 }
 0x952   : > { %v1776_v36 = vmul.f32 1.442695, %v1773_v34  ;;  %v1443_v39 = vpop.xlane.xlu1 %1442  ;;  %v6404_v34 = vld [vmem:[%s8489_s9 + $0x38] sm:$0xff]  }
 0x953   : > { %6679 = vpow2.f32 %v1780_v32  ;;  %v1769_v38 = vpop.xlane.xlu0 %1768 }
 0x954   : > { %v1774_v40 = vsub.f32 %v1762_v20, %v1769_v38  ;;  %6681 = vpow2.f32 %v1776_v36 }
 0x955   : > { %6683 = vrcp.f32 %v1443_v39 }
 0x956   : > { %v1778_v41 = vmul.f32 1.442695, %v1774_v40 }
 0x957   : > { %v1440_v42 = vpop.xlane.xlu0 %1439 }
 0x958   : > { %6685 = vpow2.f32 %v1778_v41 }
 0x959   : > { %6687 = vrcp.f32 %v1440_v42 }
 0x95b   : > { %v1446_v0 = vpop.xlane.xlu0 %1445 }
 0x95c   : > { %6689 = vrcp.f32 %v1446_v0 }
 0x95d   : > { %v6680_v43 = vpop.eup %6679 }
 0x95e   : > { %v1788_v46 = vsel %vm1252_vm4, %v6680_v43, 0.0  ;;  %v6682_v47 = vpop.eup %6681 }
 0x95f   : > { %1789 = vadd.xlane.f32.xlu1 %v1788_v46  ;;  %v6684_v48 = vpop.eup %6683  ;;  %v1782_v52 = vsel %vm1245_vm3, %v6682_v47, 0.0 }
 0x960   : > { %v1450_v62 = vmul.f32 %v6684_v48, %v6674_v22 }
 0x962   : > { %v6686_v49 = vpop.eup %6685 }
 0x963   : > { %v6688_v55 = vpop.eup %6687  ;;  %1783 = vadd.xlane.f32.xlu1 %v1782_v52  ;;  %v1785_v58 = vsel %vm1245_vm3, %v6686_v49, 0.0 }
 0x964   : > { %1786 = vadd.xlane.f32.xlu0 %v1785_v58  ;;  %v1448_v59 = vmul.f32 %v6688_v55, %v6676_v24  ;;  %v6399_v24 = vld [vmem:[%s8489_s9 + $0x10] sm:$0xff]  }
 0x966   : > { %v1453_v63 = vpack.c.bf16 %v1450_v62, %v1448_v59  ;;  %v6690_v5 = vpop.eup %6689 }
 0x967   : > { %v1452_v8 = vmul.f32 %v6690_v5, %v6678_v27  ;;  %v6401_v27 = vld [vmem:[%s8489_s9 + $0x20] sm:$0xff]  }
 0x968   : > { %6118 = vmatprep.mubr.msk.bf16.mxu0 %vm1245_vm3, %v1453_v63 }
 0x969   : > { %v1454_v13 = vpack.c.bf16 %v1452_v8, %v1452_v8 }
 0x974   : > { %1459 = vrot.lane.b32.xlu1 %v7138_v14, %s8510_s28 }
 0x978   : > { %1799 = vrot.lane.b32.xlu1 %v7130_v11, %s8514_s29 }
 0x97a   : > { %1457 = vrot.lane.b32.xlu0 %v7130_v11, %s8510_s28 }
 0x97c   : > { %1801 = vrot.lane.b32.xlu1 %v7138_v14, %s8514_s29 }
 0x9ec   : > { %v1790_v1 = vpop.xlane.xlu1 %1789 }
 0x9f0   : > { %v1784_v2 = vpop.xlane.xlu1 %1783 }
 0x9f1   : > { %6691 = vrcp.f32 %v1784_v2  ;;  %v1787_v3 = vpop.xlane.xlu0 %1786 }
 0x9f2   : > { %6693 = vrcp.f32 %v1787_v3 }
 0x9f3   : > { %6695 = vrcp.f32 %v1790_v1 }
 0x9f4   : > { %v1460_v4 = vpop.permute.xlu1 %1459 }
 0x9f5   : > { %v1458_v7 = vpop.permute.xlu0 %1457  ;;  %v1469_v9 = vsel %vm1290_vm2, %v1460_v4, 0 }
 0x9f6   : > { %6114 = vmatprep.subr.bf16.mxu0 %v1458_v7 }
 0x9f7   : > { %6115 = vmatpush3.bf16.msra.mxu0 %v1458_v7 }
 0x9f8   : > { %6303 = vmatprep.subr.msk.bf16.mxu0 %vm1290_vm2, %v1460_v4  ;;  %v1800_v11 = vpop.permute.xlu1 %1799 }
 0x9fb   : > { %v6692_v14 = vpop.eup %6691  ;;  %6117 = vmatpush3.bf16.msra.mxu0 %v1469_v9 }
 0x9fc   : > { %v6694_v12 = vpop.eup %6693  ;;  %6146 = vmatprep.subr.bf16.mxu0 %v1800_v11  ;;  %v1792_v16 = vmul.f32 %v6692_v14, %v6682_v47  ;;  %v1802_v21 = vpop.permute.xlu1 %1801 }
 0x9fd   : > { %v6696_v17 = vpop.eup %6695  ;;  %v1794_v19 = vmul.f32 %v6694_v12, %v6686_v49  ;;  %v1811_v10 = vsel %vm1290_vm2, %v1802_v21, 0 }
 0x9fe   : > { %6119 = vmatmul.mubr.msk.bf16.vlgmr.msra.gmra.mrb[12].mxu0 %vm1245_vm3, %v1454_v13  ;;  %v1796_v22 = vmul.f32 %v6696_v17, %v6680_v43 }
 0x9ff   : > { %6147 = vmatpush3.bf16.msra.mxu0 %v1800_v11  ;;  %v1797_v18 = vpack.c.bf16 %v1794_v19, %v1792_v16  ;;  %v5474_v11 = vld [vmem:[%s8490_s10] ss:$0 sm:$0xff] }
 0xa00   : > { %6309 = vmatprep.subr.msk.bf16.mxu0 %vm1290_vm2, %v1802_v21  ;;  %v1798_v20 = vpack.c.bf16 %v1796_v22, %v1796_v22  ;;  %v6410_v22 = vld [vmem:[%s8493_s13 + $0xc] ss:$16 sps:$4 sm:$0xff]  }
 0xa01   : > { %6150 = vmatprep.mubr.msk.bf16.mxu0 %vm1245_vm3, %v1797_v18  ;;  %v6408_v18 = vld [vmem:[%s8493_s13 + $0x8] ss:$16 sps:$4 sm:$0xff]  }
 0xa03   : > { %6149 = vmatpush3.bf16.msra.mxu0 %v1811_v10  ;;  %v6413_v10 = vld [vmem:[%s8493_s13 + $0x24] ss:$16 sps:$4 sm:$0xff]  }
 0xa04   : > { %6154 = vmatprep.subr.bf16.mxu0 %v6397_v6 }
 0xa06   : > { %6151 = vmatmul.mubr.msk.bf16.vlgmr.msra.gmra.mrb[16].mxu0 %vm1245_vm3, %v1798_v20  ;;  %v6416_v20 = vld [vmem:[%s8493_s13 + $0x2c] ss:$16 sps:$4 sm:$0xff]  }
 0xa07   : > { %6155 = vmatpush3.bf16.msra.mxu0 %v6397_v6  ;;  %v6411_v6 = vld [vmem:[%s8493_s13 + $0x20] ss:$16 sps:$4 sm:$0xff]  }
 0xa08   : > { %6156 = vmatprep.subr.bf16.mxu0 %v6398_v23 }
 0xa0b   : > { %6157 = vmatpush3.bf16.msra.mxu0 %v6398_v23  ;;  %v6414_v23 = vld [vmem:[%s8493_s13 + $0x28] ss:$16 sps:$4 sm:$0xff]  }
 0xa0c   : > { %6158 = vmatprep.subr.bf16.mxu0 %v6399_v24 }
 0xa0f   : > { %6159 = vmatpush3.bf16.msra.mxu0 %v6399_v24 }
 0xa10   : > { %6160 = vmatprep.subr.bf16.mxu0 %v6400_v33 }
 0xa13   : > { %6161 = vmatpush3.bf16.msra.mxu0 %v6400_v33 }
 0xa14   : > { %6162 = vmatprep.subr.bf16.mxu0 %v6401_v27 }
 0xa17   : > { %6163 = vmatpush3.bf16.msra.mxu0 %v6401_v27 }
 0xa18   : > { %6164 = vmatprep.subr.bf16.mxu0 %v6402_v25 }
 0xa1b   : > { %6165 = vmatpush3.bf16.msra.mxu0 %v6402_v25 }
 0xa1c   : > { %6166 = vmatprep.subr.bf16.mxu0 %v6403_v26 }
 0xa1f   : > { %6167 = vmatpush3.bf16.msra.mxu0 %v6403_v26 }
 0xa20   : > { %6168 = vmatprep.subr.bf16.mxu0 %v6404_v34 }
 0xa23   : > { %6169 = vmatpush3.bf16.msra.mxu0 %v6404_v34 }
 0xa24   : > { %2357 = vmatprep.subr.bf16.mxu0 %v6410_v22 }
 0xad1   : > { %v6120_v28 = vpop.f32.mrb[12].mxu0 }
 0xad2   : > { %1868 = vrot.lane.b32.xlu1 %v6120_v28, %s8544_s26  ;;  %v1505_v29 = vpop.f32.mrb[13].mxu0 }
 0xad3   : > { %v6121_v32 = vpop.f32.mrb[14].mxu0 }
 0xad4   : > { %v1508_v36 = vpop.f32.mrb[15].mxu0 }
 0xad5   : > { %v6335_v38 = vpack.i.bf16 %v1508_v36, %v1505_v29 }
 0xad6   : > { %1880 = vrot.lane.b32.xlu1 %v7254_v56, %s8545_s3 }
 0xad7   : > { %6336 = vrot.lane.b32.xlu0 %v6335_v38, %s8544_s26 }
 0xad9   : > { %v6152_v39 = vpop.f32.mrb[16].mxu0 }
 0xada   : > { %1892 = vrot.lane.b32.xlu1 %v6152_v39, %s8546_s25  ;;  %v1847_v40 = vpop.f32.mrb[17].mxu0 }
 0xadb   : > { %6341 = vrot.lane.b32.xlu0 %v6340_v61, %s8545_s3  ;;  %v6153_v41 = vpop.f32.mrb[18].mxu0 }
 0xadc   : > { %v1850_v42 = vpop.f32.mrb[19].mxu0  ;;  %v6419_v41 = vld [vmem:[%s8493_s13 + $0x44] ss:$16 sps:$4 sm:$0xff]  }
 0xadd   : > { %v6345_v43 = vpack.i.bf16 %v1850_v42, %v1847_v40  ;;  %v6422_v42 = vld [vmem:[%s8493_s13 + $0x4c] ss:$16 sps:$4 sm:$0xff]  }
 0xadf   : > { %6346 = vrot.lane.b32.xlu0 %v6345_v43, %s8546_s25  ;;  %v6417_v43 = vld [vmem:[%s8493_s13 + $0x40] ss:$16 sps:$4 sm:$0xff]  }
 0xb44   : > { %v1869_v46 = vpop.permute.xlu1 %1868 }
 0xb45   : > { %v1899_v59 = vsel %vm1178_vm1, %v7210_v30, %v1869_v46  ;;  %v6420_v46 = vld [vmem:[%s8493_s13 + $0x48] ss:$16 sps:$4 sm:$0xff]  }
 0xb48   : > { %v1881_v56 = vpop.permute.xlu1 %1880 }
 0xb49   : > { %v6337_v47 = vpop.permute.xlu0 %6336  ;;  %v1903_v60 = vsel %vm1900_vm5, %v1899_v59, %v1881_v56  ;;  %v6428_v56 = vld [vmem:[%s8493_s13 + $0x6c] ss:$16 sps:$4 sm:$0xff]   ;;  %v6432_v59 = vld [vmem:[%s8493_s13 + $0x88] ss:$16 sps:$4 sm:$0xff]  }
 0xb4a   : > { %v6339_v49 = vunpack.i.h.bf16 %v6337_v47  ;;  %v6338_v52 = vunpack.i.l.bf16 %v6337_v47  ;;  %v6425_v47 = vld [vmem:[%s8493_s13 + $0x64] ss:$16 sps:$4 sm:$0xff]  }
 0xb4c   : > { %v1893_v57 = vpop.permute.xlu1 %1892  ;;  %v1898_v62 = vsel %vm1178_vm1, %v7214_v35, %v6339_v49  ;;  %v1897_v63 = vsel %vm1178_vm1, %v7212_v31, %v6338_v52  ;;  %v6426_v49 = vld [vmem:[%s8493_s13 + $0x68] ss:$16 sps:$4 sm:$0xff]   ;;  %v6431_v52 = vld [vmem:[%s8493_s13 + $0x84] ss:$16 sps:$4 sm:$0xff]  }
 0xb4d   : > { %v6342_v48 = vpop.permute.xlu0 %6341  ;;  %v1907_v2 = vsel %vm1904_vm6, %v1903_v60, %v1893_v57  ;;  %v6437_v57 = vld [vmem:[%s8493_s13 + $0xa4] ss:$16 sps:$4 sm:$0xff]   ;;  %v6440_v60 = vld [vmem:[%s8493_s13 + $0xac] ss:$16 sps:$4 sm:$0xff]  }
 0xb4e   : > { %v6344_v55 = vunpack.i.h.bf16 %v6342_v48  ;;  %v6343_v58 = vunpack.i.l.bf16 %v6342_v48  ;;  %v1909_v8 = vpack.c.bf16 %v1907_v2, %v1907_v2  ;;  %v6423_v48 = vld [vmem:[%s8493_s13 + $0x60] ss:$16 sps:$4 sm:$0xff]   ;;  %v6446_v2 = vld [vmem:[%s8493_s13 + $0xcc] ss:$16 sps:$4 sm:$0xff]  }
 0xb50   : > { %v1901_v3 = vsel %vm1900_vm5, %v1897_v63, %v6343_v58  ;;  %v1902_v4 = vsel %vm1900_vm5, %v1898_v62, %v6344_v55  ;;  %v6434_v55 = vld [vmem:[%s8493_s13 + $0x8c] ss:$16 sps:$4 sm:$0xff]   ;;  %v6429_v58 = vld [vmem:[%s8493_s13 + $0x80] ss:$16 sps:$4 sm:$0xff]   ;;  %v6438_v62 = vld [vmem:[%s8493_s13 + $0xa8] ss:$16 sps:$4 sm:$0xff]  }
 0xb51   : > { %v6347_v61 = vpop.permute.xlu0 %6346  ;;  %v6441_v63 = vld [vmem:[%s8493_s13 + $0xc0] ss:$16 sps:$4 sm:$0xff]  }
 0xb52   : > { %v6349_v0 = vunpack.i.h.bf16 %v6347_v61  ;;  %v6348_v1 = vunpack.i.l.bf16 %v6347_v61  ;;  %v6435_v61 = vld [vmem:[%s8493_s13 + $0xa0] ss:$16 sps:$4 sm:$0xff]  }
 0xb54   : > { %v1905_v30 = vsel %vm1904_vm6, %v1901_v3, %v6348_v1  ;;  %v1906_v5 = vsel %vm1904_vm6, %v1902_v4, %v6349_v0  ;;  %v6443_v0 = vld [vmem:[%s8493_s13 + $0xc4] ss:$16 sps:$4 sm:$0xff]   ;;  %v6444_v1 = vld [vmem:[%s8493_s13 + $0xc8] ss:$16 sps:$4 sm:$0xff]   ;;  %v6452_v4 = vld [vmem:[%s8493_s13 + $0xec] ss:$16 sps:$4 sm:$0xff]  }
 0xb55   : > { %v1908_v7 = vpack.c.bf16 %v1906_v5, %v1905_v30  ;;  %v6449_v3 = vld [vmem:[%s8493_s13 + $0xe4] ss:$16 sps:$4 sm:$0xff]   ;;  %v6447_v30 = vld [vmem:[%s8493_s13 + $0xe0] ss:$16 sps:$4 sm:$0xff]   ;;  %v6450_v5 = vld [vmem:[%s8493_s13 + $0xe8] ss:$16 sps:$4 sm:$0xff]  }
 0xb57   : > { %6170 = vmatprep.mubr.bf16.mxu0 %v1908_v7 }
 0xb58   : > { %6171 = vmatmul.mubr.bf16.vlgmr.msra.gmra.mrb[20].mxu0 %v1909_v8 }
 0xb59   : > { %2389 = vmatprep.mubr.bf16.mxu0 %v6840_v15  ;;  %2358 = vmatpush1.bf16.msra.mxu0 %v6408_v18 }
 0xb5a   : > { %2359 = vmatprep.subr.bf16.mxu0 %v6416_v20  ;;  %v5476_v20 = vld [vmem:[%s8492_s12] ss:$0 sm:$0xff] }
 0xb5d   : > { %2360 = vmatpush1.bf16.msra.mxu0 %v6414_v23 }
 0xb5e   : > { %2361 = vmatprep.subr.bf16.mxu0 %v6422_v42  ;;  %v6461_v42 = vld [vmem:[%s8495_s15 + $0x50] sm:$0xff]  }
 0xb61   : > { %2362 = vmatpush1.bf16.msra.mxu0 %v6420_v46  ;;  %v6463_v46 = vld [vmem:[%s8495_s15 + $0x10] sm:$0xff]  }
 0xb62   : > { %2363 = vmatprep.subr.bf16.mxu0 %v6428_v56  ;;  %v6465_v56 = vld [vmem:[%s8495_s15 + $0x58] sm:$0xff]  }
 0xb65   : > { %2364 = vmatpush1.bf16.msra.mxu0 %v6426_v49  ;;  %v6467_v49 = vld [vmem:[%s8495_s15 + $0x18] sm:$0xff]  }
 0xb66   : > { %2365 = vmatprep.subr.bf16.mxu0 %v6434_v55  ;;  %v6469_v55 = vld [vmem:[%s8495_s15 + $0x60] sm:$0xff]  }
 0xb69   : > { %2366 = vmatpush1.bf16.msra.mxu0 %v6432_v59  ;;  %v6471_v59 = vld [vmem:[%s8495_s15 + $0x20] sm:$0xff]  }
 0xb6a   : > { %2367 = vmatprep.subr.bf16.mxu0 %v6440_v60  ;;  %v6473_v60 = vld [vmem:[%s8495_s15 + $0x68] sm:$0xff]  }
 0xb6d   : > { %2368 = vmatpush1.bf16.msra.mxu0 %v6438_v62  ;;  %v6475_v62 = vld [vmem:[%s8495_s15 + $0x28] sm:$0xff]  }
 0xb6e   : > { %2369 = vmatprep.subr.bf16.mxu0 %v6446_v2  ;;  %v6479_v2 = vld [vmem:[%s8495_s15 + $0x30] sm:$0xff]  }
 0xb71   : > { %2370 = vmatpush1.bf16.msra.mxu0 %v6444_v1  ;;  %v6478_v1 = vld [vmem:[%s8495_s15 + $0xf0] sm:$0xff]  }
 0xb72   : > { %2371 = vmatprep.subr.bf16.mxu0 %v6452_v4  ;;  %v6481_v4 = vld [vmem:[%s8495_s15 + $0x78] sm:$0xff]  }
 0xb75   : > { %2372 = vmatpush1.bf16.msra.mxu0 %v6450_v5  ;;  %v6483_v5 = vld [vmem:[%s8495_s15 + $0x38] sm:$0xff]  }
 0xc2b   : > { %v6172_v35 = vpop.f32.mrb[20].mxu0 }
 0xc2c   : > { %v2024_v31 = vadd.f32 %v6172_v35, %v7003_v44  ;;  %v2008_v9 = vpop.f32.mrb[21].mxu0 }
 0xc2d   : > { %v2022_v14 = vadd.f32 %v2008_v9, %v6994_v37  ;;  %v6173_v12 = vpop.f32.mrb[22].mxu0  ;;  %v6405_v37 = vld [vmem:[%s8493_s13] ss:$16 sps:$4 sm:$0xff]  }
 0xc2e   : > { %v2011_v13 = vpop.f32.mrb[23].mxu0  ;;  %v7345_v19 = vadd.f32 %v5474_v11, %v2024_v31 }
 0xc2f   : > { %v7342_v16 = vadd.f32 %v5474_v11, %v2022_v14  ;;  %v2023_v17 = vadd.f32 %v2011_v13, %v7005_v45  ;;  %v6407_v45 = vld [vmem:[%s8493_s13 + $0x4] ss:$16 sps:$4 sm:$0xff]  }
 0xc30   : > { %v2041_v44 = vsel %vm784_vm0, %v7345_v19, 0.0  ;;  %2306 = vmatprep.subr.bf16.mxu1 %v6407_v45 }
 0xc31   : > { %v7347_v21 = vadd.f32 %v5474_v11, %v2023_v17  ;;  %2037 = vadd.xlane.f32.xlu0 %v7342_v16  ;;  %2307 = vmatpush1.bf16.msra.mxu1 %v6405_v37  ;;  %v5475_v37 = vld [vmem:[%s8491_s11] ss:$0 sm:$0xff] }
 0xc32   : > { %2308 = vmatprep.subr.bf16.mxu1 %v6413_v10 }
 0xc33   : > { %2039 = vadd.xlane.f32.xlu1 %v7347_v21 }
 0xc35   : > { %2042 = vadd.xlane.f32.xlu0 %v2041_v44  ;;  %2309 = vmatpush1.bf16.msra.mxu1 %v6411_v6 }
 0xc36   : > { %2310 = vmatprep.subr.bf16.mxu1 %v6419_v41  ;;  %v6460_v41 = vld [vmem:[%s8495_s15 + $0x88] sm:$0xff]  }
 0xc39   : > { %2311 = vmatpush1.bf16.msra.mxu1 %v6417_v43  ;;  %v6462_v43 = vld [vmem:[%s8495_s15 + $0xd0] sm:$0xff]  }
 0xc3a   : > { %2312 = vmatprep.subr.bf16.mxu1 %v6425_v47  ;;  %v6464_v47 = vld [vmem:[%s8495_s15 + $0x90] sm:$0xff]  }
 0xc3d   : > { %2313 = vmatpush1.bf16.msra.mxu1 %v6423_v48  ;;  %v6466_v48 = vld [vmem:[%s8495_s15 + $0xd8] sm:$0xff]  }
 0xc3e   : > { %2314 = vmatprep.subr.bf16.mxu1 %v6431_v52  ;;  %v6468_v52 = vld [vmem:[%s8495_s15 + $0x98] sm:$0xff]  }
 0xc41   : > { %2315 = vmatpush1.bf16.msra.mxu1 %v6429_v58  ;;  %v6470_v58 = vld [vmem:[%s8495_s15 + $0xe0] sm:$0xff]  }
 0xc42   : > { %2316 = vmatprep.subr.bf16.mxu1 %v6437_v57  ;;  %v6472_v57 = vld [vmem:[%s8495_s15 + $0xa0] sm:$0xff]  }
 0xc45   : > { %2317 = vmatpush1.bf16.msra.mxu1 %v6435_v61  ;;  %v6474_v61 = vld [vmem:[%s8495_s15 + $0xe8] sm:$0xff]  }
 0xc46   : > { %2318 = vmatprep.subr.bf16.mxu1 %v6443_v0  ;;  %v6477_v0 = vld [vmem:[%s8495_s15 + $0x70] sm:$0xff]  }
 0xc49   : > { %2319 = vmatpush1.bf16.msra.mxu1 %v6441_v63  ;;  %v6476_v63 = vld [vmem:[%s8495_s15 + $0xa8] sm:$0xff]  }
 0xc4a   : > { %2320 = vmatprep.subr.bf16.mxu1 %v6449_v3  ;;  %v6480_v3 = vld [vmem:[%s8495_s15 + $0xb0] sm:$0xff]  }
 0xc4d   : > { %2321 = vmatpush1.bf16.msra.mxu1 %v6447_v30  ;;  %v6482_v30 = vld [vmem:[%s8495_s15 + $0xf8] sm:$0xff]  }
 0xcbe   : > { %v2038_v24 = vpop.xlane.xlu0 %2037 }
 0xcbf   : > { %v2044_v33 = vmul.f32 0.0078125, %v2038_v24 }
 0xcc0   : > { %v2040_v27 = vpop.xlane.xlu1 %2039 }
 0xcc1   : > { %v7378_v25 = vsub.f32 %v7342_v16, %v2044_v33  ;;  %v2045_v26 = vmul.f32 0.0078125, %v2040_v27 }
 0xcc2   : > { %v2043_v28 = vpop.xlane.xlu0 %2042 }
 0xcc3   : > { %v7381_v29 = vsub.f32 %v7347_v21, %v2045_v26  ;;  %v2046_v34 = vmul.f32 0.0078125, %v2043_v28  ;;  %v2050_v32 = vmul.f32 %v7378_v25, %v7378_v25 }
 0xcc5   : > { %v7386_v36 = vsub.f32 %v7345_v19, %v2046_v34  ;;  %2053 = vadd.xlane.f32.xlu0 %v2050_v32  ;;  %v2051_v38 = vmul.f32 %v7381_v29, %v7381_v29  ;;  %v6454_v34 = vld [vmem:[%s8495_s15 + $0xc0] sm:$0xff]  }
 0xcc6   : > { %v6455_v32 = vld [vmem:[%s8495_s15] sm:$0xff]   ;;  %5924 = vmatprep.subr.bf16.mxu0 %v6454_v34 }
 0xcc7   : > { %v2052_v39 = vmul.f32 %v7386_v36, %v7386_v36 }
 0xcc9   : > { %2055 = vadd.xlane.f32.xlu0 %v2051_v38  ;;  %v2057_v40 = vsel %vm784_vm0, %v2052_v39, 0.0  ;;  %v6457_v38 = vld [vmem:[%s8495_s15 + $0x48] sm:$0xff]  }
 0xcca   : > { %2058 = vadd.xlane.f32.xlu1 %v2057_v40  ;;  %v6458_v39 = vld [vmem:[%s8495_s15 + $0xc8] sm:$0xff]  }
 0xccb   : > { %v6459_v40 = vld [vmem:[%s8495_s15 + $0x8] sm:$0xff]  }
 0xd52   : > { %v2054_v7 = vpop.xlane.xlu0 %2053 }
 0xd53   : > { %v2060_v8 = vmul.f32 0.0078125, %v2054_v7  ;;  %v6484_v7 = vld [vmem:[%s8495_s15 + $0xb8] sm:$0xff]  }
 0xd55   : > { %v2063_v35 = vadd.f32 1e-05, %v2060_v8  ;;  %v2124_v8 = vld [vmem:[%s8494_s14] sm:$0xf] }
 0xd56   : > { %v2056_v31 = vpop.xlane.xlu0 %2055 }
 0xd57   : > { %6697 = vrsqrt.f32 %v2063_v35  ;;  %v2061_v11 = vmul.f32 0.0078125, %v2056_v31  ;;  %v2059_v9 = vpop.xlane.xlu1 %2058  ;;  %v2140_v35 = vsub.s32 3, %v7109_v50  ;;  %v7577_v31 = vrot.slane %v2124_v8, %v7112_v51 }
 0xd58   : > { %v2062_v14 = vmul.f32 0.0078125, %v2059_v9  ;;  %v7583_v9 = vrot.slane %v2124_v8, %v7118_v53 }
 0xd59   : > { %v2064_v12 = vadd.f32 1e-05, %v2061_v11  ;;  %v7580_v11 = vrot.slane %v2124_v8, %v7121_v54 }
 0xd5a   : > { %v2065_v13 = vadd.f32 1e-05, %v2062_v14  ;;  %v7587_v14 = vrot.slane %v2124_v8, %v2140_v35 }
 0xd5b   : > { %6699 = vrsqrt.f32 %v2064_v12 }
 0xd5c   : > { %6701 = vrsqrt.f32 %v2065_v13 }
 0xd61   : > { %v6698_v17 = vpop.eup %6697 }
 0xd62   : > { %v2069_v44 = vmul.f32 %v6698_v17, %v7378_v25 }
 0xd64   : > { %v2078_v10 = vmul.f32 %v5475_v37, %v2069_v44 }
 0xd65   : > { %v6700_v45 = vpop.eup %6699 }
 0xd66   : > { %v6702_v18 = vpop.eup %6701  ;;  %v2070_v22 = vmul.f32 %v6700_v45, %v7381_v29  ;;  %v2087_v24 = vadd.f32 %v5476_v20, %v2078_v10  ;;  %v6453_v29 = vld [vmem:[%s8495_s15 + $0x40] sm:$0xff]  }
 0xd67   : > { %v2071_v23 = vmul.f32 %v6702_v18, %v7386_v36  ;;  %v6456_v36 = vld [vmem:[%s8495_s15 + $0x80] sm:$0xff]   ;;  %5896 = vmatprep.subr.bf16.mxu1 %v6453_v29 }
 0xd68   : > { %v2079_v6 = vmul.f32 %v5475_v37, %v2070_v22 }
 0xd69   : > { %v2080_v25 = vmul.f32 %v5475_v37, %v2071_v23 }
 0xd6a   : > { %v2088_v33 = vadd.f32 %v5476_v20, %v2079_v6 }
 0xd6b   : > { %v2089_v26 = vadd.f32 %v5476_v20, %v2080_v25 }
 0xd6c   : > { %v2090_v27 = vpack.c.bf16 %v2088_v33, %v2087_v24 }
 0xd6d   : > { %v2091_v28 = vpack.c.bf16 %v2089_v26, %v2089_v26 }
 0xd6e   : > { %2339 = vmatmul.mubr.bf16.vlgmr.msra.gmra.mrb[24].mxu1 %v2090_v27  ;;  %2390 = vmatmul.mubr.bf16.vlgmr.msra.gmra.mrb[24].mxu0 %v2090_v27 }
 0xd6f   : > { %2348 = vmatprep.mubr.bf16.mxu1 %v6840_v15  ;;  %2399 = vmatprep.mubr.bf16.mxu0 %v6840_v15 }
 0xd70   : > { %5897 = vmatpush3.bf16.msra.mxu1 %v6455_v32  ;;  %5925 = vmatpush3.bf16.msra.mxu0 %v6456_v36 }
 0xd71   : > { %5898 = vmatprep.subr.bf16.mxu1 %v6457_v38  ;;  %5926 = vmatprep.subr.bf16.mxu0 %v6458_v39 }
 0xd74   : > { %5899 = vmatpush3.bf16.msra.mxu1 %v6459_v40  ;;  %5927 = vmatpush3.bf16.msra.mxu0 %v6460_v41 }
 0xd75   : > { %5900 = vmatprep.subr.bf16.mxu1 %v6461_v42  ;;  %5928 = vmatprep.subr.bf16.mxu0 %v6462_v43 }
 0xd76   : > { %2349 = vmatmul.mubr.bf16.gmra.mrb[28].mxu1 %v2091_v28  ;;  %2400 = vmatmul.mubr.bf16.gmra.mrb[28].mxu0 %v2091_v28 }
 0xd78   : > { %5901 = vmatpush3.bf16.msra.mxu1 %v6463_v46  ;;  %5929 = vmatpush3.bf16.msra.mxu0 %v6464_v47 }
 0xd79   : > { %5902 = vmatprep.subr.bf16.mxu1 %v6465_v56  ;;  %5930 = vmatprep.subr.bf16.mxu0 %v6466_v48 }
 0xd7c   : > { %5903 = vmatpush3.bf16.msra.mxu1 %v6467_v49  ;;  %5931 = vmatpush3.bf16.msra.mxu0 %v6468_v52 }
 0xd7d   : > { %5904 = vmatprep.subr.bf16.mxu1 %v6469_v55  ;;  %5932 = vmatprep.subr.bf16.mxu0 %v6470_v58 }
 0xd80   : > { %5905 = vmatpush3.bf16.msra.mxu1 %v6471_v59  ;;  %5933 = vmatpush3.bf16.msra.mxu0 %v6472_v57 }
 0xd81   : > { %5906 = vmatprep.subr.bf16.mxu1 %v6473_v60  ;;  %5934 = vmatprep.subr.bf16.mxu0 %v6474_v61 }
 0xd84   : > { %5907 = vmatpush3.bf16.msra.mxu1 %v6475_v62  ;;  %5935 = vmatpush3.bf16.msra.mxu0 %v6476_v63 }
 0xd85   : > { %5908 = vmatprep.subr.bf16.mxu1 %v6477_v0  ;;  %5936 = vmatprep.subr.bf16.mxu0 %v6478_v1 }
 0xd88   : > { %5909 = vmatpush3.bf16.msra.mxu1 %v6479_v2  ;;  %5937 = vmatpush3.bf16.msra.mxu0 %v6480_v3 }
 0xd89   : > { %5910 = vmatprep.subr.bf16.mxu1 %v6481_v4  ;;  %5938 = vmatprep.subr.bf16.mxu0 %v6482_v30 }
 0xd8c   : > { %5911 = vmatpush3.bf16.msra.mxu1 %v6483_v5  ;;  %5939 = vmatpush3.bf16.msra.mxu0 %v6484_v7 }
 0xe41   : > { %v2340_v12 = vpop.f32.mrb[24].mxu1  ;;  %v2391_v13 = vpop.f32.mrb[24].mxu0 }
 0xe42   : > { %v7590_v17 = vadd.f32 %v2340_v12, %v7577_v31  ;;  %v7593_v44 = vadd.f32 %v2391_v13, %v7580_v11  ;;  %v2342_v37 = vpop.f32.mrb[25].mxu1  ;;  %v2393_v45 = vpop.f32.mrb[25].mxu0 }
 0xe43   : > { %v7596_v18 = vadd.f32 %v2342_v37, %v7583_v9  ;;  %v7599_v22 = vadd.f32 %v2393_v45, %v7587_v14  ;;  %v2344_v10 = vpop.f32.mrb[26].mxu1  ;;  %v2395_v20 = vpop.f32.mrb[26].mxu0 }
 0xe44   : > { %v2408_v6 = vmul.f32 %v7590_v17, %v7590_v17  ;;  %v2410_v23 = vmul.f32 %v7593_v44, %v7593_v44  ;;  %v7606_v24 = vadd.f32 %v2344_v10, %v7577_v31  ;;  %v7609_v33 = vadd.f32 %v2395_v20, %v7580_v11  ;;  %v2346_v27 = vpop.f32.mrb[27].mxu1  ;;  %v2397_v25 = vpop.f32.mrb[27].mxu0 }
 0xe45   : > { %v2409_v26 = vmul.f32 %v7596_v18, %v7596_v18  ;;  %v2411_v28 = vmul.f32 %v7599_v22, %v7599_v22  ;;  %v7616_v29 = vadd.f32 %v2346_v27, %v7583_v9  ;;  %v7619_v34 = vadd.f32 %v2397_v25, %v7587_v14 }
 0xe46   : > { %v2420_v32 = vmul.f32 %v2408_v6, %v7590_v17  ;;  %v2422_v36 = vmul.f32 %v2410_v23, %v7593_v44  ;;  %v2412_v38 = vmul.f32 %v7606_v24, %v7606_v24  ;;  %v2414_v39 = vmul.f32 %v7609_v33, %v7609_v33 }
 0xe47   : > { %v2421_v40 = vmul.f32 %v2409_v26, %v7596_v18  ;;  %v2423_v41 = vmul.f32 %v2411_v28, %v7599_v22  ;;  %v2413_v42 = vmul.f32 %v7616_v29, %v7616_v29  ;;  %v2415_v43 = vmul.f32 %v7619_v34, %v7619_v34 }
 0xe48   : > { %v2432_v46 = vmul.f32 0.044715, %v2420_v32  ;;  %v2434_v47 = vmul.f32 0.044715, %v2422_v36  ;;  %v2424_v56 = vmul.f32 %v2412_v38, %v7606_v24  ;;  %v2426_v48 = vmul.f32 %v2414_v39, %v7609_v33 }
 0xe49   : > { %v2433_v49 = vmul.f32 0.044715, %v2421_v40  ;;  %v2435_v52 = vmul.f32 0.044715, %v2423_v41  ;;  %v2425_v55 = vmul.f32 %v2413_v42, %v7616_v29  ;;  %v2427_v58 = vmul.f32 %v2415_v43, %v7619_v34  ;;  %v2350_v59 = vpop.f32.mrb[28].mxu1  ;;  %v2401_v57 = vpop.f32.mrb[28].mxu0 }
 0xe4a   : > { %v2444_v60 = vadd.f32 %v2432_v46, %v7590_v17  ;;  %v2446_v61 = vadd.f32 %v2434_v47, %v7593_v44  ;;  %v2436_v62 = vmul.f32 0.044715, %v2424_v56  ;;  %v2438_v63 = vmul.f32 0.044715, %v2426_v48  ;;  %v2352_v0 = vpop.f32.mrb[29].mxu1  ;;  %v2403_v1 = vpop.f32.mrb[29].mxu0 }
 0xe4b   : > { %v2445_v2 = vadd.f32 %v2433_v49, %v7596_v18  ;;  %v2447_v3 = vadd.f32 %v2435_v52, %v7599_v22  ;;  %v2437_v4 = vmul.f32 0.044715, %v2425_v55  ;;  %v2439_v30 = vmul.f32 0.044715, %v2427_v58  ;;  %v2354_v5 = vpop.f32.mrb[30].mxu1  ;;  %v2405_v7 = vpop.f32.mrb[30].mxu0 }
 0xe4c   : > { %v2456_v8 = vmul.f32 0.7978846, %v2444_v60  ;;  %v2458_v12 = vmul.f32 0.7978846, %v2446_v61  ;;  %v2448_v13 = vadd.f32 %v2436_v62, %v7606_v24  ;;  %v2450_v37 = vadd.f32 %v2438_v63, %v7609_v33  ;;  %v2355_v45 = vpop.f32.mrb[31].mxu1  ;;  %v2406_v10 = vpop.f32.mrb[31].mxu0 }
 0xe4d   : > { %v2457_v20 = vmul.f32 0.7978846, %v2445_v2  ;;  %v2459_v6 = vmul.f32 0.7978846, %v2447_v3  ;;  %v2449_v23 = vadd.f32 %v2437_v4, %v7616_v29  ;;  %v2451_v27 = vadd.f32 %v2439_v30, %v7619_v34 }
 0xe4e   : > { %6703 = vtanh.f32 %v2456_v8  ;;  %v2460_v25 = vmul.f32 0.7978846, %v2448_v13  ;;  %v7646_v26 = vadd.f32 %v2350_v59, %v7577_v31  ;;  %v2462_v28 = vmul.f32 0.7978846, %v2450_v37 }
 0xe4f   : > { %6705 = vtanh.f32 %v2458_v12  ;;  %v2461_v32 = vmul.f32 0.7978846, %v2449_v23  ;;  %v7649_v36 = vadd.f32 %v2401_v57, %v7580_v11  ;;  %v7654_v39 = vadd.f32 %v2352_v0, %v7583_v9 }
 0xe50   : > { %6707 = vtanh.f32 %v2457_v20  ;;  %v2416_v38 = vmul.f32 %v7646_v26, %v7646_v26  ;;  %v7657_v40 = vadd.f32 %v2403_v1, %v7587_v14  ;;  %v2463_v41 = vmul.f32 0.7978846, %v2451_v27 }
 0xe51   : > { %6709 = vtanh.f32 %v2459_v6  ;;  %v2418_v31 = vmul.f32 %v7649_v36, %v7649_v36  ;;  %v2417_v11 = vmul.f32 %v7654_v39, %v7654_v39 }
 0xe52   : > { %6711 = vtanh.f32 %v2460_v25  ;;  %v2428_v42 = vmul.f32 %v2416_v38, %v7646_v26  ;;  %v2419_v43 = vmul.f32 %v7657_v40, %v7657_v40 }
 0xe53   : > { %6713 = vtanh.f32 %v2462_v28  ;;  %v2430_v9 = vmul.f32 %v2418_v31, %v7649_v36  ;;  %v2429_v46 = vmul.f32 %v2417_v11, %v7654_v39 }
 0xe54   : > { %6715 = vtanh.f32 %v2461_v32  ;;  %v2440_v14 = vmul.f32 0.044715, %v2428_v42  ;;  %v2431_v47 = vmul.f32 %v2419_v43, %v7657_v40 }
 0xe55   : > { %6717 = vtanh.f32 %v2463_v41  ;;  %v2442_v56 = vmul.f32 0.044715, %v2430_v9  ;;  %v2441_v49 = vmul.f32 0.044715, %v2429_v46 }
 0xe56   : > { %v2452_v48 = vadd.f32 %v2440_v14, %v7646_v26  ;;  %v2443_v52 = vmul.f32 0.044715, %v2431_v47 }
 0xe57   : > { %v2454_v55 = vadd.f32 %v2442_v56, %v7649_v36  ;;  %v2453_v57 = vadd.f32 %v2441_v49, %v7654_v39 }
 0xe58   : > { %v6704_v58 = vpop.eup %6703  ;;  %v2464_v59 = vmul.f32 0.7978846, %v2452_v48  ;;  %v2455_v60 = vadd.f32 %v2443_v52, %v7657_v40 }
 0xe59   : > { %v6706_v61 = vpop.eup %6705  ;;  %v2480_v62 = vadd.f32 1.0, %v6704_v58  ;;  %v2466_v63 = vmul.f32 0.7978846, %v2454_v55  ;;  %v2465_v2 = vmul.f32 0.7978846, %v2453_v57 }
 0xe5a   : > { %v6708_v0 = vpop.eup %6707  ;;  %v2482_v1 = vadd.f32 1.0, %v6706_v61  ;;  %6719 = vtanh.f32 %v2464_v59  ;;  %v2467_v3 = vmul.f32 0.7978846, %v2455_v60 }
 0xe5b   : > { %v6710_v4 = vpop.eup %6709  ;;  %6721 = vtanh.f32 %v2466_v63  ;;  %v2481_v30 = vadd.f32 1.0, %v6708_v0  ;;  %v2492_v12 = vmul.f32 0.5, %v2480_v62 }
 0xe5c   : > { %v6712_v5 = vpop.eup %6711  ;;  %6723 = vtanh.f32 %v2465_v2  ;;  %v2483_v7 = vadd.f32 1.0, %v6710_v4  ;;  %v2494_v45 = vmul.f32 0.5, %v2482_v1 }
 0xe5d   : > { %v6714_v8 = vpop.eup %6713  ;;  %v2484_v13 = vadd.f32 1.0, %v6712_v5  ;;  %6725 = vtanh.f32 %v2467_v3  ;;  %v2493_v27 = vmul.f32 0.5, %v2481_v30  ;;  %v2504_v38 = vmul.f32 %v2492_v12, %v7590_v17 }
 0xe5e   : > { %v6716_v37 = vpop.eup %6715  ;;  %v2486_v10 = vadd.f32 1.0, %v6714_v8  ;;  %v2495_v32 = vmul.f32 0.5, %v2483_v7  ;;  %v2506_v42 = vmul.f32 %v2494_v45, %v7593_v44 }
 0xe5f   : > { %v6718_v20 = vpop.eup %6717  ;;  %v2496_v6 = vmul.f32 0.5, %v2484_v13  ;;  %v2485_v23 = vadd.f32 1.0, %v6716_v37  ;;  %v2505_v14 = vmul.f32 %v2493_v27, %v7596_v18 }
 0xe60   : > { %v2498_v25 = vmul.f32 0.5, %v2486_v10  ;;  %v2487_v28 = vadd.f32 1.0, %v6718_v20  ;;  %v2507_v48 = vmul.f32 %v2495_v32, %v7599_v22  ;;  %v5541_v10 = vld [vmem:[%s8496_s16] ss:$0 sm:$0xff] }
 0xe61   : > { %v2508_v41 = vmul.f32 %v2496_v6, %v7606_v24  ;;  %v2497_v31 = vmul.f32 0.5, %v2485_v23 }
 0xe62   : > { %v2510_v11 = vmul.f32 %v2498_v25, %v7609_v33  ;;  %v2499_v43 = vmul.f32 0.5, %v2487_v28 }
 0xe63   : > { %v2516_v9 = vpack.c.bf16 %v2508_v41, %v2504_v38  ;;  %v2509_v46 = vmul.f32 %v2497_v31, %v7616_v29 }
 0xe64   : > { %v6720_v47 = vpop.eup %6719  ;;  %v2518_v56 = vpack.c.bf16 %v2510_v11, %v2506_v42  ;;  %v2511_v49 = vmul.f32 %v2499_v43, %v7619_v34 }
 0xe65   : > { %v6722_v17 = vpop.eup %6721  ;;  %v2517_v52 = vpack.c.bf16 %v2509_v46, %v2505_v14  ;;  %v2488_v24 = vadd.f32 1.0, %v6720_v47 }
 0xe66   : > { %v6724_v55 = vpop.eup %6723  ;;  %v2519_v58 = vpack.c.bf16 %v2511_v49, %v2507_v48  ;;  %v2490_v44 = vadd.f32 1.0, %v6722_v17  ;;  %v6487_v48 = vld [vmem:[%s8539_s30 + $0xc4] ss:$12 sps:$4 sm:$0xff]   ;;  %v6490_v49 = vld [vmem:[%s8539_s30 + $0xdc] ss:$12 sps:$4 sm:$0xff]  }
 0xe67   : > { %v6726_v59 = vpop.eup %6725  ;;  %2812 = vmatprep.mubr.bf16.mxu1 %v2517_v52  ;;  %v2489_v33 = vadd.f32 1.0, %v6724_v55  ;;  %v2500_v57 = vmul.f32 0.5, %v2488_v24  ;;  %3127 = vmatprep.subr.bf16.mxu1 %v6487_v48 }
 0xe68   : > { %2860 = vmatprep.mubr.bf16.mxu0 %v2519_v58  ;;  %2813 = vmatmul.mubr.bf16.vlgmr.msra.gmra.mrb[32].mxu1 %v2516_v9  ;;  %v2491_v18 = vadd.f32 1.0, %v6726_v59  ;;  %v2502_v29 = vmul.f32 0.5, %v2490_v44 }
 0xe69   : > { %2861 = vmatmul.mubr.bf16.vlgmr.msra.gmra.mrb[32].mxu0 %v2518_v56  ;;  %v2501_v60 = vmul.f32 0.5, %v2489_v33  ;;  %v2512_v22 = vmul.f32 %v2500_v57, %v7646_v26  ;;  %v6485_v56 = vld [vmem:[%s8539_s30 + $0xc0] ss:$12 sps:$4 sm:$0xff]  }
 0xe6a   : > { %v2503_v61 = vmul.f32 0.5, %v2491_v18  ;;  %v2514_v62 = vmul.f32 %v2502_v29, %v7649_v36  ;;  %3128 = vmatpush1.bf16.msra.mxu1 %v6485_v56 }
 0xe6b   : > { %v2513_v34 = vmul.f32 %v2501_v60, %v7654_v39  ;;  %v2520_v2 = vpack.c.bf16 %v2512_v22, %v2512_v22  ;;  %3129 = vmatprep.subr.bf16.mxu1 %v6490_v49  ;;  %v6493_v22 = vld [vmem:[%s8539_s30 + $0xf4] ss:$12 sps:$4 sm:$0xff]  }
 0xe6c   : > { %v2515_v63 = vmul.f32 %v2503_v61, %v7657_v40  ;;  %v2522_v3 = vpack.c.bf16 %v2514_v62, %v2514_v62  ;;  %v6491_v62 = vld [vmem:[%s8539_s30 + $0xf0] ss:$12 sps:$4 sm:$0xff]  }
 0xe6d   : > { %v2521_v0 = vpack.c.bf16 %v2513_v34, %v2513_v34  ;;  %v6494_v34 = vld [vmem:[%s8539_s30 + $0xc8] ss:$12 sps:$4 sm:$0xff]  }
 0xe6e   : > { %v2523_v1 = vpack.c.bf16 %v2515_v63, %v2515_v63  ;;  %6174 = vmatprep.subr.bf16.mxu0 %v6494_v34  ;;  %v6497_v63 = vld [vmem:[%s8539_s30 + $0x10c] ss:$12 sps:$4 sm:$0xff]  }
 0xe6f   : > { %2820 = vmatprep.mubr.bf16.mxu1 %v2521_v0  ;;  %6175 = vmatpush3.bf16.msra.mxu0 %v6494_v34  ;;  %v6498_v0 = vld [vmem:[%s8539_s30 + $0xe0] ss:$12 sps:$4 sm:$0xff]  }
 0xe70   : > { %2868 = vmatprep.mubr.bf16.mxu0 %v2523_v1  ;;  %2821 = vmatmul.mubr.bf16.gmra.mrb[36].mxu1 %v2520_v2  ;;  %v6495_v1 = vld [vmem:[%s8539_s30 + $0x108] ss:$12 sps:$4 sm:$0xff]   ;;  %v6501_v2 = vld [vmem:[%s8539_s30 + $0x124] ss:$12 sps:$4 sm:$0xff]  }
 0xe71   : > { %2869 = vmatmul.mubr.bf16.gmra.mrb[36].mxu0 %v2522_v3  ;;  %3159 = vmatprep.mubr.bf16.mxu1 %v6840_v15  ;;  %v6502_v3 = vld [vmem:[%s8539_s30 + $0xf8] ss:$12 sps:$4 sm:$0xff]  }
 0xe72   : > { %6176 = vmatprep.subr.bf16.mxu0 %v6498_v0 }
 0xe73   : > { %6177 = vmatpush3.bf16.msra.mxu0 %v6498_v0 }
 0xe74   : > { %6178 = vmatprep.subr.bf16.mxu0 %v6502_v3 }
 0xe77   : > { %6179 = vmatpush3.bf16.msra.mxu0 %v6502_v3 }
 0xf3b   : > { %v5912_v4 = vpop.f32.mrb[32].mxu1 }
 0xf3c   : > { %v5940_v30 = vpop.f32.mrb[32].mxu0  ;;  %v5913_v5 = vpop.f32.mrb[33].mxu1 }
 0xf3d   : > { %v5914_v26 = vadd.f32 %v5913_v5, %v5912_v4  ;;  %v5941_v7 = vpop.f32.mrb[33].mxu0  ;;  %v5915_v39 = vpop.f32.mrb[34].mxu1  ;;  %v6499_v4 = vld [vmem:[%s8539_s30 + $0x120] ss:$12 sps:$4 sm:$0xff]   ;;  %v6506_v5 = vld [vmem:[%s8539_s30 + $0x110] ss:$12 sps:$4 sm:$0xff]  }
 0xf3e   : > { %v5942_v8 = vadd.f32 %v5941_v7, %v5940_v30  ;;  %v5943_v36 = vpop.f32.mrb[34].mxu0  ;;  %v5916_v12 = vpop.f32.mrb[35].mxu1  ;;  %v6505_v30 = vld [vmem:[%s8539_s30 + $0x13c] ss:$12 sps:$4 sm:$0xff]   ;;  %6180 = vmatprep.subr.bf16.mxu0 %v6506_v5  ;;  %v6509_v7 = vld [vmem:[%s8539_s30 + $0x154] ss:$12 sps:$4 sm:$0xff]  }
 0xf3f   : > { %v5917_v40 = vadd.f32 %v5916_v12, %v5915_v39  ;;  %v5944_v13 = vpop.f32.mrb[35].mxu0  ;;  %6181 = vmatpush3.bf16.msra.mxu0 %v6506_v5  ;;  %v6510_v39 = vld [vmem:[%s8539_s30 + $0x128] ss:$12 sps:$4 sm:$0xff]   ;;  %v6514_v12 = vld [vmem:[%s8539_s30 + $0x140] ss:$12 sps:$4 sm:$0xff]  }
 0xf40   : > { %v2863_v37 = vadd.f32 %v5942_v8, %v5914_v26  ;;  %v5945_v45 = vadd.f32 %v5944_v13, %v5943_v36  ;;  %v6503_v26 = vld [vmem:[%s8539_s30 + $0x138] ss:$12 sps:$4 sm:$0xff]   ;;  %v6507_v8 = vld [vmem:[%s8539_s30 + $0x150] ss:$12 sps:$4 sm:$0xff]   ;;  %6182 = vmatprep.subr.bf16.mxu0 %v6510_v39 }
 0xf41   : > { %v6513_v36 = vld [vmem:[%s8539_s30 + $0x16c] ss:$12 sps:$4 sm:$0xff]  }
 0xf42   : > { %v2876_v20 = vadd.f32 %v2863_v37, %v7342_v16  ;;  %v2866_v6 = vadd.f32 %v5945_v45, %v5917_v40  ;;  %v6511_v40 = vld [vmem:[%s8539_s30 + $0x168] ss:$12 sps:$4 sm:$0xff]   ;;  %v6515_v13 = vld [vmem:[%s8539_s30 + $0x158] ss:$12 sps:$4 sm:$0xff]   ;;  %v6516_v37 = vld [vmem:[%s8539_s30 + $0x170] ss:$12 sps:$4 sm:$0xff]  }
 0xf43   : > { %v5918_v23 = vpop.f32.mrb[36].mxu1  ;;  %6183 = vmatpush3.bf16.msra.mxu0 %v6510_v39 }
 0xf44   : > { %v2877_v27 = vadd.f32 %v2866_v6, %v7347_v21  ;;  %v5946_v25 = vpop.f32.mrb[36].mxu0  ;;  %v5919_v28 = vpop.f32.mrb[37].mxu1  ;;  %v7691_v32 = vadd.f32 %v5541_v10, %v2876_v20  ;;  %6184 = vmatprep.subr.bf16.mxu0 %v6514_v12 }
 0xf45   : > { %v5920_v38 = vadd.f32 %v5919_v28, %v5918_v23  ;;  %v5947_v41 = vpop.f32.mrb[37].mxu0  ;;  %v5921_v31 = vpop.f32.mrb[38].mxu1 }
 0xf46   : > { %v5948_v42 = vadd.f32 %v5947_v41, %v5946_v25  ;;  %v5949_v11 = vpop.f32.mrb[38].mxu0  ;;  %2893 = vadd.xlane.f32.xlu0 %v7691_v32  ;;  %v5922_v43 = vpop.f32.mrb[39].mxu1  ;;  %v7694_v9 = vadd.f32 %v5541_v10, %v2877_v27  ;;  %v5544_v31 = vld [vmem:[%s8540_s1 + $0x1] ss:$0 sm:$0xff] }
 0xf47   : > { %v5950_v14 = vpop.f32.mrb[39].mxu0  ;;  %6185 = vmatpush3.bf16.msra.mxu0 %v6514_v12 }
 0xf48   : > { %v2871_v16 = vadd.f32 %v5948_v42, %v5920_v38  ;;  %2895 = vadd.xlane.f32.xlu1 %v7694_v9  ;;  %6186 = vmatprep.subr.bf16.mxu0 %v6515_v13 }
 0xf4a   : > { %v2878_v21 = vadd.f32 %v2871_v16, %v7345_v19  ;;  %v6488_v19 = vld [vmem:[%s8539_s30 + $0xd8] ss:$12 sps:$4 sm:$0xff]   ;;  %v5545_v16 = vld [vmem:[%s8541_s2 + $0x1] ss:$0 sm:$0xff] }
 0xf4b   : > { %3130 = vmatpush1.bf16.msra.mxu1 %v6488_v19  ;;  %6187 = vmatpush3.bf16.msra.mxu0 %v6515_v13 }
 0xf4c   : > { %v7698_v46 = vadd.f32 %v5541_v10, %v2878_v21  ;;  %3131 = vmatprep.subr.bf16.mxu1 %v6493_v22  ;;  %6188 = vmatprep.subr.bf16.mxu0 %v6516_v37 }
 0xf4e   : > { %v2897_v47 = vsel %vm784_vm0, %v7698_v46, 0.0 }
 0xf4f   : > { %2898 = vadd.xlane.f32.xlu0 %v2897_v47  ;;  %3132 = vmatpush1.bf16.msra.mxu1 %v6491_v62 }
 0xf50   : > { %3133 = vmatprep.subr.bf16.mxu1 %v6497_v63  ;;  %6189 = vmatpush3.bf16.msra.mxu0 %v6516_v37 }
 0xf53   : > { %3134 = vmatpush1.bf16.msra.mxu1 %v6495_v1 }
 0xf54   : > { %3135 = vmatprep.subr.bf16.mxu1 %v6501_v2 }
 0xf57   : > { %3136 = vmatpush1.bf16.msra.mxu1 %v6499_v4 }
 0xf58   : > { %3137 = vmatprep.subr.bf16.mxu1 %v6505_v30 }
 0xf5b   : > { %3138 = vmatpush1.bf16.msra.mxu1 %v6503_v26 }
 0xf5c   : > { %3139 = vmatprep.subr.bf16.mxu1 %v6509_v7 }
 0xf5f   : > { %3140 = vmatpush1.bf16.msra.mxu1 %v6507_v8 }
 0xf60   : > { %3141 = vmatprep.subr.bf16.mxu1 %v6513_v36 }
 0xf63   : > { %3142 = vmatpush1.bf16.msra.mxu1 %v6511_v40 }
 0xfd3   : > { %v2894_v17 = vpop.xlane.xlu0 %2893 }
 0xfd4   : > { %v2900_v52 = vmul.f32 0.0078125, %v2894_v17 }
 0xfd5   : > { %v2896_v24 = vpop.xlane.xlu1 %2895 }
 0xfd6   : > { %v7715_v55 = vsub.f32 %v7691_v32, %v2900_v52  ;;  %v2901_v58 = vmul.f32 0.0078125, %v2896_v24 }
 0xfd8   : > { %v7718_v44 = vsub.f32 %v7694_v9, %v2901_v58  ;;  %v2906_v59 = vmul.f32 %v7715_v55, %v7715_v55 }
 0xfda   : > { %2909 = vadd.xlane.f32.xlu1 %v2906_v59  ;;  %v2907_v33 = vmul.f32 %v7718_v44, %v7718_v44 }
 0xfdc   : > { %2911 = vadd.xlane.f32.xlu0 %v2907_v33  ;;  %v2899_v57 = vpop.xlane.xlu0 %2898 }
 0xfdd   : > { %v2902_v18 = vmul.f32 0.0078125, %v2899_v57 }
 0xfdf   : > { %v7725_v29 = vsub.f32 %v7698_v46, %v2902_v18 }
 0xfe1   : > { %v2908_v60 = vmul.f32 %v7725_v29, %v7725_v29 }
 0xfe3   : > { %v2913_v61 = vsel %vm784_vm0, %v2908_v60, 0.0 }
 0xfe4   : > { %2914 = vadd.xlane.f32.xlu1 %v2913_v61 }
0x1067   : > { %v2910_v45 = vpop.xlane.xlu1 %2909 }
0x1068   : > { %v2916_v10 = vmul.f32 0.0078125, %v2910_v45 }
0x1069   : > { %v2912_v20 = vpop.xlane.xlu0 %2911 }
0x106a   : > { %v2919_v6 = vadd.f32 1e-05, %v2916_v10  ;;  %v2917_v23 = vmul.f32 0.0078125, %v2912_v20 }
0x106c   : > { %6727 = vrsqrt.f32 %v2919_v6  ;;  %v2920_v27 = vadd.f32 1e-05, %v2917_v23 }
0x106e   : > { %6729 = vrsqrt.f32 %v2920_v27 }
0x1071   : > { %v2915_v25 = vpop.xlane.xlu1 %2914 }
0x1072   : > { %v2918_v28 = vmul.f32 0.0078125, %v2915_v25 }
0x1074   : > { %v2921_v38 = vadd.f32 1e-05, %v2918_v28 }
0x1076   : > { %v6728_v41 = vpop.eup %6727  ;;  %6731 = vrsqrt.f32 %v2921_v38 }
0x1077   : > { %v2925_v42 = vmul.f32 %v6728_v41, %v7715_v55  ;;  %v5578_v55 = vld [vmem:[%s8542_s7 + $0x3] sm:$0x7] }
0x1078   : > { %v6730_v11 = vpop.eup %6729  ;;  %v2987_v58 = vrot.slane %v5578_v55, %v7112_v51  ;;  %v2991_v59 = vrot.slane %v5578_v55, %v7118_v53  ;;  %v2995_v0 = vrot.slane %v5578_v55, %v7121_v54 }
0x1079   : > { %v2934_v43 = vmul.f32 %v5544_v31, %v2925_v42  ;;  %v2926_v14 = vmul.f32 %v6730_v11, %v7718_v44  ;;  %v7837_v42 = vld [vmem:[%s7160_s4] sm:$0xff] }
0x107b   : > { %v2935_v21 = vmul.f32 %v5544_v31, %v2926_v14  ;;  %v2943_v47 = vadd.f32 %v5545_v16, %v2934_v43  ;;  %v7842_v14 = vld [vmem:[%s7160_s4 + $0x8] sm:$0xff] }
0x107d   : > { %v2944_v56 = vadd.f32 %v5545_v16, %v2935_v21  ;;  %v7846_v21 = vld [vmem:[%s7160_s4 + $0x10] sm:$0x3f]  ;;  %s8548_s4 = sld [smem:[#allocation3_spill]] }
0x107f   : > { %v2946_v48 = vpack.c.bf16 %v2944_v56, %v2943_v47 }
0x1080   : > { %v6732_v49 = vpop.eup %6731 }
0x1081   : > { %3160 = vmatmul.mubr.bf16.vlgmr.msra.gmra.mrb[40].mxu1 %v2946_v48  ;;  %6190 = vmatprep.mubr.bf16.mxu0 %v2946_v48  ;;  %v2927_v19 = vmul.f32 %v6732_v49, %v7725_v29 }
0x1082   : > { %3169 = vmatprep.mubr.bf16.mxu1 %v6840_v15 }
0x1083   : > { %v2936_v17 = vmul.f32 %v5544_v31, %v2927_v19  ;;  %s765_s22 = scalar_lea.vmem %s8550_s20, %s8548_s4  ;;  %s770_s28 = scalar_lea.vmem %s8551_s8, %s8548_s4 }
0x1085   : > { %v2945_v52 = vadd.f32 %v5545_v16, %v2936_v17 }
0x1087   : > { %v2947_v24 = vpack.c.bf16 %v2945_v52, %v2945_v52 }
0x1089   : > { %3170 = vmatmul.mubr.bf16.gmra.mrb[44].mxu1 %v2947_v24  ;;  %6191 = vmatmul.mubr.bf16.vlgmr.msra.gmra.mrb[40].mxu0 %v2947_v24 }
0x1154   : > { %v3161_v44 = vpop.f32.mrb[40].mxu1 }
0x1155   : > { %v3163_v33 = vpop.f32.mrb[41].mxu1  ;;  %v3162_v18 = vadd.f32 %v3161_v44, %v2987_v58 }
0x1156   : > { %v3165_v57 = vpop.f32.mrb[42].mxu1  ;;  %v3164_v61 = vadd.f32 %v3163_v33, %v2991_v59 }
0x1157   : > { %v3166_v29 = vadd.f32 %v3165_v57, %v2987_v58  ;;  %v3167_v60 = vpop.f32.mrb[43].mxu1 }
0x1158   : > { %v3168_v22 = vadd.f32 %v3167_v60, %v2991_v59 }
0x1159   : > { %v7805_v34 = vpack.c.bf16 %v3166_v29, %v3162_v18 }
0x115a   : > { %v7807_v62 = vpack.c.bf16 %v3168_v22, %v3164_v61 }
0x115b   : > { %6198 = vmatprep.mubr.msk.bf16.mxu1 %vm1178_vm1, %v7805_v34 }
0x115c   : > { %v3171_v63 = vpop.f32.mrb[44].mxu1  ;;  %v6192_v1 = vpop.f32.mrb[40].mxu0  ;;  %6310 = vmatprep.subr.msk.bf16.mxu1 %vm1178_vm1, %v7807_v62  ;;  %v3237_v2 = vsel %vm1178_vm1, %v7807_v62, 0 }
0x115d   : > { %v3173_v3 = vpop.f32.mrb[45].mxu1  ;;  %v3212_v4 = vpop.f32.mrb[41].mxu0  ;;  %6195 = vmatpush3.bf16.xpose.msra.mxu1 %v3237_v2  ;;  %v3172_v37 = vadd.f32 %v3171_v63, %v2987_v58  ;;  %v3221_v45 = vadd.f32 %v6192_v1, %v2995_v0 }
0x115e   : > { %v3174_v30 = vadd.f32 %v3173_v3, %v2991_v59  ;;  %v3175_v5 = vpop.f32.mrb[46].mxu1  ;;  %v6193_v26 = vpop.f32.mrb[42].mxu0  ;;  %v3213_v36 = vadd.f32 %v3212_v4, %v2995_v0 }
0x115f   : > { %v3176_v7 = vpop.f32.mrb[47].mxu1  ;;  %v3215_v39 = vpop.f32.mrb[43].mxu0  ;;  %v7825_v10 = vpack.c.bf16 %v3172_v37, %v3172_v37  ;;  %v7827_v20 = vpack.c.bf16 %v3221_v45, %v3221_v45 }
0x1160   : > { %v7816_v8 = vpack.c.bf16 %v3174_v30, %v3174_v30  ;;  %v3216_v12 = vadd.f32 %v3215_v39, %v2995_v0 }
0x1161   : > { %v3340_v6 = vsel %vm1290_vm2, %v7827_v20, 0 }
0x1162   : > { %v7818_v40 = vpack.c.bf16 %v3216_v12, %v3213_v36  ;;  %6311 = vmatprep.subr.msk.bf16.mxu1 %vm1178_vm1, %v7816_v8  ;;  %v3240_v13 = vsel %vm1178_vm1, %v7816_v8, 0 }
0x1165   : > { %6197 = vmatpush3.bf16.xpose.msra.mxu1 %v3240_v13 }
0x1166   : > { %6202 = vmatprep.subr.bf16.mxu1 %v7818_v40 }
0x116c   : > { %6199 = vmatmul.mubr.msk.bf16.vlgmr.msra.gmra.mrb[48].mxu1 %vm1178_vm1, %v7825_v10 }
0x116d   : > { %6203 = vmatpush3.bf16.msra.mxu1 %v7818_v40 }
0x116e   : > { %6312 = vmatprep.subr.msk.bf16.mxu1 %vm1290_vm2, %v7827_v20 }
0x1171   : > { %6205 = vmatpush3.bf16.msra.mxu1 %v3340_v6 }
0x123f   : > { %v6200_v23 = vpop.f32.mrb[48].mxu1 }
0x1240   : > { %v3276_v27 = vpop.f32.mrb[49].mxu1  ;;  %v3292_v25 = vmul.f32 0.17677669, %v6200_v23 }
0x1241   : > { %v3290_v28 = vmul.f32 0.17677669, %v3276_v27  ;;  %v6201_v38 = vpop.f32.mrb[50].mxu1 }
0x1242   : > { %v3279_v41 = vpop.f32.mrb[51].mxu1  ;;  %v3295_v47 = vadd.f32 %v7846_v21, %v3292_v25 }
0x1243   : > { %v3291_v31 = vmul.f32 0.17677669, %v3279_v41  ;;  %v3293_v11 = vadd.f32 %v7837_v42, %v3290_v28 }
0x1244   : > { %v3302_v48 = vsel %vm1252_vm4, %v3295_v47, -inf }
0x1245   : > { %v3296_v43 = vsel %vm1245_vm3, %v3293_v11, -inf  ;;  %v3294_v16 = vadd.f32 %v7842_v14, %v3291_v31 }
0x1246   : > { %3297 = vmax.xlane.f32.xlu0 %v3296_v43 }
0x1247   : > { %v3299_v56 = vsel %vm1245_vm3, %v3294_v16, -inf }
0x1248   : > { %3300 = vmax.xlane.f32.xlu1 %v3299_v56 }
0x124a   : > { %3303 = vmax.xlane.f32.xlu0 %v3302_v48 }
0x12d3   : > { %v3298_v49 = vpop.xlane.xlu0 %3297 }
0x12d4   : > { %v3305_v19 = vsub.f32 %v3293_v11, %v3298_v49 }
0x12d5   : > { %v3301_v17 = vpop.xlane.xlu1 %3300 }
0x12d6   : > { %v3308_v52 = vmul.f32 1.442695, %v3305_v19  ;;  %v3306_v24 = vsub.f32 %v3294_v16, %v3301_v17 }
0x12d7   : > { %v3304_v55 = vpop.xlane.xlu0 %3303 }
0x12d8   : > { %6733 = vpow2.f32 %v3308_v52  ;;  %v3310_v58 = vmul.f32 1.442695, %v3306_v24  ;;  %v3307_v44 = vsub.f32 %v3295_v47, %v3304_v55 }
0x12da   : > { %6735 = vpow2.f32 %v3310_v58  ;;  %v3312_v59 = vmul.f32 1.442695, %v3307_v44 }
0x12dc   : > { %6737 = vpow2.f32 %v3312_v59 }
0x12e2   : > { %v6734_v33 = vpop.eup %6733 }
0x12e3   : > { %v3314_v57 = vsel %vm1245_vm3, %v6734_v33, 0.0 }
0x12e4   : > { %v6736_v18 = vpop.eup %6735  ;;  %3315 = vadd.xlane.f32.xlu1 %v3314_v57 }
0x12e5   : > { %v3317_v29 = vsel %vm1245_vm3, %v6736_v18, 0.0 }
0x12e6   : > { %v6738_v60 = vpop.eup %6737  ;;  %3318 = vadd.xlane.f32.xlu0 %v3317_v29 }
0x12e7   : > { %v3320_v61 = vsel %vm1252_vm4, %v6738_v60, 0.0 }
0x12e8   : > { %3321 = vadd.xlane.f32.xlu1 %v3320_v61 }
0x12f9   : > { %3400 = vrot.lane.b32.xlu1 %v7816_v8, %s8546_s25 }
0x12fc   : > { %3398 = vrot.lane.b32.xlu0 %v7807_v62, %s8546_s25 }
0x12fd   : > { %3392 = vrot.lane.b32.xlu1 %v7805_v34, %s8546_s25 }
0x1301   : > { %3394 = vrot.lane.b32.xlu1 %v7825_v10, %s8546_s25 }
0x1371   : > { %v3316_v22 = vpop.xlane.xlu1 %3315 }
0x1372   : > { %6739 = vrcp.f32 %v3316_v22 }
0x1373   : > { %v3319_v63 = vpop.xlane.xlu0 %3318 }
0x1374   : > { %6741 = vrcp.f32 %v3319_v63 }
0x1375   : > { %v3322_v0 = vpop.xlane.xlu1 %3321 }
0x1376   : > { %6743 = vrcp.f32 %v3322_v0 }
0x1377   : > { %v3399_v1 = vpop.permute.xlu0 %3398 }
0x1378   : > { %6313 = vmatprep.subr.msk.bf16.mxu1 %vm1178_vm1, %v3399_v1  ;;  %v3409_v12 = vsel %vm1178_vm1, %v3399_v1, 0 }
0x1379   : > { %v3401_v4 = vpop.permute.xlu1 %3400 }
0x137a   : > { %v3412_v37 = vsel %vm1178_vm1, %v3401_v4, 0 }
0x137c   : > { %v6740_v2 = vpop.eup %6739 }
0x137d   : > { %v3324_v30 = vmul.f32 %v6740_v2, %v6734_v33  ;;  %v3393_v13 = vpop.permute.xlu1 %3392 }
0x137e   : > { %v6742_v3 = vpop.eup %6741 }
0x137f   : > { %v3326_v5 = vmul.f32 %v6742_v3, %v6736_v18 }
0x1380   : > { %v6744_v26 = vpop.eup %6743 }
0x1381   : > { %v3328_v7 = vmul.f32 %v6744_v26, %v6738_v60  ;;  %v3329_v39 = vpack.c.bf16 %v3326_v5, %v3324_v30  ;;  %v3395_v45 = vpop.permute.xlu1 %3394 }
0x1383   : > { %6206 = vmatprep.mubr.msk.bf16.mxu1 %vm1245_vm3, %v3329_v39  ;;  %v3330_v36 = vpack.c.bf16 %v3328_v7, %v3328_v7 }
0x1385   : > { %6207 = vmatmul.mubr.msk.bf16.vlgmr.msra.gmra.mrb[52].mxu1 %vm1245_vm3, %v3330_v36 }
0x1386   : > { %6211 = vmatpush3.bf16.xpose.msra.mxu1 %v3409_v12  ;;  %6214 = vmatprep.mubr.msk.bf16.mxu1 %vm1178_vm1, %v3393_v13 }
0x1387   : > { %6314 = vmatprep.subr.msk.bf16.mxu1 %vm1178_vm1, %v3401_v4 }
0x138e   : > { %6213 = vmatpush3.bf16.xpose.msra.mxu1 %v3412_v37 }
0x1395   : > { %6215 = vmatmul.mubr.msk.bf16.vlgmr.msra.gmra.mrb[56].mxu1 %vm1178_vm1, %v3395_v45 }
0x1458   : > { %v7870_v6 = vpop.f32.mrb[52].mxu1 }
0x1459   : > { %v7872_v23 = vpop.f32.mrb[53].mxu1 }
0x145a   : > { %v6209_v27 = vpop.f32.mrb[54].mxu1 }
0x145b   : > { %v7874_v25 = vpop.f32.mrb[55].mxu1 }
0x1468   : > { %v6216_v28 = vpop.f32.mrb[56].mxu1 }
0x1469   : > { %v3448_v38 = vpop.f32.mrb[57].mxu1  ;;  %v3464_v41 = vmul.f32 0.17677669, %v6216_v28 }
0x146a   : > { %v3462_v31 = vmul.f32 0.17677669, %v3448_v38  ;;  %v6217_v11 = vpop.f32.mrb[58].mxu1 }
0x146b   : > { %v3451_v43 = vpop.f32.mrb[59].mxu1  ;;  %v3467_v49 = vadd.f32 %v7846_v21, %v3464_v41 }
0x146c   : > { %v3463_v16 = vmul.f32 0.17677669, %v3451_v43  ;;  %v3465_v47 = vadd.f32 %v7837_v42, %v3462_v31 }
0x146d   : > { %v3474_v17 = vsel %vm1252_vm4, %v3467_v49, -inf }
0x146e   : > { %v3468_v56 = vsel %vm1245_vm3, %v3465_v47, -inf  ;;  %v3466_v48 = vadd.f32 %v7842_v14, %v3463_v16 }
0x146f   : > { %3469 = vmax.xlane.f32.xlu0 %v3468_v56 }
0x1470   : > { %v3471_v19 = vsel %vm1245_vm3, %v3466_v48, -inf }
0x1471   : > { %3472 = vmax.xlane.f32.xlu1 %v3471_v19 }
0x1473   : > { %3475 = vmax.xlane.f32.xlu0 %v3474_v17 }
0x14fc   : > { %v3470_v52 = vpop.xlane.xlu0 %3469 }
0x14fd   : > { %v3477_v24 = vsub.f32 %v3465_v47, %v3470_v52 }
0x14fe   : > { %v3473_v55 = vpop.xlane.xlu1 %3472 }
0x14ff   : > { %v3480_v58 = vmul.f32 1.442695, %v3477_v24  ;;  %v3478_v44 = vsub.f32 %v3466_v48, %v3473_v55 }
0x1500   : > { %v3476_v59 = vpop.xlane.xlu0 %3475 }
0x1501   : > { %6745 = vpow2.f32 %v3480_v58  ;;  %v3482_v33 = vmul.f32 1.442695, %v3478_v44  ;;  %v3479_v57 = vsub.f32 %v3467_v49, %v3476_v59 }
0x1503   : > { %6747 = vpow2.f32 %v3482_v33  ;;  %v3484_v18 = vmul.f32 1.442695, %v3479_v57 }
0x1505   : > { %6749 = vpow2.f32 %v3484_v18 }
0x150b   : > { %v6746_v29 = vpop.eup %6745 }
0x150c   : > { %v3486_v60 = vsel %vm1245_vm3, %v6746_v29, 0.0 }
0x150d   : > { %v6748_v61 = vpop.eup %6747  ;;  %3487 = vadd.xlane.f32.xlu0 %v3486_v60 }
0x150e   : > { %v3489_v0 = vsel %vm1245_vm3, %v6748_v61, 0.0 }
0x150f   : > { %v6750_v22 = vpop.eup %6749 }
0x1510   : > { %v3492_v63 = vsel %vm1252_vm4, %v6750_v22, 0.0 }
0x1511   : > { %3493 = vadd.xlane.f32.xlu1 %v3492_v63  ;;  %3490 = vadd.xlane.f32.xlu0 %v3489_v0 }
0x1522   : > { %3507 = vrot.lane.b32.xlu1 %v7827_v20, %s8546_s25 }
0x1526   : > { %3571 = vrot.lane.b32.xlu1 %v7807_v62, %s8545_s3 }
0x1527   : > { %3505 = vrot.lane.b32.xlu0 %v7818_v40, %s8546_s25 }
0x152a   : > { %3573 = vrot.lane.b32.xlu1 %v7816_v8, %s8545_s3 }
0x152b   : > { %3567 = vrot.lane.b32.xlu0 %v7805_v34, %s8545_s3 }
0x152e   : > { %3569 = vrot.lane.b32.xlu1 %v7825_v10, %s8545_s3 }
0x159a   : > { %v3488_v1 = vpop.xlane.xlu0 %3487 }
0x159b   : > { %6751 = vrcp.f32 %v3488_v1 }
0x159e   : > { %v3491_v2 = vpop.xlane.xlu0 %3490  ;;  %v3494_v3 = vpop.xlane.xlu1 %3493 }
0x159f   : > { %6753 = vrcp.f32 %v3491_v2 }
0x15a0   : > { %6755 = vrcp.f32 %v3494_v3 }
0x15a2   : > { %v3506_v4 = vpop.permute.xlu0 %3505  ;;  %v3508_v30 = vpop.permute.xlu1 %3507 }
0x15a3   : > { %6218 = vmatprep.subr.bf16.mxu0 %v3506_v4  ;;  %v3517_v26 = vsel %vm1290_vm2, %v3508_v30, 0 }
0x15a4   : > { %6219 = vmatpush3.bf16.msra.mxu0 %v3506_v4 }
0x15a5   : > { %6315 = vmatprep.subr.msk.bf16.mxu0 %vm1290_vm2, %v3508_v30  ;;  %v6752_v5 = vpop.eup %6751 }
0x15a6   : > { %v3572_v7 = vpop.permute.xlu1 %3571  ;;  %v3496_v12 = vmul.f32 %v6752_v5, %v6746_v29  ;;  %v3568_v28 = vpop.permute.xlu0 %3567 }
0x15a7   : > { %v3582_v38 = vsel %vm1178_vm1, %v3572_v7, 0 }
0x15a8   : > { %6221 = vmatpush3.bf16.msra.mxu0 %v3517_v26 }
0x15a9   : > { %v6754_v39 = vpop.eup %6753  ;;  %6316 = vmatprep.subr.msk.bf16.mxu0 %vm1178_vm1, %v3572_v7 }
0x15aa   : > { %v6756_v36 = vpop.eup %6755  ;;  %v3498_v13 = vmul.f32 %v6754_v39, %v6748_v61  ;;  %v3574_v41 = vpop.permute.xlu1 %3573 }
0x15ab   : > { %v3500_v37 = vmul.f32 %v6756_v36, %v6750_v22  ;;  %v3585_v31 = vsel %vm1178_vm1, %v3574_v41, 0 }
0x15ac   : > { %v3501_v45 = vpack.c.bf16 %v3498_v13, %v3496_v12 }
0x15ad   : > { %v3502_v27 = vpack.c.bf16 %v3500_v37, %v3500_v37 }
0x15ae   : > { %6222 = vmatprep.mubr.msk.bf16.mxu0 %vm1245_vm3, %v3501_v45  ;;  %v3570_v11 = vpop.permute.xlu1 %3569 }
0x15af   : > { %6223 = vmatmul.mubr.msk.bf16.vlgmr.msra.gmra.mrb[44].mxu0 %vm1245_vm3, %v3502_v27 }
0x15b0   : > { %6230 = vmatprep.mubr.msk.bf16.mxu0 %vm1178_vm1, %v3568_v28 }
0x15b1   : > { %6227 = vmatpush3.bf16.xpose.msra.mxu0 %v3582_v38 }
0x15b2   : > { %6317 = vmatprep.subr.msk.bf16.mxu0 %vm1178_vm1, %v3574_v41 }
0x15b9   : > { %6229 = vmatpush3.bf16.xpose.msra.mxu0 %v3585_v31 }
0x15c0   : > { %6231 = vmatmul.mubr.msk.bf16.vlgmr.msra.gmra.mrb[48].mxu0 %vm1178_vm1, %v3570_v11 }
0x1682   : > { %v7907_v43 = vpop.f32.mrb[44].mxu0 }
0x1683   : > { %v7909_v16 = vpop.f32.mrb[45].mxu0 }
0x1684   : > { %v6225_v47 = vpop.f32.mrb[46].mxu0 }
0x1685   : > { %v7911_v56 = vpop.f32.mrb[47].mxu0 }
0x1686   : > { %v6350_v48 = vpack.i.bf16 %v7911_v56, %v7909_v16 }
0x1693   : > { %v6232_v49 = vpop.f32.mrb[48].mxu0 }
0x1694   : > { %v3621_v19 = vpop.f32.mrb[49].mxu0  ;;  %v3637_v17 = vmul.f32 0.17677669, %v6232_v49 }
0x1695   : > { %v3635_v52 = vmul.f32 0.17677669, %v3621_v19  ;;  %v6233_v24 = vpop.f32.mrb[50].mxu0 }
0x1696   : > { %v3624_v55 = vpop.f32.mrb[51].mxu0  ;;  %v3640_v57 = vadd.f32 %v7846_v21, %v3637_v17 }
0x1697   : > { %v3636_v58 = vmul.f32 0.17677669, %v3624_v55  ;;  %v3638_v44 = vadd.f32 %v7837_v42, %v3635_v52 }
0x1698   : > { %v3647_v29 = vsel %vm1252_vm4, %v3640_v57, -inf }
0x1699   : > { %v3641_v59 = vsel %vm1245_vm3, %v3638_v44, -inf  ;;  %v3639_v33 = vadd.f32 %v7842_v14, %v3636_v58 }
0x169a   : > { %3642 = vmax.xlane.f32.xlu0 %v3641_v59 }
0x169b   : > { %v3644_v18 = vsel %vm1245_vm3, %v3639_v33, -inf }
0x169c   : > { %3645 = vmax.xlane.f32.xlu1 %v3644_v18 }
0x169e   : > { %3648 = vmax.xlane.f32.xlu0 %v3647_v29 }
0x1727   : > { %v3643_v60 = vpop.xlane.xlu0 %3642 }
0x1728   : > { %v3650_v61 = vsub.f32 %v3638_v44, %v3643_v60 }
0x1729   : > { %v3646_v22 = vpop.xlane.xlu1 %3645 }
0x172a   : > { %v3653_v63 = vmul.f32 1.442695, %v3650_v61  ;;  %v3651_v0 = vsub.f32 %v3639_v33, %v3646_v22 }
0x172b   : > { %v3649_v1 = vpop.xlane.xlu0 %3648 }
0x172c   : > { %6757 = vpow2.f32 %v3653_v63  ;;  %v3655_v2 = vmul.f32 1.442695, %v3651_v0  ;;  %v3652_v3 = vsub.f32 %v3640_v57, %v3649_v1 }
0x172e   : > { %6759 = vpow2.f32 %v3655_v2  ;;  %v3657_v4 = vmul.f32 1.442695, %v3652_v3 }
0x1730   : > { %6761 = vpow2.f32 %v3657_v4 }
0x1736   : > { %v6758_v30 = vpop.eup %6757 }
0x1737   : > { %v3659_v5 = vsel %vm1245_vm3, %v6758_v30, 0.0 }
0x1738   : > { %v6760_v26 = vpop.eup %6759  ;;  %3660 = vadd.xlane.f32.xlu0 %v3659_v5 }
0x1739   : > { %v3662_v36 = vsel %vm1245_vm3, %v6760_v26, 0.0 }
0x173a   : > { %v6762_v7 = vpop.eup %6761 }
0x173b   : > { %v3665_v39 = vsel %vm1252_vm4, %v6762_v7, 0.0 }
0x173c   : > { %3666 = vadd.xlane.f32.xlu1 %v3665_v39  ;;  %3663 = vadd.xlane.f32.xlu0 %v3662_v36 }
0x174d   : > { %3678 = vrot.lane.b32.xlu1 %v7827_v20, %s8545_s3 }
0x1751   : > { %3742 = vrot.lane.b32.xlu1 %v7807_v62, %s8544_s26 }
0x1752   : > { %3676 = vrot.lane.b32.xlu0 %v7818_v40, %s8545_s3 }
0x1755   : > { %3744 = vrot.lane.b32.xlu1 %v7816_v8, %s8544_s26 }
0x1756   : > { %3738 = vrot.lane.b32.xlu0 %v7805_v34, %s8544_s26 }
0x1759   : > { %3740 = vrot.lane.b32.xlu1 %v7825_v10, %s8544_s26 }
0x17c5   : > { %v3661_v12 = vpop.xlane.xlu0 %3660 }
0x17c6   : > { %6763 = vrcp.f32 %v3661_v12 }
0x17c9   : > { %v3664_v13 = vpop.xlane.xlu0 %3663  ;;  %v3667_v37 = vpop.xlane.xlu1 %3666 }
0x17ca   : > { %6765 = vrcp.f32 %v3664_v13 }
0x17cb   : > { %6767 = vrcp.f32 %v3667_v37 }
0x17cd   : > { %v3677_v45 = vpop.permute.xlu0 %3676  ;;  %v3679_v62 = vpop.permute.xlu1 %3678 }
0x17ce   : > { %6234 = vmatprep.subr.bf16.mxu1 %v3677_v45  ;;  %v3688_v8 = vsel %vm1290_vm2, %v3679_v62, 0 }
0x17cf   : > { %6235 = vmatpush3.bf16.msra.mxu1 %v3677_v45 }
0x17d0   : > { %6318 = vmatprep.subr.msk.bf16.mxu1 %vm1290_vm2, %v3679_v62  ;;  %v6764_v27 = vpop.eup %6763 }
0x17d1   : > { %v3743_v28 = vpop.permute.xlu1 %3742  ;;  %v3669_v38 = vmul.f32 %v6764_v27, %v6758_v30  ;;  %v3739_v49 = vpop.permute.xlu0 %3738 }
0x17d2   : > { %v3753_v19 = vsel %vm1178_vm1, %v3743_v28, 0 }
0x17d3   : > { %6237 = vmatpush3.bf16.msra.mxu1 %v3688_v8 }
0x17d4   : > { %v6766_v34 = vpop.eup %6765  ;;  %6319 = vmatprep.subr.msk.bf16.mxu1 %vm1178_vm1, %v3743_v28 }
0x17d5   : > { %v6768_v10 = vpop.eup %6767  ;;  %v3671_v41 = vmul.f32 %v6766_v34, %v6760_v26  ;;  %v3745_v17 = vpop.permute.xlu1 %3744 }
0x17d6   : > { %v3673_v31 = vmul.f32 %v6768_v10, %v6762_v7  ;;  %v3756_v52 = vsel %vm1178_vm1, %v3745_v17, 0 }
0x17d7   : > { %v3674_v11 = vpack.c.bf16 %v3671_v41, %v3669_v38 }
0x17d8   : > { %v3675_v47 = vpack.c.bf16 %v3673_v31, %v3673_v31 }
0x17d9   : > { %6238 = vmatprep.mubr.msk.bf16.mxu1 %vm1245_vm3, %v3674_v11  ;;  %v3741_v24 = vpop.permute.xlu1 %3740 }
0x17da   : > { %6239 = vmatmul.mubr.msk.bf16.vlgmr.msra.gmra.mrb[60].mxu1 %vm1245_vm3, %v3675_v47 }
0x17db   : > { %6246 = vmatprep.mubr.msk.bf16.mxu1 %vm1178_vm1, %v3739_v49  ;;  %v6517_v49 = vld [vmem:[%s8489_s9 + $0x40] sm:$0xff]  }
0x17dc   : > { %6243 = vmatpush3.bf16.xpose.msra.mxu1 %v3753_v19  ;;  %v6518_v19 = vld [vmem:[%s8489_s9 + $0x48] sm:$0xff]  }
0x17dd   : > { %6320 = vmatprep.subr.msk.bf16.mxu1 %vm1178_vm1, %v3745_v17  ;;  %v6519_v17 = vld [vmem:[%s8489_s9 + $0x50] sm:$0xff]  }
0x17e4   : > { %6245 = vmatpush3.bf16.xpose.msra.mxu1 %v3756_v52  ;;  %v6520_v52 = vld [vmem:[%s8489_s9 + $0x58] sm:$0xff]  }
0x17eb   : > { %6247 = vmatmul.mubr.msk.bf16.vlgmr.msra.gmra.mrb[64].mxu1 %vm1178_vm1, %v3741_v24  ;;  %v6521_v24 = vld [vmem:[%s8489_s9 + $0x60] sm:$0xff]  }
0x17ec   : > { %4390 = vmatprep.mubr.bf16.mxu1 %v6840_v15 }
0x18ad   : > { %v6240_v55 = vpop.f32.mrb[60].mxu1 }
0x18ae   : > { %v3724_v58 = vpop.f32.mrb[61].mxu1 }
0x18af   : > { %v6241_v44 = vpop.f32.mrb[62].mxu1 }
0x18b0   : > { %v3727_v59 = vpop.f32.mrb[63].mxu1  ;;  %v6524_v44 = vld [vmem:[%s8489_s9 + $0x78] sm:$0xff]  }
0x18b1   : > { %v6355_v33 = vpack.i.bf16 %v3727_v59, %v3724_v58  ;;  %v6523_v58 = vld [vmem:[%s8489_s9 + $0x70] sm:$0xff]  }
0x18be   : > { %v6248_v57 = vpop.f32.mrb[64].mxu1 }
0x18bf   : > { %v3792_v18 = vpop.f32.mrb[65].mxu1  ;;  %v3808_v29 = vmul.f32 0.17677669, %v6248_v57 }
0x18c0   : > { %v3806_v60 = vmul.f32 0.17677669, %v3792_v18  ;;  %v6249_v61 = vpop.f32.mrb[66].mxu1 }
0x18c1   : > { %v3795_v22 = vpop.f32.mrb[67].mxu1  ;;  %v3811_v1 = vadd.f32 %v7846_v21, %v3808_v29 }
0x18c2   : > { %v3809_v63 = vadd.f32 %v7837_v42, %v3806_v60  ;;  %v3807_v0 = vmul.f32 0.17677669, %v3795_v22 }
0x18c3   : > { %v3818_v30 = vsel %vm1252_vm4, %v3811_v1, -inf }
0x18c4   : > { %v3810_v2 = vadd.f32 %v7842_v14, %v3807_v0  ;;  %v3812_v3 = vsel %vm1245_vm3, %v3809_v63, -inf }
0x18c5   : > { %3813 = vmax.xlane.f32.xlu0 %v3812_v3 }
0x18c6   : > { %v3815_v4 = vsel %vm1245_vm3, %v3810_v2, -inf }
0x18c7   : > { %3816 = vmax.xlane.f32.xlu1 %v3815_v4 }
0x18c9   : > { %3819 = vmax.xlane.f32.xlu0 %v3818_v30 }
0x1952   : > { %v3814_v5 = vpop.xlane.xlu0 %3813 }
0x1953   : > { %v3821_v26 = vsub.f32 %v3809_v63, %v3814_v5 }
0x1954   : > { %v3817_v7 = vpop.xlane.xlu1 %3816 }
0x1955   : > { %v3824_v39 = vmul.f32 1.442695, %v3821_v26  ;;  %v3822_v36 = vsub.f32 %v3810_v2, %v3817_v7 }
0x1956   : > { %v3820_v42 = vpop.xlane.xlu0 %3819 }
0x1957   : > { %6769 = vpow2.f32 %v3824_v39  ;;  %v3826_v12 = vmul.f32 1.442695, %v3822_v36  ;;  %v3823_v21 = vsub.f32 %v3811_v1, %v3820_v42 }
0x1959   : > { %6771 = vpow2.f32 %v3826_v12  ;;  %v3828_v14 = vmul.f32 1.442695, %v3823_v21 }
0x195b   : > { %6773 = vpow2.f32 %v3828_v14 }
0x1961   : > { %v6770_v13 = vpop.eup %6769 }
0x1962   : > { %v3830_v37 = vsel %vm1245_vm3, %v6770_v13, 0.0 }
0x1963   : > { %v6772_v45 = vpop.eup %6771  ;;  %3831 = vadd.xlane.f32.xlu0 %v3830_v37 }
0x1964   : > { %v3833_v8 = vsel %vm1245_vm3, %v6772_v45, 0.0 }
0x1965   : > { %v6774_v62 = vpop.eup %6773 }
0x1966   : > { %v3836_v27 = vsel %vm1252_vm4, %v6774_v62, 0.0 }
0x1967   : > { %3837 = vadd.xlane.f32.xlu1 %v3836_v27  ;;  %3834 = vadd.xlane.f32.xlu0 %v3833_v8 }
0x1978   : > { %3849 = vrot.lane.b32.xlu1 %v7827_v20, %s8544_s26 }
0x197c   : > { %6351 = vrot.lane.b32.xlu1 %v6350_v48, %s8544_s26 }
0x197d   : > { %3847 = vrot.lane.b32.xlu0 %v7818_v40, %s8544_s26 }
0x1980   : > { %3916 = vrot.lane.b32.xlu1 %v7907_v43, %s8544_s26 }
0x1981   : > { %6356 = vrot.lane.b32.xlu0 %v6355_v33, %s8545_s3 }
0x1984   : > { %3928 = vrot.lane.b32.xlu1 %v6240_v55, %s8545_s3  ;;  %v6522_v55 = vld [vmem:[%s8489_s9 + $0x68] sm:$0xff]   ;;  %s8549_s3 = sld [smem:[#allocation14_spill]] }
0x19f0   : > { %v3832_v28 = vpop.xlane.xlu0 %3831 }
0x19f1   : > { %6775 = vrcp.f32 %v3832_v28 }
0x19f4   : > { %v3835_v34 = vpop.xlane.xlu0 %3834  ;;  %v3838_v10 = vpop.xlane.xlu1 %3837 }
0x19f5   : > { %6777 = vrcp.f32 %v3835_v34 }
0x19f6   : > { %6779 = vrcp.f32 %v3838_v10 }
0x19f8   : > { %v3848_v20 = vpop.permute.xlu0 %3847  ;;  %v3850_v16 = vpop.permute.xlu1 %3849 }
0x19f9   : > { %6250 = vmatprep.subr.bf16.mxu0 %v3848_v20  ;;  %v3859_v56 = vsel %vm1290_vm2, %v3850_v16, 0 }
0x19fa   : > { %6251 = vmatpush3.bf16.msra.mxu0 %v3848_v20 }
0x19fb   : > { %6321 = vmatprep.subr.msk.bf16.mxu0 %vm1290_vm2, %v3850_v16  ;;  %v6776_v40 = vpop.eup %6775 }
0x19fc   : > { %v3840_v38 = vmul.f32 %v6776_v40, %v6770_v13  ;;  %v6352_v60 = vpop.permute.xlu1 %6351  ;;  %v6357_v22 = vpop.permute.xlu0 %6356 }
0x19fd   : > { %v6354_v63 = vunpack.i.h.bf16 %v6352_v60  ;;  %v6353_v0 = vunpack.i.l.bf16 %v6352_v60  ;;  %v6359_v2 = vunpack.i.h.bf16 %v6357_v22  ;;  %v6358_v3 = vunpack.i.l.bf16 %v6357_v22  ;;  %v6537_v60 = vld [vmem:[%s8493_s13 + $0x140] ss:$16 sps:$4 sm:$0xff]   ;;  %v6545_v22 = vld [vmem:[%s8493_s13 + $0x164] ss:$16 sps:$4 sm:$0xff]  }
0x19fe   : > { %6253 = vmatpush3.bf16.msra.mxu0 %v3859_v56  ;;  %v6528_v56 = vld [vmem:[%s8493_s13 + $0x108] ss:$16 sps:$4 sm:$0xff]  }
0x19ff   : > { %v6778_v43 = vpop.eup %6777  ;;  %6258 = vmatprep.subr.bf16.mxu0 %v6517_v49  ;;  %v3946_v4 = vsel %vm1178_vm1, %v7874_v25, %v6354_v63  ;;  %v3945_v30 = vsel %vm1178_vm1, %v7872_v23, %v6353_v0  ;;  %v6548_v63 = vld [vmem:[%s8493_s13 + $0x16c] ss:$16 sps:$4 sm:$0xff]   ;;  %v6543_v0 = vld [vmem:[%s8493_s13 + $0x160] ss:$16 sps:$4 sm:$0xff]  }
0x1a00   : > { %v6780_v48 = vpop.eup %6779  ;;  %v3842_v41 = vmul.f32 %v6778_v43, %v6772_v45  ;;  %v3917_v61 = vpop.permute.xlu1 %3916  ;;  %v3948_v21 = vsel %vm1900_vm5, %v3945_v30, %v6358_v3  ;;  %v3949_v14 = vsel %vm1900_vm5, %v3946_v4, %v6359_v2  ;;  %v6530_v43 = vld [vmem:[%s8493_s13 + $0x10c] ss:$16 sps:$4 sm:$0xff]   ;;  %v6551_v2 = vld [vmem:[%s8493_s13 + $0x184] ss:$16 sps:$4 sm:$0xff]   ;;  %v6549_v4 = vld [vmem:[%s8493_s13 + $0x180] ss:$16 sps:$4 sm:$0xff]  }
0x1a01   : > { %v3844_v31 = vmul.f32 %v6780_v48, %v6774_v62  ;;  %v3947_v26 = vsel %vm1178_vm1, %v7870_v6, %v3917_v61  ;;  %v5644_v62 = vld [vmem:[%s8490_s10 + $0x1] ss:$0 sm:$0xff]  ;;  %v6533_v48 = vld [vmem:[%s8493_s13 + $0x124] ss:$16 sps:$4 sm:$0xff]   ;;  %v6540_v61 = vld [vmem:[%s8493_s13 + $0x148] ss:$16 sps:$4 sm:$0xff]  }
0x1a02   : > { %v3845_v11 = vpack.c.bf16 %v3842_v41, %v3840_v38  ;;  %v6536_v38 = vld [vmem:[%s8493_s13 + $0x12c] ss:$16 sps:$4 sm:$0xff]   ;;  %v6531_v41 = vld [vmem:[%s8493_s13 + $0x120] ss:$16 sps:$4 sm:$0xff]   ;;  %v6552_v30 = vld [vmem:[%s8493_s13 + $0x188] ss:$16 sps:$4 sm:$0xff]  }
0x1a03   : > { %v3846_v47 = vpack.c.bf16 %v3844_v31, %v3844_v31  ;;  %v6534_v31 = vld [vmem:[%s8493_s13 + $0x128] ss:$16 sps:$4 sm:$0xff]   ;;  %v6554_v3 = vld [vmem:[%s8493_s13 + $0x18c] ss:$16 sps:$4 sm:$0xff]  }
0x1a04   : > { %6254 = vmatprep.mubr.msk.bf16.mxu0 %vm1245_vm3, %v3845_v11  ;;  %v3929_v1 = vpop.permute.xlu1 %3928 }
0x1a05   : > { %6255 = vmatmul.mubr.msk.bf16.vlgmr.msra.gmra.mrb[52].mxu0 %vm1245_vm3, %v3846_v47  ;;  %v3950_v39 = vsel %vm1900_vm5, %v3947_v26, %v3929_v1  ;;  %v6546_v1 = vld [vmem:[%s8493_s13 + $0x168] ss:$16 sps:$4 sm:$0xff]   ;;  %v6560_v26 = vld [vmem:[%s8493_s13 + $0x1ac] ss:$16 sps:$4 sm:$0xff]  }
0x1a06   : > { %6259 = vmatpush3.bf16.msra.mxu0 %v6517_v49 }
0x1a07   : > { %6260 = vmatprep.subr.bf16.mxu0 %v6518_v19 }
0x1a0a   : > { %6261 = vmatpush3.bf16.msra.mxu0 %v6518_v19 }
0x1a0b   : > { %6262 = vmatprep.subr.bf16.mxu0 %v6519_v17 }
0x1a0e   : > { %6263 = vmatpush3.bf16.msra.mxu0 %v6519_v17 }
0x1a0f   : > { %6264 = vmatprep.subr.bf16.mxu0 %v6520_v52 }
0x1a12   : > { %6265 = vmatpush3.bf16.msra.mxu0 %v6520_v52 }
0x1a13   : > { %6266 = vmatprep.subr.bf16.mxu0 %v6521_v24 }
0x1a16   : > { %6267 = vmatpush3.bf16.msra.mxu0 %v6521_v24 }
0x1a17   : > { %6268 = vmatprep.subr.bf16.mxu0 %v6522_v55 }
0x1a1a   : > { %6269 = vmatpush3.bf16.msra.mxu0 %v6522_v55 }
0x1a1b   : > { %6270 = vmatprep.subr.bf16.mxu0 %v6523_v58 }
0x1a1e   : > { %6271 = vmatpush3.bf16.msra.mxu0 %v6523_v58 }
0x1a1f   : > { %6272 = vmatprep.subr.bf16.mxu0 %v6524_v44 }
0x1a22   : > { %6273 = vmatpush3.bf16.msra.mxu0 %v6524_v44 }
0x1a23   : > { %4409 = vmatprep.subr.bf16.mxu0 %v6530_v43 }
0x1ad8   : > { %v6256_v59 = vpop.f32.mrb[52].mxu0 }
0x1ad9   : > { %3940 = vrot.lane.b32.xlu1 %v6256_v59, %s8546_s25  ;;  %v3895_v33 = vpop.f32.mrb[53].mxu0 }
0x1ada   : > { %v6257_v57 = vpop.f32.mrb[54].mxu0 }
0x1adb   : > { %v3898_v18 = vpop.f32.mrb[55].mxu0 }
0x1adc   : > { %v6360_v29 = vpack.i.bf16 %v3898_v18, %v3895_v33  ;;  %v6539_v18 = vld [vmem:[%s8493_s13 + $0x144] ss:$16 sps:$4 sm:$0xff]  }
0x1ade   : > { %6361 = vrot.lane.b32.xlu0 %v6360_v29, %s8546_s25  ;;  %v6542_v29 = vld [vmem:[%s8493_s13 + $0x14c] ss:$16 sps:$4 sm:$0xff]  }
0x1b4b   : > { %v3941_v5 = vpop.permute.xlu1 %3940 }
0x1b4c   : > { %v3953_v12 = vsel %vm1904_vm6, %v3950_v39, %v3941_v5  ;;  %v6557_v5 = vld [vmem:[%s8493_s13 + $0x1a4] ss:$16 sps:$4 sm:$0xff]   ;;  %v6558_v39 = vld [vmem:[%s8493_s13 + $0x1a8] ss:$16 sps:$4 sm:$0xff]  }
0x1b4d   : > { %v3955_v37 = vpack.c.bf16 %v3953_v12, %v3953_v12  ;;  %v6561_v12 = vld [vmem:[%s8493_s13 + $0x1c0] ss:$16 sps:$4 sm:$0xff]  }
0x1b50   : > { %v6362_v7 = vpop.permute.xlu0 %6361 }
0x1b51   : > { %v6364_v36 = vunpack.i.h.bf16 %v6362_v7  ;;  %v6363_v42 = vunpack.i.l.bf16 %v6362_v7  ;;  %v6555_v7 = vld [vmem:[%s8493_s13 + $0x1a0] ss:$16 sps:$4 sm:$0xff]  }
0x1b53   : > { %v3951_v25 = vsel %vm1904_vm6, %v3948_v21, %v6363_v42  ;;  %v3952_v13 = vsel %vm1904_vm6, %v3949_v14, %v6364_v36  ;;  %v6563_v36 = vld [vmem:[%s8493_s13 + $0x1c4] ss:$16 sps:$4 sm:$0xff]   ;;  %v6566_v42 = vld [vmem:[%s8493_s13 + $0x1cc] ss:$16 sps:$4 sm:$0xff]   ;;  %v6564_v21 = vld [vmem:[%s8493_s13 + $0x1c8] ss:$16 sps:$4 sm:$0xff]  }
0x1b54   : > { %v3954_v23 = vpack.c.bf16 %v3952_v13, %v3951_v25  ;;  %v6569_v14 = vld [vmem:[%s8493_s13 + $0x1e4] ss:$16 sps:$4 sm:$0xff]   ;;  %v6572_v25 = vld [vmem:[%s8493_s13 + $0x1ec] ss:$16 sps:$4 sm:$0xff]   ;;  %v6567_v13 = vld [vmem:[%s8493_s13 + $0x1e0] ss:$16 sps:$4 sm:$0xff]  }
0x1b56   : > { %6274 = vmatprep.mubr.bf16.mxu0 %v3954_v23  ;;  %v6570_v23 = vld [vmem:[%s8493_s13 + $0x1e8] ss:$16 sps:$4 sm:$0xff]  }
0x1b57   : > { %6275 = vmatmul.mubr.bf16.vlgmr.msra.gmra.mrb[56].mxu0 %v3955_v37 }
0x1b58   : > { %4441 = vmatprep.mubr.bf16.mxu0 %v6840_v15  ;;  %4410 = vmatpush1.bf16.msra.mxu0 %v6528_v56 }
0x1b59   : > { %4411 = vmatprep.subr.bf16.mxu0 %v6536_v38 }
0x1b5c   : > { %4412 = vmatpush1.bf16.msra.mxu0 %v6534_v31 }
0x1b5d   : > { %4413 = vmatprep.subr.bf16.mxu0 %v6542_v29  ;;  %v6580_v29 = vld [vmem:[%s8495_s15 + $0x188] sm:$0xff]  }
0x1b60   : > { %4414 = vmatpush1.bf16.msra.mxu0 %v6540_v61  ;;  %v6582_v61 = vld [vmem:[%s8495_s15 + $0x1d0] sm:$0xff]  }
0x1b61   : > { %4415 = vmatprep.subr.bf16.mxu0 %v6548_v63  ;;  %v6584_v63 = vld [vmem:[%s8495_s15 + $0x190] sm:$0xff]  }
0x1b64   : > { %4416 = vmatpush1.bf16.msra.mxu0 %v6546_v1  ;;  %v6586_v1 = vld [vmem:[%s8495_s15 + $0x1d8] sm:$0xff]  }
0x1b65   : > { %4417 = vmatprep.subr.bf16.mxu0 %v6554_v3  ;;  %v6588_v3 = vld [vmem:[%s8495_s15 + $0x198] sm:$0xff]  }
0x1b68   : > { %4418 = vmatpush1.bf16.msra.mxu0 %v6552_v30  ;;  %v6590_v30 = vld [vmem:[%s8495_s15 + $0x1e0] sm:$0xff]  }
0x1b69   : > { %4419 = vmatprep.subr.bf16.mxu0 %v6560_v26  ;;  %v6592_v26 = vld [vmem:[%s8495_s15 + $0x1a0] sm:$0xff]  }
0x1b6c   : > { %4420 = vmatpush1.bf16.msra.mxu0 %v6558_v39  ;;  %v6594_v39 = vld [vmem:[%s8495_s15 + $0x1e8] sm:$0xff]  }
0x1b6d   : > { %4421 = vmatprep.subr.bf16.mxu0 %v6566_v42  ;;  %v6596_v42 = vld [vmem:[%s8495_s15 + $0x1a8] sm:$0xff]  }
0x1b70   : > { %4422 = vmatpush1.bf16.msra.mxu0 %v6564_v21  ;;  %v6598_v21 = vld [vmem:[%s8495_s15 + $0x1f0] sm:$0xff]  }
0x1b71   : > { %4423 = vmatprep.subr.bf16.mxu0 %v6572_v25  ;;  %v6600_v25 = vld [vmem:[%s8495_s15 + $0x1b0] sm:$0xff]  }
0x1b74   : > { %4424 = vmatpush1.bf16.msra.mxu0 %v6570_v23  ;;  %v6602_v23 = vld [vmem:[%s8495_s15 + $0x1f8] sm:$0xff]  }
0x1c2a   : > { %v6276_v6 = vpop.f32.mrb[56].mxu0 }
0x1c2b   : > { %v4071_v45 = vadd.f32 %v6276_v6, %v7698_v46  ;;  %v4055_v27 = vpop.f32.mrb[57].mxu0 }
0x1c2c   : > { %v4069_v8 = vadd.f32 %v4055_v27, %v7691_v32  ;;  %v6277_v28 = vpop.f32.mrb[58].mxu0  ;;  %v6525_v32 = vld [vmem:[%s8493_s13 + $0x100] ss:$16 sps:$4 sm:$0xff]  }
0x1c2d   : > { %v4058_v34 = vpop.f32.mrb[59].mxu0  ;;  %v8019_v16 = vadd.f32 %v5644_v62, %v4071_v45 }
0x1c2e   : > { %v8016_v10 = vadd.f32 %v5644_v62, %v4069_v8  ;;  %v4070_v20 = vadd.f32 %v4058_v34, %v7694_v9  ;;  %v6527_v9 = vld [vmem:[%s8493_s13 + $0x104] ss:$16 sps:$4 sm:$0xff]  }
0x1c2f   : > { %v4091_v46 = vsel %vm784_vm0, %v8019_v16, 0.0  ;;  %4358 = vmatprep.subr.bf16.mxu1 %v6527_v9  ;;  %v5647_v9 = vld [vmem:[%s8491_s11 + $0x1] ss:$0 sm:$0xff] }
0x1c30   : > { %v8021_v40 = vadd.f32 %v5644_v62, %v4070_v20  ;;  %4087 = vadd.xlane.f32.xlu0 %v8016_v10  ;;  %4359 = vmatpush1.bf16.msra.mxu1 %v6525_v32 }
0x1c31   : > { %4360 = vmatprep.subr.bf16.mxu1 %v6533_v48 }
0x1c32   : > { %4089 = vadd.xlane.f32.xlu1 %v8021_v40 }
0x1c34   : > { %4092 = vadd.xlane.f32.xlu0 %v4091_v46  ;;  %4361 = vmatpush1.bf16.msra.mxu1 %v6531_v41  ;;  %v5648_v41 = vld [vmem:[%s8492_s12 + $0x1] ss:$0 sm:$0xff] }
0x1c35   : > { %4362 = vmatprep.subr.bf16.mxu1 %v6539_v18  ;;  %v6579_v18 = vld [vmem:[%s8495_s15 + $0x108] sm:$0xff]  }
0x1c38   : > { %4363 = vmatpush1.bf16.msra.mxu1 %v6537_v60  ;;  %v6581_v60 = vld [vmem:[%s8495_s15 + $0x150] sm:$0xff]  }
0x1c39   : > { %4364 = vmatprep.subr.bf16.mxu1 %v6545_v22  ;;  %v6583_v22 = vld [vmem:[%s8495_s15 + $0x110] sm:$0xff]  }
0x1c3c   : > { %4365 = vmatpush1.bf16.msra.mxu1 %v6543_v0  ;;  %v6585_v0 = vld [vmem:[%s8495_s15 + $0x158] sm:$0xff]  }
0x1c3d   : > { %4366 = vmatprep.subr.bf16.mxu1 %v6551_v2  ;;  %v6587_v2 = vld [vmem:[%s8495_s15 + $0x118] sm:$0xff]  }
0x1c40   : > { %4367 = vmatpush1.bf16.msra.mxu1 %v6549_v4  ;;  %v6589_v4 = vld [vmem:[%s8495_s15 + $0x160] sm:$0xff]  }
0x1c41   : > { %4368 = vmatprep.subr.bf16.mxu1 %v6557_v5  ;;  %v6591_v5 = vld [vmem:[%s8495_s15 + $0x120] sm:$0xff]  }
0x1c44   : > { %4369 = vmatpush1.bf16.msra.mxu1 %v6555_v7  ;;  %v6593_v7 = vld [vmem:[%s8495_s15 + $0x168] sm:$0xff]  }
0x1c45   : > { %4370 = vmatprep.subr.bf16.mxu1 %v6563_v36  ;;  %v6595_v36 = vld [vmem:[%s8495_s15 + $0x128] sm:$0xff]  }
0x1c48   : > { %4371 = vmatpush1.bf16.msra.mxu1 %v6561_v12  ;;  %v6597_v12 = vld [vmem:[%s8495_s15 + $0x170] sm:$0xff]  }
0x1c49   : > { %4372 = vmatprep.subr.bf16.mxu1 %v6569_v14  ;;  %v6599_v14 = vld [vmem:[%s8495_s15 + $0x130] sm:$0xff]  }
0x1c4c   : > { %4373 = vmatpush1.bf16.msra.mxu1 %v6567_v13  ;;  %v6601_v13 = vld [vmem:[%s8495_s15 + $0x178] sm:$0xff]  }
0x1cbd   : > { %v4088_v11 = vpop.xlane.xlu0 %4087 }
0x1cbe   : > { %v4094_v47 = vmul.f32 0.0078125, %v4088_v11 }
0x1cbf   : > { %v4090_v49 = vpop.xlane.xlu1 %4089 }
0x1cc0   : > { %v8052_v19 = vsub.f32 %v8016_v10, %v4094_v47  ;;  %v4095_v17 = vmul.f32 0.0078125, %v4090_v49 }
0x1cc1   : > { %v4093_v52 = vpop.xlane.xlu0 %4092 }
0x1cc2   : > { %v8055_v24 = vsub.f32 %v8021_v40, %v4095_v17  ;;  %v4096_v55 = vmul.f32 0.0078125, %v4093_v52  ;;  %v4100_v58 = vmul.f32 %v8052_v19, %v8052_v19 }
0x1cc4   : > { %v8060_v44 = vsub.f32 %v8019_v16, %v4096_v55  ;;  %4103 = vadd.xlane.f32.xlu0 %v4100_v58  ;;  %v4101_v59 = vmul.f32 %v8055_v24, %v8055_v24  ;;  %v6573_v55 = vld [vmem:[%s8495_s15 + $0x140] sm:$0xff]  }
0x1cc5   : > { %v6574_v58 = vld [vmem:[%s8495_s15 + $0x1c0] sm:$0xff]   ;;  %6004 = vmatprep.subr.bf16.mxu1 %v6573_v55 }
0x1cc6   : > { %v4102_v33 = vmul.f32 %v8060_v44, %v8060_v44  ;;  %6032 = vmatprep.subr.bf16.mxu0 %v6574_v58 }
0x1cc8   : > { %4105 = vadd.xlane.f32.xlu0 %v4101_v59  ;;  %v4107_v57 = vsel %vm784_vm0, %v4102_v33, 0.0  ;;  %v6576_v59 = vld [vmem:[%s8495_s15 + $0x180] sm:$0xff]   ;;  %v6577_v33 = vld [vmem:[%s8495_s15 + $0x148] sm:$0xff]  }
0x1cc9   : > { %4108 = vadd.xlane.f32.xlu1 %v4107_v57  ;;  %v6578_v57 = vld [vmem:[%s8495_s15 + $0x1c8] sm:$0xff]  }
0x1d51   : > { %v4104_v37 = vpop.xlane.xlu0 %4103 }
0x1d52   : > { %v4110_v6 = vmul.f32 0.0078125, %v4104_v37  ;;  %v6603_v37 = vld [vmem:[%s8495_s15 + $0x138] sm:$0xff]  }
0x1d54   : > { %v4113_v45 = vadd.f32 1e-05, %v4110_v6  ;;  %v6604_v6 = vld [vmem:[%s8495_s15 + $0x1b8] sm:$0xff]  }
0x1d55   : > { %v4106_v62 = vpop.xlane.xlu0 %4105 }
0x1d56   : > { %6781 = vrsqrt.f32 %v4113_v45  ;;  %v4111_v27 = vmul.f32 0.0078125, %v4106_v62  ;;  %v4109_v8 = vpop.xlane.xlu1 %4108  ;;  %v5681_v45 = vld [vmem:[%s8494_s14 + $0x4] sm:$0xf] }
0x1d57   : > { %v4112_v28 = vmul.f32 0.0078125, %v4109_v8  ;;  %v8250_v62 = vrot.slane %v5681_v45, %v7112_v51  ;;  %v8256_v8 = vrot.slane %v5681_v45, %v7118_v53 }
0x1d58   : > { %v4114_v34 = vadd.f32 1e-05, %v4111_v27  ;;  %v8253_v27 = vrot.slane %v5681_v45, %v7121_v54 }
0x1d59   : > { %v4115_v20 = vadd.f32 1e-05, %v4112_v28  ;;  %v8260_v28 = vrot.slane %v5681_v45, %v2140_v35 }
0x1d5a   : > { %6783 = vrsqrt.f32 %v4114_v34 }
0x1d5b   : > { %6785 = vrsqrt.f32 %v4115_v20 }
0x1d60   : > { %v6782_v46 = vpop.eup %6781 }
0x1d61   : > { %v4119_v32 = vmul.f32 %v6782_v46, %v8052_v19 }
0x1d63   : > { %v4128_v38 = vmul.f32 %v5647_v9, %v4119_v32 }
0x1d64   : > { %v6784_v56 = vpop.eup %6783 }
0x1d65   : > { %v6786_v43 = vpop.eup %6785  ;;  %v4120_v48 = vmul.f32 %v6784_v56, %v8055_v24  ;;  %v4137_v47 = vadd.f32 %v5648_v41, %v4128_v38 }
0x1d66   : > { %v4121_v11 = vmul.f32 %v6786_v43, %v8060_v44  ;;  %v6575_v44 = vld [vmem:[%s8495_s15 + $0x100] sm:$0xff]  }
0x1d67   : > { %v4129_v31 = vmul.f32 %v5647_v9, %v4120_v48 }
0x1d68   : > { %v4130_v19 = vmul.f32 %v5647_v9, %v4121_v11 }
0x1d69   : > { %v4138_v49 = vadd.f32 %v5648_v41, %v4129_v31 }
0x1d6a   : > { %v4139_v52 = vadd.f32 %v5648_v41, %v4130_v19 }
0x1d6b   : > { %v4140_v17 = vpack.c.bf16 %v4138_v49, %v4137_v47 }
0x1d6c   : > { %v4141_v24 = vpack.c.bf16 %v4139_v52, %v4139_v52 }
0x1d6d   : > { %4391 = vmatmul.mubr.bf16.vlgmr.msra.gmra.mrb[68].mxu1 %v4140_v17  ;;  %4442 = vmatmul.mubr.bf16.vlgmr.msra.gmra.mrb[60].mxu0 %v4140_v17 }
0x1d6e   : > { %4400 = vmatprep.mubr.bf16.mxu1 %v6840_v15  ;;  %4451 = vmatprep.mubr.bf16.mxu0 %v6840_v15 }
0x1d6f   : > { %6005 = vmatpush3.bf16.msra.mxu1 %v6575_v44  ;;  %6033 = vmatpush3.bf16.msra.mxu0 %v6576_v59 }
0x1d70   : > { %6006 = vmatprep.subr.bf16.mxu1 %v6577_v33  ;;  %6034 = vmatprep.subr.bf16.mxu0 %v6578_v57 }
0x1d73   : > { %6007 = vmatpush3.bf16.msra.mxu1 %v6579_v18  ;;  %6035 = vmatpush3.bf16.msra.mxu0 %v6580_v29 }
0x1d74   : > { %6008 = vmatprep.subr.bf16.mxu1 %v6581_v60  ;;  %6036 = vmatprep.subr.bf16.mxu0 %v6582_v61 }
0x1d75   : > { %4401 = vmatmul.mubr.bf16.gmra.mrb[72].mxu1 %v4141_v24  ;;  %4452 = vmatmul.mubr.bf16.gmra.mrb[64].mxu0 %v4141_v24 }
0x1d77   : > { %6009 = vmatpush3.bf16.msra.mxu1 %v6583_v22  ;;  %6037 = vmatpush3.bf16.msra.mxu0 %v6584_v63 }
0x1d78   : > { %6010 = vmatprep.subr.bf16.mxu1 %v6585_v0  ;;  %6038 = vmatprep.subr.bf16.mxu0 %v6586_v1 }
0x1d7b   : > { %6011 = vmatpush3.bf16.msra.mxu1 %v6587_v2  ;;  %6039 = vmatpush3.bf16.msra.mxu0 %v6588_v3 }
0x1d7c   : > { %6012 = vmatprep.subr.bf16.mxu1 %v6589_v4  ;;  %6040 = vmatprep.subr.bf16.mxu0 %v6590_v30 }
0x1d7f   : > { %6013 = vmatpush3.bf16.msra.mxu1 %v6591_v5  ;;  %6041 = vmatpush3.bf16.msra.mxu0 %v6592_v26 }
0x1d80   : > { %6014 = vmatprep.subr.bf16.mxu1 %v6593_v7  ;;  %6042 = vmatprep.subr.bf16.mxu0 %v6594_v39 }
0x1d83   : > { %6015 = vmatpush3.bf16.msra.mxu1 %v6595_v36  ;;  %6043 = vmatpush3.bf16.msra.mxu0 %v6596_v42 }
0x1d84   : > { %6016 = vmatprep.subr.bf16.mxu1 %v6597_v12  ;;  %6044 = vmatprep.subr.bf16.mxu0 %v6598_v21 }
0x1d87   : > { %6017 = vmatpush3.bf16.msra.mxu1 %v6599_v14  ;;  %6045 = vmatpush3.bf16.msra.mxu0 %v6600_v25 }
0x1d88   : > { %6018 = vmatprep.subr.bf16.mxu1 %v6601_v13  ;;  %6046 = vmatprep.subr.bf16.mxu0 %v6602_v23 }
0x1d8b   : > { %6019 = vmatpush3.bf16.msra.mxu1 %v6603_v37  ;;  %6047 = vmatpush3.bf16.msra.mxu0 %v6604_v6 }
0x1e40   : > { %v4392_v34 = vpop.f32.mrb[68].mxu1  ;;  %v4443_v20 = vpop.f32.mrb[60].mxu0 }
0x1e41   : > { %v8263_v46 = vadd.f32 %v4392_v34, %v8250_v62  ;;  %v8266_v32 = vadd.f32 %v4443_v20, %v8253_v27  ;;  %v4394_v9 = vpop.f32.mrb[69].mxu1  ;;  %v4445_v56 = vpop.f32.mrb[61].mxu0 }
0x1e42   : > { %v8269_v54 = vadd.f32 %v4394_v9, %v8256_v8  ;;  %v8272_v43 = vadd.f32 %v4445_v56, %v8260_v28  ;;  %v4396_v48 = vpop.f32.mrb[70].mxu1  ;;  %v4447_v50 = vpop.f32.mrb[62].mxu0 }
0x1e43   : > { %v4460_v35 = vmul.f32 %v8263_v46, %v8263_v46  ;;  %v4462_v38 = vmul.f32 %v8266_v32, %v8266_v32  ;;  %v8279_v41 = vadd.f32 %v4396_v48, %v8250_v62  ;;  %v8282_v31 = vadd.f32 %v4447_v50, %v8253_v27  ;;  %v4398_v11 = vpop.f32.mrb[71].mxu1  ;;  %v4449_v47 = vpop.f32.mrb[63].mxu0 }
0x1e44   : > { %v4461_v49 = vmul.f32 %v8269_v54, %v8269_v54  ;;  %v4463_v17 = vmul.f32 %v8272_v43, %v8272_v43  ;;  %v8289_v19 = vadd.f32 %v4398_v11, %v8256_v8  ;;  %v8292_v52 = vadd.f32 %v4449_v47, %v8260_v28 }
0x1e45   : > { %v4472_v24 = vmul.f32 %v4460_v35, %v8263_v46  ;;  %v4474_v55 = vmul.f32 %v4462_v38, %v8266_v32  ;;  %v4464_v58 = vmul.f32 %v8279_v41, %v8279_v41  ;;  %v4466_v44 = vmul.f32 %v8282_v31, %v8282_v31 }
0x1e46   : > { %v4473_v59 = vmul.f32 %v4461_v49, %v8269_v54  ;;  %v4475_v33 = vmul.f32 %v4463_v17, %v8272_v43  ;;  %v4465_v57 = vmul.f32 %v8289_v19, %v8289_v19  ;;  %v4467_v18 = vmul.f32 %v8292_v52, %v8292_v52 }
0x1e47   : > { %v4484_v29 = vmul.f32 0.044715, %v4472_v24  ;;  %v4486_v60 = vmul.f32 0.044715, %v4474_v55  ;;  %v4476_v61 = vmul.f32 %v4464_v58, %v8279_v41  ;;  %v4478_v22 = vmul.f32 %v4466_v44, %v8282_v31 }
0x1e48   : > { %v4485_v63 = vmul.f32 0.044715, %v4473_v59  ;;  %v4487_v0 = vmul.f32 0.044715, %v4475_v33  ;;  %v4477_v1 = vmul.f32 %v4465_v57, %v8289_v19  ;;  %v4479_v2 = vmul.f32 %v4467_v18, %v8292_v52  ;;  %v4402_v3 = vpop.f32.mrb[72].mxu1  ;;  %v4453_v4 = vpop.f32.mrb[64].mxu0 }
0x1e49   : > { %v4496_v30 = vadd.f32 %v4484_v29, %v8263_v46  ;;  %v4498_v5 = vadd.f32 %v4486_v60, %v8266_v32  ;;  %v4488_v26 = vmul.f32 0.044715, %v4476_v61  ;;  %v4490_v7 = vmul.f32 0.044715, %v4478_v22  ;;  %v4404_v39 = vpop.f32.mrb[73].mxu1  ;;  %v4455_v36 = vpop.f32.mrb[65].mxu0 }
0x1e4a   : > { %v4497_v42 = vadd.f32 %v4485_v63, %v8269_v54  ;;  %v4499_v12 = vadd.f32 %v4487_v0, %v8272_v43  ;;  %v4489_v21 = vmul.f32 0.044715, %v4477_v1  ;;  %v4491_v14 = vmul.f32 0.044715, %v4479_v2  ;;  %v4406_v25 = vpop.f32.mrb[74].mxu1  ;;  %v4457_v13 = vpop.f32.mrb[66].mxu0 }
0x1e4b   : > { %v4508_v23 = vmul.f32 0.7978846, %v4496_v30  ;;  %v4510_v37 = vmul.f32 0.7978846, %v4498_v5  ;;  %v4500_v6 = vadd.f32 %v4488_v26, %v8279_v41  ;;  %v4502_v45 = vadd.f32 %v4490_v7, %v8282_v31  ;;  %v4407_v34 = vpop.f32.mrb[75].mxu1  ;;  %v4458_v20 = vpop.f32.mrb[67].mxu0 }
0x1e4c   : > { %v4509_v9 = vmul.f32 0.7978846, %v4497_v42  ;;  %v4511_v56 = vmul.f32 0.7978846, %v4499_v12  ;;  %v4501_v48 = vadd.f32 %v4489_v21, %v8289_v19  ;;  %v4503_v50 = vadd.f32 %v4491_v14, %v8292_v52 }
0x1e4d   : > { %6787 = vtanh.f32 %v4508_v23  ;;  %v4512_v35 = vmul.f32 0.7978846, %v4500_v6  ;;  %v8319_v38 = vadd.f32 %v4402_v3, %v8250_v62  ;;  %v4514_v11 = vmul.f32 0.7978846, %v4502_v45 }
0x1e4e   : > { %6789 = vtanh.f32 %v4510_v37  ;;  %v4513_v47 = vmul.f32 0.7978846, %v4501_v48  ;;  %v8322_v49 = vadd.f32 %v4453_v4, %v8253_v27  ;;  %v8327_v24 = vadd.f32 %v4404_v39, %v8256_v8 }
0x1e4f   : > { %6791 = vtanh.f32 %v4509_v9  ;;  %v4468_v17 = vmul.f32 %v8319_v38, %v8319_v38  ;;  %v8330_v55 = vadd.f32 %v4455_v36, %v8260_v28  ;;  %v4515_v58 = vmul.f32 0.7978846, %v4503_v50 }
0x1e50   : > { %6793 = vtanh.f32 %v4511_v56  ;;  %v4470_v62 = vmul.f32 %v8322_v49, %v8322_v49  ;;  %v4469_v27 = vmul.f32 %v8327_v24, %v8327_v24 }
0x1e51   : > { %6795 = vtanh.f32 %v4512_v35  ;;  %v4480_v44 = vmul.f32 %v4468_v17, %v8319_v38  ;;  %v4471_v59 = vmul.f32 %v8330_v55, %v8330_v55 }
0x1e52   : > { %6797 = vtanh.f32 %v4514_v11  ;;  %v4482_v8 = vmul.f32 %v4470_v62, %v8322_v49  ;;  %v4481_v33 = vmul.f32 %v4469_v27, %v8327_v24 }
0x1e53   : > { %6799 = vtanh.f32 %v4513_v47  ;;  %v4492_v28 = vmul.f32 0.044715, %v4480_v44  ;;  %v4483_v57 = vmul.f32 %v4471_v59, %v8330_v55 }
0x1e54   : > { %6801 = vtanh.f32 %v4515_v58  ;;  %v4494_v18 = vmul.f32 0.044715, %v4482_v8  ;;  %v4493_v60 = vmul.f32 0.044715, %v4481_v33 }
0x1e55   : > { %v4504_v29 = vadd.f32 %v4492_v28, %v8319_v38  ;;  %v4495_v61 = vmul.f32 0.044715, %v4483_v57 }
0x1e56   : > { %v4506_v22 = vadd.f32 %v4494_v18, %v8322_v49  ;;  %v4505_v1 = vadd.f32 %v4493_v60, %v8327_v24 }
0x1e57   : > { %v6788_v63 = vpop.eup %6787  ;;  %v4516_v0 = vmul.f32 0.7978846, %v4504_v29  ;;  %v4507_v2 = vadd.f32 %v4495_v61, %v8330_v55 }
0x1e58   : > { %v6790_v3 = vpop.eup %6789  ;;  %v4532_v4 = vadd.f32 1.0, %v6788_v63  ;;  %v4518_v30 = vmul.f32 0.7978846, %v4506_v22  ;;  %v4517_v7 = vmul.f32 0.7978846, %v4505_v1 }
0x1e59   : > { %v6792_v5 = vpop.eup %6791  ;;  %v4534_v26 = vadd.f32 1.0, %v6790_v3  ;;  %6803 = vtanh.f32 %v4516_v0  ;;  %v4519_v39 = vmul.f32 0.7978846, %v4507_v2 }
0x1e5a   : > { %v6794_v36 = vpop.eup %6793  ;;  %6805 = vtanh.f32 %v4518_v30  ;;  %v4533_v42 = vadd.f32 1.0, %v6792_v5  ;;  %v4544_v25 = vmul.f32 0.5, %v4532_v4 }
0x1e5b   : > { %v6796_v12 = vpop.eup %6795  ;;  %6807 = vtanh.f32 %v4517_v7  ;;  %v4535_v21 = vadd.f32 1.0, %v6794_v36  ;;  %v4546_v37 = vmul.f32 0.5, %v4534_v26 }
0x1e5c   : > { %v6798_v14 = vpop.eup %6797  ;;  %v4536_v13 = vadd.f32 1.0, %v6796_v12  ;;  %6809 = vtanh.f32 %v4519_v39  ;;  %v4545_v9 = vmul.f32 0.5, %v4533_v42  ;;  %v4556_v35 = vmul.f32 %v4544_v25, %v8263_v46 }
0x1e5d   : > { %v6800_v23 = vpop.eup %6799  ;;  %v4538_v6 = vadd.f32 1.0, %v6798_v14  ;;  %v4547_v50 = vmul.f32 0.5, %v4535_v21  ;;  %v4558_v17 = vmul.f32 %v4546_v37, %v8266_v32 }
0x1e5e   : > { %v6802_v45 = vpop.eup %6801  ;;  %v4548_v34 = vmul.f32 0.5, %v4536_v13  ;;  %v4537_v20 = vadd.f32 1.0, %v6800_v23  ;;  %v4557_v27 = vmul.f32 %v4545_v9, %v8269_v54  ;;  %v5811_v13 = vld [vmem:[%s8496_s16 + $0x1] ss:$0 sm:$0xff] }
0x1e5f   : > { %v4550_v56 = vmul.f32 0.5, %v4538_v6  ;;  %v4539_v48 = vadd.f32 1.0, %v6802_v45  ;;  %v4559_v33 = vmul.f32 %v4547_v50, %v8272_v43 }
0x1e60   : > { %v4560_v11 = vmul.f32 %v4548_v34, %v8279_v41  ;;  %v4549_v47 = vmul.f32 0.5, %v4537_v20 }
0x1e61   : > { %v4562_v58 = vmul.f32 %v4550_v56, %v8282_v31  ;;  %v4551_v62 = vmul.f32 0.5, %v4539_v48 }
0x1e62   : > { %v4568_v44 = vpack.c.bf16 %v4560_v11, %v4556_v35  ;;  %v4561_v59 = vmul.f32 %v4549_v47, %v8289_v19 }
0x1e63   : > { %v6804_v8 = vpop.eup %6803  ;;  %v4570_v28 = vpack.c.bf16 %v4562_v58, %v4558_v17  ;;  %v4563_v57 = vmul.f32 %v4551_v62, %v8292_v52 }
0x1e64   : > { %v6806_v46 = vpop.eup %6805  ;;  %v4569_v18 = vpack.c.bf16 %v4561_v59, %v4557_v27  ;;  %v4540_v41 = vadd.f32 1.0, %v6804_v8 }
0x1e65   : > { %v6808_v29 = vpop.eup %6807  ;;  %v4571_v60 = vpack.c.bf16 %v4563_v57, %v4559_v33  ;;  %v4542_v32 = vadd.f32 1.0, %v6806_v46 }
0x1e66   : > { %v6810_v61 = vpop.eup %6809  ;;  %4865 = vmatprep.mubr.bf16.mxu1 %v4569_v18  ;;  %v4541_v31 = vadd.f32 1.0, %v6808_v29  ;;  %v4552_v22 = vmul.f32 0.5, %v4540_v41 }
0x1e67   : > { %4913 = vmatprep.mubr.bf16.mxu0 %v4571_v60  ;;  %4866 = vmatmul.mubr.bf16.vlgmr.msra.gmra.mrb[76].mxu1 %v4568_v44  ;;  %v4543_v54 = vadd.f32 1.0, %v6810_v61  ;;  %v4554_v19 = vmul.f32 0.5, %v4542_v32  ;;  %v6605_v61 = vld [vmem:[%s8499_s19] sm:$0xff]  }
0x1e68   : > { %4914 = vmatmul.mubr.bf16.vlgmr.msra.gmra.mrb[68].mxu0 %v4570_v28  ;;  %v4553_v63 = vmul.f32 0.5, %v4541_v31  ;;  %v4564_v43 = vmul.f32 %v4552_v22, %v8319_v38  ;;  %6278 = vmatprep.subr.bf16.mxu1 %v6605_v61  ;;  %v6606_v31 = vld [vmem:[%s8499_s19 + $0x8] sm:$0xff]   ;;  %v6607_v22 = vld [vmem:[%s8499_s19 + $0x10] sm:$0xff]  }
0x1e69   : > { %v4555_v0 = vmul.f32 0.5, %v4543_v54  ;;  %v4566_v1 = vmul.f32 %v4554_v19, %v8322_v49  ;;  %6279 = vmatpush3.bf16.msra.mxu1 %v6605_v61  ;;  %v6608_v54 = vld [vmem:[%s8499_s19 + $0x18] sm:$0xff]   ;;  %v6609_v19 = vld [vmem:[%s8499_s19 + $0x20] sm:$0xff]  }
0x1e6a   : > { %v4565_v52 = vmul.f32 %v4553_v63, %v8327_v24  ;;  %v4572_v30 = vpack.c.bf16 %v4564_v43, %v4564_v43  ;;  %6280 = vmatprep.subr.bf16.mxu1 %v6606_v31  ;;  %v6610_v63 = vld [vmem:[%s8499_s19 + $0x28] sm:$0xff]   ;;  %v6612_v43 = vld [vmem:[%s8499_s19 + $0x38] sm:$0xff]  }
0x1e6b   : > { %v4567_v2 = vmul.f32 %v4555_v0, %v8330_v55  ;;  %v4574_v5 = vpack.c.bf16 %v4566_v1, %v4566_v1  ;;  %v6611_v0 = vld [vmem:[%s8499_s19 + $0x30] sm:$0xff]   ;;  %v6615_v1 = vld [vmem:[%s8501_s21 + $0x4] ss:$8 sps:$4 sm:$0xff]  }
0x1e6c   : > { %v4573_v3 = vpack.c.bf16 %v4565_v52, %v4565_v52  ;;  %v6613_v52 = vld [vmem:[%s8501_s21] ss:$8 sps:$4 sm:$0xff]   ;;  %5229 = vmatprep.subr.bf16.mxu0 %v6615_v1 }
0x1e6d   : > { %v4575_v4 = vpack.c.bf16 %v4567_v2, %v4567_v2  ;;  %6281 = vmatpush3.bf16.msra.mxu1 %v6606_v31  ;;  %v6618_v2 = vld [vmem:[%s8501_s21 + $0x14] ss:$8 sps:$4 sm:$0xff]   ;;  %5230 = vmatpush1.bf16.msra.mxu0 %v6613_v52 }
0x1e6e   : > { %4873 = vmatprep.mubr.bf16.mxu1 %v4573_v3  ;;  %6282 = vmatprep.subr.bf16.mxu1 %v6607_v22  ;;  %v6616_v3 = vld [vmem:[%s8501_s21 + $0x10] ss:$8 sps:$4 sm:$0xff]  }
0x1e6f   : > { %4921 = vmatprep.mubr.bf16.mxu0 %v4575_v4  ;;  %4874 = vmatmul.mubr.bf16.gmra.mrb[80].mxu1 %v4572_v30  ;;  %v6621_v4 = vld [vmem:[%s8501_s21 + $0x24] ss:$8 sps:$4 sm:$0xff]   ;;  %v6619_v30 = vld [vmem:[%s8501_s21 + $0x20] ss:$8 sps:$4 sm:$0xff]  }
0x1e70   : > { %4922 = vmatmul.mubr.bf16.gmra.mrb[72].mxu0 %v4574_v5  ;;  %5231 = vmatprep.subr.bf16.mxu0 %v6618_v2  ;;  %v6624_v5 = vld [vmem:[%s8501_s21 + $0x34] ss:$8 sps:$4 sm:$0xff]  }
0x1e71   : > { %5261 = vmatprep.mubr.bf16.mxu0 %v6840_v15  ;;  %6283 = vmatpush3.bf16.msra.mxu1 %v6607_v22 }
0x1e72   : > { %6284 = vmatprep.subr.bf16.mxu1 %v6608_v54  ;;  %5232 = vmatpush1.bf16.msra.mxu0 %v6616_v3 }
0x1e73   : > { %5233 = vmatprep.subr.bf16.mxu0 %v6621_v4 }
0x1e75   : > { %6285 = vmatpush3.bf16.msra.mxu1 %v6608_v54 }
0x1e76   : > { %6286 = vmatprep.subr.bf16.mxu1 %v6609_v19  ;;  %5234 = vmatpush1.bf16.msra.mxu0 %v6619_v30 }
0x1e77   : > { %5235 = vmatprep.subr.bf16.mxu0 %v6624_v5 }
0x1e79   : > { %6287 = vmatpush3.bf16.msra.mxu1 %v6609_v19 }
0x1e7a   : > { %6288 = vmatprep.subr.bf16.mxu1 %v6610_v63 }
0x1e7d   : > { %6289 = vmatpush3.bf16.msra.mxu1 %v6610_v63 }
0x1e7e   : > { %6290 = vmatprep.subr.bf16.mxu1 %v6611_v0 }
0x1e81   : > { %6291 = vmatpush3.bf16.msra.mxu1 %v6611_v0 }
0x1e82   : > { %6292 = vmatprep.subr.bf16.mxu1 %v6612_v43 }
0x1e85   : > { %6293 = vmatpush3.bf16.msra.mxu1 %v6612_v43 }
0x1f3a   : > { %v6020_v26 = vpop.f32.mrb[76].mxu1 }
0x1f3b   : > { %v6048_v7 = vpop.f32.mrb[68].mxu0  ;;  %v6021_v39 = vpop.f32.mrb[77].mxu1 }
0x1f3c   : > { %v6022_v38 = vadd.f32 %v6021_v39, %v6020_v26  ;;  %v6049_v36 = vpop.f32.mrb[69].mxu0  ;;  %v6023_v24 = vpop.f32.mrb[78].mxu1  ;;  %v6622_v26 = vld [vmem:[%s8501_s21 + $0x30] ss:$8 sps:$4 sm:$0xff]   ;;  %v6625_v39 = vld [vmem:[%s8501_s21 + $0x40] ss:$8 sps:$4 sm:$0xff]  }
0x1f3d   : > { %v6050_v42 = vadd.f32 %v6049_v36, %v6048_v7  ;;  %v6051_v49 = vpop.f32.mrb[70].mxu0  ;;  %v6024_v12 = vpop.f32.mrb[79].mxu1  ;;  %v6627_v7 = vld [vmem:[%s8501_s21 + $0x44] ss:$8 sps:$4 sm:$0xff]   ;;  %5236 = vmatpush1.bf16.msra.mxu0 %v6622_v26  ;;  %v6628_v36 = vld [vmem:[%s8501_s21 + $0x50] ss:$8 sps:$4 sm:$0xff]  }
0x1f3e   : > { %v6025_v55 = vadd.f32 %v6024_v12, %v6023_v24  ;;  %v6052_v21 = vpop.f32.mrb[71].mxu0  ;;  %5237 = vmatprep.subr.bf16.mxu0 %v6627_v7 }
0x1f3f   : > { %v4916_v14 = vadd.f32 %v6050_v42, %v6022_v38  ;;  %v6053_v25 = vadd.f32 %v6052_v21, %v6051_v49  ;;  %v6630_v38 = vld [vmem:[%s8501_s21 + $0x54] ss:$8 sps:$4 sm:$0xff]  }
0x1f41   : > { %v4929_v23 = vadd.f32 %v4916_v14, %v8016_v10  ;;  %v4919_v37 = vadd.f32 %v6053_v25, %v6025_v55  ;;  %5238 = vmatpush1.bf16.msra.mxu0 %v6625_v39 }
0x1f42   : > { %v6026_v6 = vpop.f32.mrb[80].mxu1  ;;  %5239 = vmatprep.subr.bf16.mxu0 %v6630_v38 }
0x1f43   : > { %v4930_v45 = vadd.f32 %v4919_v37, %v8021_v40  ;;  %v6054_v34 = vpop.f32.mrb[72].mxu0  ;;  %v6027_v20 = vpop.f32.mrb[81].mxu1  ;;  %v4940_v9 = vadd.f32 %v5811_v13, %v4929_v23  ;;  %v5812_v37 = vld [vmem:[%s8497_s17] ss:$0 sm:$0xff] }
0x1f44   : > { %v6028_v56 = vadd.f32 %v6027_v20, %v6026_v6  ;;  %v6055_v48 = vpop.f32.mrb[73].mxu0  ;;  %v6029_v50 = vpop.f32.mrb[82].mxu1 }
0x1f45   : > { %v6056_v35 = vadd.f32 %v6055_v48, %v6054_v34  ;;  %v6057_v11 = vpop.f32.mrb[74].mxu0  ;;  %4945 = vadd.xlane.f32.xlu0 %v4940_v9  ;;  %v6030_v47 = vpop.f32.mrb[83].mxu1  ;;  %v4941_v17 = vadd.f32 %v5811_v13, %v4930_v45  ;;  %5240 = vmatpush1.bf16.msra.mxu0 %v6628_v36 }
0x1f46   : > { %v6058_v58 = vpop.f32.mrb[75].mxu0 }
0x1f47   : > { %v4924_v62 = vadd.f32 %v6056_v35, %v6028_v56  ;;  %4947 = vadd.xlane.f32.xlu1 %v4941_v17 }
0x1f49   : > { %v4931_v10 = vadd.f32 %v4924_v62, %v8019_v16 }
0x1f4b   : > { %v4942_v44 = vadd.f32 %v5811_v13, %v4931_v10  ;;  %v6633_v10 = vld [vmem:[%s8501_s21 + $0x64] ss:$8 sps:$4 sm:$0xff]  }
0x1f4c   : > { %5241 = vmatprep.subr.bf16.mxu0 %v6633_v10 }
0x1f4d   : > { %v4949_v27 = vsel %vm784_vm0, %v4942_v44, 0.0 }
0x1f4e   : > { %4950 = vadd.xlane.f32.xlu0 %v4949_v27  ;;  %v6636_v27 = vld [vmem:[%s8501_s21 + $0x74] ss:$8 sps:$4 sm:$0xff]  }
0x1fd2   : > { %v4946_v40 = vpop.xlane.xlu0 %4945 }
0x1fd3   : > { %v4952_v59 = vmul.f32 0.0078125, %v4946_v40  ;;  %v6634_v40 = vld [vmem:[%s8501_s21 + $0x70] ss:$8 sps:$4 sm:$0xff]  }
0x1fd4   : > { %v4948_v8 = vpop.xlane.xlu1 %4947 }
0x1fd5   : > { %v8366_v28 = vsub.f32 %v4940_v9, %v4952_v59  ;;  %v4953_v33 = vmul.f32 0.0078125, %v4948_v8  ;;  %v5813_v9 = vld [vmem:[%s8498_s18] ss:$0 sm:$0xff] }
0x1fd6   : > { %v5814_v8 = vld [vmem:[%s8547_s0] ss:$0 sm:$0xff] }
0x1fd7   : > { %v8368_v57 = vsub.f32 %v4941_v17, %v4953_v33  ;;  %v4958_v46 = vmul.f32 %v8366_v28, %v8366_v28 }
0x1fd9   : > { %4961 = vadd.xlane.f32.xlu1 %v4958_v46  ;;  %v4959_v18 = vmul.f32 %v8368_v57, %v8368_v57 }
0x1fdb   : > { %4963 = vadd.xlane.f32.xlu0 %v4959_v18  ;;  %v4951_v16 = vpop.xlane.xlu0 %4950 }
0x1fdc   : > { %v4954_v41 = vmul.f32 0.0078125, %v4951_v16 }
0x1fde   : > { %v8374_v29 = vsub.f32 %v4942_v44, %v4954_v41  ;;  %v6631_v44 = vld [vmem:[%s8501_s21 + $0x60] ss:$8 sps:$4 sm:$0xff]  }
0x1fdf   : > { %5242 = vmatpush1.bf16.msra.mxu0 %v6631_v44 }
0x1fe0   : > { %v4960_v60 = vmul.f32 %v8374_v29, %v8374_v29  ;;  %5243 = vmatprep.subr.bf16.mxu0 %v6636_v27 }
0x1fe2   : > { %v4965_v32 = vsel %vm784_vm0, %v4960_v60, 0.0  ;;  %v5137_v60 = vld [vmem:[%s8549_s3] sm:$0x3] }
0x1fe3   : > { %4966 = vadd.xlane.f32.xlu1 %v4965_v32  ;;  %5244 = vmatpush1.bf16.msra.mxu0 %v6634_v40  ;;  %v5142_v32 = vrot.slane %v5137_v60, %v7112_v51  ;;  %v5146_v61 = vrot.slane %v5137_v60, %v7118_v53 }
0x2066   : > { %v4962_v24 = vpop.xlane.xlu1 %4961 }
0x2067   : > { %v4968_v42 = vmul.f32 0.0078125, %v4962_v24 }
0x2068   : > { %v4964_v49 = vpop.xlane.xlu0 %4963 }
0x2069   : > { %v4971_v12 = vadd.f32 1e-05, %v4968_v42  ;;  %v4969_v55 = vmul.f32 0.0078125, %v4964_v49 }
0x206b   : > { %6811 = vrsqrt.f32 %v4971_v12  ;;  %v4972_v21 = vadd.f32 1e-05, %v4969_v55 }
0x206d   : > { %6813 = vrsqrt.f32 %v4972_v21 }
0x2070   : > { %v4967_v14 = vpop.xlane.xlu1 %4966 }
0x2071   : > { %v4970_v25 = vmul.f32 0.0078125, %v4967_v14 }
0x2073   : > { %v4973_v13 = vadd.f32 1e-05, %v4970_v25 }
0x2075   : > { %v6812_v23 = vpop.eup %6811  ;;  %6815 = vrsqrt.f32 %v4973_v13 }
0x2076   : > { %v4977_v6 = vmul.f32 %v6812_v23, %v8366_v28 }
0x2077   : > { %v6814_v45 = vpop.eup %6813 }
0x2078   : > { %v4978_v34 = vmul.f32 %v6814_v45, %v8368_v57  ;;  %v4986_v20 = vmul.f32 %v5812_v37, %v4977_v6 }
0x207a   : > { %v4987_v56 = vmul.f32 %v5812_v37, %v4978_v34  ;;  %v4995_v48 = vadd.f32 %v5813_v9, %v4986_v20 }
0x207c   : > { %v4996_v50 = vadd.f32 %v5813_v9, %v4987_v56 }
0x207e   : > { %v4998_v35 = vpack.c.bf16 %v4996_v50, %v4995_v48 }
0x207f   : > { %v6816_v11 = vpop.eup %6815 }
0x2080   : > { %v4979_v47 = vmul.f32 %v6816_v11, %v8374_v29  ;;  %6294 = vmatprep.mubr.bf16.mxu1 %v4998_v35 }
0x2082   : > { %v4988_v17 = vmul.f32 %v5812_v37, %v4979_v47 }
0x2084   : > { %v4997_v58 = vadd.f32 %v5813_v9, %v4988_v17 }
0x2086   : > { %v4999_v62 = vpack.c.bf16 %v4997_v58, %v4997_v58 }
0x2088   : > { %6295 = vmatmul.mubr.bf16.vlgmr.msra.gmra.mrb[84].mxu1 %v4999_v62 }
0x215b   : > { %v6296_v59 = vpop.f32.mrb[84].mxu1 }
0x215c   : > { %v5105_v28 = vpop.f32.mrb[85].mxu1  ;;  %v5114_v41 = vadd.f32 %v6296_v59, %v5814_v8 }
0x215d   : > { %v6297_v33 = vpop.f32.mrb[86].mxu1  ;;  %v5106_v46 = vadd.f32 %v5814_v8, %v5105_v28 }
0x215e   : > { %v5108_v57 = vpop.f32.mrb[87].mxu1  ;;  %v5120_v29 = vpack.c.bf16 %v5114_v41, %v5114_v41 }
0x215f   : > { %v5109_v18 = vadd.f32 %v5814_v8, %v5108_v57 }
0x2161   : > { %v5119_v16 = vpack.c.bf16 %v5109_v18, %v5106_v46 }
0x2163   : > { %5262 = vmatmul.mubr.bf16.vlgmr.msra.gmra.mrb[76].mxu0 %v5119_v16 }
0x2164   : > { %5271 = vmatprep.mubr.bf16.mxu0 %v6840_v15 }
0x216b   : > { %5272 = vmatmul.mubr.bf16.gmra.mrb[80].mxu0 %v5120_v29 }
0x2236   : > { %v5263_v31 = vpop.f32.mrb[76].mxu0 }
0x2237   : > { %v5264_v22 = vadd.f32 %v5263_v31, %v5142_v32  ;;  %v5265_v54 = vpop.f32.mrb[77].mxu0 }
0x2238   : > { %v5266_v19 = vadd.f32 %v5265_v54, %v5146_v61  ;;  %v5267_v15 = vpop.f32.mrb[78].mxu0 }
0x2239   : > { %5280 = vst [vmem:[%s765_s22] sm:$0xff] %v5264_v22  ;;  %v5268_v63 = vadd.f32 %v5267_v15, %v5142_v32  ;;  %v5269_v0 = vpop.f32.mrb[79].mxu0 }
0x223a   : > { %v5839_v43 = vmul.f32 -0.5, %v5266_v19  ;;  %v5270_v52 = vadd.f32 %v5269_v0, %v5146_v61 }
0x223b   : > { %5281 = vst [vmem:[%s765_s22 + $0x8] sm:$0xff] %v5268_v63 }
0x223c   : > { %v5289_v1 = vmul.f32 1.442695, %v5839_v43  ;;  %v5840_v2 = vmul.f32 -0.5, %v5270_v52 }
0x223e   : > { %6817 = vpow2.f32 %v5289_v1  ;;  %v5291_v51 = vmul.f32 1.442695, %v5840_v2  ;;  %v5273_v53 = vpop.f32.mrb[80].mxu0 }
0x223f   : > { %v5274_v3 = vadd.f32 %v5273_v53, %v5142_v32  ;;  %v5275_v4 = vpop.f32.mrb[81].mxu0 }
0x2240   : > { %6819 = vpow2.f32 %v5291_v51  ;;  %v5276_v30 = vadd.f32 %v5275_v4, %v5146_v61  ;;  %v5277_v5 = vpop.f32.mrb[82].mxu0 }
0x2241   : > { %5282 = vst [vmem:[%s765_s22 + $0x10] sm:$0x3f] %v5274_v3  ;;  %v5278_v26 = vpop.f32.mrb[83].mxu0 }
0x2242   : > { %v5841_v7 = vmul.f32 -0.5, %v5276_v30 }
0x2244   : > { %v5293_v39 = vmul.f32 1.442695, %v5841_v7 }
0x2246   : > { %6821 = vpow2.f32 %v5293_v39 }
0x2248   : > { %v6818_v38 = vpop.eup %6817 }
0x2249   : > { %v5295_v36 = vadd.f32 1.0, %v6818_v38 }
0x224a   : > { %v6820_v24 = vpop.eup %6819 }
0x224b   : > { %6823 = vrcp.f32 %v5295_v36  ;;  %v5296_v42 = vadd.f32 1.0, %v6820_v24 }
0x224d   : > { %6825 = vrcp.f32 %v5296_v42 }
0x2250   : > { %v6822_v49 = vpop.eup %6821 }
0x2251   : > { %v5297_v12 = vadd.f32 1.0, %v6822_v49 }
0x2253   : > { %6827 = vrcp.f32 %v5297_v12 }
0x2255   : > { %v6824_v55 = vpop.eup %6823 }
0x2256   : > { %v5304_v21 = vmul.f32 2.0, %v6824_v55 }
0x2257   : > { %v6826_v14 = vpop.eup %6825 }
0x2258   : > { %v5307_v25 = vadd.f32 0.1, %v5304_v21  ;;  %v5305_v13 = vmul.f32 2.0, %v6826_v14 }
0x225a   : > { %5310 = vst [vmem:[%s770_s28] sm:$0xff] %v5307_v25  ;;  %v5308_v23 = vadd.f32 0.1, %v5305_v13 }
0x225c   : > { %5311 = vst [vmem:[%s770_s28 + $0x8] sm:$0xff] %v5308_v23 }
0x225d   : > { %v6828_v37 = vpop.eup %6827 }
0x225e   : > { %v5306_v6 = vmul.f32 2.0, %v6828_v37 }
0x2260   : > { %v5309_v45 = vadd.f32 0.1, %v5306_v6 }
0x2262   : > { %5312 = vst [vmem:[%s770_s28 + $0x10] sm:$0x3f] %v5309_v45 }
0x2263 PF: > { %s8552_s6 = sld [smem:[#allocation2_spill]] }
0x2269   : > { %s35_s5 = sadd.s32 1, %s8552_s6  }
0x226a   : > { %p32_p4 = scmp.ge.s32.totalorder %s35_s5, 4  }
0x226c   :  { %34 = sbr.rel (!%p32_p4) target bundleno = 14 (0xe), region = 169 }

// kernel: latent_world_model_forward.2
= control target key start
LH: loop header
LB: loop body
LE: loop exit
PB: predicated region body
PF: predicated region fallthrough
CT: control target
= control target key end

     0   :  { %s9519_s0 = inlined_call_operand.vmem [shape: f32[4,16,128], index: 0, kind: input, shape index: {}]   ;;  %s9520_s1 = inlined_call_operand.hbm [shape: f32[8,128], index: 1, kind: input, shape index: {}]   ;;  %s9521_s2 = inlined_call_operand.hbm [shape: f32[2,1,128], index: 2, kind: input, shape index: {}]   ;;  %s9522_s3 = inlined_call_operand.hbm [shape: f32[2,1,128], index: 3, kind: input, shape index: {}]   ;;  %s9523_s4 = inlined_call_operand.hbm [shape: f32[2,1,128], index: 4, kind: input, shape index: {}]   ;;  %s9524_s5 = inlined_call_operand.hbm [shape: f32[2,1,128], index: 5, kind: input, shape index: {}]   ;;  %s9525_s6 = inlined_call_operand.vmem [shape: bf16[2,128,128], index: 6, kind: input, shape index: {}]   ;;  %s9526_s7 = inlined_call_operand.hbm [shape: f32[2,1,128], index: 7, kind: input, shape index: {}]   ;;  %s9527_s8 = inlined_call_operand.hbm [shape: bf16[2,128,256], index: 8, kind: input, shape index: {}]   ;;  %s9528_s9 = inlined_call_operand.hbm [shape: f32[2,1,256], index: 9, kind: input, shape index: {}]   ;;  %s9529_s10 = inlined_call_operand.hbm [shape: bf16[2,128,128], index: 10, kind: input, shape index: {}]   ;;  %s9530_s11 = inlined_call_operand.hbm [shape: f32[2,1,128], index: 11, kind: input, shape index: {}]   ;;  %s9531_s12 = inlined_call_operand.hbm [shape: f32[2,1,128], index: 12, kind: input, shape index: {}]   ;;  %s9532_s13 = inlined_call_operand.hbm [shape: f32[2,1,128], index: 13, kind: input, shape index: {}]   ;;  %s9533_s14 = inlined_call_operand.vmem [shape: bf16[2,128,512], index: 14, kind: input, shape index: {}]   ;;  %s9534_s15 = inlined_call_operand.hbm [shape: f32[2,1,512], index: 15, kind: input, shape index: {}]   ;;  %s9535_s16 = inlined_call_operand.hbm [shape: bf16[2,512,128], index: 16, kind: input, shape index: {}]   ;;  %s9536_s17 = inlined_call_operand.hbm [shape: f32[2,1,128], index: 17, kind: input, shape index: {}]   ;;  %s9537_s18 = inlined_call_operand.hbm [shape: bf16[128,128], index: 18, kind: input, shape index: {}]   ;;  %s9538_s19 = inlined_call_operand.vmem [shape: f32[1,128], index: 19, kind: input, shape index: {}]   ;;  %s9539_s20 = inlined_call_operand.vmem [shape: bf16[128,256], index: 20, kind: input, shape index: {}]   ;;  %s9540_s21 = inlined_call_operand.hbm [shape: f32[1,256], index: 21, kind: input, shape index: {}]   ;;  %s9541_s22 = inlined_call_operand.vmem [shape: f32[4,8,128], index: 22, kind: output, shape index: {0}]   ;;  %s9542_s23 = inlined_call_operand.hbm [shape: f32[4,8,128], index: 23, kind: output, shape index: {1}]  }
   0x1   :  { %9579 = sst [smem:[#allocation49_spill]] %s9519_s0 }
   0x2   :  { %9580 = sst [smem:[#allocation50_spill]] %s9520_s1 }
   0x3   :  { %9581 = sst [smem:[#allocation51_spill]] %s9521_s2 }
   0x4   :  { %9582 = sst [smem:[#allocation52_spill]] %s9522_s3 }
   0x5   :  { %9583 = sst [smem:[#allocation53_spill]] %s9523_s4 }
   0x6   :  { %9584 = sst [smem:[#allocation54_spill]] %s9524_s5 }
   0x7   :  { %9585 = sst [smem:[#allocation55_spill]] %s9525_s6 }
   0x8   :  { %9586 = sst [smem:[#allocation56_spill]] %s9526_s7 }
   0x9   :  { %9587 = sst [smem:[#allocation57_spill]] %s9528_s9 }
   0xa   :  { %9588 = sst [smem:[#allocation58_spill]] %s9533_s14 }
   0xb   :  { %9589 = sst [smem:[#allocation59_spill]] %s9538_s19 }
   0xc   :  { %9590 = sst [smem:[#allocation60_spill]] %s9539_s20 }
   0xd   :  { %9591 = sst [smem:[#allocation61_spill]] %s9541_s22 }
   0xe   :  { %9592 = sst [smem:[#allocation62_spill]] %s9542_s23 }
   0xf   :  { %29 = vsyncpa [#allocation3], 0 }
  0x10   :  { %30 = vsyncpa [#allocation6], 0 }
  0x11   :  { %31 = vsyncpa [#allocation9], 0 }
  0x12   :  { %32 = vsyncpa [#allocation12], 0 }
  0x13   :  { %33 = vsyncpa [#allocation15], 0 }
  0x14   :  { %34 = vsyncpa [#allocation18], 0 }
  0x15   :  { %35 = vsyncpa [#allocation21], 0 }
  0x16   :  { %36 = vsyncpa [#allocation24], 0 }
  0x17   :  { %37 = vsyncpa [#allocation27], 0 }
  0x18   :  { %38 = vsyncpa [#allocation4], 0 }
  0x19   :  { %40 = vsyncpa [#allocation4 + $0x1], 0  ;;  %s8075_s4 = smov 0   ;;  %s8077_s30 = smov 0  }
  0x1a   :  { %s8079_s24 = smov 0   ;;  %s8081_s25 = smov 0  }
  0x1b LB: > { %9593 = sst [smem:[#allocation40_spill]] %s7907_s4  ;;  %s8096_s5 = sadd.s32 4294967295, %s7919_s25   ;;  %s7919_s25 = sphi %s8081_s25, %s9653_s25   ;;  %s7915_s24 = sphi %s8079_s24, %s9656_s24   ;;  %s7911_s30 = sphi %s8077_s30, %s9655_s30   ;;  %s7907_s4 = sphi %s8075_s4, %s9654_s4  }
  0x1c   : > { %9594 = sst [smem:[#allocation41_spill]] %s7911_s30  ;;  %s5833_s1 = sadd.s32 4294967294, %s7919_s25  }
  0x1d   : > { %9595 = sst [smem:[#allocation42_spill]] %s7915_s24  ;;  %s8100_s26 = sadd.s32 1, %s7919_s25  }
  0x1e   : > { %9596 = sst [smem:[#allocation43_spill]] %s7919_s25  ;;  %s546_s2 = sadd.s32 1, %s7915_s24 }
  0x1f   : > { %9597 = sst [smem:[#allocation44_spill]] %s8096_s5  ;;  %s543_s6 = ssub.s32 %s7919_s25, %s8100_s26 }
  0x20   : > { %9598 = sst [smem:[#allocation45_spill]] %s8100_s26  ;;  %p556_p0 = scmp.ne.s32.totalorder %s7915_s24, %s7911_s30 }
  0x21   : > { %p544_p1 = scmp.eq.s32.totalorder %s543_s6, 0  ;;  %p557_p2 = scmp.eq.s32.totalorder %s8096_s5, 1 }
  0x22   : > { %p562_p3 = scmp.ne.s32.totalorder %s7911_s30, %s7907_s4  ;;  %p563_p4 = scmp.eq.s32.totalorder %s5833_s1, 1 }
  0x23   : > { %s8111_s27 = scalar_select %p544_p1, %s7915_s24, %s546_s2  }
  0x24   : > { %p8113_p5 = por %p557_p2, %p556_p0  ;;  %p8117_p6 = por %p563_p4, %p562_p3 }
  0x25   : > { %9599 = sst [smem:[#allocation46_spill]] %s8111_s27  ;;  %p5834_p7 = scmp.ge.s32.totalorder %s7919_s25, 1 }
  0x26   : > { %s9600_s7 = scalar_select %p8113_p5, 1, 0 }
  0x27   : > { %s9602_s28 = scalar_select %p8117_p6, 1, 0 }
  0x28   : > { %9601 = sst [smem:[#allocation47_spill]] %s9600_s7  ;;  %p570_p8 = scmp.lt.s32.totalorder %s7919_s25, 3 }
  0x29   : > { %9603 = sst [smem:[#allocation48_spill]] %s9602_s28  ;;  %p9559_p9 = scmp.eq.s32.totalorder %s8096_s5, 0 }
  0x2a   : > { %p8124_p10 = pnand %p5834_p7, %p570_p8  ;;  %s7921_s3 = smov [#allocation5]  }
  0x2b   : > { %s593_s0 = sshll.u32 %s7921_s3, 4  ;;  %s7922_s2 = smov [#allocation8]   ;;  %s8130_s0 = int_to_ptr.vmem [resolvable:$true] %s593_s0 }
  0x2c   : > { %s9604_s29 = scalar_select %p8124_p10, 1, 0 }
  0x2d   : > { %p6760_p11 = pneg %p8124_p10  ;;  %s619_s6 = sshll.u32 %s7922_s2, 4  ;;  %s8138_s6 = int_to_ptr.vmem [resolvable:$true] %s619_s6 }
  0x2e   : > { %s7923_s27 = smov [#allocation11]   ;;  %s9606_s3 = sld [smem:[#allocation51_spill]] }
  0x2f   : > { %p8134_p12 = pnand %p9559_p9, %p6760_p11  ;;  %s8140_s24 = sshll.u32 %s7923_s27, 4  ;;  %s649_s24 = int_to_ptr.vmem [resolvable:$true] %s8140_s24 }
  0x31   : > { %p8150_p0 = pneg %p8134_p12 }
  0x34   : > { %s7345_s4 = scalar_lea.hbm %s9606_s3, 32 }
  0x35   : > { %p7346_p13 = scmp.ne.s32.totalorder %s9606_s3, %s7345_s4  ;;  %p7352_p3 = scmp.lt.u32.totalorder %s7345_s4, %s9606_s3 }
  0x37   : > { %p7348_p1 = pnand %p8150_p0, %p7346_p13 }
  0x39   : > { %p7349_p2 = pneg %p7348_p1 }
  0x3b   : > { %p7354_p4 = pnand %p7352_p3, %p7349_p2 }
  0x3d   : > { %7357 = shalt.err (!%p7354_p4)
}
  0x3e   : > { %s7358_s23 = scalar_lea.vmem %s8130_s0, 32  ;;  %p7366_p9 = scmp.lt.s32.totalorder %s8130_s0, %s8130_s0 }
  0x3f   : > { %p7359_p7 = scmp.ne.s32.totalorder %s8130_s0, %s7358_s23  ;;  %p7367_p6 = scmp.lt.s32.totalorder %s7358_s23, %s7358_s23 }
  0x41   : > { %p7361_p8 = pnand %p7359_p7, %p8150_p0  ;;  %p7368_p13 = por %p7367_p6, %p7366_p9 }
  0x43   : > { %p7362_p11 = pneg %p7361_p8 }
  0x45   : > { %p7369_p1 = pnand %p7368_p13, %p7362_p11 }
  0x47   : > { %7372 = shalt.err (!%p7369_p1)
}
  0x48   : > { %s9567_s25 = smov 16   ;;  %s9569_s4 = smov 1  }
  0x49   : > { %6766 = dma.hbm_to_vmem [thread:$0]  (!%p8134_p12), %s9606_s3, 32, %s8130_s0, [#allocation6], %s9567_s25, %s9567_s25, %s9569_s4  }
  0x4a   : > { %s9608_s30 = sld [smem:[#allocation53_spill]] }
  0x50   : > { %s9609_s22 = smov %s9608_s30  ;;  %s7373_s23 = scalar_lea.hbm %s9608_s30, 32 }
  0x51   : > { %p7374_p6 = scmp.ne.s32.totalorder %s9609_s22, %s7373_s23  ;;  %p7380_p3 = scmp.lt.u32.totalorder %s7373_s23, %s9609_s22 }
  0x53   : > { %p7376_p9 = pnand %p7374_p6, %p8150_p0 }
  0x55   : > { %p7377_p2 = pneg %p7376_p9 }
  0x57   : > { %p7382_p4 = pnand %p7380_p3, %p7377_p2 }
  0x59   : > { %7385 = shalt.err (!%p7382_p4)
}
  0x5a   : > { %s7386_s0 = scalar_lea.vmem %s8138_s6, 32  ;;  %p7394_p13 = scmp.lt.s32.totalorder %s8138_s6, %s8138_s6 }
  0x5b   : > { %p7387_p7 = scmp.ne.s32.totalorder %s8138_s6, %s7386_s0  ;;  %p7395_p1 = scmp.lt.s32.totalorder %s7386_s0, %s7386_s0 }
  0x5d   : > { %p7389_p8 = pnand %p7387_p7, %p8150_p0  ;;  %p7396_p6 = por %p7395_p1, %p7394_p13 }
  0x5f   : > { %p7390_p11 = pneg %p7389_p8 }
  0x61   : > { %p7397_p9 = pnand %p7396_p6, %p7390_p11 }
  0x63   : > { %7400 = shalt.err (!%p7397_p9)
}
  0x64   : > { %6772 = dma.hbm_to_vmem [thread:$0]  (!%p8134_p12), %s9609_s22, 32, %s8138_s6, [#allocation9], %s9567_s25, %s9567_s25, %s9569_s4  }
  0x65   : > { %s9610_s5 = sld [smem:[#allocation56_spill]] }
  0x6b   : > { %s7401_s26 = scalar_lea.hbm %s9610_s5, 32 }
  0x6c   : > { %p7402_p2 = scmp.ne.s32.totalorder %s9610_s5, %s7401_s26  ;;  %p7408_p7 = scmp.lt.u32.totalorder %s7401_s26, %s9610_s5 }
  0x6e   : > { %p7404_p3 = pnand %p7402_p2, %p8150_p0 }
  0x70   : > { %p7405_p4 = pneg %p7404_p3 }
  0x72   : > { %p7410_p8 = pnand %p7408_p7, %p7405_p4 }
  0x74   : > { %7413 = shalt.err (!%p7410_p8)
}
  0x75   : > { %s7414_s0 = scalar_lea.vmem %s649_s24, 32  ;;  %p7422_p6 = scmp.lt.s32.totalorder %s649_s24, %s649_s24 }
  0x76   : > { %p7415_p11 = scmp.ne.s32.totalorder %s649_s24, %s7414_s0  ;;  %p7423_p9 = scmp.lt.s32.totalorder %s7414_s0, %s7414_s0 }
  0x78   : > { %p7417_p13 = pnand %p7415_p11, %p8150_p0  ;;  %p7424_p5 = por %p7423_p9, %p7422_p6 }
  0x7a   : > { %p7418_p1 = pneg %p7417_p13 }
  0x7c   : > { %p7425_p10 = pnand %p7424_p5, %p7418_p1 }
  0x7e   : > { %7428 = shalt.err (!%p7425_p10)
}
  0x7f   : > { %6778 = dma.hbm_to_vmem [thread:$0]  (!%p8134_p12), %s9610_s5, 32, %s649_s24, [#allocation12], %s9567_s25, %s9567_s25, %s9569_s4  }
  0x80   : > { %s7926_s19 = smov [#allocation14]   ;;  %s9611_s9 = sld [smem:[#allocation57_spill]] }
  0x81   : > { %s674_s20 = sshll.u32 %s7926_s19, 4  ;;  %s675_s20 = int_to_ptr.vmem [resolvable:$true] %s674_s20 }
  0x86   : > { %s7429_s28 = scalar_lea.hbm %s9611_s9, 64 }
  0x87   : > { %p7430_p5 = scmp.ne.s32.totalorder %s9611_s9, %s7429_s28  ;;  %p7436_p3 = scmp.lt.u32.totalorder %s7429_s28, %s9611_s9 }
  0x89   : > { %p7432_p10 = pnand %p7430_p5, %p8150_p0 }
  0x8b   : > { %p7433_p2 = pneg %p7432_p10 }
  0x8d   : > { %p7438_p4 = pnand %p7436_p3, %p7433_p2 }
  0x8f   : > { %7441 = shalt.err (!%p7438_p4)
}
  0x90   : > { %s7442_s24 = scalar_lea.vmem %s675_s20, 64  ;;  %p7450_p13 = scmp.lt.s32.totalorder %s675_s20, %s675_s20 }
  0x91   : > { %p7443_p7 = scmp.ne.s32.totalorder %s675_s20, %s7442_s24  ;;  %p7451_p1 = scmp.lt.s32.totalorder %s7442_s24, %s7442_s24 }
  0x93   : > { %p7445_p8 = pnand %p7443_p7, %p8150_p0  ;;  %p7452_p6 = por %p7451_p1, %p7450_p13 }
  0x95   : > { %p7446_p11 = pneg %p7445_p8 }
  0x97   : > { %p7453_p9 = pnand %p7452_p6, %p7446_p11 }
  0x99   : > { %7456 = shalt.err (!%p7453_p9)
}
  0x9a   : > { %s7927_s6 = smov 32   ;;  %s7928_s14 = smov 2  }
  0x9b   : > { %6784 = dma.hbm_to_vmem [thread:$0]  (!%p8134_p12), %s9611_s9, 64, %s675_s20, [#allocation15], %s7927_s6, %s7927_s6, %s7928_s14  }
  0x9c   : > { %s7929_s26 = smov [#allocation17]   ;;  %s7930_s2 = smov [#allocation20]  }
  0x9d   : > { %s700_s28 = sshll.u32 %s7929_s26, 4  ;;  %s726_s27 = sshll.u32 %s7930_s2, 4  ;;  %s701_s28 = int_to_ptr.vmem [resolvable:$true] %s700_s28  ;;  %s8240_s27 = int_to_ptr.vmem [resolvable:$true] %s726_s27 }
  0x9e   : > { %s7457_s24 = scalar_lea.hbm %s9530_s11, 32 }
  0x9f   : > { %p7458_p5 = scmp.ne.s32.totalorder %s9530_s11, %s7457_s24  ;;  %p7464_p3 = scmp.lt.u32.totalorder %s7457_s24, %s9530_s11 }
  0xa1   : > { %p7460_p10 = pnand %p7458_p5, %p8150_p0 }
  0xa3   : > { %p7461_p2 = pneg %p7460_p10 }
  0xa5   : > { %p7466_p4 = pnand %p7464_p3, %p7461_p2 }
  0xa7   : > { %7469 = shalt.err (!%p7466_p4)
}
  0xa8   : > { %s7470_s6 = scalar_lea.vmem %s701_s28, 32  ;;  %p7478_p13 = scmp.lt.s32.totalorder %s701_s28, %s701_s28 }
  0xa9   : > { %p7471_p7 = scmp.ne.s32.totalorder %s701_s28, %s7470_s6  ;;  %p7479_p1 = scmp.lt.s32.totalorder %s7470_s6, %s7470_s6 }
  0xab   : > { %p7473_p8 = pnand %p7471_p7, %p8150_p0  ;;  %p7480_p6 = por %p7479_p1, %p7478_p13 }
  0xad   : > { %p7474_p11 = pneg %p7473_p8 }
  0xaf   : > { %p7481_p9 = pnand %p7480_p6, %p7474_p11 }
  0xb1   : > { %7484 = shalt.err (!%p7481_p9)
}
  0xb2   : > { %s9612_s25 = smov 1   ;;  %s9613_s4 = smov 16  }
  0xb3   : > { %6790 = dma.hbm_to_vmem [thread:$0]  (!%p8134_p12), %s9530_s11, 32, %s701_s28, [#allocation18], %s9613_s4, %s9613_s4, %s9612_s25  }
  0xb4   : > { %s7485_s23 = scalar_lea.hbm %s9532_s13, 32 }
  0xb5   : > { %p7486_p5 = scmp.ne.s32.totalorder %s9532_s13, %s7485_s23  ;;  %p7492_p3 = scmp.lt.u32.totalorder %s7485_s23, %s9532_s13 }
  0xb7   : > { %p7488_p10 = pnand %p7486_p5, %p8150_p0 }
  0xb9   : > { %p7489_p2 = pneg %p7488_p10 }
  0xbb   : > { %p7494_p4 = pnand %p7492_p3, %p7489_p2 }
  0xbd   : > { %7497 = shalt.err (!%p7494_p4)
}
  0xbe   : > { %s7498_s28 = scalar_lea.vmem %s8240_s27, 32  ;;  %p7506_p13 = scmp.lt.s32.totalorder %s8240_s27, %s8240_s27 }
  0xbf   : > { %p7499_p7 = scmp.ne.s32.totalorder %s8240_s27, %s7498_s28  ;;  %p7507_p1 = scmp.lt.s32.totalorder %s7498_s28, %s7498_s28 }
  0xc1   : > { %p7501_p8 = pnand %p7499_p7, %p8150_p0  ;;  %p7508_p6 = por %p7507_p1, %p7506_p13 }
  0xc3   : > { %p7502_p11 = pneg %p7501_p8 }
  0xc5   : > { %p7509_p9 = pnand %p7508_p6, %p7502_p11 }
  0xc7   : > { %7512 = shalt.err (!%p7509_p9)
}
  0xc8   : > { %6796 = dma.hbm_to_vmem [thread:$0]  (!%p8134_p12), %s9532_s13, 32, %s8240_s27, [#allocation21], %s9613_s4, %s9613_s4, %s9612_s25  }
  0xc9   : > { %s7931_s30 = smov [#allocation23]   ;;  %s7932_s2 = smov [#allocation26]  }
  0xca   : > { %s755_s26 = sshll.u32 %s7931_s30, 4  ;;  %s781_s23 = sshll.u32 %s7932_s2, 4  ;;  %s756_s26 = int_to_ptr.vmem [resolvable:$true] %s755_s26  ;;  %s8289_s23 = int_to_ptr.vmem [resolvable:$true] %s781_s23 }
  0xcb   : > { %s7513_s19 = scalar_lea.hbm %s9535_s16, 8192 }
  0xcc   : > { %p7514_p5 = scmp.ne.s32.totalorder %s9535_s16, %s7513_s19  ;;  %p7520_p3 = scmp.lt.u32.totalorder %s7513_s19, %s9535_s16 }
  0xce   : > { %p7516_p10 = pnand %p7514_p5, %p8150_p0 }
  0xd0   : > { %p7517_p2 = pneg %p7516_p10 }
  0xd2   : > { %p7522_p4 = pnand %p7520_p3, %p7517_p2 }
  0xd4   : > { %7525 = shalt.err (!%p7522_p4)
}
  0xd5   : > { %s7526_s14 = scalar_lea.vmem %s756_s26, 8192  ;;  %p7534_p13 = scmp.lt.s32.totalorder %s756_s26, %s756_s26 }
  0xd6   : > { %p7527_p7 = scmp.ne.s32.totalorder %s756_s26, %s7526_s14  ;;  %p7535_p1 = scmp.lt.s32.totalorder %s7526_s14, %s7526_s14 }
  0xd8   : > { %p7529_p8 = pnand %p7527_p7, %p8150_p0  ;;  %p7536_p6 = por %p7535_p1, %p7534_p13 }
  0xda   : > { %p7530_p11 = pneg %p7529_p8 }
  0xdc   : > { %p7537_p9 = pnand %p7536_p6, %p7530_p11 }
  0xde   : > { %7540 = shalt.err (!%p7537_p9)
}
  0xdf   : > { %s9573_s30 = smov 64   ;;  %s9575_s2 = smov 4  }
  0xe0   : > { %6802 = dma.hbm_to_vmem [thread:$0]  (!%p8134_p12), %s9535_s16, 8192, %s756_s26, [#allocation24], %s9573_s30, %s9573_s30, %s9575_s2  }
  0xe1   : > { %s7541_s28 = scalar_lea.hbm %s9537_s18, 1024 }
  0xe2   : > { %p7542_p5 = scmp.ne.s32.totalorder %s9537_s18, %s7541_s28  ;;  %p7548_p3 = scmp.lt.u32.totalorder %s7541_s28, %s9537_s18 }
  0xe4   : > { %p7544_p10 = pnand %p7542_p5, %p8150_p0 }
  0xe6   : > { %p7545_p2 = pneg %p7544_p10 }
  0xe8   : > { %p7550_p4 = pnand %p7548_p3, %p7545_p2 }
  0xea   : > { %7553 = shalt.err (!%p7550_p4)
}
  0xeb   : > { %s7554_s26 = scalar_lea.vmem %s8289_s23, 1024  ;;  %p7562_p13 = scmp.lt.s32.totalorder %s8289_s23, %s8289_s23 }
  0xec   : > { %p7555_p7 = scmp.ne.s32.totalorder %s8289_s23, %s7554_s26  ;;  %p7563_p1 = scmp.lt.s32.totalorder %s7554_s26, %s7554_s26 }
  0xee   : > { %p7557_p8 = pnand %p7555_p7, %p8150_p0  ;;  %p7564_p6 = por %p7563_p1, %p7562_p13 }
  0xf0   : > { %p7558_p11 = pneg %p7557_p8 }
  0xf2   : > { %p7565_p9 = pnand %p7564_p6, %p7558_p11 }
  0xf4   : > { %7568 = shalt.err (!%p7565_p9)
}
  0xf5   : > { %6808 = dma.hbm_to_vmem [thread:$0]  (!%p8134_p12), %s9537_s18, 1024, %s8289_s23, [#allocation27], %s9573_s30, %s9573_s30, %s9575_s2  }
  0xf6   : > { %s7935_s24 = smov [#allocation2]   ;;  %s7936_s20 = smov [#allocation7]  }
  0xf7   : > { %s583_s19 = sshll.u32 %s7935_s24, 4  ;;  %s606_s28 = sshll.u32 %s7936_s20, 4  ;;  %s584_s19 = int_to_ptr.vmem [resolvable:$true] %s583_s19  ;;  %s8338_s28 = int_to_ptr.vmem [resolvable:$true] %s606_s28 }
  0xf8   : > { %s9614_s14 = sld [smem:[#allocation50_spill]] }
  0xfe   : > { %s7569_s26 = scalar_lea.hbm %s9614_s14, 128 }
  0xff   : > { %p7570_p5 = scmp.ne.s32.totalorder %s9614_s14, %s7569_s26  ;;  %p7576_p3 = scmp.lt.u32.totalorder %s7569_s26, %s9614_s14 }
 0x101   : > { %p7572_p10 = pnand %p7570_p5, %p8150_p0 }
 0x103   : > { %p7573_p2 = pneg %p7572_p10 }
 0x105   : > { %p7578_p4 = pnand %p7576_p3, %p7573_p2 }
 0x107   : > { %7581 = shalt.err (!%p7578_p4)
}
 0x108   : > { %s7582_s0 = scalar_lea.vmem %s584_s19, 128  ;;  %p7590_p13 = scmp.lt.s32.totalorder %s584_s19, %s584_s19 }
 0x109   : > { %p7583_p7 = scmp.ne.s32.totalorder %s584_s19, %s7582_s0  ;;  %p7591_p1 = scmp.lt.s32.totalorder %s7582_s0, %s7582_s0 }
 0x10b   : > { %p7585_p8 = pnand %p7583_p7, %p8150_p0  ;;  %p7592_p6 = por %p7591_p1, %p7590_p13 }
 0x10d   : > { %p7586_p11 = pneg %p7585_p8 }
 0x10f   : > { %p7593_p9 = pnand %p7592_p6, %p7586_p11 }
 0x111   : > { %7596 = shalt.err (!%p7593_p9)
}
 0x112   : > { %6763 = dma.hbm_to_vmem [thread:$0]  (!%p8134_p12), %s9614_s14, 128, %s584_s19, [#allocation3]  }
 0x113   : > { %s9615_s6 = sld [smem:[#allocation52_spill]] }
 0x119   : > { %s7597_s27 = scalar_lea.hbm %s9615_s6, 32 }
 0x11a   : > { %p7598_p5 = scmp.ne.s32.totalorder %s9615_s6, %s7597_s27  ;;  %p7604_p3 = scmp.lt.u32.totalorder %s7597_s27, %s9615_s6 }
 0x11c   : > { %p7600_p10 = pnand %p7598_p5, %p8150_p0 }
 0x11e   : > { %p7601_p2 = pneg %p7600_p10 }
 0x120   : > { %p7606_p4 = pnand %p7604_p3, %p7601_p2 }
 0x122   : > { %7609 = shalt.err (!%p7606_p4)
}
 0x123   : > { %s7610_s19 = scalar_lea.vmem %s8338_s28, 32  ;;  %p7618_p13 = scmp.lt.s32.totalorder %s8338_s28, %s8338_s28 }
 0x124   : > { %p7611_p7 = scmp.ne.s32.totalorder %s8338_s28, %s7610_s19  ;;  %p7619_p1 = scmp.lt.s32.totalorder %s7610_s19, %s7610_s19 }
 0x126   : > { %p7613_p8 = pnand %p7611_p7, %p8150_p0  ;;  %p7620_p6 = por %p7619_p1, %p7618_p13 }
 0x128   : > { %p7614_p11 = pneg %p7613_p8 }
 0x12a   : > { %p7621_p9 = pnand %p7620_p6, %p7614_p11 }
 0x12c   : > { %7624 = shalt.err (!%p7621_p9)
}
 0x12d   : > { %6769 = dma.hbm_to_vmem [thread:$0]  (!%p8134_p12), %s9615_s6, 32, %s8338_s28, [#allocation6], %s9613_s4, %s9613_s4, %s9612_s25  }
 0x12e   : > { %s7937_s24 = smov [#allocation10]   ;;  %s7938_s27 = smov [#allocation13]  }
 0x12f   : > { %s632_s20 = sshll.u32 %s7937_s24, 4  ;;  %s661_s26 = sshll.u32 %s7938_s27, 4  ;;  %s633_s20 = int_to_ptr.vmem [resolvable:$true] %s632_s20  ;;  %s8384_s26 = int_to_ptr.vmem [resolvable:$true] %s661_s26 }
 0x130   : > { %s9616_s0 = sld [smem:[#allocation54_spill]] }
 0x136   : > { %s7625_s19 = scalar_lea.hbm %s9616_s0, 32 }
 0x137   : > { %p7626_p5 = scmp.ne.s32.totalorder %s9616_s0, %s7625_s19  ;;  %p7632_p3 = scmp.lt.u32.totalorder %s7625_s19, %s9616_s0 }
 0x139   : > { %p7628_p10 = pnand %p7626_p5, %p8150_p0 }
 0x13b   : > { %p7629_p2 = pneg %p7628_p10 }
 0x13d   : > { %p7634_p4 = pnand %p7632_p3, %p7629_p2 }
 0x13f   : > { %7637 = shalt.err (!%p7634_p4)
}
 0x140   : > { %s7638_s5 = scalar_lea.vmem %s633_s20, 32  ;;  %p7646_p13 = scmp.lt.s32.totalorder %s633_s20, %s633_s20 }
 0x141   : > { %p7639_p7 = scmp.ne.s32.totalorder %s633_s20, %s7638_s5  ;;  %p7647_p1 = scmp.lt.s32.totalorder %s7638_s5, %s7638_s5 }
 0x143   : > { %p7641_p8 = pnand %p7639_p7, %p8150_p0  ;;  %p7648_p6 = por %p7647_p1, %p7646_p13 }
 0x145   : > { %p7642_p11 = pneg %p7641_p8 }
 0x147   : > { %p7649_p9 = pnand %p7648_p6, %p7642_p11 }
 0x149   : > { %7652 = shalt.err (!%p7649_p9)
}
 0x14a   : > { %6775 = dma.hbm_to_vmem [thread:$0]  (!%p8134_p12), %s9616_s0, 32, %s633_s20, [#allocation9], %s9613_s4, %s9613_s4, %s9612_s25  }
 0x14b   : > { %s7653_s3 = scalar_lea.hbm %s9527_s8, 4096 }
 0x14c   : > { %p7654_p5 = scmp.ne.s32.totalorder %s9527_s8, %s7653_s3  ;;  %p7660_p3 = scmp.lt.u32.totalorder %s7653_s3, %s9527_s8 }
 0x14e   : > { %p7656_p10 = pnand %p7654_p5, %p8150_p0 }
 0x150   : > { %p7657_p2 = pneg %p7656_p10 }
 0x152   : > { %p7662_p4 = pnand %p7660_p3, %p7657_p2 }
 0x154   : > { %7665 = shalt.err (!%p7662_p4)
}
 0x155   : > { %s7666_s20 = scalar_lea.vmem %s8384_s26, 4096  ;;  %p7674_p13 = scmp.lt.s32.totalorder %s8384_s26, %s8384_s26 }
 0x156   : > { %p7667_p7 = scmp.ne.s32.totalorder %s8384_s26, %s7666_s20  ;;  %p7675_p1 = scmp.lt.s32.totalorder %s7666_s20, %s7666_s20 }
 0x158   : > { %p7669_p8 = pnand %p7667_p7, %p8150_p0  ;;  %p7676_p6 = por %p7675_p1, %p7674_p13 }
 0x15a   : > { %p7670_p11 = pneg %p7669_p8 }
 0x15c   : > { %p7677_p9 = pnand %p7676_p6, %p7670_p11 }
 0x15e   : > { %7680 = shalt.err (!%p7677_p9)
}
 0x15f   : > { %s7939_s5 = smov 128   ;;  %s7940_s30 = smov 8  }
 0x160   : > { %6781 = dma.hbm_to_vmem [thread:$0]  (!%p8134_p12), %s9527_s8, 4096, %s8384_s26, [#allocation12], %s7939_s5, %s7939_s5, %s7940_s30  }
 0x161   : > { %s7941_s27 = smov [#allocation16]   ;;  %s7942_s23 = smov [#allocation19]  }
 0x162   : > { %s687_s3 = sshll.u32 %s7941_s27, 4  ;;  %s713_s19 = sshll.u32 %s7942_s23, 4  ;;  %s688_s3 = int_to_ptr.vmem [resolvable:$true] %s687_s3  ;;  %s8430_s19 = int_to_ptr.vmem [resolvable:$true] %s713_s19 }
 0x163   : > { %s7681_s20 = scalar_lea.hbm %s9529_s10, 2048 }
 0x164   : > { %p7682_p5 = scmp.ne.s32.totalorder %s9529_s10, %s7681_s20  ;;  %p7688_p3 = scmp.lt.u32.totalorder %s7681_s20, %s9529_s10 }
 0x166   : > { %p7684_p10 = pnand %p7682_p5, %p8150_p0 }
 0x168   : > { %p7685_p2 = pneg %p7684_p10 }
 0x16a   : > { %p7690_p4 = pnand %p7688_p3, %p7685_p2 }
 0x16c   : > { %7693 = shalt.err (!%p7690_p4)
}
 0x16d   : > { %s7694_s5 = scalar_lea.vmem %s688_s3, 2048  ;;  %p7702_p13 = scmp.lt.s32.totalorder %s688_s3, %s688_s3 }
 0x16e   : > { %p7695_p7 = scmp.ne.s32.totalorder %s688_s3, %s7694_s5  ;;  %p7703_p1 = scmp.lt.s32.totalorder %s7694_s5, %s7694_s5 }
 0x170   : > { %p7697_p8 = pnand %p7695_p7, %p8150_p0  ;;  %p7704_p6 = por %p7703_p1, %p7702_p13 }
 0x172   : > { %p7698_p11 = pneg %p7697_p8 }
 0x174   : > { %p7705_p9 = pnand %p7704_p6, %p7698_p11 }
 0x176   : > { %7708 = shalt.err (!%p7705_p9)
}
 0x177   : > { %s9617_s6 = smov 4   ;;  %s9618_s0 = smov 64  }
 0x178   : > { %6787 = dma.hbm_to_vmem [thread:$0]  (!%p8134_p12), %s9529_s10, 2048, %s688_s3, [#allocation15], %s9618_s0, %s9618_s0, %s9617_s6  }
 0x179   : > { %s7709_s9 = scalar_lea.hbm %s9531_s12, 32 }
 0x17a   : > { %p7710_p5 = scmp.ne.s32.totalorder %s9531_s12, %s7709_s9  ;;  %p7716_p3 = scmp.lt.u32.totalorder %s7709_s9, %s9531_s12 }
 0x17c   : > { %p7712_p10 = pnand %p7710_p5, %p8150_p0 }
 0x17e   : > { %p7713_p2 = pneg %p7712_p10 }
 0x180   : > { %p7718_p4 = pnand %p7716_p3, %p7713_p2 }
 0x182   : > { %7721 = shalt.err (!%p7718_p4)
}
 0x183   : > { %s7722_s3 = scalar_lea.vmem %s8430_s19, 32  ;;  %p7730_p13 = scmp.lt.s32.totalorder %s8430_s19, %s8430_s19 }
 0x184   : > { %p7723_p7 = scmp.ne.s32.totalorder %s8430_s19, %s7722_s3  ;;  %p7731_p1 = scmp.lt.s32.totalorder %s7722_s3, %s7722_s3 }
 0x186   : > { %p7725_p8 = pnand %p7723_p7, %p8150_p0  ;;  %p7732_p6 = por %p7731_p1, %p7730_p13 }
 0x188   : > { %p7726_p11 = pneg %p7725_p8 }
 0x18a   : > { %p7733_p9 = pnand %p7732_p6, %p7726_p11 }
 0x18c   : > { %7736 = shalt.err (!%p7733_p9)
}
 0x18d   : > { %6793 = dma.hbm_to_vmem [thread:$0]  (!%p8134_p12), %s9531_s12, 32, %s8430_s19, [#allocation18], %s9613_s4, %s9613_s4, %s9612_s25  }
 0x18e   : > { %s7943_s24 = smov [#allocation22]   ;;  %s7944_s23 = smov [#allocation25]  }
 0x18f   : > { %s742_s27 = sshll.u32 %s7943_s24, 4  ;;  %s768_s9 = sshll.u32 %s7944_s23, 4  ;;  %s743_s27 = int_to_ptr.vmem [resolvable:$true] %s742_s27  ;;  %s8479_s9 = int_to_ptr.vmem [resolvable:$true] %s768_s9 }
 0x190   : > { %s7737_s2 = scalar_lea.hbm %s9534_s15, 128 }
 0x191   : > { %p7738_p5 = scmp.ne.s32.totalorder %s9534_s15, %s7737_s2  ;;  %p7744_p3 = scmp.lt.u32.totalorder %s7737_s2, %s9534_s15 }
 0x193   : > { %p7740_p10 = pnand %p7738_p5, %p8150_p0 }
 0x195   : > { %p7741_p2 = pneg %p7740_p10 }
 0x197   : > { %p7746_p4 = pnand %p7744_p3, %p7741_p2 }
 0x199   : > { %7749 = shalt.err (!%p7746_p4)
}
 0x19a   : > { %s7750_s30 = scalar_lea.vmem %s743_s27, 128  ;;  %p7758_p13 = scmp.lt.s32.totalorder %s743_s27, %s743_s27 }
 0x19b   : > { %p7751_p7 = scmp.ne.s32.totalorder %s743_s27, %s7750_s30  ;;  %p7759_p1 = scmp.lt.s32.totalorder %s7750_s30, %s7750_s30 }
 0x19d   : > { %p7753_p8 = pnand %p7751_p7, %p8150_p0  ;;  %p7760_p6 = por %p7759_p1, %p7758_p13 }
 0x19f   : > { %p7754_p11 = pneg %p7753_p8 }
 0x1a1   : > { %p7761_p9 = pnand %p7760_p6, %p7754_p11 }
 0x1a3   : > { %7764 = shalt.err (!%p7761_p9)
}
 0x1a4   : > { %6799 = dma.hbm_to_vmem [thread:$0]  (!%p8134_p12), %s9534_s15, 128, %s743_s27, [#allocation21], %s9618_s0, %s9618_s0, %s9617_s6  }
 0x1a5   : > { %s7765_s2 = scalar_lea.hbm %s9536_s17, 32 }
 0x1a6   : > { %p7766_p5 = scmp.ne.s32.totalorder %s9536_s17, %s7765_s2  ;;  %p7772_p3 = scmp.lt.u32.totalorder %s7765_s2, %s9536_s17 }
 0x1a8   : > { %p7768_p10 = pnand %p7766_p5, %p8150_p0 }
 0x1aa   : > { %p7769_p2 = pneg %p7768_p10 }
 0x1ac   : > { %p7774_p4 = pnand %p7772_p3, %p7769_p2 }
 0x1ae   : > { %7777 = shalt.err (!%p7774_p4)
}
 0x1af   : > { %s7778_s6 = scalar_lea.vmem %s8479_s9, 32  ;;  %p7786_p13 = scmp.lt.s32.totalorder %s8479_s9, %s8479_s9 }
 0x1b0   : > { %p7779_p7 = scmp.ne.s32.totalorder %s8479_s9, %s7778_s6  ;;  %p7787_p1 = scmp.lt.s32.totalorder %s7778_s6, %s7778_s6 }
 0x1b2   : > { %p7781_p8 = pnand %p7779_p7, %p8150_p0  ;;  %p7788_p6 = por %p7787_p1, %p7786_p13 }
 0x1b4   : > { %p7782_p11 = pneg %p7781_p8 }
 0x1b6   : > { %p7789_p9 = pnand %p7788_p6, %p7782_p11 }
 0x1b8   : > { %7792 = shalt.err (!%p7789_p9)
}
 0x1b9   : > { %6805 = dma.hbm_to_vmem [thread:$0]  (!%p8134_p12), %s9536_s17, 32, %s8479_s9, [#allocation24], %s9613_s4, %s9613_s4, %s9612_s25  }
 0x1ba   : > { %s7945_s30 = smov [#allocation28]   ;;  %s7793_s20 = scalar_lea.hbm %s9540_s21, 32 }
 0x1bb   : > { %s801_s24 = sshll.u32 %s7945_s30, 4  ;;  %p7794_p5 = scmp.ne.s32.totalorder %s9540_s21, %s7793_s20  ;;  %s802_s24 = int_to_ptr.vmem [resolvable:$true] %s801_s24 }
 0x1bc   : > { %p7800_p3 = scmp.lt.u32.totalorder %s7793_s20, %s9540_s21 }
 0x1bd   : > { %p7796_p10 = pnand %p7794_p5, %p8150_p0 }
 0x1bf   : > { %p7797_p2 = pneg %p7796_p10 }
 0x1c1   : > { %p7802_p4 = pnand %p7800_p3, %p7797_p2 }
 0x1c3   : > { %7805 = shalt.err (!%p7802_p4)
}
 0x1c4   : > { %s7806_s25 = scalar_lea.vmem %s802_s24, 32  ;;  %p7814_p13 = scmp.lt.s32.totalorder %s802_s24, %s802_s24 }
 0x1c5   : > { %p7807_p7 = scmp.ne.s32.totalorder %s802_s24, %s7806_s25  ;;  %p7815_p1 = scmp.lt.s32.totalorder %s7806_s25, %s7806_s25 }
 0x1c7   : > { %p7809_p8 = pnand %p7807_p7, %p8150_p0  ;;  %p7816_p6 = por %p7815_p1, %p7814_p13 }
 0x1c9   : > { %p7810_p11 = pneg %p7809_p8 }
 0x1cb   : > { %p7817_p9 = pnand %p7816_p6, %p7810_p11 }
 0x1cd   : > { %7820 = shalt.err (!%p7817_p9)
}
 0x1ce   : > { %6811 = dma.hbm_to_vmem [thread:$0]  (!%p8134_p12), %s9540_s21, 32, %s802_s24, [#allocation27]  }
 0x1cf   : > { %p9619_p5 = scmp.ne.s32.totalorder %s9604_s29, 0 }
 0x1d0   : > { %s9620_s19 = sld [smem:[#allocation44_spill]] (!%p9619_p5) }
 0x1d1   : > { %824 = sbr.rel (%p9619_p5) target bundleno = 7597 (0x1dad), region = 108 }
 0x1d6   : > { %p9621_p10 = scmp.eq.s32.totalorder (!%p9619_p5), %s9620_s19, 0 }
 0x1d8   : > { %7866 = dma.done.wait (%p9621_p10), [#allocation3], 128   ;;  %p9622_p0 = pmov %p9621_p10 }
 0x1da   : > { %7868 = vsyncadd (%p9622_p0), [#allocation3], 4294967168  ;;  %p9623_p2 = pmov %p9622_p0 }
 0x1db   : > { %p9624_p3 = pmov %p9622_p0 }
 0x1dc   : > { %7870 = dma.done.wait (%p9623_p2), [#allocation6], 64  }
 0x1dd   : > { %7872 = vsyncadd (%p9624_p3), [#allocation6], 4294967232  ;;  %p9625_p4 = pmov %p9622_p0 }
 0x1de   : > { %p9626_p12 = pmov %p9622_p0 }
 0x1df   : > { %7874 = dma.done.wait (%p9625_p4), [#allocation9], 64  }
 0x1e0   : > { %7876 = vsyncadd (%p9626_p12), [#allocation9], 4294967232  ;;  %p9627_p7 = pmov %p9622_p0 }
 0x1e1   : > { %p9628_p8 = pmov %p9622_p0 }
 0x1e2   : > { %7878 = dma.done.wait (%p9627_p7), [#allocation12], 4128  }
 0x1e3   : > { %7880 = vsyncadd (%p9628_p8), [#allocation12], 4294963168  ;;  %p9629_p11 = pmov %p9622_p0 }
 0x1e4   : > { %p9630_p13 = pmov %p9622_p0 }
 0x1e5   : > { %7882 = dma.done.wait (%p9629_p11), [#allocation15], 2112  }
 0x1e6   : > { %7884 = vsyncadd (%p9630_p13), [#allocation15], 4294965184  ;;  %p9631_p1 = pmov %p9622_p0 }
 0x1e7   : > { %p9632_p6 = pmov %p9622_p0 }
 0x1e8   : > { %7886 = dma.done.wait (%p9631_p1), [#allocation18], 64  }
 0x1e9   : > { %7888 = vsyncadd (%p9632_p6), [#allocation18], 4294967232  ;;  %p9633_p9 = pmov %p9622_p0 }
 0x1ea   : > { %p9634_p5 = pmov %p9622_p0 }
 0x1eb   : > { %7890 = dma.done.wait (%p9633_p9), [#allocation21], 160  }
 0x1ec   : > { %7892 = vsyncadd (%p9634_p5), [#allocation21], 4294967136  ;;  %p9635_p10 = pmov %p9622_p0 }
 0x1ee   : > { %7894 = dma.done.wait (%p9635_p10), [#allocation24], 8224  }
 0x1ef   : > { %7896 = vsyncadd (%p9622_p0), [#allocation24], 4294959072  ;;  %p9636_p2 = pmov %p9622_p0 }
 0x1f0   : > { %p9637_p3 = pmov %p9622_p0 }
 0x1f1   : > { %7898 = dma.done.wait (%p9636_p2), [#allocation27], 1056  }
 0x1f2   : > { %7900 = vsyncadd (%p9637_p3), [#allocation27], 4294966240  ;;  %s5872_s7 = sshll.u32 %s9620_s19, 1  ;;  %s9638_s0 = sld [smem:[#allocation49_spill]]  ;;  %v977_v1 = vld [vmem:[#allocation2] sm:$0xff]  ;;  %v7946_v6 = vmov 0.0  }
 0x1f3   : > { %p959_p4 = scmp.lt.s32.totalorder %s5872_s7, 3  ;;  %980 = vadd.xlane.f32.xlu1 %v977_v1  ;;  %v6946_v3 = vld [vmem:[#allocation13 + $0x4] ss:$8 sps:$4 sm:$0xff]   ;;  %s9639_s23 = sld [smem:[#allocation55_spill]]  ;;  %v6949_v5 = vld [vmem:[#allocation13] ss:$8 sps:$4 sm:$0xff]   ;;  %6398 = vmatprep.subr.bf16.mxu0 %v7946_v6 }
 0x1f4   : > { %v6950_v7 = vld [vmem:[#allocation13 + $0x14] ss:$8 sps:$4 sm:$0xff]   ;;  %1295 = vmatprep.subr.bf16.mxu1 %v6946_v3  ;;  %v6953_v23 = vld [vmem:[#allocation13 + $0x10] ss:$8 sps:$4 sm:$0xff]   ;;  %v6954_v24 = vld [vmem:[#allocation13 + $0x24] ss:$8 sps:$4 sm:$0xff]  }
 0x1f5   : > { %s9658_s7 = smov (!%p959_p4, %s5872_s7), 3  ;;  %1296 = vmatpush1.bf16.msra.mxu1 %v6949_v5  ;;  %v6957_v26 = vld [vmem:[#allocation13 + $0x20] ss:$8 sps:$4 sm:$0xff]   ;;  %v6958_v27 = vld [vmem:[#allocation13 + $0x34] ss:$8 sps:$4 sm:$0xff]   ;;  %vm7947_vm0 = vmmov 0  }
 0x1f6   : > { %s6199_s29 = sshll.u32 %s9658_s7, 4  ;;  %1297 = vmatprep.subr.bf16.mxu1 %v6950_v7  ;;  %v6961_v29 = vld [vmem:[#allocation13 + $0x30] ss:$8 sps:$4 sm:$0xff]   ;;  %v6962_v30 = vld [vmem:[#allocation13 + $0x44] ss:$8 sps:$4 sm:$0xff]   ;;  %6414 = vmatprep.mubr.msk.bf16.mxu0 %vm7947_vm0, %v7946_v6  ;;  %v7948_v37 = vmov 0  }
 0x1f7   : > { %v6965_v32 = vld [vmem:[#allocation13 + $0x40] ss:$8 sps:$4 sm:$0xff]   ;;  %v6966_v33 = vld [vmem:[#allocation13 + $0x54] ss:$8 sps:$4 sm:$0xff]   ;;  %v6969_v35 = vld [vmem:[#allocation13 + $0x50] ss:$8 sps:$4 sm:$0xff]   ;;  %1327 = vmatprep.mubr.bf16.mxu1 %v7948_v37 }
 0x1f8   : > { %s8591_s27 = scalar_lea.vmem %s9638_s0, %s6199_s29  ;;  %v6970_v36 = vld [vmem:[#allocation13 + $0x64] ss:$8 sps:$4 sm:$0xff]   ;;  %v6973_v39 = vld [vmem:[#allocation13 + $0x60] ss:$8 sps:$4 sm:$0xff]   ;;  %v6974_v40 = vld [vmem:[#allocation13 + $0x74] ss:$8 sps:$4 sm:$0xff]  }
 0x1f9   : > { %v973_v0 = vld [vmem:[%s8591_s27] sm:$0xff]  ;;  %v974_v2 = vld [vmem:[%s8591_s27 + $0x8] sm:$0xff]  ;;  %v8613_v20 = vld [vmem:[%s8591_s27 + $0x18] sm:$0xff]  ;;  %1298 = vmatpush1.bf16.msra.mxu1 %v6953_v23  ;;  %vm1350_vm1 = vcmask 261120   ;;  %vm1398_vm2 = vcmask 130048   ;;  %s7949_s30 = smov 96  }
 0x1fa   : > { %1008 = vadd.xlane.f32.xlu0 %v973_v0  ;;  %v6948_v4 = vld [vmem:[%s9639_s23] sm:$0xff]   ;;  %v8616_v21 = vld [vmem:[%s8591_s27 + $0x10] sm:$0xff]  ;;  %v6952_v22 = vld [vmem:[%s9639_s23 + $0x8] sm:$0xff]   ;;  %1299 = vmatprep.subr.bf16.mxu1 %v6954_v24  ;;  %s7950_s24 = smov 32   ;;  %s7951_s28 = smov 64   ;;  %vm1798_vm3 = vcmask 523264  }
 0x1fb   : > { %6399 = vmatpush3.bf16.msra.mxu0 %v6948_v4  ;;  %v6956_v25 = vld [vmem:[%s9639_s23 + $0x10] sm:$0xff]   ;;  %v6960_v28 = vld [vmem:[%s9639_s23 + $0x18] sm:$0xff]   ;;  %v6964_v31 = vld [vmem:[%s9639_s23 + $0x20] sm:$0xff]   ;;  %vm1800_vm4 = vcmask 785408   ;;  %s9640_s26 = sld [smem:[#allocation58_spill]]  ;;  %s9641_s27 = sld [smem:[#allocation60_spill]] }
 0x1fc   : > { %6400 = vmatprep.subr.bf16.mxu0 %v7946_v6  ;;  %v6968_v34 = vld [vmem:[%s9639_s23 + $0x28] sm:$0xff]   ;;  %v6972_v38 = vld [vmem:[%s9639_s23 + $0x30] sm:$0xff]   ;;  %v6976_v41 = vld [vmem:[%s9639_s23 + $0x38] sm:$0xff]   ;;  %s9642_s25 = sld [smem:[#allocation59_spill]]  ;;  %s5876_s4 = sshll.u32 %s9658_s7, 3 }
 0x1fd   : > { %1300 = vmatpush1.bf16.msra.mxu1 %v6957_v26  ;;  %v6977_v42 = vld [vmem:[#allocation13 + $0x70] ss:$8 sps:$4 sm:$0xff]   ;;  %s9645_s6 = sld [smem:[#allocation47_spill]]  ;;  %s6200_s0 = sshll.u32 %s9620_s19, 8 }
 0x1fe   : > { %1010 = vadd.xlane.f32.xlu0 %v974_v2  ;;  %1301 = vmatprep.subr.bf16.mxu1 %v6958_v27  ;;  %v5879_v62 = vld [vmem:[#allocation8] ss:$0 sm:$0xff]  ;;  %v6000_v63 = vld [vmem:[#allocation8 + $0x1] ss:$0 sm:$0xff]  ;;  %v5878_v4 = vld [vmem:[#allocation7] ss:$0 sm:$0xff] }
 0x1ff   : > { %6401 = vmatpush3.bf16.msra.mxu0 %v6952_v22 }
 0x200   : > { %6402 = vmatprep.subr.bf16.mxu0 %v7946_v6 }
 0x201   : > { %1302 = vmatpush1.bf16.msra.mxu1 %v6961_v29 }
 0x202   : > { %1303 = vmatprep.subr.bf16.mxu1 %v6962_v30 }
 0x203   : > { %6403 = vmatpush3.bf16.msra.mxu0 %v6956_v25  ;;  %p9648_p7 = scmp.ne.s32.totalorder %s9645_s6, 0 }
 0x204   : > { %6404 = vmatprep.subr.bf16.mxu0 %v7946_v6 }
 0x205   : > { %1304 = vmatpush1.bf16.msra.mxu1 %v6965_v32 }
 0x206   : > { %1305 = vmatprep.subr.bf16.mxu1 %v6966_v33 }
 0x207   : > { %6405 = vmatpush3.bf16.msra.mxu0 %v6960_v28 }
 0x208   : > { %6406 = vmatprep.subr.bf16.mxu0 %v7946_v6 }
 0x209   : > { %1306 = vmatpush1.bf16.msra.mxu1 %v6969_v35 }
 0x20a   : > { %1307 = vmatprep.subr.bf16.mxu1 %v6970_v36 }
 0x20b   : > { %6407 = vmatpush3.bf16.msra.mxu0 %v6964_v31 }
 0x20c   : > { %6408 = vmatprep.subr.bf16.mxu0 %v7946_v6 }
 0x20d   : > { %1308 = vmatpush1.bf16.msra.mxu1 %v6973_v39 }
 0x20e   : > { %1309 = vmatprep.subr.bf16.mxu1 %v6974_v40 }
 0x20f   : > { %6409 = vmatpush3.bf16.msra.mxu0 %v6968_v34 }
 0x210   : > { %6410 = vmatprep.subr.bf16.mxu0 %v7946_v6 }
 0x211   : > { %1310 = vmatpush1.bf16.msra.mxu1 %v6977_v42 }
 0x212   : > { %6418 = vmatprep.subr.bf16.mxu1 %v7946_v6 }
 0x213   : > { %6411 = vmatpush3.bf16.msra.mxu0 %v6972_v38 }
 0x214   : > { %6412 = vmatprep.subr.bf16.mxu0 %v7946_v6 }
 0x217   : > { %6413 = vmatpush3.bf16.msra.mxu0 %v6976_v41 }
 0x218   : > { %6436 = vmatprep.subr.bf16.mxu0 %v7946_v6 }
 0x280   : > { %v981_v9 = vpop.xlane.xlu1 %980 }
 0x281   : > { %v983_v11 = vmul.f32 0.0078125, %v981_v9 }
 0x283   : > { %v8602_v13 = vsub.f32 %v977_v1, %v983_v11  ;;  %v5877_v1 = vld [vmem:[#allocation5] ss:$0 sm:$0xff]  ;;  %v6001_v11 = vld [vmem:[#allocation10 + $0x1] ss:$0 sm:$0xff] }
 0x285   : > { %v985_v18 = vmul.f32 %v8602_v13, %v8602_v13 }
 0x287   : > { %v1009_v8 = vpop.xlane.xlu0 %1008 }
 0x288   : > { %v1016_v10 = vmul.f32 0.0078125, %v1009_v8 }
 0x28a   : > { %v8600_v12 = vsub.f32 %v973_v0, %v1016_v10  ;;  %v5880_v10 = vld [vmem:[#allocation10] ss:$0 sm:$0xff] }
 0x28b   : > { %v1011_v14 = vpop.xlane.xlu0 %1010 }
 0x28c   : > { %v1017_v15 = vmul.f32 0.0078125, %v1011_v14  ;;  %v1024_v16 = vmul.f32 %v8600_v12, %v8600_v12 }
 0x28e   : > { %v8606_v17 = vsub.f32 %v974_v2, %v1017_v15  ;;  %1028 = vadd.xlane.f32.xlu1 %v1024_v16 }
 0x290   : > { %v1025_v19 = vmul.f32 %v8606_v17, %v8606_v17 }
 0x292   : > { %986 = vadd.xlane.f32.xlu1 %v985_v18  ;;  %1030 = vadd.xlane.f32.xlu0 %v1025_v19 }
 0x296   : > { %1014 = vadd.xlane.f32.xlu1 %v8613_v20  ;;  %1012 = vadd.xlane.f32.xlu0 %v8616_v21 }
 0x31b   : > { %v1029_v43 = vpop.xlane.xlu1 %1028 }
 0x31c   : > { %v1036_v44 = vmul.f32 0.0078125, %v1029_v43  ;;  %v1205_v43 = vlaneseq }
 0x31e   : > { %v1040_v45 = vadd.f32 1e-05, %v1036_v44  ;;  %v8674_v44 = vshrl.u32 %v1205_v43, 7 }
 0x31f   : > { %v987_v46 = vpop.xlane.xlu1 %986  ;;  %v1031_v47 = vpop.xlane.xlu0 %1030 }
 0x320   : > { %7218 = vrsqrt.f32 %v1040_v45  ;;  %v988_v48 = vmul.f32 0.0078125, %v987_v46  ;;  %v1037_v49 = vmul.f32 0.0078125, %v1031_v47  ;;  %v8677_v45 = vsub.s32 0, %v8674_v44  ;;  %v1203_v46 = vld [vmem:[#allocation14] sm:$0x3] }
 0x321   : > { %v8680_v47 = vsub.s32 1, %v8674_v44 }
 0x322   : > { %v989_v50 = vadd.f32 1e-05, %v988_v48  ;;  %v1041_v51 = vadd.f32 1e-05, %v1037_v49  ;;  %v1208_v49 = vrot.slane %v1203_v46, %v8677_v45 }
 0x323   : > { %v1015_v52 = vpop.xlane.xlu1 %1014  ;;  %v1013_v53 = vpop.xlane.xlu0 %1012 }
 0x324   : > { %7220 = vrsqrt.f32 %v989_v50  ;;  %v1019_v54 = vmul.f32 0.0078125, %v1015_v52  ;;  %v1018_v55 = vmul.f32 0.0078125, %v1013_v53  ;;  %v1212_v52 = vrot.slane %v1203_v46, %v8680_v47  ;;  %v5881_v53 = vld [vmem:[#allocation11] ss:$0 sm:$0xff] }
 0x325   : > { %7222 = vrsqrt.f32 %v1041_v51 }
 0x326   : > { %v1023_v56 = vsub.f32 %v8613_v20, %v1019_v54  ;;  %v1022_v57 = vsub.f32 %v8616_v21, %v1018_v55 }
 0x328   : > { %v1027_v58 = vmul.f32 %v1023_v56, %v1023_v56  ;;  %v1026_v59 = vmul.f32 %v1022_v57, %v1022_v57 }
 0x32a   : > { %v7219_v60 = vpop.eup %7218  ;;  %1034 = vadd.xlane.f32.xlu1 %v1027_v58  ;;  %1032 = vadd.xlane.f32.xlu0 %v1026_v59 }
 0x32b   : > { %v1048_v61 = vmul.f32 %v7219_v60, %v8600_v12 }
 0x32d   : > { %v1058_v7 = vmul.f32 %v5879_v62, %v1048_v61  ;;  %v3187_v8 = vmul.f32 %v6000_v63, %v1048_v61 }
 0x32e   : > { %v7221_v0 = vpop.eup %7220 }
 0x32f   : > { %v7223_v2 = vpop.eup %7222  ;;  %v991_v3 = vmul.f32 %v7221_v0, %v8602_v13  ;;  %v1068_v18 = vadd.f32 %v5880_v10, %v1058_v7  ;;  %v8657_v19 = vadd.f32 %v6001_v11, %v3187_v8 }
 0x330   : > { %v1049_v5 = vmul.f32 %v7223_v2, %v8606_v17 }
 0x331   : > { %v998_v9 = vmul.f32 %v5877_v1, %v991_v3 }
 0x332   : > { %v1059_v14 = vmul.f32 %v5879_v62, %v1049_v5  ;;  %v3188_v15 = vmul.f32 %v6000_v63, %v1049_v5 }
 0x333   : > { %v1005_v16 = vadd.f32 %v5878_v4, %v998_v9 }
 0x334   : > { %v1069_v12 = vadd.f32 %v5880_v10, %v1059_v14  ;;  %v8659_v20 = vadd.f32 %v6001_v11, %v3188_v15 }
 0x335   : > { %v1072_v21 = vpack.c.bf16 %v1005_v16, %v1005_v16 }
 0x336   : > { %v1185_v22 = vpack.c.bf16 %v1069_v12, %v1068_v18  ;;  %v3316_v13 = vpack.c.bf16 %v8659_v20, %v8657_v19 }
 0x337   : > { %6415 = vmatmul.mubr.bf16.vlgmr.msra.gmra.mrb[0].mxu0 %v1072_v21 }
 0x338   : > { %1328 = vmatmul.mubr.bf16.vlgmr.msra.gmra.mrb[0].mxu1 %v1185_v22  ;;  %6438 = vmatprep.mubr.msk.bf16.mxu0 %vm7947_vm0, %v7946_v6 }
 0x339   : > { %1337 = vmatprep.mubr.bf16.mxu1 %v7948_v37 }
 0x3b7   : > { %v1035_v17 = vpop.xlane.xlu1 %1034  ;;  %v1033_v23 = vpop.xlane.xlu0 %1032 }
 0x3b8   : > { %v1039_v24 = vmul.f32 0.0078125, %v1035_v17  ;;  %v1038_v25 = vmul.f32 0.0078125, %v1033_v23 }
 0x3ba   : > { %v1043_v26 = vadd.f32 1e-05, %v1039_v24  ;;  %v1042_v27 = vadd.f32 1e-05, %v1038_v25 }
 0x3bc   : > { %7224 = vrsqrt.f32 %v1043_v26 }
 0x3bd   : > { %7226 = vrsqrt.f32 %v1042_v27 }
 0x3c6   : > { %v7225_v28 = vpop.eup %7224 }
 0x3c7   : > { %v7227_v29 = vpop.eup %7226  ;;  %v1051_v30 = vmul.f32 %v7225_v28, %v1023_v56 }
 0x3c8   : > { %v1050_v31 = vmul.f32 %v7227_v29, %v1022_v57 }
 0x3c9   : > { %v1061_v32 = vmul.f32 %v5879_v62, %v1051_v30  ;;  %v3190_v33 = vmul.f32 %v6000_v63, %v1051_v30 }
 0x3ca   : > { %v1060_v34 = vmul.f32 %v5879_v62, %v1050_v31  ;;  %v3189_v35 = vmul.f32 %v6000_v63, %v1050_v31 }
 0x3cb   : > { %v1071_v36 = vadd.f32 %v5880_v10, %v1061_v32  ;;  %v8666_v38 = vadd.f32 %v6001_v11, %v3190_v33 }
 0x3cc   : > { %v1070_v39 = vadd.f32 %v5880_v10, %v1060_v34  ;;  %v8668_v40 = vadd.f32 %v6001_v11, %v3189_v35 }
 0x3ce   : > { %v1186_v41 = vpack.c.bf16 %v1071_v36, %v1070_v39  ;;  %v3317_v42 = vpack.c.bf16 %v8666_v38, %v8668_v40 }
 0x3d0   : > { %1338 = vmatmul.mubr.bf16.gmra.mrb[4].mxu1 %v1186_v41 }
 0x3d1   : > { %6420 = vmatprep.mubr.msk.bf16.mxu1 %vm7947_vm0, %v7946_v6 }
 0x40a   : > { %v1178_v48 = vpop.f32.mrb[0].mxu0 }
 0x40b   : > { %v1329_v50 = vpop.f32.mrb[0].mxu1  ;;  %v6416_v51 = vpop.f32.mrb[1].mxu0  ;;  %v1179_v3 = vadd.f32 %v5881_v53, %v1178_v48 }
 0x40c   : > { %v1331_v54 = vpop.f32.mrb[1].mxu1  ;;  %v1181_v55 = vpop.f32.mrb[2].mxu0  ;;  %v1330_v59 = vadd.f32 %v1329_v50, %v1208_v49 }
 0x40d   : > { %v1182_v56 = vadd.f32 %v5881_v53, %v1181_v55  ;;  %v1333_v57 = vpop.f32.mrb[2].mxu1  ;;  %v6417_v58 = vpop.f32.mrb[3].mxu0  ;;  %v1332_v62 = vadd.f32 %v1331_v54, %v1212_v52  ;;  %v1348_v4 = vpack.c.bf16 %v1179_v3, %v1179_v3 }
 0x40e   : > { %v1334_v60 = vadd.f32 %v1333_v57, %v1208_v49  ;;  %v1335_v61 = vpop.f32.mrb[3].mxu1 }
 0x40f   : > { %v1336_v63 = vadd.f32 %v1335_v61, %v1212_v52  ;;  %v1802_v30 = vpack.c.bf16 %v1182_v56, %v1182_v56 }
 0x410   : > { %v1349_v0 = vpack.c.bf16 %v1334_v60, %v1330_v59 }
 0x411   : > { %v8684_v1 = vpack.c.bf16 %v1336_v63, %v1332_v62 }
 0x412   : > { %v1355_v2 = vsel %vm1350_vm1, %v1349_v0, 0 }
 0x413   : > { %6419 = vmatpush3.bf16.xpose.msra.mxu1 %v1355_v2 }
 0x414   : > { %6424 = vmatprep.subr.bf16.mxu1 %v7946_v6 }
 0x41a   : > { %6421 = vmatmul.mubr.msk.bf16.vlgmr.msra.gmra.mrb[8].mxu1 %vm1350_vm1, %v1348_v4 }
 0x41b   : > { %6425 = vmatpush3.bf16.msra.mxu1 %v8684_v1  ;;  %6426 = vmatprep.mubr.msk.bf16.mxu1 %vm7947_vm0, %v7946_v6 }
 0x41c   : > { %6430 = vmatprep.subr.bf16.mxu1 %v7946_v6 }
 0x4a3   : > { %v1339_v5 = vpop.f32.mrb[4].mxu1 }
 0x4a4   : > { %v1341_v7 = vpop.f32.mrb[5].mxu1  ;;  %v1340_v9 = vadd.f32 %v1339_v5, %v1208_v49 }
 0x4a5   : > { %v1343_v8 = vpop.f32.mrb[6].mxu1  ;;  %v1342_v14 = vadd.f32 %v1341_v7, %v1212_v52 }
 0x4a6   : > { %v1344_v10 = vadd.f32 %v1343_v8, %v1208_v49  ;;  %v1345_v11 = vpop.f32.mrb[7].mxu1 }
 0x4a7   : > { %v1346_v15 = vadd.f32 %v1345_v11, %v1212_v52 }
 0x4a8   : > { %v1803_v16 = vpack.c.bf16 %v1344_v10, %v1340_v9 }
 0x4a9   : > { %v8693_v18 = vpack.c.bf16 %v1346_v15, %v1342_v14 }
 0x4aa   : > { %v1808_v51 = vsel %vm1350_vm1, %v1803_v16, 0 }
 0x4ed   : > { %v1391_v12 = vpop.f32.mrb[8].mxu1 }
 0x4ee   : > { %v1397_v21 = vmul.f32 0.17677669, %v1391_v12  ;;  %v6422_v22 = vpop.f32.mrb[9].mxu1 }
 0x4ef   : > { %v1394_v17 = vpop.f32.mrb[10].mxu1 }
 0x4f0   : > { %v6423_v23 = vpop.f32.mrb[11].mxu1  ;;  %v1399_v24 = vsel %vm1398_vm2, %v1397_v21, -inf }
 0x4f1   : > { %1400 = vmax.xlane.f32.xlu0 %v1399_v24 }
 0x507   : > { %1459 = vrot.lane.b32.xlu0 %v1349_v0, %s7949_s30 }
 0x50b   : > { %1678 = vrot.lane.b32.xlu0 %v1349_v0, %s7950_s24 }
 0x50f   : > { %1911 = vrot.lane.b32.xlu0 %v1803_v16, %s7949_s30 }
 0x513   : > { %2021 = vrot.lane.b32.xlu0 %v1803_v16, %s7951_s28 }
 0x517   : > { %2130 = vrot.lane.b32.xlu0 %v1803_v16, %s7950_s24 }
 0x57e   : > { %v1401_v25 = vpop.xlane.xlu0 %1400 }
 0x57f   : > { %v1402_v26 = vsub.f32 %v1397_v21, %v1401_v25 }
 0x581   : > { %v1403_v27 = vmul.f32 1.442695, %v1402_v26 }
 0x582   : > { %v1460_v34 = vpop.permute.xlu0 %1459 }
 0x583   : > { %7228 = vpow2.f32 %v1403_v27  ;;  %v1465_v39 = vsel %vm1350_vm1, %v1460_v34, 0 }
 0x586   : > { %v1679_v46 = vpop.permute.xlu0 %1678 }
 0x587   : > { %v1684_v49 = vsel %vm1350_vm1, %v1679_v46, 0 }
 0x58a   : > { %v1912_v52 = vpop.permute.xlu0 %1911 }
 0x58b   : > { %v1917_v53 = vsel %vm1350_vm1, %v1912_v52, 0 }
 0x58d   : > { %v7229_v28 = vpop.eup %7228 }
 0x58e   : > { %v1405_v29 = vsel %vm1398_vm2, %v7229_v28, 0.0  ;;  %v2022_v54 = vpop.permute.xlu0 %2021 }
 0x58f   : > { %1406 = vadd.xlane.f32.xlu1 %v1405_v29  ;;  %v2027_v56 = vsel %vm1350_vm1, %v2022_v54, 0 }
 0x592   : > { %v2131_v57 = vpop.permute.xlu0 %2130 }
 0x593   : > { %v2136_v59 = vsel %vm1350_vm1, %v2131_v57, 0 }
 0x5a0   : > { %1456 = vrot.lane.b32.xlu1 %v1348_v4, %s7949_s30 }
 0x5a4   : > { %1569 = vrot.lane.b32.xlu1 %v1349_v0, %s7951_s28 }
 0x5a8   : > { %1567 = vrot.lane.b32.xlu1 %v1348_v4, %s7951_s28 }
 0x5ac   : > { %1676 = vrot.lane.b32.xlu1 %v1348_v4, %s7950_s24 }
 0x5b0   : > { %1908 = vrot.lane.b32.xlu1 %v1802_v30, %s7949_s30 }
 0x5b4   : > { %2019 = vrot.lane.b32.xlu1 %v1802_v30, %s7951_s28 }
 0x5b8   : > { %2128 = vrot.lane.b32.xlu1 %v1802_v30, %s7950_s24 }
 0x61c   : > { %v1407_v31 = vpop.xlane.xlu1 %1406 }
 0x61d   : > { %7230 = vrcp.f32 %v1407_v31 }
 0x620   : > { %v1457_v36 = vpop.permute.xlu1 %1456 }
 0x624   : > { %v1570_v41 = vpop.permute.xlu1 %1569 }
 0x625   : > { %v1575_v43 = vsel %vm1350_vm1, %v1570_v41, 0 }
 0x627   : > { %v7231_v32 = vpop.eup %7230 }
 0x628   : > { %v1409_v33 = vmul.f32 %v7231_v32, %v7229_v28  ;;  %v1568_v48 = vpop.permute.xlu1 %1567 }
 0x62a   : > { %v1410_v35 = vpack.c.bf16 %v1409_v33, %v1409_v33 }
 0x62c   : > { %6427 = vmatmul.mubr.msk.bf16.vlgmr.msra.gmra.mrb[12].mxu1 %vm1398_vm2, %v1410_v35  ;;  %v1677_v50 = vpop.permute.xlu1 %1676 }
 0x62d   : > { %6431 = vmatpush3.bf16.xpose.msra.mxu1 %v1465_v39  ;;  %6432 = vmatprep.mubr.msk.bf16.mxu1 %vm7947_vm0, %v7946_v6 }
 0x62e   : > { %6442 = vmatprep.subr.bf16.mxu1 %v7946_v6 }
 0x630   : > { %v1909_v55 = vpop.permute.xlu1 %1908 }
 0x634   : > { %6433 = vmatmul.mubr.msk.bf16.vlgmr.msra.gmra.mrb[16].mxu1 %vm1350_vm1, %v1457_v36  ;;  %v2020_v58 = vpop.permute.xlu1 %2019 }
 0x635   : > { %6443 = vmatpush3.bf16.xpose.msra.mxu1 %v1575_v43  ;;  %6444 = vmatprep.mubr.msk.bf16.mxu1 %vm7947_vm0, %v7946_v6 }
 0x636   : > { %6454 = vmatprep.subr.bf16.mxu1 %v7946_v6 }
 0x638   : > { %v2129_v60 = vpop.permute.xlu1 %2128 }
 0x63c   : > { %6445 = vmatmul.mubr.msk.bf16.vlgmr.msra.gmra.mrb[20].mxu1 %vm1350_vm1, %v1568_v48 }
 0x63d   : > { %6455 = vmatpush3.bf16.xpose.msra.mxu1 %v1684_v49  ;;  %6456 = vmatprep.mubr.msk.bf16.mxu1 %vm7947_vm0, %v7946_v6 }
 0x63e   : > { %6466 = vmatprep.subr.bf16.mxu1 %v7946_v6 }
 0x644   : > { %6457 = vmatmul.mubr.msk.bf16.vlgmr.msra.gmra.mrb[24].mxu1 %vm1350_vm1, %v1677_v50 }
 0x645   : > { %6467 = vmatpush3.bf16.xpose.msra.mxu1 %v1808_v51  ;;  %6468 = vmatprep.mubr.msk.bf16.mxu1 %vm7947_vm0, %v7946_v6 }
 0x646   : > { %6478 = vmatprep.subr.bf16.mxu1 %v7946_v6 }
 0x64c   : > { %6469 = vmatmul.mubr.msk.bf16.vlgmr.msra.gmra.mrb[28].mxu1 %vm1350_vm1, %v1802_v30 }
 0x64d   : > { %6479 = vmatpush3.bf16.xpose.msra.mxu1 %v1917_v53  ;;  %6480 = vmatprep.mubr.msk.bf16.mxu1 %vm7947_vm0, %v7946_v6 }
 0x64e   : > { %6490 = vmatprep.subr.bf16.mxu1 %v7946_v6 }
 0x654   : > { %6481 = vmatmul.mubr.msk.bf16.vlgmr.msra.gmra.mrb[32].mxu1 %vm1350_vm1, %v1909_v55 }
 0x655   : > { %6491 = vmatpush3.bf16.xpose.msra.mxu1 %v2027_v56  ;;  %6492 = vmatprep.mubr.msk.bf16.mxu1 %vm7947_vm0, %v7946_v6 }
 0x656   : > { %6502 = vmatprep.subr.bf16.mxu1 %v7946_v6 }
 0x65c   : > { %6493 = vmatmul.mubr.msk.bf16.vlgmr.msra.gmra.mrb[36].mxu1 %vm1350_vm1, %v2020_v58 }
 0x65d   : > { %6503 = vmatpush3.bf16.xpose.msra.mxu1 %v2136_v59  ;;  %6504 = vmatprep.mubr.msk.bf16.mxu1 %vm7947_vm0, %v7946_v6 }
 0x65e   : > { %6514 = vmatprep.subr.bf16.mxu1 %v7946_v6 }
 0x664   : > { %6505 = vmatmul.mubr.msk.bf16.vlgmr.msra.gmra.mrb[40].mxu1 %vm1350_vm1, %v2129_v60 }
 0x665   : > { %6530 = vmatprep.mubr.msk.bf16.mxu1 %vm7947_vm0, %v7946_v6 }
 0x6ff   : > { %v8747_v61 = vpop.f32.mrb[12].mxu1 }
 0x700   : > { %v6428_v62 = vpop.f32.mrb[13].mxu1 }
 0x701   : > { %v1452_v63 = vpop.f32.mrb[14].mxu1 }
 0x702   : > { %v6429_v0 = vpop.f32.mrb[15].mxu1 }
 0x707   : > { %v1501_v2 = vpop.f32.mrb[16].mxu1 }
 0x708   : > { %v1507_v3 = vmul.f32 0.17677669, %v1501_v2  ;;  %v6434_v4 = vpop.f32.mrb[17].mxu1 }
 0x709   : > { %v1504_v5 = vpop.f32.mrb[18].mxu1 }
 0x70a   : > { %v6435_v7 = vpop.f32.mrb[19].mxu1  ;;  %v1508_v8 = vsel %vm1398_vm2, %v1507_v3, -inf }
 0x70b   : > { %1509 = vmax.xlane.f32.xlu0 %v1508_v8 }
 0x70f   : > { %v1611_v9 = vpop.f32.mrb[20].mxu1 }
 0x710   : > { %v1617_v10 = vmul.f32 0.17677669, %v1611_v9  ;;  %v6446_v11 = vpop.f32.mrb[21].mxu1 }
 0x711   : > { %v1614_v14 = vpop.f32.mrb[22].mxu1 }
 0x712   : > { %v6447_v15 = vpop.f32.mrb[23].mxu1  ;;  %v1618_v16 = vsel %vm1398_vm2, %v1617_v10, -inf }
 0x713   : > { %1619 = vmax.xlane.f32.xlu1 %v1618_v16 }
 0x717   : > { %v1720_v12 = vpop.f32.mrb[24].mxu1 }
 0x718   : > { %v1726_v21 = vmul.f32 0.17677669, %v1720_v12  ;;  %v6458_v22 = vpop.f32.mrb[25].mxu1 }
 0x719   : > { %v1723_v17 = vpop.f32.mrb[26].mxu1 }
 0x71a   : > { %v6459_v23 = vpop.f32.mrb[27].mxu1  ;;  %v1727_v24 = vsel %vm1398_vm2, %v1726_v21, -inf }
 0x71b   : > { %1728 = vmax.xlane.f32.xlu0 %v1727_v24 }
 0x71f   : > { %v1844_v25 = vpop.f32.mrb[28].mxu1 }
 0x720   : > { %v1850_v26 = vmul.f32 0.17677669, %v1844_v25  ;;  %v6470_v27 = vpop.f32.mrb[29].mxu1 }
 0x721   : > { %v1847_v28 = vpop.f32.mrb[30].mxu1 }
 0x722   : > { %v6471_v29 = vpop.f32.mrb[31].mxu1  ;;  %v1851_v30 = vsel %vm1398_vm2, %v1850_v26, -inf }
 0x723   : > { %1852 = vmax.xlane.f32.xlu0 %v1851_v30 }
 0x727   : > { %v1953_v31 = vpop.f32.mrb[32].mxu1 }
 0x728   : > { %v1959_v32 = vmul.f32 0.17677669, %v1953_v31  ;;  %v6482_v33 = vpop.f32.mrb[33].mxu1 }
 0x729   : > { %v1956_v34 = vpop.f32.mrb[34].mxu1 }
 0x72a   : > { %v6483_v35 = vpop.f32.mrb[35].mxu1  ;;  %v1960_v36 = vsel %vm1398_vm2, %v1959_v32, -inf }
 0x72b   : > { %1961 = vmax.xlane.f32.xlu0 %v1960_v36 }
 0x72f   : > { %v2063_v39 = vpop.f32.mrb[36].mxu1 }
 0x730   : > { %v2069_v41 = vmul.f32 0.17677669, %v2063_v39  ;;  %v6494_v43 = vpop.f32.mrb[37].mxu1 }
 0x731   : > { %v2066_v46 = vpop.f32.mrb[38].mxu1 }
 0x732   : > { %v6495_v48 = vpop.f32.mrb[39].mxu1  ;;  %v2070_v49 = vsel %vm1398_vm2, %v2069_v41, -inf }
 0x733   : > { %2071 = vmax.xlane.f32.xlu1 %v2070_v49 }
 0x737   : > { %v2172_v50 = vpop.f32.mrb[40].mxu1 }
 0x738   : > { %v2178_v51 = vmul.f32 0.17677669, %v2172_v50  ;;  %v6506_v52 = vpop.f32.mrb[41].mxu1 }
 0x739   : > { %v2175_v53 = vpop.f32.mrb[42].mxu1 }
 0x73a   : > { %v6507_v54 = vpop.f32.mrb[43].mxu1  ;;  %v2179_v55 = vsel %vm1398_vm2, %v2178_v51, -inf }
 0x73b   : > { %2180 = vmax.xlane.f32.xlu0 %v2179_v55 }
 0x744   : > { %1521 = vrot.lane.b32.xlu1 %v8684_v1, %s7949_s30 }
 0x751   : > { %1630 = vrot.lane.b32.xlu0 %v8684_v1, %s7951_s28 }
 0x798   : > { %v1510_v56 = vpop.xlane.xlu0 %1509 }
 0x799   : > { %v1511_v57 = vsub.f32 %v1507_v3, %v1510_v56 }
 0x79b   : > { %v1512_v58 = vmul.f32 1.442695, %v1511_v57 }
 0x79d   : > { %7232 = vpow2.f32 %v1512_v58 }
 0x7a0   : > { %v1620_v59 = vpop.xlane.xlu1 %1619 }
 0x7a1   : > { %v1621_v60 = vsub.f32 %v1617_v10, %v1620_v59 }
 0x7a3   : > { %v1622_v62 = vmul.f32 1.442695, %v1621_v60 }
 0x7a5   : > { %7234 = vpow2.f32 %v1622_v62 }
 0x7a7   : > { %v7233_v63 = vpop.eup %7232 }
 0x7a8   : > { %v1729_v0 = vpop.xlane.xlu0 %1728  ;;  %v1514_v2 = vsel %vm1398_vm2, %v7233_v63, 0.0 }
 0x7a9   : > { %v1730_v4 = vsub.f32 %v1726_v21, %v1729_v0  ;;  %1515 = vadd.xlane.f32.xlu1 %v1514_v2 }
 0x7ab   : > { %v1731_v5 = vmul.f32 1.442695, %v1730_v4 }
 0x7ad   : > { %7236 = vpow2.f32 %v1731_v5 }
 0x7af   : > { %v7235_v7 = vpop.eup %7234 }
 0x7b0   : > { %v1853_v8 = vpop.xlane.xlu0 %1852  ;;  %v1624_v9 = vsel %vm1398_vm2, %v7235_v7, 0.0 }
 0x7b1   : > { %v1854_v11 = vsub.f32 %v1850_v26, %v1853_v8  ;;  %1625 = vadd.xlane.f32.xlu0 %v1624_v9 }
 0x7b3   : > { %v1855_v3 = vmul.f32 1.442695, %v1854_v11 }
 0x7b5   : > { %7238 = vpow2.f32 %v1855_v3 }
 0x7b7   : > { %v7237_v14 = vpop.eup %7236 }
 0x7b8   : > { %v1733_v10 = vsel %vm1398_vm2, %v7237_v14, 0.0  ;;  %v1962_v23 = vpop.xlane.xlu0 %1961 }
 0x7b9   : > { %1734 = vadd.xlane.f32.xlu1 %v1733_v10  ;;  %v1963_v24 = vsub.f32 %v1959_v32, %v1962_v23  ;;  %v6978_v10 = vld [vmem:[#allocation16] sm:$0xff]  }
 0x7ba   : > { %6515 = vmatpush3.bf16.msra.mxu1 %v6978_v10 }
 0x7bb   : > { %v1964_v26 = vmul.f32 1.442695, %v1963_v24  ;;  %6516 = vmatprep.subr.bf16.mxu1 %v7946_v6 }
 0x7bf   : > { %v8763_v15 = vpop.eup %7238 }
 0x7c0   : > { %v2072_v16 = vpop.xlane.xlu1 %2071  ;;  %v1857_v12 = vsel %vm1398_vm2, %v8763_v15, 0.0 }
 0x7c1   : > { %1858 = vadd.xlane.f32.xlu0 %v1857_v12  ;;  %v2073_v22 = vsub.f32 %v2069_v41, %v2072_v16  ;;  %v6980_v16 = vld [vmem:[#allocation16 + $0x10] sm:$0xff]  }
 0x7c3   : > { %v2074_v17 = vmul.f32 1.442695, %v2073_v22 }
 0x7c4   : > { %v1522_v21 = vpop.permute.xlu1 %1521 }
 0x7c5   : > { %6437 = vmatpush3.bf16.msra.mxu0 %v1522_v21  ;;  %7240 = vpow2.f32 %v2074_v17 }
 0x7c6   : > { %6448 = vmatprep.subr.bf16.mxu0 %v7946_v6  ;;  %7242 = vpow2.f32 %v1964_v26 }
 0x7c8   : > { %v2181_v25 = vpop.xlane.xlu0 %2180 }
 0x7c9   : > { %v2182_v27 = vsub.f32 %v2178_v51, %v2181_v25 }
 0x7ca   : > { %1973 = vrot.lane.b32.xlu1 %v8693_v18, %s7949_s30 }
 0x7cb   : > { %v2183_v28 = vmul.f32 1.442695, %v2182_v27 }
 0x7cc   : > { %v1631_v35 = vpop.permute.xlu0 %1630 }
 0x7cd   : > { %7244 = vpow2.f32 %v2183_v28 }
 0x7cf   : > { %v8772_v29 = vpop.eup %7240 }
 0x7d0   : > { %v2076_v30 = vsel %vm1398_vm2, %v8772_v29, 0.0  ;;  %v7243_v31 = vpop.eup %7242 }
 0x7d7   : > { %1739 = vrot.lane.b32.xlu0 %v8684_v1, %s7950_s24  ;;  %v1966_v1 = vsel %vm1398_vm2, %v7243_v31, 0.0  ;;  %v8777_v33 = vpop.eup %7244 }
 0x7d8   : > { %v2185_v32 = vsel %vm1398_vm2, %v8777_v33, 0.0 }
 0x7ee   : > { %2077 = vadd.xlane.f32.xlu1 %v2076_v30 }
 0x7f6   : > { %1967 = vadd.xlane.f32.xlu0 %v1966_v1 }
 0x7fa   : > { %2186 = vadd.xlane.f32.xlu0 %v2185_v32 }
 0x7ff   : > { %2191 = vrot.lane.b32.xlu1 %v8693_v18, %s7950_s24 }
 0x810   : > { %2082 = vrot.lane.b32.xlu0 %v8693_v18, %s7951_s28 }
 0x836   : > { %v1516_v34 = vpop.xlane.xlu1 %1515 }
 0x837   : > { %7246 = vrcp.f32 %v1516_v34  ;;  %v6981_v34 = vld [vmem:[#allocation16 + $0x18] sm:$0xff]  }
 0x83e   : > { %v1626_v36 = vpop.xlane.xlu0 %1625 }
 0x83f   : > { %7248 = vrcp.f32 %v1626_v36  ;;  %v6983_v36 = vld [vmem:[#allocation16 + $0x28] sm:$0xff]  }
 0x841   : > { %v7247_v39 = vpop.eup %7246 }
 0x842   : > { %v1518_v41 = vmul.f32 %v7247_v39, %v7233_v63 }
 0x844   : > { %v1519_v43 = vpack.c.bf16 %v1518_v41, %v1518_v41 }
 0x846   : > { %6439 = vmatmul.mubr.msk.bf16.vlgmr.msra.gmra.mrb[4].mxu0 %vm1398_vm2, %v1519_v43  ;;  %v1735_v46 = vpop.xlane.xlu1 %1734 }
 0x847   : > { %7250 = vrcp.f32 %v1735_v46  ;;  %6449 = vmatpush3.bf16.msra.mxu0 %v1631_v35  ;;  %6450 = vmatprep.mubr.msk.bf16.mxu0 %vm7947_vm0, %v7946_v6  ;;  %v6982_v35 = vld [vmem:[#allocation16 + $0x20] sm:$0xff]   ;;  %v6984_v46 = vld [vmem:[#allocation16 + $0x30] sm:$0xff]  }
 0x848   : > { %6460 = vmatprep.subr.bf16.mxu0 %v7946_v6 }
 0x849   : > { %v7249_v48 = vpop.eup %7248 }
 0x84a   : > { %v1628_v49 = vmul.f32 %v7249_v48, %v7235_v7  ;;  %v1974_v59 = vpop.permute.xlu1 %1973 }
 0x84c   : > { %v1629_v50 = vpack.c.bf16 %v1628_v49, %v1628_v49 }
 0x84e   : > { %6451 = vmatmul.mubr.msk.bf16.vlgmr.msra.gmra.mrb[8].mxu0 %vm1398_vm2, %v1629_v50  ;;  %v1859_v51 = vpop.xlane.xlu0 %1858  ;;  %v6985_v50 = vld [vmem:[#allocation16 + $0x38] sm:$0xff]  }
 0x84f   : > { %7252 = vrcp.f32 %v1859_v51  ;;  %6462 = vmatprep.mubr.msk.bf16.mxu0 %vm7947_vm0, %v7946_v6 }
 0x851   : > { %v7251_v52 = vpop.eup %7250 }
 0x852   : > { %v1737_v53 = vmul.f32 %v7251_v52, %v7237_v14  ;;  %v1740_v54 = vpop.permute.xlu0 %1739 }
 0x853   : > { %6461 = vmatpush3.bf16.msra.mxu0 %v1740_v54 }
 0x854   : > { %v1738_v55 = vpack.c.bf16 %v1737_v53, %v1737_v53  ;;  %6472 = vmatprep.subr.bf16.mxu0 %v7946_v6 }
 0x856   : > { %6463 = vmatmul.mubr.msk.bf16.vlgmr.msra.gmra.mrb[12].mxu0 %vm1398_vm2, %v1738_v55 }
 0x857   : > { %6473 = vmatpush3.bf16.msra.mxu0 %v8693_v18  ;;  %6474 = vmatprep.mubr.msk.bf16.mxu0 %vm7947_vm0, %v7946_v6 }
 0x858   : > { %6484 = vmatprep.subr.bf16.mxu0 %v7946_v6 }
 0x859   : > { %v7253_v56 = vpop.eup %7252 }
 0x85a   : > { %v1861_v57 = vmul.f32 %v7253_v56, %v8763_v15  ;;  %v6979_v15 = vld [vmem:[#allocation16 + $0x8] sm:$0xff]  }
 0x85b   : > { %6517 = vmatpush3.bf16.msra.mxu1 %v6979_v15 }
 0x85c   : > { %v1862_v58 = vpack.c.bf16 %v1861_v57, %v1861_v57  ;;  %6518 = vmatprep.subr.bf16.mxu1 %v7946_v6 }
 0x85e   : > { %6475 = vmatmul.mubr.msk.bf16.vlgmr.msra.gmra.mrb[16].mxu0 %vm1398_vm2, %v1862_v58 }
 0x85f   : > { %6485 = vmatpush3.bf16.msra.mxu0 %v1974_v59  ;;  %6486 = vmatprep.mubr.msk.bf16.mxu0 %vm7947_vm0, %v7946_v6 }
 0x860   : > { %6496 = vmatprep.subr.bf16.mxu0 %v7946_v6  ;;  %6519 = vmatpush3.bf16.msra.mxu1 %v6980_v16 }
 0x861   : > { %6520 = vmatprep.subr.bf16.mxu1 %v7946_v6 }
 0x864   : > { %6521 = vmatpush3.bf16.msra.mxu1 %v6981_v34  ;;  %v6995_v34 = vld [vmem:[%s9640_s26 + $0x28] ss:$16 sps:$4 sm:$0xff]  }
 0x865   : > { %6522 = vmatprep.subr.bf16.mxu1 %v7946_v6 }
 0x868   : > { %6523 = vmatpush3.bf16.msra.mxu1 %v6982_v35 }
 0x869   : > { %6524 = vmatprep.subr.bf16.mxu1 %v7946_v6 }
 0x86c   : > { %6525 = vmatpush3.bf16.msra.mxu1 %v6983_v36 }
 0x86d   : > { %6526 = vmatprep.subr.bf16.mxu1 %v7946_v6 }
 0x870   : > { %6527 = vmatpush3.bf16.msra.mxu1 %v6984_v46 }
 0x871   : > { %6528 = vmatprep.subr.bf16.mxu1 %v7946_v6 }
 0x874   : > { %6529 = vmatpush3.bf16.msra.mxu1 %v6985_v50  ;;  %v7000_v50 = vld [vmem:[%s9640_s26 + $0x44] ss:$16 sps:$4 sm:$0xff]  }
 0x87b   : > { %v2078_v18 = vpop.xlane.xlu1 %2077 }
 0x87f   : > { %v2192_v11 = vpop.permute.xlu1 %2191 }
 0x883   : > { %v1968_v60 = vpop.xlane.xlu0 %1967 }
 0x884   : > { %7254 = vrcp.f32 %v1968_v60 }
 0x885   : > { %7256 = vrcp.f32 %v2078_v18 }
 0x887   : > { %v2187_v62 = vpop.xlane.xlu0 %2186 }
 0x888   : > { %7258 = vrcp.f32 %v2187_v62 }
 0x88b   : > { %v2083_v5 = vpop.permute.xlu0 %2082 }
 0x88e   : > { %v7255_v63 = vpop.eup %7254 }
 0x88f   : > { %v1970_v0 = vmul.f32 %v7255_v63, %v7243_v31  ;;  %v7257_v4 = vpop.eup %7256 }
 0x890   : > { %v2080_v7 = vmul.f32 %v7257_v4, %v8772_v29 }
 0x891   : > { %v1971_v2 = vpack.c.bf16 %v1970_v0, %v1970_v0 }
 0x892   : > { %v2081_v8 = vpack.c.bf16 %v2080_v7, %v2080_v7  ;;  %v7259_v9 = vpop.eup %7258 }
 0x893   : > { %6487 = vmatmul.mubr.msk.bf16.vlgmr.msra.gmra.mrb[20].mxu0 %vm1398_vm2, %v1971_v2  ;;  %v2189_v3 = vmul.f32 %v7259_v9, %v8777_v33 }
 0x894   : > { %6497 = vmatpush3.bf16.msra.mxu0 %v2083_v5  ;;  %6498 = vmatprep.mubr.msk.bf16.mxu0 %vm7947_vm0, %v7946_v6 }
 0x895   : > { %6508 = vmatprep.subr.bf16.mxu0 %v7946_v6  ;;  %v2190_v14 = vpack.c.bf16 %v2189_v3, %v2189_v3 }
 0x89b   : > { %6499 = vmatmul.mubr.msk.bf16.vlgmr.msra.gmra.mrb[24].mxu0 %vm1398_vm2, %v2081_v8 }
 0x89c   : > { %6509 = vmatpush3.bf16.msra.mxu0 %v2192_v11  ;;  %6510 = vmatprep.mubr.msk.bf16.mxu0 %vm7947_vm0, %v7946_v6 }
 0x8a3   : > { %6511 = vmatmul.mubr.msk.bf16.vlgmr.msra.gmra.mrb[28].mxu0 %vm1398_vm2, %v2190_v14 }
 0x8a4   : > { %2656 = vmatprep.mubr.bf16.mxu0 %v7948_v37 }
 0x919   : > { %v1561_v12 = vpop.f32.mrb[4].mxu0 }
 0x91a   : > { %v6440_v21 = vpop.f32.mrb[5].mxu0 }
 0x91b   : > { %v1564_v22 = vpop.f32.mrb[6].mxu0  ;;  %v5930_v21 = vld [vmem:[#allocation17] ss:$0 sm:$0xff] }
 0x91c   : > { %v6441_v17 = vpop.f32.mrb[7].mxu0  ;;  %v7344_v22 = vld [vmem:[#allocation2] sm:$0xff] }
 0x921   : > { %v1670_v23 = vpop.f32.mrb[8].mxu0 }
 0x922   : > { %v6452_v24 = vpop.f32.mrb[9].mxu0 }
 0x923   : > { %v1673_v25 = vpop.f32.mrb[10].mxu0 }
 0x924   : > { %v6453_v26 = vpop.f32.mrb[11].mxu0 }
 0x929   : > { %v1779_v27 = vpop.f32.mrb[12].mxu0 }
 0x92a   : > { %v6464_v28 = vpop.f32.mrb[13].mxu0 }
 0x92b   : > { %v1782_v29 = vpop.f32.mrb[14].mxu0  ;;  %v6986_v28 = vld [vmem:[%s9640_s26] ss:$16 sps:$4 sm:$0xff]  }
 0x92c   : > { %v6465_v30 = vpop.f32.mrb[15].mxu0  ;;  %v6988_v29 = vld [vmem:[%s9640_s26 + $0x4] ss:$16 sps:$4 sm:$0xff]  }
 0x92d   : > { %v6989_v30 = vld [vmem:[%s9640_s26 + $0x8] ss:$16 sps:$4 sm:$0xff]   ;;  %2624 = vmatprep.subr.bf16.mxu0 %v6988_v29 }
 0x92e   : > { %2625 = vmatpush1.bf16.msra.mxu0 %v6986_v28  ;;  %v5932_v29 = vld [vmem:[#allocation20] ss:$0 sm:$0xff] }
 0x931   : > { %v1901_v31 = vpop.f32.mrb[16].mxu0 }
 0x932   : > { %v6476_v1 = vpop.f32.mrb[17].mxu0 }
 0x933   : > { %v1904_v33 = vpop.f32.mrb[18].mxu0  ;;  %v6994_v1 = vld [vmem:[%s9640_s26 + $0x24] ss:$16 sps:$4 sm:$0xff]  }
 0x934   : > { %v6477_v32 = vpop.f32.mrb[19].mxu0  ;;  %v6997_v33 = vld [vmem:[%s9640_s26 + $0x2c] ss:$16 sps:$4 sm:$0xff]   ;;  %2626 = vmatprep.subr.bf16.mxu0 %v6994_v1 }
 0x935   : > { %v6992_v32 = vld [vmem:[%s9640_s26 + $0x20] ss:$16 sps:$4 sm:$0xff]  }
 0x936   : > { %2627 = vmatpush1.bf16.msra.mxu0 %v6992_v32  ;;  %v7034_v32 = vld [vmem:[#allocation23 + $0xc0] sm:$0xff]  }
 0x937   : > { %2628 = vmatprep.subr.bf16.mxu0 %v7000_v50  ;;  %v7044_v50 = vld [vmem:[#allocation23 + $0x90] sm:$0xff]  }
 0x966   : > { %v2013_v39 = vpop.f32.mrb[20].mxu0 }
 0x967   : > { %v6916_v41 = vpack.i.bf16 %v2013_v39, %v1561_v12  ;;  %v6488_v43 = vpop.f32.mrb[21].mxu0 }
 0x968   : > { %v2016_v48 = vpop.f32.mrb[22].mxu0 }
 0x969   : > { %6917 = vrot.lane.b32.xlu1 %v6916_v41, %s7950_s24  ;;  %v6489_v49 = vpop.f32.mrb[23].mxu0 }
 0x96e   : > { %v2122_v51 = vpop.f32.mrb[24].mxu0 }
 0x96f   : > { %v6921_v52 = vpack.i.bf16 %v2122_v51, %v1670_v23  ;;  %v6500_v53 = vpop.f32.mrb[25].mxu0  ;;  %v7003_v51 = vld [vmem:[%s9640_s26 + $0x4c] ss:$16 sps:$4 sm:$0xff]  }
 0x970   : > { %v2125_v54 = vpop.f32.mrb[26].mxu0  ;;  %v7001_v53 = vld [vmem:[%s9640_s26 + $0x48] ss:$16 sps:$4 sm:$0xff]  }
 0x971   : > { %6922 = vrot.lane.b32.xlu1 %v6921_v52, %s7951_s28  ;;  %v6501_v55 = vpop.f32.mrb[27].mxu0  ;;  %v6998_v52 = vld [vmem:[%s9640_s26 + $0x40] ss:$16 sps:$4 sm:$0xff]   ;;  %v7006_v54 = vld [vmem:[%s9640_s26 + $0x64] ss:$16 sps:$4 sm:$0xff]  }
 0x972   : > { %2629 = vmatpush1.bf16.msra.mxu0 %v6998_v52  ;;  %v7009_v55 = vld [vmem:[%s9640_s26 + $0x6c] ss:$16 sps:$4 sm:$0xff]  }
 0x973   : > { %2630 = vmatprep.subr.bf16.mxu0 %v7006_v54  ;;  %v7046_v52 = vld [vmem:[#allocation23 + $0xd8] sm:$0xff]  }
 0x974   : > { %v7048_v54 = vld [vmem:[#allocation23 + $0x98] sm:$0xff]  }
 0x976   : > { %v2231_v56 = vpop.f32.mrb[28].mxu0 }
 0x977   : > { %v6926_v57 = vpack.i.bf16 %v2231_v56, %v1779_v27  ;;  %v6512_v58 = vpop.f32.mrb[29].mxu0  ;;  %v7004_v56 = vld [vmem:[%s9640_s26 + $0x60] ss:$16 sps:$4 sm:$0xff]  }
 0x978   : > { %v2234_v59 = vpop.f32.mrb[30].mxu0  ;;  %2631 = vmatpush1.bf16.msra.mxu0 %v7004_v56  ;;  %v7012_v58 = vld [vmem:[%s9640_s26 + $0x84] ss:$16 sps:$4 sm:$0xff]  }
 0x979   : > { %6927 = vrot.lane.b32.xlu1 %v6926_v57, %s7949_s30  ;;  %v6513_v60 = vpop.f32.mrb[31].mxu0  ;;  %v7007_v57 = vld [vmem:[%s9640_s26 + $0x68] ss:$16 sps:$4 sm:$0xff]   ;;  %v7015_v59 = vld [vmem:[%s9640_s26 + $0x8c] ss:$16 sps:$4 sm:$0xff]   ;;  %2632 = vmatprep.subr.bf16.mxu0 %v7012_v58 }
 0x97a   : > { %v7010_v60 = vld [vmem:[%s9640_s26 + $0x80] ss:$16 sps:$4 sm:$0xff]   ;;  %v7050_v56 = vld [vmem:[#allocation23 + $0xe0] sm:$0xff]  }
 0x97b   : > { %v7052_v58 = vld [vmem:[#allocation23 + $0xa0] sm:$0xff]  }
 0x97c   : > { %2633 = vmatpush1.bf16.msra.mxu0 %v7010_v60  ;;  %v7054_v60 = vld [vmem:[#allocation23 + $0xe8] sm:$0xff]  }
 0x9db   : > { %v6918_v18 = vpop.permute.xlu1 %6917 }
 0x9dc   : > { %v6920_v63 = vunpack.i.h.bf16 %v6918_v18  ;;  %v6919_v0 = vunpack.i.l.bf16 %v6918_v18  ;;  %v7013_v18 = vld [vmem:[%s9640_s26 + $0x88] ss:$16 sps:$4 sm:$0xff]  }
 0x9de   : > { %v2249_v7 = vsel %vm1350_vm1, %v1901_v31, %v6920_v63  ;;  %v1797_v8 = vsel %vm1350_vm1, %v8747_v61, %v6919_v0  ;;  %v6991_v31 = vld [vmem:[%s9640_s26 + $0xc] ss:$16 sps:$4 sm:$0xff]   ;;  %v7016_v0 = vld [vmem:[%s9640_s26 + $0xa0] ss:$16 sps:$4 sm:$0xff]  }
 0x9df   : > { %2667 = vmatprep.subr.bf16.mxu1 %v6991_v31  ;;  %v7021_v63 = vld [vmem:[%s9640_s26 + $0xac] ss:$16 sps:$4 sm:$0xff]  }
 0x9e3   : > { %v6923_v62 = vpop.permute.xlu1 %6922 }
 0x9e4   : > { %v6925_v2 = vunpack.i.h.bf16 %v6923_v62  ;;  %v6924_v4 = vunpack.i.l.bf16 %v6923_v62  ;;  %v7018_v62 = vld [vmem:[%s9640_s26 + $0xa4] ss:$16 sps:$4 sm:$0xff]  }
 0x9e5   : > { %2634 = vmatprep.subr.bf16.mxu0 %v7018_v62  ;;  %v7056_v62 = vld [vmem:[#allocation23 + $0xa8] sm:$0xff]  }
 0x9e6   : > { %v2250_v3 = vsel %vm1798_vm3, %v2249_v7, %v6925_v2  ;;  %v1799_v14 = vsel %vm1798_vm3, %v1797_v8, %v6924_v4  ;;  %v7019_v2 = vld [vmem:[%s9640_s26 + $0xa8] ss:$16 sps:$4 sm:$0xff]   ;;  %2635 = vmatpush1.bf16.msra.mxu0 %v7016_v0  ;;  %v7024_v4 = vld [vmem:[%s9640_s26 + $0xc4] ss:$16 sps:$4 sm:$0xff]   ;;  %v7022_v7 = vld [vmem:[%s9640_s26 + $0xc0] ss:$16 sps:$4 sm:$0xff]  }
 0x9e7   : > { %v7025_v8 = vld [vmem:[%s9640_s26 + $0xc8] ss:$16 sps:$4 sm:$0xff]   ;;  %2636 = vmatprep.subr.bf16.mxu0 %v7024_v4 }
 0x9e8   : > { %v7058_v0 = vld [vmem:[#allocation23 + $0xf0] sm:$0xff]  }
 0x9e9   : > { %v7060_v4 = vld [vmem:[#allocation23 + $0xb0] sm:$0xff]  }
 0x9ea   : > { %2637 = vmatpush1.bf16.msra.mxu0 %v7022_v7  ;;  %v7062_v7 = vld [vmem:[#allocation23 + $0xf8] sm:$0xff]  }
 0x9eb   : > { %v6928_v5 = vpop.permute.xlu1 %6927 }
 0x9ec   : > { %v6930_v9 = vunpack.i.h.bf16 %v6928_v5  ;;  %v6929_v11 = vunpack.i.l.bf16 %v6928_v5  ;;  %v7027_v5 = vld [vmem:[%s9640_s26 + $0xcc] ss:$16 sps:$4 sm:$0xff]  }
 0x9ee   : > { %v2251_v10 = vsel %vm1800_vm4, %v2250_v3, %v6930_v9  ;;  %v1801_v15 = vsel %vm1800_vm4, %v1799_v14, %v6929_v11  ;;  %v7030_v9 = vld [vmem:[%s9640_s26 + $0xe4] ss:$16 sps:$4 sm:$0xff]   ;;  %v7033_v11 = vld [vmem:[%s9640_s26 + $0xec] ss:$16 sps:$4 sm:$0xff]   ;;  %v7028_v3 = vld [vmem:[%s9640_s26 + $0xe0] ss:$16 sps:$4 sm:$0xff]  }
 0x9ef   : > { %v2252_v16 = vpack.c.bf16 %v2251_v10, %v1801_v15  ;;  %v7031_v14 = vld [vmem:[%s9640_s26 + $0xe8] ss:$16 sps:$4 sm:$0xff]   ;;  %2638 = vmatprep.subr.bf16.mxu0 %v7030_v9  ;;  %v7064_v9 = vld [vmem:[#allocation23 + $0xb8] sm:$0xff]  }
 0x9f0   : > { %2639 = vmatpush1.bf16.msra.mxu0 %v7028_v3  ;;  %v7068_v3 = vld [vmem:[#allocation13 + $0x84] ss:$8 sps:$4 sm:$0xff]  }
 0x9f1   : > { %6531 = vmatmul.mubr.bf16.vlgmr.msra.gmra.mrb[44].mxu1 %v2252_v16 }
 0x9f2   : > { %2699 = vmatprep.mubr.bf16.mxu1 %v7948_v37  ;;  %2668 = vmatpush1.bf16.msra.mxu1 %v6989_v30 }
 0x9f3   : > { %2669 = vmatprep.subr.bf16.mxu1 %v6997_v33 }
 0x9f6   : > { %2670 = vmatpush1.bf16.msra.mxu1 %v6995_v34  ;;  %v7035_v34 = vld [vmem:[#allocation23 + $0x40] sm:$0xff]  }
 0x9f7   : > { %2671 = vmatprep.subr.bf16.mxu1 %v7003_v51  ;;  %6251 = vmatprep.subr.bf16.mxu0 %v7035_v34  ;;  %v7045_v51 = vld [vmem:[#allocation23 + $0x10] sm:$0xff]  }
 0x9fa   : > { %2672 = vmatpush1.bf16.msra.mxu1 %v7001_v53  ;;  %v7047_v53 = vld [vmem:[#allocation23 + $0x58] sm:$0xff]  }
 0x9fb   : > { %2673 = vmatprep.subr.bf16.mxu1 %v7009_v55  ;;  %v7049_v55 = vld [vmem:[#allocation23 + $0x18] sm:$0xff]  }
 0x9fe   : > { %2674 = vmatpush1.bf16.msra.mxu1 %v7007_v57  ;;  %v7051_v57 = vld [vmem:[#allocation23 + $0x60] sm:$0xff]  }
 0x9ff   : > { %2675 = vmatprep.subr.bf16.mxu1 %v7015_v59  ;;  %v7053_v59 = vld [vmem:[#allocation23 + $0x20] sm:$0xff]  }
 0xa02   : > { %2676 = vmatpush1.bf16.msra.mxu1 %v7013_v18  ;;  %v7055_v18 = vld [vmem:[#allocation23 + $0x68] sm:$0xff]  }
 0xa03   : > { %2677 = vmatprep.subr.bf16.mxu1 %v7021_v63  ;;  %v7057_v63 = vld [vmem:[#allocation23 + $0x28] sm:$0xff]  }
 0xa06   : > { %2678 = vmatpush1.bf16.msra.mxu1 %v7019_v2  ;;  %v7059_v2 = vld [vmem:[#allocation23 + $0x70] sm:$0xff]  }
 0xa07   : > { %2679 = vmatprep.subr.bf16.mxu1 %v7027_v5  ;;  %v7061_v5 = vld [vmem:[#allocation23 + $0x30] sm:$0xff]  }
 0xa0a   : > { %2680 = vmatpush1.bf16.msra.mxu1 %v7025_v8  ;;  %v7063_v8 = vld [vmem:[#allocation23 + $0x78] sm:$0xff]  }
 0xa0b   : > { %2681 = vmatprep.subr.bf16.mxu1 %v7033_v11  ;;  %v7065_v11 = vld [vmem:[#allocation23 + $0x38] sm:$0xff]  }
 0xa0e   : > { %2682 = vmatpush1.bf16.msra.mxu1 %v7031_v14  ;;  %v2454_v14 = vsub.s32 2, %v8674_v44 }
 0xa0f   : > { %6273 = vmatprep.subr.bf16.mxu1 %v7034_v32 }
 0xac4   : > { %v2351_v12 = vpop.f32.mrb[44].mxu1 }
 0xac5   : > { %v2358_v17 = vadd.f32 %v7344_v22, %v2351_v12  ;;  %v6532_v23 = vpop.f32.mrb[45].mxu1 }
 0xac6   : > { %v2354_v61 = vpop.f32.mrb[46].mxu1 }
 0xac7   : > { %v8832_v24 = vadd.f32 %v5930_v21, %v2358_v17  ;;  %v2359_v25 = vadd.f32 %v7344_v22, %v2354_v61  ;;  %v6533_v26 = vpop.f32.mrb[47].mxu1  ;;  %v5931_v61 = vld [vmem:[#allocation19] ss:$0 sm:$0xff] }
 0xac9   : > { %v8834_v27 = vadd.f32 %v5930_v21, %v2359_v25  ;;  %2371 = vadd.xlane.f32.xlu1 %v8832_v24 }
 0xacb   : > { %2373 = vadd.xlane.f32.xlu0 %v8834_v27 }
 0xb56   : > { %v2372_v35 = vpop.xlane.xlu1 %2371 }
 0xb57   : > { %v2375_v36 = vmul.f32 0.0078125, %v2372_v35  ;;  %v7036_v35 = vld [vmem:[#allocation23 + $0x80] sm:$0xff]  }
 0xb58   : > { %v2374_v39 = vpop.xlane.xlu0 %2373 }
 0xb59   : > { %v8863_v41 = vsub.f32 %v8832_v24, %v2375_v36  ;;  %v2376_v43 = vmul.f32 0.0078125, %v2374_v39  ;;  %v7037_v36 = vld [vmem:[#allocation23] sm:$0xff]   ;;  %v7038_v39 = vld [vmem:[#allocation23 + $0xc8] sm:$0xff]  }
 0xb5b   : > { %v8866_v46 = vsub.f32 %v8834_v27, %v2376_v43  ;;  %v2379_v48 = vmul.f32 %v8863_v41, %v8863_v41  ;;  %v7040_v43 = vld [vmem:[#allocation23 + $0x88] sm:$0xff]  }
 0xb5d   : > { %2381 = vadd.xlane.f32.xlu0 %v2379_v48  ;;  %v2380_v49 = vmul.f32 %v8866_v46, %v8866_v46  ;;  %v7042_v48 = vld [vmem:[#allocation23 + $0xd0] sm:$0xff]  }
 0xb61   : > { %2383 = vadd.xlane.f32.xlu0 %v2380_v49  ;;  %v7043_v49 = vld [vmem:[#allocation23 + $0x50] sm:$0xff]  }
 0xbea   : > { %v2382_v10 = vpop.xlane.xlu0 %2381 }
 0xbeb   : > { %v2385_v15 = vmul.f32 0.0078125, %v2382_v10  ;;  %v2442_v10 = vld [vmem:[#allocation22] sm:$0xf] }
 0xbed   : > { %v2387_v16 = vadd.f32 1e-05, %v2385_v15  ;;  %v2458_v15 = vsub.s32 3, %v8674_v44 }
 0xbee   : > { %v2384_v12 = vpop.xlane.xlu0 %2383 }
 0xbef   : > { %7260 = vrsqrt.f32 %v2387_v16  ;;  %v2386_v21 = vmul.f32 0.0078125, %v2384_v12  ;;  %v2447_v16 = vrot.slane %v2442_v10, %v8677_v45  ;;  %v2455_v12 = vrot.slane %v2442_v10, %v2454_v14 }
 0xbf1   : > { %v2388_v22 = vadd.f32 1e-05, %v2386_v21  ;;  %v2451_v21 = vrot.slane %v2442_v10, %v8680_v47 }
 0xbf3   : > { %7262 = vrsqrt.f32 %v2388_v22  ;;  %v2459_v22 = vrot.slane %v2442_v10, %v2458_v15 }
 0xbf9   : > { %v7261_v17 = vpop.eup %7260 }
 0xbfa   : > { %v2391_v23 = vmul.f32 %v7261_v17, %v8863_v41  ;;  %v7039_v41 = vld [vmem:[#allocation23 + $0x48] sm:$0xff]  }
 0xbfc   : > { %v2399_v28 = vmul.f32 %v5931_v61, %v2391_v23 }
 0xbfd   : > { %v7263_v25 = vpop.eup %7262 }
 0xbfe   : > { %v2392_v26 = vmul.f32 %v7263_v25, %v8866_v46  ;;  %v2407_v31 = vadd.f32 %v5932_v29, %v2399_v28  ;;  %v7041_v46 = vld [vmem:[#allocation23 + $0x8] sm:$0xff]  }
 0xc00   : > { %v2400_v30 = vmul.f32 %v5931_v61, %v2392_v26 }
 0xc02   : > { %v2408_v1 = vadd.f32 %v5932_v29, %v2400_v30 }
 0xc04   : > { %v2409_v33 = vpack.c.bf16 %v2408_v1, %v2407_v31 }
 0xc06   : > { %2657 = vmatmul.mubr.bf16.vlgmr.msra.gmra.mrb[32].mxu0 %v2409_v33  ;;  %2700 = vmatmul.mubr.bf16.vlgmr.msra.gmra.mrb[48].mxu1 %v2409_v33 }
 0xc07   : > { %6274 = vmatpush3.bf16.msra.mxu1 %v7036_v35  ;;  %6252 = vmatpush3.bf16.msra.mxu0 %v7037_v36 }
 0xc08   : > { %6275 = vmatprep.subr.bf16.mxu1 %v7038_v39  ;;  %6253 = vmatprep.subr.bf16.mxu0 %v7039_v41 }
 0xc0b   : > { %6276 = vmatpush3.bf16.msra.mxu1 %v7040_v43  ;;  %6254 = vmatpush3.bf16.msra.mxu0 %v7041_v46 }
 0xc0c   : > { %6277 = vmatprep.subr.bf16.mxu1 %v7042_v48  ;;  %6255 = vmatprep.subr.bf16.mxu0 %v7043_v49 }
 0xc0f   : > { %6278 = vmatpush3.bf16.msra.mxu1 %v7044_v50  ;;  %6256 = vmatpush3.bf16.msra.mxu0 %v7045_v51 }
 0xc10   : > { %6279 = vmatprep.subr.bf16.mxu1 %v7046_v52  ;;  %6257 = vmatprep.subr.bf16.mxu0 %v7047_v53 }
 0xc13   : > { %6280 = vmatpush3.bf16.msra.mxu1 %v7048_v54  ;;  %6258 = vmatpush3.bf16.msra.mxu0 %v7049_v55 }
 0xc14   : > { %6281 = vmatprep.subr.bf16.mxu1 %v7050_v56  ;;  %6259 = vmatprep.subr.bf16.mxu0 %v7051_v57 }
 0xc17   : > { %6282 = vmatpush3.bf16.msra.mxu1 %v7052_v58  ;;  %6260 = vmatpush3.bf16.msra.mxu0 %v7053_v59 }
 0xc18   : > { %6283 = vmatprep.subr.bf16.mxu1 %v7054_v60  ;;  %6261 = vmatprep.subr.bf16.mxu0 %v7055_v18 }
 0xc1b   : > { %6284 = vmatpush3.bf16.msra.mxu1 %v7056_v62  ;;  %6262 = vmatpush3.bf16.msra.mxu0 %v7057_v63 }
 0xc1c   : > { %6285 = vmatprep.subr.bf16.mxu1 %v7058_v0  ;;  %6263 = vmatprep.subr.bf16.mxu0 %v7059_v2 }
 0xc1f   : > { %6286 = vmatpush3.bf16.msra.mxu1 %v7060_v4  ;;  %6264 = vmatpush3.bf16.msra.mxu0 %v7061_v5 }
 0xc20   : > { %6287 = vmatprep.subr.bf16.mxu1 %v7062_v7  ;;  %6265 = vmatprep.subr.bf16.mxu0 %v7063_v8 }
 0xc23   : > { %6288 = vmatpush3.bf16.msra.mxu1 %v7064_v9  ;;  %6266 = vmatpush3.bf16.msra.mxu0 %v7065_v11 }
 0xc24   : > { %6534 = vmatprep.subr.bf16.mxu0 %v7946_v6  ;;  %3428 = vmatprep.subr.bf16.mxu1 %v7068_v3 }
 0xcd9   : > { %v2658_v17 = vpop.f32.mrb[32].mxu0  ;;  %v2701_v23 = vpop.f32.mrb[48].mxu1 }
 0xcda   : > { %v8955_v61 = vadd.f32 %v2658_v17, %v2447_v16  ;;  %v8957_v25 = vadd.f32 %v2701_v23, %v2455_v12  ;;  %v2660_v26 = vpop.f32.mrb[33].mxu0  ;;  %v2703_v28 = vpop.f32.mrb[49].mxu1 }
 0xcdb   : > { %v8959_v29 = vadd.f32 %v2660_v26, %v2451_v21  ;;  %v8961_v30 = vadd.f32 %v2703_v28, %v2459_v22  ;;  %v2662_v31 = vpop.f32.mrb[34].mxu0  ;;  %v2705_v1 = vpop.f32.mrb[50].mxu1 }
 0xcdc   : > { %v2710_v33 = vmul.f32 %v8955_v61, %v8955_v61  ;;  %v2712_v32 = vmul.f32 %v8957_v25, %v8957_v25  ;;  %v8967_v34 = vadd.f32 %v2662_v31, %v2447_v16  ;;  %v8969_v35 = vadd.f32 %v2705_v1, %v2455_v12  ;;  %v2664_v36 = vpop.f32.mrb[35].mxu0  ;;  %v2707_v39 = vpop.f32.mrb[51].mxu1 }
 0xcdd   : > { %v2711_v41 = vmul.f32 %v8959_v29, %v8959_v29  ;;  %v2713_v43 = vmul.f32 %v8961_v30, %v8961_v30  ;;  %v8975_v46 = vadd.f32 %v2664_v36, %v2451_v21  ;;  %v8977_v48 = vadd.f32 %v2707_v39, %v2459_v22 }
 0xcde   : > { %v2718_v49 = vmul.f32 %v2710_v33, %v8955_v61  ;;  %v2720_v50 = vmul.f32 %v2712_v32, %v8957_v25  ;;  %v2714_v51 = vmul.f32 %v8967_v34, %v8967_v34  ;;  %v2716_v52 = vmul.f32 %v8969_v35, %v8969_v35 }
 0xcdf   : > { %v2719_v53 = vmul.f32 %v2711_v41, %v8959_v29  ;;  %v2721_v54 = vmul.f32 %v2713_v43, %v8961_v30  ;;  %v2715_v55 = vmul.f32 %v8975_v46, %v8975_v46  ;;  %v2717_v56 = vmul.f32 %v8977_v48, %v8977_v48 }
 0xce0   : > { %v2726_v57 = vmul.f32 0.044715, %v2718_v49  ;;  %v2728_v58 = vmul.f32 0.044715, %v2720_v50  ;;  %v2722_v59 = vmul.f32 %v2714_v51, %v8967_v34  ;;  %v2724_v60 = vmul.f32 %v2716_v52, %v8969_v35 }
 0xce1   : > { %v2727_v18 = vmul.f32 0.044715, %v2719_v53  ;;  %v2729_v62 = vmul.f32 0.044715, %v2721_v54  ;;  %v2723_v63 = vmul.f32 %v2715_v55, %v8975_v46  ;;  %v2725_v0 = vmul.f32 %v2717_v56, %v8977_v48 }
 0xce2   : > { %v2734_v2 = vadd.f32 %v2726_v57, %v8955_v61  ;;  %v2736_v4 = vadd.f32 %v2728_v58, %v8957_v25  ;;  %v2730_v5 = vmul.f32 0.044715, %v2722_v59  ;;  %v2732_v7 = vmul.f32 0.044715, %v2724_v60 }
 0xce3   : > { %v2735_v8 = vadd.f32 %v2727_v18, %v8959_v29  ;;  %v2737_v9 = vadd.f32 %v2729_v62, %v8961_v30  ;;  %v2731_v11 = vmul.f32 0.044715, %v2723_v63  ;;  %v2733_v3 = vmul.f32 0.044715, %v2725_v0 }
 0xce4   : > { %v2742_v10 = vmul.f32 0.7978846, %v2734_v2  ;;  %v2744_v16 = vmul.f32 0.7978846, %v2736_v4  ;;  %v2738_v12 = vadd.f32 %v2730_v5, %v8967_v34  ;;  %v2740_v21 = vadd.f32 %v2732_v7, %v8969_v35 }
 0xce5   : > { %v2743_v22 = vmul.f32 0.7978846, %v2735_v8  ;;  %v2745_v17 = vmul.f32 0.7978846, %v2737_v9  ;;  %v2739_v23 = vadd.f32 %v2731_v11, %v8975_v46  ;;  %v2741_v26 = vadd.f32 %v2733_v3, %v8977_v48 }
 0xce6   : > { %7264 = vtanh.f32 %v2742_v10  ;;  %v2746_v28 = vmul.f32 0.7978846, %v2738_v12  ;;  %v2748_v31 = vmul.f32 0.7978846, %v2740_v21 }
 0xce7   : > { %7266 = vtanh.f32 %v2744_v16  ;;  %v2747_v1 = vmul.f32 0.7978846, %v2739_v23  ;;  %v2749_v33 = vmul.f32 0.7978846, %v2741_v26  ;;  %v7066_v23 = vld [vmem:[#allocation13 + $0x80] ss:$8 sps:$4 sm:$0xff]  }
 0xce8   : > { %7268 = vtanh.f32 %v2743_v22  ;;  %v7078_v26 = vld [vmem:[#allocation13 + $0xc0] ss:$8 sps:$4 sm:$0xff]  }
 0xce9   : > { %7270 = vtanh.f32 %v2745_v17 }
 0xcea   : > { %7272 = vtanh.f32 %v2746_v28  ;;  %v7083_v28 = vld [vmem:[#allocation13 + $0xd4] ss:$8 sps:$4 sm:$0xff]  }
 0xceb   : > { %7274 = vtanh.f32 %v2748_v31  ;;  %v7081_v31 = vld [vmem:[#allocation13 + $0xd0] ss:$8 sps:$4 sm:$0xff]  }
 0xcec   : > { %7276 = vtanh.f32 %v2747_v1  ;;  %v7086_v1 = vld [vmem:[#allocation13 + $0xe4] ss:$8 sps:$4 sm:$0xff]  }
 0xced   : > { %7278 = vtanh.f32 %v2749_v33  ;;  %v7084_v33 = vld [vmem:[#allocation13 + $0xe0] ss:$8 sps:$4 sm:$0xff]  }
 0xcf0   : > { %v7265_v32 = vpop.eup %7264 }
 0xcf1   : > { %v7267_v36 = vpop.eup %7266  ;;  %v2758_v39 = vadd.f32 1.0, %v7265_v32  ;;  %v7089_v32 = vld [vmem:[#allocation13 + $0xf4] ss:$8 sps:$4 sm:$0xff]  }
 0xcf2   : > { %v7269_v41 = vpop.eup %7268  ;;  %v2760_v43 = vadd.f32 1.0, %v7267_v36  ;;  %v7087_v36 = vld [vmem:[#allocation13 + $0xf0] ss:$8 sps:$4 sm:$0xff]  }
 0xcf3   : > { %v7271_v49 = vpop.eup %7270  ;;  %v2759_v50 = vadd.f32 1.0, %v7269_v41  ;;  %v2766_v54 = vmul.f32 0.5, %v2758_v39 }
 0xcf4   : > { %v7273_v51 = vpop.eup %7272  ;;  %v2761_v52 = vadd.f32 1.0, %v7271_v49  ;;  %v2768_v57 = vmul.f32 0.5, %v2760_v43 }
 0xcf5   : > { %v7275_v53 = vpop.eup %7274  ;;  %v2762_v55 = vadd.f32 1.0, %v7273_v51  ;;  %v2767_v62 = vmul.f32 0.5, %v2759_v50  ;;  %v2774_v4 = vmul.f32 %v2766_v54, %v8955_v61 }
 0xcf6   : > { %v7277_v56 = vpop.eup %7276  ;;  %v2764_v58 = vadd.f32 1.0, %v7275_v53  ;;  %v2769_v2 = vmul.f32 0.5, %v2761_v52  ;;  %v2776_v8 = vmul.f32 %v2768_v57, %v8957_v25  ;;  %v7069_v25 = vld [vmem:[#allocation13 + $0x90] ss:$8 sps:$4 sm:$0xff]  }
 0xcf7   : > { %v7279_v59 = vpop.eup %7278  ;;  %v2770_v60 = vmul.f32 0.5, %v2762_v55  ;;  %v2763_v18 = vadd.f32 1.0, %v7277_v56  ;;  %v2775_v3 = vmul.f32 %v2767_v62, %v8959_v29  ;;  %v7074_v29 = vld [vmem:[#allocation13 + $0xa4] ss:$8 sps:$4 sm:$0xff]   ;;  %v5997_v56 = vld [vmem:[#allocation25] ss:$0 sm:$0xff] }
 0xcf8   : > { %v2772_v63 = vmul.f32 0.5, %v2764_v58  ;;  %v2765_v0 = vadd.f32 1.0, %v7279_v59  ;;  %v2777_v12 = vmul.f32 %v2769_v2, %v8961_v30  ;;  %v7072_v30 = vld [vmem:[#allocation13 + $0xa0] ss:$8 sps:$4 sm:$0xff]   ;;  %v7091_v2 = vld [vmem:[%s9639_s23 + $0x48] sm:$0xff]  }
 0xcf9   : > { %v2778_v5 = vmul.f32 %v2770_v60, %v8967_v34  ;;  %v2771_v7 = vmul.f32 0.5, %v2763_v18  ;;  %v7071_v34 = vld [vmem:[#allocation13 + $0x94] ss:$8 sps:$4 sm:$0xff]   ;;  %v3336_v59 = vld [vmem:[#allocation14 + $0x2] sm:$0x3] }
 0xcfa   : > { %v2780_v9 = vmul.f32 %v2772_v63, %v8969_v35  ;;  %v2773_v11 = vmul.f32 0.5, %v2765_v0  ;;  %v7077_v35 = vld [vmem:[#allocation13 + $0xb4] ss:$8 sps:$4 sm:$0xff]   ;;  %v3345_v60 = vrot.slane %v3336_v59, %v8680_v47  ;;  %v3341_v18 = vrot.slane %v3336_v59, %v8677_v45 }
 0xcfb   : > { %v2779_v10 = vmul.f32 %v2771_v7, %v8975_v46  ;;  %v2782_v16 = vpack.c.bf16 %v2778_v5, %v2774_v4  ;;  %v7075_v46 = vld [vmem:[#allocation13 + $0xb0] ss:$8 sps:$4 sm:$0xff]  }
 0xcfc   : > { %v2781_v21 = vmul.f32 %v2773_v11, %v8977_v48  ;;  %v2784_v22 = vpack.c.bf16 %v2780_v9, %v2776_v8  ;;  %v7080_v48 = vld [vmem:[#allocation13 + $0xc4] ss:$8 sps:$4 sm:$0xff]  }
 0xcfd   : > { %v2783_v17 = vpack.c.bf16 %v2779_v10, %v2775_v3  ;;  %v7092_v3 = vld [vmem:[%s9639_s23 + $0x50] sm:$0xff]  }
 0xcfe   : > { %v2785_v61 = vpack.c.bf16 %v2781_v21, %v2777_v12 }
 0xcff   : > { %3074 = vmatprep.mubr.bf16.mxu0 %v2783_v17 }
 0xd00   : > { %3115 = vmatprep.mubr.bf16.mxu1 %v2785_v61  ;;  %3075 = vmatmul.mubr.bf16.vlgmr.msra.gmra.mrb[36].mxu0 %v2782_v16 }
 0xd01   : > { %3116 = vmatmul.mubr.bf16.vlgmr.msra.gmra.mrb[52].mxu1 %v2784_v22  ;;  %6550 = vmatprep.mubr.msk.bf16.mxu0 %vm7947_vm0, %v7946_v6 }
 0xd02   : > { %3429 = vmatpush1.bf16.msra.mxu1 %v7066_v23  ;;  %3460 = vmatprep.mubr.bf16.mxu1 %v7948_v37 }
 0xd03   : > { %3430 = vmatprep.subr.bf16.mxu1 %v7071_v34 }
 0xd06   : > { %3431 = vmatpush1.bf16.msra.mxu1 %v7069_v25 }
 0xd07   : > { %3432 = vmatprep.subr.bf16.mxu1 %v7074_v29 }
 0xd0a   : > { %3433 = vmatpush1.bf16.msra.mxu1 %v7072_v30 }
 0xd0b   : > { %3434 = vmatprep.subr.bf16.mxu1 %v7077_v35 }
 0xd0e   : > { %3435 = vmatpush1.bf16.msra.mxu1 %v7075_v46 }
 0xd0f   : > { %3436 = vmatprep.subr.bf16.mxu1 %v7080_v48 }
 0xd12   : > { %3437 = vmatpush1.bf16.msra.mxu1 %v7078_v26 }
 0xd13   : > { %3438 = vmatprep.subr.bf16.mxu1 %v7083_v28 }
 0xd16   : > { %3439 = vmatpush1.bf16.msra.mxu1 %v7081_v31 }
 0xd17   : > { %3440 = vmatprep.subr.bf16.mxu1 %v7086_v1  ;;  %v7093_v1 = vld [vmem:[%s9639_s23 + $0x58] sm:$0xff]  }
 0xd1a   : > { %3441 = vmatpush1.bf16.msra.mxu1 %v7084_v33  ;;  %v7094_v33 = vld [vmem:[%s9639_s23 + $0x60] sm:$0xff]  }
 0xd1b   : > { %3442 = vmatprep.subr.bf16.mxu1 %v7089_v32  ;;  %v7095_v32 = vld [vmem:[%s9639_s23 + $0x68] sm:$0xff]  }
 0xd1e   : > { %3443 = vmatpush1.bf16.msra.mxu1 %v7087_v36  ;;  %v7096_v36 = vld [vmem:[%s9639_s23 + $0x70] sm:$0xff]  }
 0xd1f   : > { %6584 = vmatprep.subr.bf16.mxu1 %v7946_v6 }
 0xd21   : > { %3461 = vmatmul.mubr.bf16.vlgmr.msra.gmra.mrb[56].mxu1 %v3316_v13 }
 0xd22   : > { %3470 = vmatprep.mubr.bf16.mxu1 %v7948_v37 }
 0xd29   : > { %3471 = vmatmul.mubr.bf16.gmra.mrb[60].mxu1 %v3317_v42 }
 0xd2a   : > { %6586 = vmatprep.mubr.msk.bf16.mxu1 %vm7947_vm0, %v7946_v6 }
 0xdd3   : > { %v6267_v39 = vpop.f32.mrb[36].mxu0 }
 0xdd4   : > { %v6289_v41 = vpop.f32.mrb[52].mxu1  ;;  %v6268_v43 = vpop.f32.mrb[37].mxu0 }
 0xdd5   : > { %v6269_v49 = vadd.f32 %v6268_v43, %v6267_v39  ;;  %v6290_v50 = vpop.f32.mrb[53].mxu1  ;;  %v6270_v51 = vpop.f32.mrb[38].mxu0  ;;  %v7097_v39 = vld [vmem:[%s9639_s23 + $0x78] sm:$0xff]  }
 0xdd6   : > { %v6291_v52 = vadd.f32 %v6290_v50, %v6289_v41  ;;  %v6292_v53 = vpop.f32.mrb[54].mxu1  ;;  %v6271_v54 = vpop.f32.mrb[39].mxu0 }
 0xdd7   : > { %v6272_v19 = vadd.f32 %v6271_v54, %v6270_v51  ;;  %v6293_v20 = vpop.f32.mrb[55].mxu1  ;;  %v5998_v54 = vld [vmem:[#allocation5 + $0x1] ss:$0 sm:$0xff] }
 0xdd8   : > { %v3118_v13 = vadd.f32 %v6291_v52, %v6269_v49  ;;  %v6294_v55 = vadd.f32 %v6293_v20, %v6292_v53 }
 0xdda   : > { %v3124_v38 = vadd.f32 %v3118_v13, %v8832_v24  ;;  %v3121_v40 = vadd.f32 %v6294_v55, %v6272_v19  ;;  %v7090_v24 = vld [vmem:[%s9639_s23 + $0x40] sm:$0xff]  }
 0xddb   : > { %6535 = vmatpush3.bf16.msra.mxu0 %v7090_v24 }
 0xddc   : > { %v3125_v42 = vadd.f32 %v3121_v40, %v8834_v27  ;;  %v9026_v57 = vadd.f32 %v5997_v56, %v3124_v38  ;;  %6536 = vmatprep.subr.bf16.mxu0 %v7946_v6 }
 0xdde   : > { %3139 = vadd.xlane.f32.xlu1 %v9026_v57  ;;  %v9029_v58 = vadd.f32 %v5997_v56, %v3125_v42  ;;  %v5999_v56 = vld [vmem:[#allocation7 + $0x1] ss:$0 sm:$0xff] }
 0xddf   : > { %6537 = vmatpush3.bf16.msra.mxu0 %v7091_v2 }
 0xde0   : > { %3141 = vadd.xlane.f32.xlu0 %v9029_v58  ;;  %6538 = vmatprep.subr.bf16.mxu0 %v7946_v6 }
 0xde3   : > { %6539 = vmatpush3.bf16.msra.mxu0 %v7092_v3 }
 0xde4   : > { %6540 = vmatprep.subr.bf16.mxu0 %v7946_v6 }
 0xde7   : > { %6541 = vmatpush3.bf16.msra.mxu0 %v7093_v1 }
 0xde8   : > { %6542 = vmatprep.subr.bf16.mxu0 %v7946_v6 }
 0xdeb   : > { %6543 = vmatpush3.bf16.msra.mxu0 %v7094_v33 }
 0xdec   : > { %6544 = vmatprep.subr.bf16.mxu0 %v7946_v6 }
 0xdef   : > { %6545 = vmatpush3.bf16.msra.mxu0 %v7095_v32 }
 0xdf0   : > { %6546 = vmatprep.subr.bf16.mxu0 %v7946_v6 }
 0xdf3   : > { %6547 = vmatpush3.bf16.msra.mxu0 %v7096_v36 }
 0xdf4   : > { %v3462_v62 = vpop.f32.mrb[56].mxu1  ;;  %6548 = vmatprep.subr.bf16.mxu0 %v7946_v6 }
 0xdf5   : > { %v3464_v63 = vpop.f32.mrb[57].mxu1  ;;  %v3463_v4 = vadd.f32 %v3462_v62, %v3341_v18 }
 0xdf6   : > { %v3465_v27 = vadd.f32 %v3464_v63, %v3345_v60  ;;  %v3466_v0 = vpop.f32.mrb[58].mxu1 }
 0xdf7   : > { %v3467_v5 = vadd.f32 %v3466_v0, %v3341_v18  ;;  %v3468_v7 = vpop.f32.mrb[59].mxu1  ;;  %6549 = vmatpush3.bf16.msra.mxu0 %v7097_v39 }
 0xdf8   : > { %v3469_v8 = vadd.f32 %v3468_v7, %v3345_v60  ;;  %6554 = vmatprep.subr.bf16.mxu0 %v7946_v6 }
 0xdf9   : > { %v9041_v9 = vpack.c.bf16 %v3467_v5, %v3463_v4 }
 0xdfa   : > { %v9043_v11 = vpack.c.bf16 %v3469_v8, %v3465_v27 }
 0xdfc   : > { %v3472_v10 = vpop.f32.mrb[60].mxu1 }
 0xdfd   : > { %v3473_v16 = vadd.f32 %v3472_v10, %v3341_v18  ;;  %v3474_v12 = vpop.f32.mrb[61].mxu1 }
 0xdfe   : > { %v3475_v21 = vadd.f32 %v3474_v12, %v3345_v60  ;;  %v3476_v22 = vpop.f32.mrb[62].mxu1 }
 0xdff   : > { %v3477_v17 = vadd.f32 %v3476_v22, %v3341_v18  ;;  %v3478_v61 = vpop.f32.mrb[63].mxu1  ;;  %v6018_v18 = vld [vmem:[#allocation11 + $0x1] ss:$0 sm:$0xff] }
 0xe00   : > { %v3479_v23 = vadd.f32 %v3478_v61, %v3345_v60  ;;  %v3487_v60 = vsel %vm1350_vm1, %v9041_v9, 0 }
 0xe01   : > { %v9050_v34 = vpack.c.bf16 %v3477_v17, %v3473_v16 }
 0xe02   : > { %v9052_v25 = vpack.c.bf16 %v3479_v23, %v3475_v21 }
 0xe6b   : > { %v3140_v29 = vpop.xlane.xlu1 %3139 }
 0xe6c   : > { %v3143_v30 = vmul.f32 0.0078125, %v3140_v29 }
 0xe6d   : > { %v3142_v35 = vpop.xlane.xlu0 %3141 }
 0xe6e   : > { %v3145_v46 = vsub.f32 %v9026_v57, %v3143_v30  ;;  %v3144_v48 = vmul.f32 0.0078125, %v3142_v35 }
 0xe70   : > { %v3146_v26 = vsub.f32 %v9029_v58, %v3144_v48  ;;  %v3147_v28 = vmul.f32 %v3145_v46, %v3145_v46 }
 0xe72   : > { %3149 = vadd.xlane.f32.xlu1 %v3147_v28  ;;  %v3148_v31 = vmul.f32 %v3146_v26, %v3146_v26 }
 0xe74   : > { %3151 = vadd.xlane.f32.xlu0 %v3148_v31 }
 0xeff   : > { %v3150_v41 = vpop.xlane.xlu1 %3149 }
 0xf00   : > { %v3153_v43 = vmul.f32 0.0078125, %v3150_v41 }
 0xf01   : > { %v3152_v49 = vpop.xlane.xlu0 %3151 }
 0xf02   : > { %v3155_v50 = vadd.f32 1e-05, %v3153_v43  ;;  %v3154_v51 = vmul.f32 0.0078125, %v3152_v49 }
 0xf04   : > { %7280 = vrsqrt.f32 %v3155_v50  ;;  %v3156_v52 = vadd.f32 1e-05, %v3154_v51 }
 0xf06   : > { %7282 = vrsqrt.f32 %v3156_v52 }
 0xf0e   : > { %v7281_v53 = vpop.eup %7280 }
 0xf0f   : > { %v3159_v19 = vmul.f32 %v7281_v53, %v3145_v46 }
 0xf10   : > { %v7283_v20 = vpop.eup %7282 }
 0xf11   : > { %v3160_v13 = vmul.f32 %v7283_v20, %v3146_v26  ;;  %v3167_v55 = vmul.f32 %v5998_v54, %v3159_v19 }
 0xf13   : > { %v3168_v38 = vmul.f32 %v5998_v54, %v3160_v13  ;;  %v3175_v40 = vadd.f32 %v5999_v56, %v3167_v55 }
 0xf15   : > { %v3176_v42 = vadd.f32 %v5999_v56, %v3168_v38 }
 0xf17   : > { %v3201_v59 = vpack.c.bf16 %v3176_v42, %v3175_v40 }
 0xf19   : > { %6551 = vmatmul.mubr.bf16.vlgmr.msra.gmra.mrb[40].mxu0 %v3201_v59 }
 0xf1a   : > { %6555 = vmatpush3.bf16.xpose.msra.mxu0 %v3487_v60  ;;  %6556 = vmatprep.mubr.msk.bf16.mxu0 %vm7947_vm0, %v7946_v6 }
 0xf1b   : > { %6560 = vmatprep.subr.bf16.mxu0 %v7946_v6 }
 0xfec   : > { %v3309_v62 = vpop.f32.mrb[40].mxu0 }
 0xfed   : > { %v3310_v24 = vadd.f32 %v6018_v18, %v3309_v62  ;;  %v6552_v63 = vpop.f32.mrb[41].mxu0  ;;  %v3937_v62 = vsel %vm1350_vm1, %v9050_v34, 0 }
 0xfee   : > { %v3312_v27 = vpop.f32.mrb[42].mxu0 }
 0xfef   : > { %v3481_v0 = vpack.c.bf16 %v3310_v24, %v3310_v24  ;;  %v3313_v2 = vadd.f32 %v6018_v18, %v3312_v27  ;;  %v6553_v4 = vpop.f32.mrb[43].mxu0 }
 0xff1   : > { %6557 = vmatmul.mubr.msk.bf16.vlgmr.msra.gmra.mrb[44].mxu0 %vm1350_vm1, %v3481_v0  ;;  %v3931_v50 = vpack.c.bf16 %v3313_v2, %v3313_v2 }
 0xff2   : > { %6561 = vmatpush3.bf16.msra.mxu0 %v9043_v11  ;;  %6562 = vmatprep.mubr.msk.bf16.mxu0 %vm7947_vm0, %v7946_v6 }
 0xff3   : > { %6566 = vmatprep.subr.bf16.mxu0 %v7946_v6 }
0x10c4   : > { %v3523_v5 = vpop.f32.mrb[44].mxu0 }
0x10c5   : > { %v3529_v7 = vmul.f32 0.17677669, %v3523_v5  ;;  %v6558_v8 = vpop.f32.mrb[45].mxu0 }
0x10c6   : > { %v3526_v3 = vpop.f32.mrb[46].mxu0 }
0x10c7   : > { %v6559_v10 = vpop.f32.mrb[47].mxu0  ;;  %v3530_v16 = vsel %vm1398_vm2, %v3529_v7, -inf }
0x10c8   : > { %3531 = vmax.xlane.f32.xlu1 %v3530_v16 }
0x10d9   : > { %3590 = vrot.lane.b32.xlu1 %v9041_v9, %s7949_s30 }
0x1155   : > { %v3532_v12 = vpop.xlane.xlu1 %3531 }
0x1156   : > { %v3533_v21 = vsub.f32 %v3529_v7, %v3532_v12 }
0x1158   : > { %v3534_v22 = vmul.f32 1.442695, %v3533_v21 }
0x1159   : > { %v3591_v35 = vpop.permute.xlu1 %3590 }
0x115a   : > { %7284 = vpow2.f32 %v3534_v22  ;;  %v3596_v48 = vsel %vm1350_vm1, %v3591_v35, 0 }
0x1164   : > { %v7285_v17 = vpop.eup %7284 }
0x1165   : > { %v3536_v61 = vsel %vm1398_vm2, %v7285_v17, 0.0 }
0x1166   : > { %3537 = vadd.xlane.f32.xlu0 %v3536_v61 }
0x117c   : > { %3587 = vrot.lane.b32.xlu0 %v3481_v0, %s7949_s30 }
0x11f3   : > { %v3538_v23 = vpop.xlane.xlu0 %3537 }
0x11f4   : > { %7286 = vrcp.f32 %v3538_v23 }
0x11f7   : > { %v3588_v26 = vpop.permute.xlu0 %3587 }
0x11fe   : > { %v7287_v29 = vpop.eup %7286 }
0x11ff   : > { %v3540_v30 = vmul.f32 %v7287_v29, %v7285_v17 }
0x1201   : > { %v3541_v46 = vpack.c.bf16 %v3540_v30, %v3540_v30 }
0x1203   : > { %6563 = vmatmul.mubr.msk.bf16.vlgmr.msra.gmra.mrb[48].mxu0 %vm1398_vm2, %v3541_v46 }
0x1204   : > { %6567 = vmatpush3.bf16.xpose.msra.mxu0 %v3596_v48  ;;  %6568 = vmatprep.mubr.msk.bf16.mxu0 %vm7947_vm0, %v7946_v6 }
0x1205   : > { %6572 = vmatprep.subr.bf16.mxu0 %v7946_v6 }
0x120b   : > { %6569 = vmatmul.mubr.msk.bf16.vlgmr.msra.gmra.mrb[52].mxu0 %vm1350_vm1, %v3588_v26 }
0x120c   : > { %6574 = vmatprep.mubr.msk.bf16.mxu0 %vm7947_vm0, %v7946_v6 }
0x12d6   : > { %v9099_v28 = vpop.f32.mrb[48].mxu0 }
0x12d7   : > { %v6564_v31 = vpop.f32.mrb[49].mxu0 }
0x12d8   : > { %v3583_v1 = vpop.f32.mrb[50].mxu0 }
0x12d9   : > { %v6565_v33 = vpop.f32.mrb[51].mxu0 }
0x12de   : > { %v3632_v32 = vpop.f32.mrb[52].mxu0 }
0x12df   : > { %v3638_v36 = vmul.f32 0.17677669, %v3632_v32  ;;  %v6570_v39 = vpop.f32.mrb[53].mxu0 }
0x12e0   : > { %v3635_v41 = vpop.f32.mrb[54].mxu0 }
0x12e1   : > { %v6571_v43 = vpop.f32.mrb[55].mxu0  ;;  %v3639_v49 = vsel %vm1398_vm2, %v3638_v36, -inf }
0x12e2   : > { %3640 = vmax.xlane.f32.xlu1 %v3639_v49 }
0x12f3   : > { %3652 = vrot.lane.b32.xlu1 %v9043_v11, %s7949_s30 }
0x12f7   : > { %3698 = vrot.lane.b32.xlu1 %v3481_v0, %s7951_s28 }
0x12fb   : > { %3809 = vrot.lane.b32.xlu1 %v9041_v9, %s7950_s24 }
0x12ff   : > { %3807 = vrot.lane.b32.xlu1 %v3481_v0, %s7950_s24 }
0x1303   : > { %4037 = vrot.lane.b32.xlu1 %v3931_v50, %s7949_s30 }
0x1307   : > { %4148 = vrot.lane.b32.xlu1 %v3931_v50, %s7951_s28 }
0x130b   : > { %4257 = vrot.lane.b32.xlu1 %v3931_v50, %s7950_s24 }
0x136f   : > { %v3641_v51 = vpop.xlane.xlu1 %3640 }
0x1370   : > { %v3642_v52 = vsub.f32 %v3638_v36, %v3641_v51 }
0x1372   : > { %v3643_v53 = vmul.f32 1.442695, %v3642_v52 }
0x1373   : > { %v3653_v54 = vpop.permute.xlu1 %3652 }
0x1374   : > { %7288 = vpow2.f32 %v3643_v53  ;;  %6573 = vmatpush3.bf16.msra.mxu0 %v3653_v54 }
0x1375   : > { %6578 = vmatprep.subr.bf16.mxu0 %v7946_v6 }
0x1377   : > { %v3699_v42 = vpop.permute.xlu1 %3698 }
0x137e   : > { %v7289_v19 = vpop.eup %7288 }
0x137f   : > { %v3645_v20 = vsel %vm1398_vm2, %v7289_v19, 0.0 }
0x1380   : > { %3646 = vadd.xlane.f32.xlu0 %v3645_v20 }
0x1396   : > { %3700 = vrot.lane.b32.xlu0 %v9041_v9, %s7951_s28  ;;  %v3810_v9 = vpop.permute.xlu1 %3809 }
0x1397   : > { %v3815_v60 = vsel %vm1350_vm1, %v3810_v9, 0 }
0x139a   : > { %4040 = vrot.lane.b32.xlu0 %v9050_v34, %s7949_s30  ;;  %v3808_v18 = vpop.permute.xlu1 %3807 }
0x139e   : > { %4150 = vrot.lane.b32.xlu0 %v9050_v34, %s7951_s28  ;;  %v4038_v0 = vpop.permute.xlu1 %4037 }
0x13a2   : > { %4259 = vrot.lane.b32.xlu0 %v9050_v34, %s7950_s24  ;;  %v4149_v4 = vpop.permute.xlu1 %4148 }
0x13a6   : > { %v4258_v7 = vpop.permute.xlu1 %4257 }
0x140d   : > { %v3647_v13 = vpop.xlane.xlu0 %3646 }
0x140e   : > { %7290 = vrcp.f32 %v3647_v13 }
0x1411   : > { %v3701_v38 = vpop.permute.xlu0 %3700 }
0x1412   : > { %v3706_v59 = vsel %vm1350_vm1, %v3701_v38, 0 }
0x1415   : > { %v4041_v24 = vpop.permute.xlu0 %4040 }
0x1416   : > { %v4046_v63 = vsel %vm1350_vm1, %v4041_v24, 0 }
0x1418   : > { %v7291_v55 = vpop.eup %7290 }
0x1419   : > { %v3649_v56 = vmul.f32 %v7291_v55, %v7289_v19  ;;  %v4151_v27 = vpop.permute.xlu0 %4150 }
0x141a   : > { %v4156_v34 = vsel %vm1350_vm1, %v4151_v27, 0 }
0x141b   : > { %v3650_v40 = vpack.c.bf16 %v3649_v56, %v3649_v56 }
0x141d   : > { %6575 = vmatmul.mubr.msk.bf16.vlgmr.msra.gmra.mrb[56].mxu0 %vm1398_vm2, %v3650_v40  ;;  %v4260_v2 = vpop.permute.xlu0 %4259 }
0x141e   : > { %6579 = vmatpush3.bf16.xpose.msra.mxu0 %v3706_v59  ;;  %6580 = vmatprep.mubr.msk.bf16.mxu0 %vm7947_vm0, %v7946_v6  ;;  %v4265_v5 = vsel %vm1350_vm1, %v4260_v2, 0 }
0x141f   : > { %6590 = vmatprep.subr.bf16.mxu0 %v7946_v6 }
0x1425   : > { %6581 = vmatmul.mubr.msk.bf16.vlgmr.msra.gmra.mrb[60].mxu0 %vm1350_vm1, %v3699_v42 }
0x1426   : > { %6591 = vmatpush3.bf16.xpose.msra.mxu0 %v3815_v60  ;;  %6592 = vmatprep.mubr.msk.bf16.mxu0 %vm7947_vm0, %v7946_v6 }
0x1427   : > { %6602 = vmatprep.subr.bf16.mxu0 %v7946_v6 }
0x142d   : > { %6593 = vmatmul.mubr.msk.bf16.vlgmr.msra.gmra.mrb[64].mxu0 %vm1350_vm1, %v3808_v18 }
0x142e   : > { %6603 = vmatpush3.bf16.xpose.msra.mxu0 %v3937_v62  ;;  %6604 = vmatprep.mubr.msk.bf16.mxu0 %vm7947_vm0, %v7946_v6 }
0x142f   : > { %6614 = vmatprep.subr.bf16.mxu0 %v7946_v6 }
0x1435   : > { %6605 = vmatmul.mubr.msk.bf16.vlgmr.msra.gmra.mrb[68].mxu0 %vm1350_vm1, %v3931_v50 }
0x1436   : > { %6615 = vmatpush3.bf16.xpose.msra.mxu0 %v4046_v63  ;;  %6616 = vmatprep.mubr.msk.bf16.mxu0 %vm7947_vm0, %v7946_v6 }
0x1437   : > { %6626 = vmatprep.subr.bf16.mxu0 %v7946_v6 }
0x143d   : > { %6617 = vmatmul.mubr.msk.bf16.vlgmr.msra.gmra.mrb[72].mxu0 %vm1350_vm1, %v4038_v0 }
0x143e   : > { %6627 = vmatpush3.bf16.xpose.msra.mxu0 %v4156_v34  ;;  %6628 = vmatprep.mubr.msk.bf16.mxu0 %vm7947_vm0, %v7946_v6 }
0x143f   : > { %6638 = vmatprep.subr.bf16.mxu0 %v7946_v6 }
0x1445   : > { %6629 = vmatmul.mubr.msk.bf16.vlgmr.msra.gmra.mrb[76].mxu0 %vm1350_vm1, %v4149_v4 }
0x1446   : > { %6639 = vmatpush3.bf16.xpose.msra.mxu0 %v4265_v5  ;;  %6640 = vmatprep.mubr.msk.bf16.mxu0 %vm7947_vm0, %v7946_v6 }
0x1447   : > { %6650 = vmatprep.subr.bf16.mxu0 %v7946_v6 }
0x144d   : > { %6641 = vmatmul.mubr.msk.bf16.vlgmr.msra.gmra.mrb[80].mxu0 %vm1350_vm1, %v4258_v7 }
0x144e   : > { %6666 = vmatprep.mubr.msk.bf16.mxu0 %vm7947_vm0, %v7946_v6 }
0x14f0   : > { %v9155_v8 = vpop.f32.mrb[56].mxu0 }
0x14f1   : > { %v6576_v3 = vpop.f32.mrb[57].mxu0 }
0x14f2   : > { %v3695_v10 = vpop.f32.mrb[58].mxu0 }
0x14f3   : > { %v6577_v16 = vpop.f32.mrb[59].mxu0 }
0x14f8   : > { %v3742_v12 = vpop.f32.mrb[60].mxu0 }
0x14f9   : > { %v3748_v21 = vmul.f32 0.17677669, %v3742_v12  ;;  %v6582_v22 = vpop.f32.mrb[61].mxu0 }
0x14fa   : > { %v3745_v17 = vpop.f32.mrb[62].mxu0 }
0x14fb   : > { %v6583_v61 = vpop.f32.mrb[63].mxu0  ;;  %v3749_v23 = vsel %vm1398_vm2, %v3748_v21, -inf }
0x14fc   : > { %3750 = vmax.xlane.f32.xlu0 %v3749_v23 }
0x1500   : > { %v3851_v29 = vpop.f32.mrb[64].mxu0 }
0x1501   : > { %v3857_v30 = vmul.f32 0.17677669, %v3851_v29  ;;  %v6594_v35 = vpop.f32.mrb[65].mxu0 }
0x1502   : > { %v3854_v46 = vpop.f32.mrb[66].mxu0 }
0x1503   : > { %v6595_v48 = vpop.f32.mrb[67].mxu0  ;;  %v3858_v26 = vsel %vm1398_vm2, %v3857_v30, -inf }
0x1504   : > { %3859 = vmax.xlane.f32.xlu1 %v3858_v26 }
0x1508   : > { %v3973_v31 = vpop.f32.mrb[68].mxu0 }
0x1509   : > { %v3979_v1 = vmul.f32 0.17677669, %v3973_v31  ;;  %v6606_v33 = vpop.f32.mrb[69].mxu0 }
0x150a   : > { %v3976_v32 = vpop.f32.mrb[70].mxu0 }
0x150b   : > { %v6607_v36 = vpop.f32.mrb[71].mxu0  ;;  %v3980_v39 = vsel %vm1398_vm2, %v3979_v1, -inf }
0x150c   : > { %3981 = vmax.xlane.f32.xlu0 %v3980_v39 }
0x1510   : > { %v4082_v41 = vpop.f32.mrb[72].mxu0 }
0x1511   : > { %v4088_v43 = vmul.f32 0.17677669, %v4082_v41  ;;  %v6618_v49 = vpop.f32.mrb[73].mxu0 }
0x1512   : > { %v4085_v50 = vpop.f32.mrb[74].mxu0 }
0x1513   : > { %v6619_v51 = vpop.f32.mrb[75].mxu0  ;;  %v4089_v52 = vsel %vm1398_vm2, %v4088_v43, -inf }
0x1514   : > { %4090 = vmax.xlane.f32.xlu0 %v4089_v52 }
0x1518   : > { %v4192_v53 = vpop.f32.mrb[76].mxu0 }
0x1519   : > { %v4198_v54 = vmul.f32 0.17677669, %v4192_v53  ;;  %v6630_v19 = vpop.f32.mrb[77].mxu0 }
0x151a   : > { %v4195_v20 = vpop.f32.mrb[78].mxu0 }
0x151b   : > { %v6631_v13 = vpop.f32.mrb[79].mxu0  ;;  %v4199_v55 = vsel %vm1398_vm2, %v4198_v54, -inf }
0x151c   : > { %4200 = vmax.xlane.f32.xlu0 %v4199_v55 }
0x1520   : > { %v4301_v56 = vpop.f32.mrb[80].mxu0 }
0x1521   : > { %v4307_v38 = vmul.f32 0.17677669, %v4301_v56  ;;  %v6642_v40 = vpop.f32.mrb[81].mxu0 }
0x1522   : > { %v4304_v42 = vpop.f32.mrb[82].mxu0 }
0x1523   : > { %v6643_v59 = vpop.f32.mrb[83].mxu0  ;;  %v4308_v9 = vsel %vm1398_vm2, %v4307_v38, -inf }
0x1524   : > { %4309 = vmax.xlane.f32.xlu1 %v4308_v9 }
0x1589   : > { %v3751_v60 = vpop.xlane.xlu0 %3750 }
0x158a   : > { %v3752_v18 = vsub.f32 %v3748_v21, %v3751_v60 }
0x158c   : > { %v3753_v62 = vmul.f32 1.442695, %v3752_v18 }
0x158e   : > { %7292 = vpow2.f32 %v3753_v62 }
0x1591   : > { %v3860_v24 = vpop.xlane.xlu1 %3859 }
0x1592   : > { %v3861_v63 = vsub.f32 %v3857_v30, %v3860_v24 }
0x1594   : > { %v3862_v27 = vmul.f32 1.442695, %v3861_v63 }
0x1596   : > { %7294 = vpow2.f32 %v3862_v27 }
0x1598   : > { %v7293_v0 = vpop.eup %7292 }
0x1599   : > { %v3982_v34 = vpop.xlane.xlu0 %3981  ;;  %v3755_v2 = vsel %vm1398_vm2, %v7293_v0, 0.0 }
0x159a   : > { %v3983_v4 = vsub.f32 %v3979_v1, %v3982_v34  ;;  %3756 = vadd.xlane.f32.xlu0 %v3755_v2 }
0x159c   : > { %v3984_v5 = vmul.f32 1.442695, %v3983_v4 }
0x159e   : > { %7296 = vpow2.f32 %v3984_v5 }
0x15a0   : > { %v7295_v7 = vpop.eup %7294 }
0x15a1   : > { %v4091_v3 = vpop.xlane.xlu0 %4090  ;;  %v3864_v10 = vsel %vm1398_vm2, %v7295_v7, 0.0 }
0x15a2   : > { %v4092_v16 = vsub.f32 %v4088_v43, %v4091_v3  ;;  %3865 = vadd.xlane.f32.xlu1 %v3864_v10 }
0x15a4   : > { %v4093_v12 = vmul.f32 1.442695, %v4092_v16 }
0x15a6   : > { %7298 = vpow2.f32 %v4093_v12 }
0x15a8   : > { %v7297_v21 = vpop.eup %7296 }
0x15a9   : > { %v4201_v22 = vpop.xlane.xlu0 %4200  ;;  %v3986_v17 = vsel %vm1398_vm2, %v7297_v21, 0.0 }
0x15aa   : > { %v4202_v61 = vsub.f32 %v4198_v54, %v4201_v22  ;;  %3987 = vadd.xlane.f32.xlu0 %v3986_v17 }
0x15ac   : > { %v4203_v23 = vmul.f32 1.442695, %v4202_v61  ;;  %v7098_v61 = vld [vmem:[#allocation16 + $0x40] sm:$0xff]  }
0x15ad   : > { %6651 = vmatpush3.bf16.msra.mxu0 %v7098_v61 }
0x15ae   : > { %7300 = vpow2.f32 %v4203_v23  ;;  %6652 = vmatprep.subr.bf16.mxu0 %v7946_v6 }
0x15b0   : > { %v7299_v29 = vpop.eup %7298 }
0x15b1   : > { %v4095_v30 = vsel %vm1398_vm2, %v7299_v29, 0.0  ;;  %v4310_v48 = vpop.xlane.xlu1 %4309 }
0x15b2   : > { %4096 = vadd.xlane.f32.xlu1 %v4095_v30  ;;  %v4311_v26 = vsub.f32 %v4307_v38, %v4310_v48  ;;  %v7100_v48 = vld [vmem:[#allocation16 + $0x50] sm:$0xff]  }
0x15b4   : > { %v4312_v31 = vmul.f32 1.442695, %v4311_v26 }
0x15b6   : > { %7302 = vpow2.f32 %v4312_v31 }
0x15b8   : > { %v7301_v35 = vpop.eup %7300 }
0x15b9   : > { %v4205_v46 = vsel %vm1398_vm2, %v7301_v35, 0.0 }
0x15ba   : > { %4206 = vadd.xlane.f32.xlu1 %v4205_v46 }
0x15c0   : > { %3761 = vrot.lane.b32.xlu0 %v9043_v11, %s7951_s28  ;;  %v7303_v1 = vpop.eup %7302 }
0x15c1   : > { %v4314_v33 = vsel %vm1398_vm2, %v7303_v1, 0.0 }
0x15c4   : > { %4102 = vrot.lane.b32.xlu0 %v9052_v25, %s7949_s30 }
0x15c8   : > { %4211 = vrot.lane.b32.xlu0 %v9052_v25, %s7951_s28 }
0x15cb   : > { %3870 = vrot.lane.b32.xlu1 %v9043_v11, %s7950_s24 }
0x15cc   : > { %4320 = vrot.lane.b32.xlu0 %v9052_v25, %s7950_s24 }
0x15ef   : > { %4315 = vadd.xlane.f32.xlu1 %v4314_v33 }
0x1627   : > { %v3757_v32 = vpop.xlane.xlu0 %3756 }
0x1628   : > { %7304 = vrcp.f32 %v3757_v32  ;;  %v7101_v32 = vld [vmem:[#allocation16 + $0x58] sm:$0xff]  }
0x162f   : > { %v3866_v43 = vpop.xlane.xlu1 %3865 }
0x1630   : > { %7306 = vrcp.f32 %v3866_v43  ;;  %v7105_v43 = vld [vmem:[#allocation16 + $0x78] sm:$0xff]  }
0x1632   : > { %v7305_v36 = vpop.eup %7304 }
0x1633   : > { %v3759_v41 = vmul.f32 %v7305_v36, %v7293_v0  ;;  %v7102_v36 = vld [vmem:[#allocation16 + $0x60] sm:$0xff]  }
0x1635   : > { %v3760_v11 = vpack.c.bf16 %v3759_v41, %v3759_v41  ;;  %v7104_v41 = vld [vmem:[#allocation16 + $0x70] sm:$0xff]  }
0x1637   : > { %v3988_v39 = vpop.xlane.xlu0 %3987 }
0x1638   : > { %7308 = vrcp.f32 %v3988_v39  ;;  %v7103_v39 = vld [vmem:[#allocation16 + $0x68] sm:$0xff]  }
0x163a   : > { %v7307_v51 = vpop.eup %7306 }
0x163b   : > { %v3762_v49 = vpop.permute.xlu0 %3761  ;;  %v3868_v53 = vmul.f32 %v7307_v51, %v7295_v7 }
0x163c   : > { %6585 = vmatpush3.bf16.msra.mxu1 %v3762_v49 }
0x163d   : > { %6596 = vmatprep.subr.bf16.mxu1 %v7946_v6  ;;  %v3869_v19 = vpack.c.bf16 %v3868_v53, %v3868_v53 }
0x163f   : > { %6587 = vmatmul.mubr.msk.bf16.vlgmr.msra.gmra.mrb[64].mxu1 %vm1398_vm2, %v3760_v11  ;;  %v4097_v50 = vpop.xlane.xlu1 %4096  ;;  %v4103_v38 = vpop.permute.xlu0 %4102 }
0x1640   : > { %6598 = vmatprep.mubr.msk.bf16.mxu1 %vm7947_vm0, %v7946_v6  ;;  %7310 = vrcp.f32 %v4097_v50 }
0x1642   : > { %v7309_v20 = vpop.eup %7308 }
0x1643   : > { %v3990_v13 = vmul.f32 %v7309_v20, %v7297_v21  ;;  %v4212_v59 = vpop.permute.xlu0 %4211 }
0x1645   : > { %v3991_v55 = vpack.c.bf16 %v3990_v13, %v3990_v13 }
0x1647   : > { %v4207_v52 = vpop.xlane.xlu1 %4206  ;;  %v4321_v18 = vpop.permute.xlu0 %4320 }
0x1648   : > { %7312 = vrcp.f32 %v4207_v52 }
0x164a   : > { %v7311_v56 = vpop.eup %7310 }
0x164b   : > { %v3871_v54 = vpop.permute.xlu1 %3870  ;;  %v4099_v40 = vmul.f32 %v7311_v56, %v7299_v29 }
0x164c   : > { %6597 = vmatpush3.bf16.msra.mxu1 %v3871_v54 }
0x164d   : > { %6608 = vmatprep.subr.bf16.mxu1 %v7946_v6 }
0x164f   : > { %6599 = vmatmul.mubr.msk.bf16.vlgmr.msra.gmra.mrb[68].mxu1 %vm1398_vm2, %v3869_v19 }
0x1650   : > { %6609 = vmatpush3.bf16.msra.mxu1 %v9052_v25  ;;  %6610 = vmatprep.mubr.msk.bf16.mxu1 %vm7947_vm0, %v7946_v6  ;;  %v4100_v25 = vpack.c.bf16 %v4099_v40, %v4099_v40 }
0x1651   : > { %6620 = vmatprep.subr.bf16.mxu1 %v7946_v6 }
0x1652   : > { %v7313_v42 = vpop.eup %7312 }
0x1653   : > { %v4209_v9 = vmul.f32 %v7313_v42, %v7301_v35  ;;  %v7099_v35 = vld [vmem:[#allocation16 + $0x48] sm:$0xff]  }
0x1654   : > { %6653 = vmatpush3.bf16.msra.mxu0 %v7099_v35 }
0x1655   : > { %v4210_v60 = vpack.c.bf16 %v4209_v9, %v4209_v9  ;;  %6654 = vmatprep.subr.bf16.mxu0 %v7946_v6 }
0x1657   : > { %6611 = vmatmul.mubr.msk.bf16.vlgmr.msra.gmra.mrb[72].mxu1 %vm1398_vm2, %v3991_v55 }
0x1658   : > { %6621 = vmatpush3.bf16.msra.mxu1 %v4103_v38  ;;  %6622 = vmatprep.mubr.msk.bf16.mxu1 %vm7947_vm0, %v7946_v6 }
0x1659   : > { %6632 = vmatprep.subr.bf16.mxu1 %v7946_v6  ;;  %6655 = vmatpush3.bf16.msra.mxu0 %v7100_v48  ;;  %v7120_v48 = vld [vmem:[%s9640_s26 + $0x144] ss:$16 sps:$4 sm:$0xff]  }
0x165a   : > { %6656 = vmatprep.subr.bf16.mxu0 %v7946_v6 }
0x165d   : > { %6657 = vmatpush3.bf16.msra.mxu0 %v7101_v32  ;;  %v7129_v32 = vld [vmem:[%s9640_s26 + $0x16c] ss:$16 sps:$4 sm:$0xff]  }
0x165e   : > { %6658 = vmatprep.subr.bf16.mxu0 %v7946_v6 }
0x165f   : > { %6623 = vmatmul.mubr.msk.bf16.vlgmr.msra.gmra.mrb[76].mxu1 %vm1398_vm2, %v4100_v25 }
0x1660   : > { %6633 = vmatpush3.bf16.msra.mxu1 %v4212_v59  ;;  %6634 = vmatprep.mubr.msk.bf16.mxu1 %vm7947_vm0, %v7946_v6 }
0x1661   : > { %6644 = vmatprep.subr.bf16.mxu1 %v7946_v6  ;;  %6659 = vmatpush3.bf16.msra.mxu0 %v7102_v36  ;;  %v7127_v36 = vld [vmem:[%s9640_s26 + $0x168] ss:$16 sps:$4 sm:$0xff]  }
0x1662   : > { %6660 = vmatprep.subr.bf16.mxu0 %v7946_v6 }
0x1665   : > { %6661 = vmatpush3.bf16.msra.mxu0 %v7103_v39  ;;  %v7132_v39 = vld [vmem:[%s9640_s26 + $0x184] ss:$16 sps:$4 sm:$0xff]  }
0x1666   : > { %6662 = vmatprep.subr.bf16.mxu0 %v7946_v6 }
0x1667   : > { %6635 = vmatmul.mubr.msk.bf16.vlgmr.msra.gmra.mrb[80].mxu1 %vm1398_vm2, %v4210_v60 }
0x1668   : > { %6645 = vmatpush3.bf16.msra.mxu1 %v4321_v18  ;;  %6646 = vmatprep.mubr.msk.bf16.mxu1 %vm7947_vm0, %v7946_v6 }
0x1669   : > { %6663 = vmatpush3.bf16.msra.mxu0 %v7104_v41  ;;  %v7135_v41 = vld [vmem:[%s9640_s26 + $0x18c] ss:$16 sps:$4 sm:$0xff]  }
0x166a   : > { %6664 = vmatprep.subr.bf16.mxu0 %v7946_v6 }
0x166d   : > { %6665 = vmatpush3.bf16.msra.mxu0 %v7105_v43  ;;  %v7130_v43 = vld [vmem:[%s9640_s26 + $0x180] ss:$16 sps:$4 sm:$0xff]  }
0x167c   : > { %v4316_v62 = vpop.xlane.xlu1 %4315 }
0x167d   : > { %7314 = vrcp.f32 %v4316_v62 }
0x1687   : > { %v7315_v24 = vpop.eup %7314 }
0x1688   : > { %v4318_v63 = vmul.f32 %v7315_v24, %v7303_v1 }
0x168a   : > { %v4319_v27 = vpack.c.bf16 %v4318_v63, %v4318_v63  ;;  %v6067_v63 = vld [vmem:[#allocation17 + $0x1] ss:$0 sm:$0xff] }
0x168c   : > { %6647 = vmatmul.mubr.msk.bf16.vlgmr.msra.gmra.mrb[84].mxu1 %vm1398_vm2, %v4319_v27 }
0x168d   : > { %4791 = vmatprep.mubr.bf16.mxu1 %v7948_v37 }
0x1712   : > { %v3801_v0 = vpop.f32.mrb[64].mxu1 }
0x1713   : > { %v6588_v34 = vpop.f32.mrb[65].mxu1 }
0x1714   : > { %v3804_v2 = vpop.f32.mrb[66].mxu1 }
0x1715   : > { %v6589_v4 = vpop.f32.mrb[67].mxu1 }
0x1722   : > { %v3910_v5 = vpop.f32.mrb[68].mxu1 }
0x1723   : > { %v6600_v7 = vpop.f32.mrb[69].mxu1 }
0x1724   : > { %v3913_v3 = vpop.f32.mrb[70].mxu1  ;;  %v7106_v7 = vld [vmem:[%s9640_s26 + $0x100] ss:$16 sps:$4 sm:$0xff]  }
0x1725   : > { %v6601_v10 = vpop.f32.mrb[71].mxu1  ;;  %v7109_v3 = vld [vmem:[%s9640_s26 + $0x108] ss:$16 sps:$4 sm:$0xff]  }
0x1726   : > { %v7114_v10 = vld [vmem:[%s9640_s26 + $0x124] ss:$16 sps:$4 sm:$0xff]  }
0x172a   : > { %v4030_v16 = vpop.f32.mrb[72].mxu1 }
0x172b   : > { %v6612_v12 = vpop.f32.mrb[73].mxu1 }
0x172c   : > { %v4033_v21 = vpop.f32.mrb[74].mxu1  ;;  %v7112_v12 = vld [vmem:[%s9640_s26 + $0x120] ss:$16 sps:$4 sm:$0xff]  }
0x172d   : > { %v6613_v22 = vpop.f32.mrb[75].mxu1  ;;  %v7115_v21 = vld [vmem:[%s9640_s26 + $0x128] ss:$16 sps:$4 sm:$0xff]  }
0x1732   : > { %v4142_v17 = vpop.f32.mrb[76].mxu1 }
0x1733   : > { %v6931_v23 = vpack.i.bf16 %v4142_v17, %v9155_v8  ;;  %v6624_v29 = vpop.f32.mrb[77].mxu1 }
0x1734   : > { %v4145_v30 = vpop.f32.mrb[78].mxu1 }
0x1735   : > { %6932 = vrot.lane.b32.xlu0 %v6931_v23, %s7950_s24  ;;  %v6625_v46 = vpop.f32.mrb[79].mxu1 }
0x173a   : > { %v4251_v26 = vpop.f32.mrb[80].mxu1 }
0x173b   : > { %v6936_v31 = vpack.i.bf16 %v4251_v26, %v3801_v0  ;;  %v6636_v1 = vpop.f32.mrb[81].mxu1  ;;  %v7123_v26 = vld [vmem:[%s9640_s26 + $0x14c] ss:$16 sps:$4 sm:$0xff]  }
0x173c   : > { %v4254_v33 = vpop.f32.mrb[82].mxu1  ;;  %v7121_v1 = vld [vmem:[%s9640_s26 + $0x148] ss:$16 sps:$4 sm:$0xff]  }
0x173d   : > { %6937 = vrot.lane.b32.xlu0 %v6936_v31, %s7951_s28  ;;  %v6637_v8 = vpop.f32.mrb[83].mxu1  ;;  %v7118_v31 = vld [vmem:[%s9640_s26 + $0x140] ss:$16 sps:$4 sm:$0xff]   ;;  %v7126_v33 = vld [vmem:[%s9640_s26 + $0x164] ss:$16 sps:$4 sm:$0xff]   ;;  %s9644_s28 = sld [smem:[#allocation41_spill]] }
0x173e   : > { %v7124_v8 = vld [vmem:[%s9640_s26 + $0x160] ss:$16 sps:$4 sm:$0xff]  }
0x1743   : > { %s955_s7 = sand.u32 1, %s9644_s28  }
0x1744   : > { %s5871_s1 = sshll.u32 %s955_s7, 4  ;;  %s9478_s29 = scalar_lea.sflag [#allocation4], %s955_s7 }
0x1745   : > { %s957_s20 = scalar_lea.vmem [#allocation29], %s5871_s1 }
0x1746   : > { %s5582_s2 = sshll.u32 %s957_s20, 4  ;;  %s9476_s2 = int_to_ptr.vmem [resolvable:$true] %s5582_s2 }
0x1747   : > { %s7821_s19 = scalar_lea.vmem %s9476_s2, 256 }
0x1748   : > { %p7822_p12 = scmp.ne.s32.totalorder %s9476_s2, %s7821_s19 }
0x174a   : > { %p7823_p8 = pnand %p7822_p12, %p9648_p7 }
0x174c   : > { %p7824_p11 = pneg %p7823_p8 }
0x175f   : > { %v4360_v49 = vpop.f32.mrb[84].mxu1 }
0x1760   : > { %v6941_v11 = vpack.i.bf16 %v4360_v49, %v3910_v5  ;;  %v6648_v50 = vpop.f32.mrb[85].mxu1  ;;  %v7133_v49 = vld [vmem:[%s9640_s26 + $0x188] ss:$16 sps:$4 sm:$0xff]  }
0x1761   : > { %v4363_v51 = vpop.f32.mrb[86].mxu1  ;;  %v7141_v50 = vld [vmem:[%s9640_s26 + $0x1ac] ss:$16 sps:$4 sm:$0xff]  }
0x1762   : > { %6942 = vrot.lane.b32.xlu0 %v6941_v11, %s7949_s30  ;;  %v6649_v52 = vpop.f32.mrb[87].mxu1  ;;  %v7138_v11 = vld [vmem:[%s9640_s26 + $0x1a4] ss:$16 sps:$4 sm:$0xff]   ;;  %v7136_v51 = vld [vmem:[%s9640_s26 + $0x1a0] ss:$16 sps:$4 sm:$0xff]   ;;  %s9643_s30 = sld [smem:[#allocation61_spill]] }
0x1763   : > { %v7139_v52 = vld [vmem:[%s9640_s26 + $0x1a8] ss:$16 sps:$4 sm:$0xff]  }
0x1768   : > { %s969_s24 = scalar_lea.vmem %s9643_s30, %s5876_s4  ;;  %s7952_s30 = smov [#allocation29]  }
0x17a7   : > { %v6933_v53 = vpop.permute.xlu0 %6932 }
0x17a8   : > { %v6935_v19 = vunpack.i.h.bf16 %v6933_v53  ;;  %v6934_v20 = vunpack.i.l.bf16 %v6933_v53  ;;  %v7144_v53 = vld [vmem:[%s9640_s26 + $0x1c4] ss:$16 sps:$4 sm:$0xff]  }
0x17aa   : > { %v4378_v38 = vsel %vm1350_vm1, %v4030_v16, %v6935_v19  ;;  %v3928_v40 = vsel %vm1350_vm1, %v9099_v28, %v6934_v20  ;;  %v7117_v16 = vld [vmem:[%s9640_s26 + $0x12c] ss:$16 sps:$4 sm:$0xff]   ;;  %v7142_v19 = vld [vmem:[%s9640_s26 + $0x1c0] ss:$16 sps:$4 sm:$0xff]   ;;  %v7145_v20 = vld [vmem:[%s9640_s26 + $0x1c8] ss:$16 sps:$4 sm:$0xff]  }
0x17af   : > { %v6938_v54 = vpop.permute.xlu0 %6937 }
0x17b0   : > { %v6940_v13 = vunpack.i.h.bf16 %v6938_v54  ;;  %v6939_v55 = vunpack.i.l.bf16 %v6938_v54  ;;  %v7147_v54 = vld [vmem:[%s9640_s26 + $0x1cc] ss:$16 sps:$4 sm:$0xff]  }
0x17b2   : > { %v4379_v59 = vsel %vm1798_vm3, %v4378_v38, %v6940_v13  ;;  %v3929_v9 = vsel %vm1798_vm3, %v3928_v40, %v6939_v55  ;;  %v7150_v13 = vld [vmem:[%s9640_s26 + $0x1e4] ss:$16 sps:$4 sm:$0xff]   ;;  %v7153_v55 = vld [vmem:[%s9640_s26 + $0x1ec] ss:$16 sps:$4 sm:$0xff]   ;;  %v7151_v38 = vld [vmem:[%s9640_s26 + $0x1e8] ss:$16 sps:$4 sm:$0xff]  }
0x17d4   : > { %v6943_v56 = vpop.permute.xlu0 %6942 }
0x17d5   : > { %v6945_v25 = vunpack.i.h.bf16 %v6943_v56  ;;  %v6944_v42 = vunpack.i.l.bf16 %v6943_v56  ;;  %v7148_v56 = vld [vmem:[%s9640_s26 + $0x1e0] ss:$16 sps:$4 sm:$0xff]  }
0x17d7   : > { %v4380_v60 = vsel %vm1800_vm4, %v4379_v59, %v6945_v25  ;;  %v3930_v18 = vsel %vm1800_vm4, %v3929_v9, %v6944_v42 }
0x17d8   : > { %v4381_v62 = vpack.c.bf16 %v4380_v60, %v3930_v18 }
0x17da   : > { %6667 = vmatmul.mubr.bf16.vlgmr.msra.gmra.mrb[84].mxu0 %v4381_v62 }
0x17db   : > { %4834 = vmatprep.mubr.bf16.mxu0 %v7948_v37 }
0x18ad   : > { %v4481_v24 = vpop.f32.mrb[84].mxu0 }
0x18ae   : > { %v4488_v27 = vadd.f32 %v4481_v24, %v9026_v57  ;;  %v6668_v0 = vpop.f32.mrb[85].mxu0  ;;  %v7108_v57 = vld [vmem:[%s9640_s26 + $0x104] ss:$16 sps:$4 sm:$0xff]   ;;  %v6068_v24 = vld [vmem:[#allocation19 + $0x1] ss:$0 sm:$0xff] }
0x18af   : > { %v4484_v28 = vpop.f32.mrb[86].mxu0  ;;  %4759 = vmatprep.subr.bf16.mxu1 %v7108_v57 }
0x18b0   : > { %v9222_v34 = vadd.f32 %v6067_v63, %v4488_v27  ;;  %v4489_v2 = vadd.f32 %v4484_v28, %v9029_v58  ;;  %v6669_v4 = vpop.f32.mrb[87].mxu0  ;;  %v7111_v58 = vld [vmem:[%s9640_s26 + $0x10c] ss:$16 sps:$4 sm:$0xff]   ;;  %4760 = vmatpush1.bf16.msra.mxu1 %v7106_v7  ;;  %v6069_v28 = vld [vmem:[#allocation20 + $0x1] ss:$0 sm:$0xff] }
0x18b1   : > { %4802 = vmatprep.subr.bf16.mxu0 %v7111_v58  ;;  %4761 = vmatprep.subr.bf16.mxu1 %v7114_v10  ;;  %v7155_v58 = vld [vmem:[#allocation23 + $0x1c0] sm:$0xff]  }
0x18b2   : > { %v9225_v5 = vadd.f32 %v6067_v63, %v4489_v2  ;;  %4504 = vadd.xlane.f32.xlu0 %v9222_v34  ;;  %4803 = vmatpush1.bf16.msra.mxu0 %v7109_v3  ;;  %v7154_v3 = vld [vmem:[#allocation23 + $0x140] sm:$0xff]  }
0x18b3   : > { %4804 = vmatprep.subr.bf16.mxu0 %v7117_v16  ;;  %v7156_v10 = vld [vmem:[#allocation23 + $0x100] sm:$0xff]  }
0x18b4   : > { %4506 = vadd.xlane.f32.xlu1 %v9225_v5  ;;  %4762 = vmatpush1.bf16.msra.mxu1 %v7112_v12  ;;  %v7157_v16 = vld [vmem:[#allocation23 + $0x180] sm:$0xff]   ;;  %v7158_v12 = vld [vmem:[#allocation23 + $0x148] sm:$0xff]  }
0x18b5   : > { %4763 = vmatprep.subr.bf16.mxu1 %v7120_v48  ;;  %v7168_v48 = vld [vmem:[#allocation23 + $0x118] sm:$0xff]  }
0x18b6   : > { %4805 = vmatpush1.bf16.msra.mxu0 %v7115_v21  ;;  %v7159_v21 = vld [vmem:[#allocation23 + $0x1c8] sm:$0xff]  }
0x18b7   : > { %4806 = vmatprep.subr.bf16.mxu0 %v7123_v26  ;;  %v7169_v26 = vld [vmem:[#allocation23 + $0x198] sm:$0xff]  }
0x18b8   : > { %4764 = vmatpush1.bf16.msra.mxu1 %v7118_v31  ;;  %v7170_v31 = vld [vmem:[#allocation23 + $0x160] sm:$0xff]  }
0x18b9   : > { %4765 = vmatprep.subr.bf16.mxu1 %v7126_v33  ;;  %v7172_v33 = vld [vmem:[#allocation23 + $0x120] sm:$0xff]  }
0x18ba   : > { %4807 = vmatpush1.bf16.msra.mxu0 %v7121_v1  ;;  %v7171_v1 = vld [vmem:[#allocation23 + $0x1e0] sm:$0xff]  }
0x18bb   : > { %4808 = vmatprep.subr.bf16.mxu0 %v7129_v32  ;;  %v7173_v32 = vld [vmem:[#allocation23 + $0x1a0] sm:$0xff]  }
0x18bc   : > { %4766 = vmatpush1.bf16.msra.mxu1 %v7124_v8  ;;  %v7174_v8 = vld [vmem:[#allocation23 + $0x168] sm:$0xff]  }
0x18bd   : > { %4767 = vmatprep.subr.bf16.mxu1 %v7132_v39  ;;  %v7176_v39 = vld [vmem:[#allocation23 + $0x128] sm:$0xff]  }
0x18be   : > { %4809 = vmatpush1.bf16.msra.mxu0 %v7127_v36  ;;  %v7175_v36 = vld [vmem:[#allocation23 + $0x1e8] sm:$0xff]  }
0x18bf   : > { %4810 = vmatprep.subr.bf16.mxu0 %v7135_v41  ;;  %v7177_v41 = vld [vmem:[#allocation23 + $0x1a8] sm:$0xff]  }
0x18c0   : > { %4768 = vmatpush1.bf16.msra.mxu1 %v7130_v43  ;;  %v7178_v43 = vld [vmem:[#allocation23 + $0x170] sm:$0xff]  }
0x18c1   : > { %4769 = vmatprep.subr.bf16.mxu1 %v7138_v11  ;;  %v7180_v11 = vld [vmem:[#allocation23 + $0x130] sm:$0xff]  }
0x18c2   : > { %4811 = vmatpush1.bf16.msra.mxu0 %v7133_v49  ;;  %v7179_v49 = vld [vmem:[#allocation23 + $0x1f0] sm:$0xff]  }
0x18c3   : > { %4812 = vmatprep.subr.bf16.mxu0 %v7141_v50  ;;  %v7181_v50 = vld [vmem:[#allocation23 + $0x1b0] sm:$0xff]  }
0x18c4   : > { %4770 = vmatpush1.bf16.msra.mxu1 %v7136_v51  ;;  %v7182_v51 = vld [vmem:[#allocation23 + $0x178] sm:$0xff]  }
0x18c5   : > { %4771 = vmatprep.subr.bf16.mxu1 %v7144_v53  ;;  %v7184_v53 = vld [vmem:[#allocation23 + $0x138] sm:$0xff]  }
0x18c6   : > { %4813 = vmatpush1.bf16.msra.mxu0 %v7139_v52  ;;  %v7183_v52 = vld [vmem:[#allocation23 + $0x1f8] sm:$0xff]  }
0x18c7   : > { %4814 = vmatprep.subr.bf16.mxu0 %v7147_v54  ;;  %v7185_v54 = vld [vmem:[#allocation23 + $0x1b8] sm:$0xff]  }
0x18c8   : > { %4772 = vmatpush1.bf16.msra.mxu1 %v7142_v19  ;;  %v4577_v19 = vld [vmem:[#allocation22 + $0x4] sm:$0xf] }
0x18c9   : > { %4773 = vmatprep.subr.bf16.mxu1 %v7150_v13  ;;  %v4590_v13 = vrot.slane %v4577_v19, %v2454_v14 }
0x18ca   : > { %4815 = vmatpush1.bf16.msra.mxu0 %v7145_v20  ;;  %v4582_v20 = vrot.slane %v4577_v19, %v8677_v45 }
0x18cb   : > { %4816 = vmatprep.subr.bf16.mxu0 %v7153_v55  ;;  %v4586_v55 = vrot.slane %v4577_v19, %v8680_v47 }
0x18cc   : > { %4774 = vmatpush1.bf16.msra.mxu1 %v7148_v56  ;;  %v4594_v56 = vrot.slane %v4577_v19, %v2458_v15 }
0x18cd   : > { %6345 = vmatprep.subr.bf16.mxu1 %v7154_v3 }
0x18ce   : > { %4817 = vmatpush1.bf16.msra.mxu0 %v7151_v38 }
0x18cf   : > { %6367 = vmatprep.subr.bf16.mxu0 %v7155_v58 }
0x193f   : > { %v4505_v22 = vpop.xlane.xlu0 %4504 }
0x1940   : > { %v4508_v17 = vmul.f32 0.0078125, %v4505_v22  ;;  %v7160_v22 = vld [vmem:[#allocation23 + $0x108] sm:$0xff]  }
0x1941   : > { %v4507_v61 = vpop.xlane.xlu1 %4506 }
0x1942   : > { %v9254_v23 = vsub.f32 %v9222_v34, %v4508_v17  ;;  %v4509_v29 = vmul.f32 0.0078125, %v4507_v61  ;;  %v7161_v17 = vld [vmem:[#allocation23 + $0x188] sm:$0xff]   ;;  %v7162_v61 = vld [vmem:[#allocation23 + $0x150] sm:$0xff]  }
0x1944   : > { %v9257_v30 = vsub.f32 %v9225_v5, %v4509_v29  ;;  %v4512_v35 = vmul.f32 %v9254_v23, %v9254_v23  ;;  %v7164_v29 = vld [vmem:[#allocation23 + $0x110] sm:$0xff]  }
0x1946   : > { %4514 = vadd.xlane.f32.xlu1 %v4512_v35  ;;  %v4513_v46 = vmul.f32 %v9257_v30, %v9257_v30  ;;  %v7166_v35 = vld [vmem:[#allocation23 + $0x158] sm:$0xff]  }
0x194a   : > { %4516 = vadd.xlane.f32.xlu1 %v4513_v46  ;;  %v7167_v46 = vld [vmem:[#allocation23 + $0x1d8] sm:$0xff]  }
0x19d3   : > { %v4515_v40 = vpop.xlane.xlu1 %4514 }
0x19d4   : > { %v4518_v25 = vmul.f32 0.0078125, %v4515_v40 }
0x19d6   : > { %v4520_v42 = vadd.f32 1e-05, %v4518_v25 }
0x19d7   : > { %v4517_v59 = vpop.xlane.xlu1 %4516 }
0x19d8   : > { %7316 = vrsqrt.f32 %v4520_v42  ;;  %v4519_v9 = vmul.f32 0.0078125, %v4517_v59 }
0x19da   : > { %v4521_v60 = vadd.f32 1e-05, %v4519_v9 }
0x19dc   : > { %7318 = vrsqrt.f32 %v4521_v60 }
0x19e2   : > { %v7317_v18 = vpop.eup %7316 }
0x19e3   : > { %v4524_v62 = vmul.f32 %v7317_v18, %v9254_v23  ;;  %v7163_v23 = vld [vmem:[#allocation23 + $0x1d0] sm:$0xff]  }
0x19e5   : > { %v4532_v0 = vmul.f32 %v6068_v24, %v4524_v62 }
0x19e6   : > { %v7319_v63 = vpop.eup %7318 }
0x19e7   : > { %v4525_v27 = vmul.f32 %v7319_v63, %v9257_v30  ;;  %v4540_v4 = vadd.f32 %v6069_v28, %v4532_v0  ;;  %v7165_v30 = vld [vmem:[#allocation23 + $0x190] sm:$0xff]  }
0x19e9   : > { %v4533_v2 = vmul.f32 %v6068_v24, %v4525_v27 }
0x19eb   : > { %v4541_v7 = vadd.f32 %v6069_v28, %v4533_v2 }
0x19ed   : > { %v4542_v57 = vpack.c.bf16 %v4541_v7, %v4540_v4 }
0x19ef   : > { %4792 = vmatmul.mubr.bf16.vlgmr.msra.gmra.mrb[88].mxu1 %v4542_v57  ;;  %4835 = vmatmul.mubr.bf16.vlgmr.msra.gmra.mrb[88].mxu0 %v4542_v57 }
0x19f0   : > { %6346 = vmatpush3.bf16.msra.mxu1 %v7156_v10  ;;  %6368 = vmatpush3.bf16.msra.mxu0 %v7157_v16 }
0x19f1   : > { %6347 = vmatprep.subr.bf16.mxu1 %v7158_v12  ;;  %6369 = vmatprep.subr.bf16.mxu0 %v7159_v21 }
0x19f4   : > { %6348 = vmatpush3.bf16.msra.mxu1 %v7160_v22  ;;  %6370 = vmatpush3.bf16.msra.mxu0 %v7161_v17 }
0x19f5   : > { %6349 = vmatprep.subr.bf16.mxu1 %v7162_v61  ;;  %6371 = vmatprep.subr.bf16.mxu0 %v7163_v23 }
0x19f8   : > { %6350 = vmatpush3.bf16.msra.mxu1 %v7164_v29  ;;  %6372 = vmatpush3.bf16.msra.mxu0 %v7165_v30 }
0x19f9   : > { %6351 = vmatprep.subr.bf16.mxu1 %v7166_v35  ;;  %6373 = vmatprep.subr.bf16.mxu0 %v7167_v46 }
0x19fc   : > { %6352 = vmatpush3.bf16.msra.mxu1 %v7168_v48  ;;  %6374 = vmatpush3.bf16.msra.mxu0 %v7169_v26 }
0x19fd   : > { %6353 = vmatprep.subr.bf16.mxu1 %v7170_v31  ;;  %6375 = vmatprep.subr.bf16.mxu0 %v7171_v1 }
0x1a00   : > { %6354 = vmatpush3.bf16.msra.mxu1 %v7172_v33  ;;  %6376 = vmatpush3.bf16.msra.mxu0 %v7173_v32 }
0x1a01   : > { %6355 = vmatprep.subr.bf16.mxu1 %v7174_v8  ;;  %6377 = vmatprep.subr.bf16.mxu0 %v7175_v36 }
0x1a04   : > { %6356 = vmatpush3.bf16.msra.mxu1 %v7176_v39  ;;  %6378 = vmatpush3.bf16.msra.mxu0 %v7177_v41 }
0x1a05   : > { %6357 = vmatprep.subr.bf16.mxu1 %v7178_v43  ;;  %6379 = vmatprep.subr.bf16.mxu0 %v7179_v49 }
0x1a08   : > { %6358 = vmatpush3.bf16.msra.mxu1 %v7180_v11  ;;  %6380 = vmatpush3.bf16.msra.mxu0 %v7181_v50 }
0x1a09   : > { %6359 = vmatprep.subr.bf16.mxu1 %v7182_v51  ;;  %6381 = vmatprep.subr.bf16.mxu0 %v7183_v52 }
0x1a0c   : > { %6360 = vmatpush3.bf16.msra.mxu1 %v7184_v53  ;;  %6382 = vmatpush3.bf16.msra.mxu0 %v7185_v54 }
0x1a0d   : > { %6670 = vmatprep.subr.bf16.mxu1 %v7946_v6 }
0x1ac2   : > { %v4793_v38 = vpop.f32.mrb[88].mxu1  ;;  %v4836_v40 = vpop.f32.mrb[88].mxu0 }
0x1ac3   : > { %v9344_v25 = vadd.f32 %v4793_v38, %v4582_v20  ;;  %v9346_v42 = vadd.f32 %v4836_v40, %v4590_v13  ;;  %v4795_v59 = vpop.f32.mrb[89].mxu1  ;;  %v4838_v9 = vpop.f32.mrb[89].mxu0 }
0x1ac4   : > { %v9348_v60 = vadd.f32 %v4795_v59, %v4586_v55  ;;  %v9350_v18 = vadd.f32 %v4838_v9, %v4594_v56  ;;  %v4797_v62 = vpop.f32.mrb[90].mxu1  ;;  %v4840_v24 = vpop.f32.mrb[90].mxu0 }
0x1ac5   : > { %v4845_v14 = vmul.f32 %v9344_v25, %v9344_v25  ;;  %v4847_v44 = vmul.f32 %v9346_v42, %v9346_v42  ;;  %v9356_v15 = vadd.f32 %v4797_v62, %v4582_v20  ;;  %v9358_v63 = vadd.f32 %v4840_v24, %v4590_v13  ;;  %v4799_v27 = vpop.f32.mrb[91].mxu1  ;;  %v4842_v0 = vpop.f32.mrb[91].mxu0 }
0x1ac6   : > { %v4846_v28 = vmul.f32 %v9348_v60, %v9348_v60  ;;  %v4848_v2 = vmul.f32 %v9350_v18, %v9350_v18  ;;  %v9364_v4 = vadd.f32 %v4799_v27, %v4586_v55  ;;  %v9366_v7 = vadd.f32 %v4842_v0, %v4594_v56 }
0x1ac7   : > { %v4853_v57 = vmul.f32 %v4845_v14, %v9344_v25  ;;  %v4855_v3 = vmul.f32 %v4847_v44, %v9346_v42  ;;  %v4849_v58 = vmul.f32 %v9356_v15, %v9356_v15  ;;  %v4851_v10 = vmul.f32 %v9358_v63, %v9358_v63 }
0x1ac8   : > { %v4854_v16 = vmul.f32 %v4846_v28, %v9348_v60  ;;  %v4856_v12 = vmul.f32 %v4848_v2, %v9350_v18  ;;  %v4850_v21 = vmul.f32 %v9364_v4, %v9364_v4  ;;  %v4852_v22 = vmul.f32 %v9366_v7, %v9366_v7 }
0x1ac9   : > { %v4861_v17 = vmul.f32 0.044715, %v4853_v57  ;;  %v4863_v61 = vmul.f32 0.044715, %v4855_v3  ;;  %v4857_v23 = vmul.f32 %v4849_v58, %v9356_v15  ;;  %v4859_v29 = vmul.f32 %v4851_v10, %v9358_v63 }
0x1aca   : > { %v4862_v30 = vmul.f32 0.044715, %v4854_v16  ;;  %v4864_v35 = vmul.f32 0.044715, %v4856_v12  ;;  %v4858_v46 = vmul.f32 %v4850_v21, %v9364_v4  ;;  %v4860_v48 = vmul.f32 %v4852_v22, %v9366_v7 }
0x1acb   : > { %v4869_v26 = vadd.f32 %v4861_v17, %v9344_v25  ;;  %v4871_v31 = vadd.f32 %v4863_v61, %v9346_v42  ;;  %v4865_v1 = vmul.f32 0.044715, %v4857_v23  ;;  %v4867_v33 = vmul.f32 0.044715, %v4859_v29 }
0x1acc   : > { %v4870_v32 = vadd.f32 %v4862_v30, %v9348_v60  ;;  %v4872_v8 = vadd.f32 %v4864_v35, %v9350_v18  ;;  %v4866_v36 = vmul.f32 0.044715, %v4858_v46  ;;  %v4868_v39 = vmul.f32 0.044715, %v4860_v48 }
0x1acd   : > { %v4877_v41 = vmul.f32 0.7978846, %v4869_v26  ;;  %v4879_v43 = vmul.f32 0.7978846, %v4871_v31  ;;  %v4873_v49 = vadd.f32 %v4865_v1, %v9356_v15  ;;  %v4875_v11 = vadd.f32 %v4867_v33, %v9358_v63 }
0x1ace   : > { %v4878_v50 = vmul.f32 0.7978846, %v4870_v32  ;;  %v4880_v51 = vmul.f32 0.7978846, %v4872_v8  ;;  %v4874_v52 = vadd.f32 %v4866_v36, %v9364_v4  ;;  %v4876_v53 = vadd.f32 %v4868_v39, %v9366_v7  ;;  %v7196_v36 = vld [vmem:[%s9641_s27 + $0x4] ss:$8 sps:$4 sm:$0xff]  }
0x1acf   : > { %7320 = vtanh.f32 %v4877_v41  ;;  %v4881_v54 = vmul.f32 0.7978846, %v4873_v49  ;;  %v4883_v19 = vmul.f32 0.7978846, %v4875_v11  ;;  %v7199_v39 = vld [vmem:[%s9641_s27 + $0x14] ss:$8 sps:$4 sm:$0xff]   ;;  %5494 = vmatprep.subr.bf16.mxu0 %v7196_v36 }
0x1ad0   : > { %7322 = vtanh.f32 %v4879_v43  ;;  %v4882_v20 = vmul.f32 0.7978846, %v4874_v52  ;;  %v4884_v13 = vmul.f32 0.7978846, %v4876_v53  ;;  %v7202_v41 = vld [vmem:[%s9641_s27 + $0x24] ss:$8 sps:$4 sm:$0xff]  }
0x1ad1   : > { %7324 = vtanh.f32 %v4878_v50  ;;  %v7200_v43 = vld [vmem:[%s9641_s27 + $0x20] ss:$8 sps:$4 sm:$0xff]   ;;  %v7205_v49 = vld [vmem:[%s9641_s27 + $0x34] ss:$8 sps:$4 sm:$0xff]   ;;  %v7203_v11 = vld [vmem:[%s9641_s27 + $0x30] ss:$8 sps:$4 sm:$0xff]  }
0x1ad2   : > { %7326 = vtanh.f32 %v4880_v51  ;;  %v7208_v50 = vld [vmem:[%s9641_s27 + $0x44] ss:$8 sps:$4 sm:$0xff]   ;;  %v7206_v51 = vld [vmem:[%s9641_s27 + $0x40] ss:$8 sps:$4 sm:$0xff]   ;;  %v7211_v52 = vld [vmem:[%s9641_s27 + $0x54] ss:$8 sps:$4 sm:$0xff]  }
0x1ad3   : > { %7328 = vtanh.f32 %v4881_v54  ;;  %v7209_v53 = vld [vmem:[%s9641_s27 + $0x50] ss:$8 sps:$4 sm:$0xff]   ;;  %v7214_v54 = vld [vmem:[%s9641_s27 + $0x64] ss:$8 sps:$4 sm:$0xff]  }
0x1ad4   : > { %7330 = vtanh.f32 %v4883_v19  ;;  %v7212_v19 = vld [vmem:[%s9641_s27 + $0x60] ss:$8 sps:$4 sm:$0xff]  }
0x1ad5   : > { %7332 = vtanh.f32 %v4882_v20 }
0x1ad6   : > { %7334 = vtanh.f32 %v4884_v13 }
0x1ad9   : > { %v7321_v55 = vpop.eup %7320 }
0x1ada   : > { %v7323_v56 = vpop.eup %7322  ;;  %v4893_v38 = vadd.f32 1.0, %v7321_v55 }
0x1adb   : > { %v7325_v40 = vpop.eup %7324  ;;  %v4895_v59 = vadd.f32 1.0, %v7323_v56 }
0x1adc   : > { %v7327_v9 = vpop.eup %7326  ;;  %v4894_v62 = vadd.f32 1.0, %v7325_v40  ;;  %v4901_v27 = vmul.f32 0.5, %v4893_v38 }
0x1add   : > { %v7329_v24 = vpop.eup %7328  ;;  %v4896_v14 = vadd.f32 1.0, %v7327_v9  ;;  %v4903_v2 = vmul.f32 0.5, %v4895_v59 }
0x1ade   : > { %v7331_v44 = vpop.eup %7330  ;;  %v4897_v0 = vadd.f32 1.0, %v7329_v24  ;;  %v4902_v16 = vmul.f32 0.5, %v4894_v62  ;;  %v4909_v17 = vmul.f32 %v4901_v27, %v9344_v25  ;;  %v7186_v25 = vld [vmem:[#allocation26] sm:$0xff]  }
0x1adf   : > { %v7333_v28 = vpop.eup %7332  ;;  %v4899_v57 = vadd.f32 1.0, %v7331_v44  ;;  %v4904_v22 = vmul.f32 0.5, %v4896_v14  ;;  %v4911_v29 = vmul.f32 %v4903_v2, %v9346_v42  ;;  %v7187_v42 = vld [vmem:[#allocation26 + $0x8] sm:$0xff]   ;;  %v6166_v2 = vld [vmem:[#allocation25 + $0x1] ss:$0 sm:$0xff] }
0x1ae0   : > { %v7335_v3 = vpop.eup %7334  ;;  %v4905_v58 = vmul.f32 0.5, %v4897_v0  ;;  %v4898_v10 = vadd.f32 1.0, %v7333_v28  ;;  %v4910_v46 = vmul.f32 %v4902_v16, %v9348_v60  ;;  %v7188_v60 = vld [vmem:[#allocation26 + $0x10] sm:$0xff]  }
0x1ae1   : > { %v4907_v12 = vmul.f32 0.5, %v4899_v57  ;;  %v4900_v21 = vadd.f32 1.0, %v7335_v3  ;;  %v4912_v31 = vmul.f32 %v4904_v22, %v9350_v18  ;;  %v7189_v18 = vld [vmem:[#allocation26 + $0x18] sm:$0xff]  }
0x1ae2   : > { %v4913_v61 = vmul.f32 %v4905_v58, %v9356_v15  ;;  %v4906_v23 = vmul.f32 0.5, %v4898_v10  ;;  %v7190_v15 = vld [vmem:[#allocation26 + $0x20] sm:$0xff]   ;;  %v7217_v16 = vld [vmem:[%s9641_s27 + $0x74] ss:$8 sps:$4 sm:$0xff]  }
0x1ae3   : > { %v4915_v30 = vmul.f32 %v4907_v12, %v9358_v63  ;;  %v4908_v35 = vmul.f32 0.5, %v4900_v21  ;;  %v7191_v63 = vld [vmem:[#allocation26 + $0x28] sm:$0xff]  }
0x1ae4   : > { %v4914_v48 = vmul.f32 %v4906_v23, %v9364_v4  ;;  %v4917_v26 = vpack.c.bf16 %v4913_v61, %v4909_v17  ;;  %v7193_v4 = vld [vmem:[#allocation26 + $0x38] sm:$0xff]   ;;  %v7215_v12 = vld [vmem:[%s9641_s27 + $0x70] ss:$8 sps:$4 sm:$0xff]  }
0x1ae5   : > { %v4916_v1 = vmul.f32 %v4908_v35, %v9366_v7  ;;  %v4919_v33 = vpack.c.bf16 %v4915_v30, %v4911_v29  ;;  %v7194_v7 = vld [vmem:[%s9641_s27] ss:$8 sps:$4 sm:$0xff]   ;;  %v5402_v30 = vld [vmem:[#allocation28] sm:$0x3] }
0x1ae6   : > { %v4918_v32 = vpack.c.bf16 %v4914_v48, %v4910_v46  ;;  %v5407_v35 = vrot.slane %v5402_v30, %v8677_v45  ;;  %v5411_v46 = vrot.slane %v5402_v30, %v8680_v47 }
0x1ae7   : > { %v4920_v8 = vpack.c.bf16 %v4916_v1, %v4912_v31 }
0x1ae8   : > { %5210 = vmatprep.mubr.bf16.mxu1 %v4918_v32 }
0x1ae9   : > { %5251 = vmatprep.mubr.bf16.mxu0 %v4920_v8  ;;  %5211 = vmatmul.mubr.bf16.vlgmr.msra.gmra.mrb[92].mxu1 %v4917_v26 }
0x1aea   : > { %5252 = vmatmul.mubr.bf16.vlgmr.msra.gmra.mrb[92].mxu0 %v4919_v33  ;;  %6671 = vmatpush3.bf16.msra.mxu1 %v7186_v25 }
0x1aeb   : > { %6672 = vmatprep.subr.bf16.mxu1 %v7946_v6  ;;  %6686 = vmatprep.mubr.msk.bf16.mxu1 %vm7947_vm0, %v7946_v6 }
0x1aec   : > { %5526 = vmatprep.mubr.bf16.mxu0 %v7948_v37  ;;  %v7192_v37 = vld [vmem:[#allocation26 + $0x30] sm:$0xff]   ;;  %5495 = vmatpush1.bf16.msra.mxu0 %v7194_v7 }
0x1aed   : > { %5496 = vmatprep.subr.bf16.mxu0 %v7199_v39 }
0x1aee   : > { %6673 = vmatpush3.bf16.msra.mxu1 %v7187_v42 }
0x1aef   : > { %6674 = vmatprep.subr.bf16.mxu1 %v7946_v6 }
0x1af2   : > { %6675 = vmatpush3.bf16.msra.mxu1 %v7188_v60 }
0x1af3   : > { %6676 = vmatprep.subr.bf16.mxu1 %v7946_v6 }
0x1af6   : > { %6677 = vmatpush3.bf16.msra.mxu1 %v7189_v18 }
0x1af7   : > { %6678 = vmatprep.subr.bf16.mxu1 %v7946_v6 }
0x1afa   : > { %6679 = vmatpush3.bf16.msra.mxu1 %v7190_v15 }
0x1afb   : > { %6680 = vmatprep.subr.bf16.mxu1 %v7946_v6 }
0x1afe   : > { %6681 = vmatpush3.bf16.msra.mxu1 %v7191_v63 }
0x1aff   : > { %6682 = vmatprep.subr.bf16.mxu1 %v7946_v6 }
0x1b02   : > { %6683 = vmatpush3.bf16.msra.mxu1 %v7192_v37 }
0x1b03   : > { %6684 = vmatprep.subr.bf16.mxu1 %v7946_v6  ;;  %v7197_v6 = vld [vmem:[%s9641_s27 + $0x10] ss:$8 sps:$4 sm:$0xff]  }
0x1b04   : > { %5497 = vmatpush1.bf16.msra.mxu0 %v7197_v6 }
0x1b05   : > { %5498 = vmatprep.subr.bf16.mxu0 %v7202_v41 }
0x1b06   : > { %6685 = vmatpush3.bf16.msra.mxu1 %v7193_v4 }
0x1b08   : > { %5499 = vmatpush1.bf16.msra.mxu0 %v7200_v43 }
0x1b09   : > { %5500 = vmatprep.subr.bf16.mxu0 %v7205_v49 }
0x1b0c   : > { %5501 = vmatpush1.bf16.msra.mxu0 %v7203_v11 }
0x1b0d   : > { %5502 = vmatprep.subr.bf16.mxu0 %v7208_v50 }
0x1b10   : > { %5503 = vmatpush1.bf16.msra.mxu0 %v7206_v51 }
0x1b11   : > { %5504 = vmatprep.subr.bf16.mxu0 %v7211_v52 }
0x1b14   : > { %5505 = vmatpush1.bf16.msra.mxu0 %v7209_v53 }
0x1b15   : > { %5506 = vmatprep.subr.bf16.mxu0 %v7214_v54 }
0x1b18   : > { %5507 = vmatpush1.bf16.msra.mxu0 %v7212_v19 }
0x1b19   : > { %5508 = vmatprep.subr.bf16.mxu0 %v7217_v16 }
0x1b1c   : > { %5509 = vmatpush1.bf16.msra.mxu0 %v7215_v12 }
0x1bbc   : > { %v6361_v20 = vpop.f32.mrb[92].mxu1 }
0x1bbd   : > { %v6383_v13 = vpop.f32.mrb[92].mxu0  ;;  %v6362_v55 = vpop.f32.mrb[93].mxu1 }
0x1bbe   : > { %v6363_v56 = vadd.f32 %v6362_v55, %v6361_v20  ;;  %v6384_v38 = vpop.f32.mrb[93].mxu0  ;;  %v6364_v40 = vpop.f32.mrb[94].mxu1 }
0x1bbf   : > { %v6385_v59 = vadd.f32 %v6384_v38, %v6383_v13  ;;  %v6386_v9 = vpop.f32.mrb[94].mxu0  ;;  %v6365_v62 = vpop.f32.mrb[95].mxu1 }
0x1bc0   : > { %v6366_v24 = vadd.f32 %v6365_v62, %v6364_v40  ;;  %v6387_v14 = vpop.f32.mrb[95].mxu0 }
0x1bc1   : > { %v5254_v44 = vadd.f32 %v6385_v59, %v6363_v56  ;;  %v6388_v27 = vadd.f32 %v6387_v14, %v6386_v9 }
0x1bc3   : > { %v5260_v0 = vadd.f32 %v5254_v44, %v9222_v34  ;;  %v5257_v28 = vadd.f32 %v6388_v27, %v6366_v24  ;;  %v6167_v34 = vld [vmem:[%s9642_s25] ss:$0 sm:$0xff]  ;;  %s9646_s25 = sld [smem:[#allocation62_spill]] }
0x1bc5   : > { %v5261_v57 = vadd.f32 %v5257_v28, %v9225_v5  ;;  %v5270_v3 = vadd.f32 %v6166_v2, %v5260_v0 }
0x1bc7   : > { %v5271_v58 = vadd.f32 %v6166_v2, %v5261_v57 }
0x1bc9   : > { %v5272_v10 = vpack.c.bf16 %v5271_v58, %v5270_v3  ;;  %s9647_s9 = smov %s9646_s25  ;;  %s9474_s4 = scalar_lea.hbm %s9646_s25, %s6200_s0 }
0x1bcb   : > { %6687 = vmatmul.mubr.bf16.vlgmr.msra.gmra.mrb[96].mxu1 %v5272_v10 }
0x1c9e   : > { %v5378_v5 = vpop.f32.mrb[96].mxu1 }
0x1c9f   : > { %v6688_v21 = vpop.f32.mrb[97].mxu1  ;;  %v5379_v17 = vadd.f32 %v6167_v34, %v5378_v5 }
0x1ca0   : > { %v5381_v22 = vpop.f32.mrb[98].mxu1 }
0x1ca1   : > { %v5382_v61 = vadd.f32 %v6167_v34, %v5381_v22  ;;  %v6689_v23 = vpop.f32.mrb[99].mxu1 }
0x1ca3   : > { %v5385_v29 = vpack.c.bf16 %v5382_v61, %v5379_v17 }
0x1ca5   : > { %5527 = vmatmul.mubr.bf16.vlgmr.msra.gmra.mrb[96].mxu0 %v5385_v29 }
0x1d78   : > { %v5528_v48 = vpop.f32.mrb[96].mxu0 }
0x1d79   : > { %v5529_v26 = vadd.f32 %v5528_v48, %v5407_v35  ;;  %v5530_v31 = vpop.f32.mrb[97].mxu0 }
0x1d7a   : > { %v5531_v1 = vadd.f32 %v5530_v31, %v5411_v46  ;;  %v5532_v33 = vpop.f32.mrb[98].mxu0 }
0x1d7b   : > { %5537 = vst [vmem:[%s969_s24] sm:$0xff] %v5529_v26  ;;  %v5533_v32 = vadd.f32 %v5532_v33, %v5407_v35  ;;  %v5534_v25 = vpop.f32.mrb[99].mxu0 }
0x1d7c   : > { %v6192_v8 = vmul.f32 -0.5, %v5531_v1  ;;  %v5535_v42 = vadd.f32 %v5534_v25, %v5411_v46 }
0x1d7d   : > { %5538 = vst [vmem:[%s969_s24 + $0x8] sm:$0xff] %v5533_v32  ;;  %s7825_s24 = sshll.u32 %s7952_s30, 4  ;;  %s7826_s24 = int_to_ptr.vmem [resolvable:$false] %s7825_s24 }
0x1d7e   : > { %v5543_v45 = vmul.f32 1.442695, %v6192_v8  ;;  %v6193_v60 = vmul.f32 -0.5, %v5535_v42  ;;  %s7827_s28 = scalar_lea.vmem %s7826_s24, 512  ;;  %p7828_p13 = scmp.lt.s32.totalorder %s9476_s2, %s7826_s24 }
0x1d7f   : > { %p7829_p1 = scmp.lt.s32.totalorder %s7827_s28, %s7821_s19 }
0x1d80   : > { %7336 = vpow2.f32 %v5543_v45  ;;  %v5545_v47 = vmul.f32 1.442695, %v6193_v60 }
0x1d81   : > { %p7830_p6 = por %p7829_p1, %p7828_p13 }
0x1d82   : > { %7338 = vpow2.f32 %v5545_v47 }
0x1d83   : > { %p7831_p9 = pnand %p7830_p6, %p7824_p11 }
0x1d8a   : > { %v7337_v18 = vpop.eup %7336 }
0x1d8b   : > { %v5547_v15 = vadd.f32 1.0, %v7337_v18 }
0x1d8c   : > { %v7339_v63 = vpop.eup %7338 }
0x1d8d   : > { %7340 = vrcp.f32 %v5547_v15  ;;  %v5548_v37 = vadd.f32 1.0, %v7339_v63 }
0x1d8f   : > { %7342 = vrcp.f32 %v5548_v37 }
0x1d97   : > { %v7341_v4 = vpop.eup %7340 }
0x1d98   : > { %v5553_v7 = vmul.f32 2.0, %v7341_v4 }
0x1d99   : > { %v7343_v36 = vpop.eup %7342 }
0x1d9a   : > { %v5555_v39 = vadd.f32 0.1, %v5553_v7  ;;  %v5554_v6 = vmul.f32 2.0, %v7343_v36 }
0x1d9c   : > { %5557 = vst [vmem:[%s957_s20] sm:$0xff] %v5555_v39  ;;  %v5556_v41 = vadd.f32 0.1, %v5554_v6 }
0x1d9e   : > { %5558 = vst [vmem:[%s957_s20 + $0x8] sm:$0xff] %v5556_v41 }
0x1d9f   : > { %7834 = shalt.err (!%p7831_p9)
}
0x1da0   : > { %s7835_s7 = scalar_lea.hbm %s9474_s4, 256  ;;  %s7839_s20 = scalar_lea.hbm %s9647_s9, 512 }
0x1da1   : > { %p7836_p5 = scmp.ne.s32.totalorder %s9474_s4, %s7835_s7  ;;  %p7840_p2 = scmp.lt.u32.totalorder %s9474_s4, %s9647_s9 }
0x1da2   : > { %p7841_p3 = scmp.lt.u32.totalorder %s7839_s20, %s7835_s7  ;;  %p7843_p12 = scmp.lt.u32.totalorder %s7835_s7, %s9474_s4 }
0x1da3   : > { %p7837_p10 = pnand %p7836_p5, %p9648_p7 }
0x1da4   : > { %p7842_p4 = por %p7841_p3, %p7840_p2 }
0x1da5   : > { %p7838_p0 = pneg %p7837_p10 }
0x1da6   : > { %p7844_p8 = por %p7843_p12, %p7842_p4 }
0x1da8   : > { %p7845_p11 = pnand %p7844_p8, %p7838_p0 }
0x1daa   : > { %7848 = shalt.err (!%p7845_p11)
}
0x1dab   : > { %s7953_s25 = smov 128   ;;  %s7954_s19 = smov 8  }
0x1dac   : > { %6758 = dma.vmem_to_hbm [thread:$0]  (%p9648_p7), %s9476_s2, 256, %s9474_s4, %s9478_s29, %s7953_s25, %s7953_s25, %s7954_s19  }
0x1dad PF: > { %s9649_s30 = sld [smem:[#allocation43_spill]]  ;;  %s9650_s24 = sld [smem:[#allocation40_spill]] }
0x1dae   : > { %s9651_s28 = sld [smem:[#allocation48_spill]] }
0x1db3   : > { %p6850_p13 = scmp.ge.s32.totalorder %s9649_s30, 2  ;;  %s5605_s1 = sand.u32 1, %s9650_s24  }
0x1db4   : > { %p9652_p1 = scmp.ne.s32.totalorder %s9651_s28, 0  ;;  %s5606_s7 = scalar_lea.sflag [#allocation4], %s5605_s1 }
0x1db6   : > { %p6813_p6 = pnand %p6850_p13, %p9652_p1 }
0x1db8   : > { %7902 = dma.done.wait (!%p6813_p6), %s5606_s7, 256  }
0x1db9   : > { %7904 = vsyncadd (!%p6813_p6), %s5606_s7, 4294967040  ;;  %s9653_s25 = sld [smem:[#allocation45_spill]]  ;;  %s9654_s4 = sld [smem:[#allocation41_spill]] }
0x1dba   : > { %s9655_s30 = sld [smem:[#allocation42_spill]]  ;;  %s9656_s24 = sld [smem:[#allocation46_spill]] }
0x1dbf   : > { %p43_p9 = scmp.ge.s32.totalorder %s9653_s25, 4  }
0x1dc1   :  { %45 = sbr.rel (!%p43_p9) target bundleno = 27 (0x1b), region = 240 }
0x1dc8   :  { %5611 = vsyncpa [#allocation3], 1 }
0x1dc9   :  { %5613 = vsyncpa [#allocation3 + $0x1], 1 }
0x1dca   :  { %5614 = vsyncpa [#allocation6], 1 }
0x1dcb   :  { %5615 = vsyncpa [#allocation9], 1 }
0x1dcc   :  { %5616 = vsyncpa [#allocation12], 1 }
0x1dcd   :  { %5617 = vsyncpa [#allocation15], 1 }
0x1dce   :  { %5618 = vsyncpa [#allocation18], 1 }
0x1dcf   :  { %5619 = vsyncpa [#allocation21], 1 }
0x1dd0   :  { %5620 = vsyncpa [#allocation24], 1 }
0x1dd1   :  { %5621 = vsyncpa [#allocation27], 1 }
0x1dd2   :  { %5622 = vsyncpa [#allocation4], 1 }
0x1dd3   :  { %5624 = vsyncpa [#allocation4 + $0x1], 1 }

</bundles_post_ra>
